<compile_context>
chip_gen: v7x
topology: tpu7x:2x2x1
jax: 0.10.0
libtpu: 0.0.40
codegen_flags: <defaults>
</compile_context>

<pallas_src>
import numpy as np

import jax
import jax.numpy as jnp
from jax.experimental import pallas as pl
from jax.experimental.pallas import tpu as pltpu

BN_EPS = 1e-5


def _conv_bn_relu_kernel(x_ref, w_ref, scale_ref, shift_ref, o_ref,
                         xpad_ref, acc_ref):
    """Fused 3x3x3 conv + folded-BN + ReLU for one (batch, depth-tile) step.

    x_ref:     (1, D, H, W*Cin)         bf16  full volume of this batch element
                                              (block index constant across the
                                              depth-tile axis -> fetched once
                                              per n by the pipeline).
    w_ref:     (9*W*Cin, W*Cout)        bf16  width-banded (Toeplitz) weights,
                                              whole-array VMEM resident.
    scale_ref: (1, W*Cout)              f32   gamma / sqrt(var + eps), tiled Wx.
    shift_ref: (1, W*Cout)              f32   beta - mean * scale, tiled Wx.
    o_ref:     (1, td*H, W*Cout)              lane-dense output tile.
    xpad_ref:  ((td+2)*(H+2)+2, W*Cin)  bf16  flat padded activation scratch;
                                              row dp*(H+2)+hp = plane dp,
                                              padded height hp.
    acc_ref:   (td*(H+2), W*Cout)       f32   accumulator (incl. junk rows).
    """
    _, D, H, WCin = x_ref.shape
    WCout = o_ref.shape[-1]
    P = H + 2
    td = (xpad_ref.shape[0] - 2) // P - 2
    M = td * P                                   # matmul rows (incl. junk)
    zdt = xpad_ref.dtype

    t = pl.program_id(1)
    nt = pl.num_programs(1)
    d0 = t * td

    # ---- (1) zero ONLY the halo frame (interior is overwritten below) ------
    z1 = jnp.zeros((1, WCin), zdt)
    z2 = jnp.zeros((2, WCin), zdt)
    z3 = jnp.zeros((3, WCin), zdt)
    zH = jnp.zeros((H, WCin), zdt)
    xpad_ref[pl.ds(0, 1), :] = z1                          # bottom halo, plane 0
    for dp in range(td + 1):
        # rows dp*P+H+1 and (dp+1)*P are adjacent -> zero them pairwise.
        xpad_ref[pl.ds(dp * P + H + 1, 2), :] = z2
    xpad_ref[pl.ds((td + 1) * P + H + 1, 3), :] = z3       # top halo + 2 tail

    # ---- (2) interior data planes (one plane copy each, dest offsets static)
    for dp in range(1, td + 1):
        xpad_ref[pl.ds(dp * P + 1, H), :] = x_ref[0, d0 + dp - 1, :, :]

    # ---- (3) depth-halo planes: neighbour data or zeros, rewritten EVERY
    #          step so no stale data from earlier (n, t) iterations survives.
    @pl.when(t > 0)
    def _():
        xpad_ref[pl.ds(1, H), :] = x_ref[0, d0 - 1, :, :]

    @pl.when(t == 0)
    def _():
        xpad_ref[pl.ds(1, H), :] = zH

    @pl.when(t < nt - 1)
    def _():
        xpad_ref[pl.ds((td + 1) * P + 1, H), :] = x_ref[0, d0 + td, :, :]

    @pl.when(t == nt - 1)
    def _():
        xpad_ref[pl.ds((td + 1) * P + 1, H), :] = zH

    # ---- (4) nine banded contractions, contiguous row-offset LHS views -----
    # LHS = xpad rows [kd*P+kh, kd*P+kh+M): a contiguous (at most sublane-
    # shifted) view - no per-tap slab materialization.  K = W*Cin covers all
    # kw taps at once (the width band lives inside w_ref).  Accumulation in a
    # VMEM f32 scratch keeps vreg pressure bounded.
    for tap in range(9):
        kd, kh = divmod(tap, 3)
        start = kd * P + kh                      # static per-tap row offset
        contrib = jnp.dot(
            xpad_ref[pl.ds(start, M), :],
            w_ref[tap * WCin:(tap + 1) * WCin, :],
            preferred_element_type=jnp.float32)
        if tap == 0:
            acc_ref[...] = contrib               # overwrites stale contents
        else:
            acc_ref[...] += contrib

    # ---- (5) epilogue: drop junk rows once, BN(eval) + ReLU, dense stores --
    scale = scale_ref[...]                       # (1, W*Cout) implicit bcast
    shift = shift_ref[...]
    for dp in range(td):
        a = acc_ref[pl.ds(dp * P, H), :]         # valid rows of plane dp
        y = jnp.maximum(a * scale + shift, 0.0)
        o_ref[0, pl.ds(dp * H, H), :] = y.astype(o_ref.dtype)


def _expand_conv_weights(w_dhwio, W):
    """DHWIO (3,3,3,Cin,Cout) -> width-banded matrix (9*W*Cin, W*Cout).

    Row index   ((kd*3 + kh)*W + wp)*Cin + ci ; column index w*Cout + co.
    Entry        w[kd, kh, wp - w + 1, ci, co]  if 0 <= wp - w + 1 <= 2 else 0.
    Width taps falling outside the image multiply zero padding -> dropped.

    Switch point: the band costs 18*W^2*Cin*Cout bytes of VMEM and ~W/3
    redundant MACs; beyond roughly Cin,Cout >= 32 or W >= 32 switch to a
    channel-im2col layout (K = 27*Cin or 3*W*Cin) instead.
    """
    Cin, Cout = w_dhwio.shape[3], w_dhwio.shape[4]
    sel = np.zeros((3, W, W), np.float32)
    for kw in range(3):
        sel[kw] = np.eye(W, k=1 - kw)            # sel[kw, wp, w] = [wp == w+kw-1]
    wexp = jnp.einsum("xpw,dhxio->dhpiwo",
                      jnp.asarray(sel, w_dhwio.dtype), w_dhwio)
    return wexp.reshape(9 * W * Cin, W * Cout)


def prepare_conv_bn(w_dhwio, gamma, beta, mean, var, W):
    """One-time parameter prep: fold eval-mode BatchNorm into per-channel
    scale/shift and expand the conv weights into the width-banded matrix.
    Done once at model-build time, NOT per forward call / per grid step."""
    scale = gamma / jnp.sqrt(var + BN_EPS)
    shift = beta - mean * scale
    Cout = w_dhwio.shape[-1]
    wexp = _expand_conv_weights(w_dhwio, W).astype(jnp.bfloat16)
    scale_row = jnp.tile(scale.astype(jnp.float32), W).reshape(1, W * Cout)
    shift_row = jnp.tile(shift.astype(jnp.float32), W).reshape(1, W * Cout)
    return dict(wexp=wexp, scale=scale_row, shift=shift_row)


def _pick_depth_tile(D, H, requested):
    """Largest tile <= requested that divides D (no silent full-depth
    fallback) and satisfies the (td*H) % 8 sublane rule of the output block."""
    td = max(1, min(int(requested), D))
    while td > 1 and D % td != 0:
        td -= 1
    if (td * H) % 8 != 0:
        td = D        # full-depth block satisfies the rule by covering the axis
    return td


def _round_up(v, m):
    return ((v + m - 1) // m) * m


def _padded_bytes(shape, itemsize):
    """Rough VMEM footprint of one buffer: minor dim padded to 128 lanes,
    second-minor to 16 sublanes (covers both f32 and bf16 tiling)."""
    if len(shape) == 1:
        return _round_up(int(shape[0]), 128) * itemsize
    lead = 1
    for s in shape[:-2]:
        lead *= int(s)
    return (lead * _round_up(int(shape[-2]), 16)
            * _round_up(int(shape[-1]), 128) * itemsize)


def conv3d_bn_relu(x, prep, *, out_dtype=jnp.float32, depth_tile=16):
    """x: (N, D, H, W, Cin); prep from prepare_conv_bn (same W)."""
    N, D, H, W, Cin = x.shape
    WCin = W * Cin
    wexp, scale_row, shift_row = prep["wexp"], prep["scale"], prep["shift"]
    WCout = wexp.shape[1]
    Cout = WCout // W
    assert wexp.shape[0] == 9 * WCin, (wexp.shape, W, Cin)

    td = _pick_depth_tile(D, H, depth_tile)
    nt = D // td
    P = H + 2
    pad_rows = (td + 2) * P + 2

    # Lane-dense activation packing (free row-major view + cast).
    # NOTE: W*Cin < 128 for the first stage -> 50% lane occupancy there; the
    # second stage (W*Cmid = 128 at the test config) is fully lane-dense.
    x_lane = x.reshape(N, D, H, WCin).astype(jnp.bfloat16)

    # VMEM budget derived from the actual block + scratch sizes (+ headroom).
    out_isize = np.dtype(out_dtype).itemsize
    vmem_need = (
        2 * _padded_bytes((1, D, H, WCin), 2)             # x block (2 buffers)
        + _padded_bytes((9 * WCin, WCout), 2)             # banded weights (1x)
        + 2 * _padded_bytes((1, WCout), 4)                # BN scale / shift
        + 2 * _padded_bytes((1, td * H, WCout), out_isize)  # out block (2 bufs)
        + _padded_bytes((pad_rows, WCin), 2)              # padded-act scratch
        + _padded_bytes((td * P, WCout), 4))              # f32 accumulator
    # Clamp to a range valid on v5e/v6e (128 MiB physical).  TODO(synk): on
    # v7x (64 MiB/TC) cap near ~56 MiB and use the manual haloed-slab DMA.
    vmem_limit = int(min(max(vmem_need + 8 * 2**20, 32 * 2**20), 112 * 2**20))

    out = pl.pallas_call(
        _conv_bn_relu_kernel,
        out_shape=jax.ShapeDtypeStruct((N, D * H, WCout), out_dtype),
        grid=(N, nt),
        in_specs=[
            # Full volume per batch element; block index constant across the
            # depth-tile axis -> fetched once per n by the pipeline.
            pl.BlockSpec((1, D, H, WCin), lambda n, t: (n, 0, 0, 0)),
            # Grid-invariant operands: whole-array VMEM residents (single
            # copy, no per-step pipeline buffering).
            pl.BlockSpec(memory_space=pltpu.MemorySpace.VMEM),
            pl.BlockSpec(memory_space=pltpu.MemorySpace.VMEM),
            pl.BlockSpec(memory_space=pltpu.MemorySpace.VMEM),
        ],
        out_specs=pl.BlockSpec((1, td * H, WCout), lambda n, t: (n, t, 0)),
        scratch_shapes=[
            pltpu.VMEM((pad_rows, WCin), jnp.bfloat16),   # padded activations
            pltpu.VMEM((td * P, WCout), jnp.float32),     # accumulator
        ],
        compiler_params=pltpu.CompilerParams(
            # Only the batch axis is core-parallel while the x block is a full
            # per-batch volume (splitting t across cores would re-read x).
            dimension_semantics=("parallel", "arbitrary"),
            vmem_limit_bytes=vmem_limit),
    )(x_lane, wexp, scale_row, shift_row)

    return out.reshape(N, D, H, W, Cout)         # free view of the dense output


def double_conv(x, prep1, prep2, *, depth_tile1=16, depth_tile2=16):
    """DoubleConv forward: (Conv3d 3x3x3 => BN(eval) => ReLU) * 2.

    The stage-1 activation is kept in bf16 (halves the HBM round trip into
    stage 2); final output is f32.
    TODO(synk): fuse both stages into one pallas_call (halo recompute of
    stage-1 rows per tile) to remove the intermediate HBM round trip.
    """
    y = conv3d_bn_relu(x, prep1, out_dtype=jnp.bfloat16, depth_tile=depth_tile1)
    y = conv3d_bn_relu(y, prep2, out_dtype=jnp.float32, depth_tile=depth_tile2)
    return y


def _ref_double_conv(x, raw):
    """Pure-JAX reference with the same mixed precision as the kernel:
    bf16 conv operands, f32 accumulation, f32 BN(eval)+ReLU, bf16 intermediate.
    """
    def block(h, w, gamma, beta, mean, var, out_dtype):
        y = jax.lax.conv_general_dilated(
            h.astype(jnp.bfloat16), w.astype(jnp.bfloat16),
            window_strides=(1, 1, 1), padding="SAME",
            dimension_numbers=("NDHWC", "DHWIO", "NDHWC"),
            preferred_element_type=jnp.float32)
        y = (y - mean) * (gamma / jnp.sqrt(var + BN_EPS)) + beta
        return jnp.maximum(y, 0.0).astype(out_dtype)

    h = block(x, raw["w1"], raw["g1"], raw["b1"], raw["m1"], raw["v1"],
              jnp.bfloat16)
    h = block(h, raw["w2"], raw["g2"], raw["b2"], raw["m2"], raw["v2"],
              jnp.float32)
    return h


if __name__ == "__main__":
    key = jax.random.PRNGKey(0)
    ks = jax.random.split(key, 16)

    # Small config: batch=2, in_channels=4, mid=out=8, 16^3 volume.
    # Stage-2 W*Cout = 128 -> fully lane-dense output tiles.
    N, Cin, Cmid, Cout = 2, 4, 8, 8
    D, H, W = 16, 16, 16

    # Input (NDHWC); the PyTorch NCDHW equivalent would be (N, Cin, D, H, W).
    x = jax.random.normal(ks[0], (N, D, H, W, Cin), jnp.float32)

    # Conv weights in PyTorch layout (Cout, Cin, kd, kh, kw) -> DHWIO.
    w1_pt = jax.random.normal(ks[1], (Cmid, Cin, 3, 3, 3), jnp.float32) * 0.2
    w2_pt = jax.random.normal(ks[2], (Cout, Cmid, 3, 3, 3), jnp.float32) * 0.2
    w1 = jnp.transpose(w1_pt, (2, 3, 4, 1, 0))
    w2 = jnp.transpose(w2_pt, (2, 3, 4, 1, 0))

    # BatchNorm3d parameters / running stats (eval semantics).
    g1 = 1.0 + 0.1 * jax.random.normal(ks[3], (Cmid,), jnp.float32)
    b1 = 0.1 * jax.random.normal(ks[4], (Cmid,), jnp.float32)
    m1 = 0.05 * jax.random.normal(ks[5], (Cmid,), jnp.float32)
    v1 = 1.0 + 0.1 * jnp.abs(jax.random.normal(ks[6], (Cmid,), jnp.float32))
    g2 = 1.0 + 0.1 * jax.random.normal(ks[7], (Cout,), jnp.float32)
    b2 = 0.1 * jax.random.normal(ks[8], (Cout,), jnp.float32)
    m2 = 0.05 * jax.random.normal(ks[9], (Cout,), jnp.float32)
    v2 = 1.0 + 0.1 * jnp.abs(jax.random.normal(ks[10], (Cout,), jnp.float32))

    # One-time parameter prep (outside the per-call path).
    prep1 = prepare_conv_bn(w1, g1, b1, m1, v1, W)
    prep2 = prepare_conv_bn(w2, g2, b2, m2, v2, W)

    # depth_tile1=8 exercises the multi-tile path (real depth-halo exchange);
    # depth_tile2=16 exercises the recommended td*H = 256 MXU tile.
    fwd = jax.jit(lambda xx, p1, p2: double_conv(
        xx, p1, p2, depth_tile1=8, depth_tile2=16))
    out = jax.block_until_ready(fwd(x, prep1, prep2))

    raw = dict(w1=w1, g1=g1, b1=b1, m1=m1, v1=v1,
               w2=w2, g2=g2, b2=b2, m2=m2, v2=v2)
    ref = jax.block_until_ready(jax.jit(_ref_double_conv)(x, raw))

    assert out.shape == (N, D, H, W, Cout), out.shape
    # Tolerance accounts for bf16 operands: kernel and reference use identical
    # mixed precision, but f32 accumulation-order differences can flip the
    # bf16 rounding of the stage-1 activation at isolated points.
    err = float(jnp.max(jnp.abs(out - ref)))
    assert jnp.allclose(out, ref, atol=2e-2, rtol=2e-2), err
    print("KERNEL_OK")
</pallas_src>

<mosaic_0001>
module attributes {stable_mosaic.version = 11 : i64} {
  func.func @_conv_bn_relu_kernel(%arg0: i32, %arg1: i32, %arg2: memref<1x16x16x64xbf16, #tpu.memory_space<vmem>>, %arg3: memref<576x128xbf16, #tpu.memory_space<vmem>>, %arg4: memref<1x128xf32, #tpu.memory_space<vmem>>, %arg5: memref<1x128xf32, #tpu.memory_space<vmem>>, %arg6: memref<1x128x128xbf16, #tpu.memory_space<vmem>>, %arg7: memref<182x64xbf16, #tpu.memory_space<vmem>>, %arg8: memref<144x128xf32, #tpu.memory_space<vmem>>) attributes {dimension_semantics = [#tpu.dimension_semantics<parallel>, #tpu.dimension_semantics<arbitrary>], iteration_bounds = array<i64: 2, 2>, scalar_prefetch = 0 : i64, scratch_operands = 2 : i64, tpu.core_type = #tpu.core_type<tc>, window_params = [{transform_indices = @transform_0, window_bounds = array<i64: 1, 16, 16, 64>}, {pipeline_mode = #tpu.pipeline_mode<synchronous>, transform_indices = @transform_1, window_bounds = array<i64: 576, 128>}, {pipeline_mode = #tpu.pipeline_mode<synchronous>, transform_indices = @transform_2, window_bounds = array<i64: 1, 128>}, {pipeline_mode = #tpu.pipeline_mode<synchronous>, transform_indices = @transform_3, window_bounds = array<i64: 1, 128>}, {transform_indices = @transform_4, window_bounds = array<i64: 1, 128, 128>}]} {
    %c8_i32 = arith.constant 8 : i32
    %0 = arith.muli %arg1, %c8_i32 : i32
    %cst = arith.constant 0.000000e+00 : bf16
    %1 = vector.broadcast %cst : bf16 to vector<1x64xbf16>
    %cst_0 = arith.constant 0.000000e+00 : bf16
    %2 = vector.broadcast %cst_0 : bf16 to vector<2x64xbf16>
    %cst_1 = arith.constant 0.000000e+00 : bf16
    %3 = vector.broadcast %cst_1 : bf16 to vector<3x64xbf16>
    %cst_2 = arith.constant 0.000000e+00 : bf16
    %4 = vector.broadcast %cst_2 : bf16 to vector<16x64xbf16>
    %c0 = arith.constant 0 : index
    %c0_3 = arith.constant 0 : index
    %5 = vector.load %arg7[%c0, %c0_3] : memref<182x64xbf16, #tpu.memory_space<vmem>>, vector<1x64xbf16>
    tpu.vector_store %arg7[%c0, %c0_3], %1 {strides = array<i32>} : memref<182x64xbf16, #tpu.memory_space<vmem>>, vector<1x64xbf16>,
    %c17 = arith.constant 17 : index
    %c0_4 = arith.constant 0 : index
    %6 = vector.load %arg7[%c17, %c0_4] : memref<182x64xbf16, #tpu.memory_space<vmem>>, vector<2x64xbf16>
    tpu.vector_store %arg7[%c17, %c0_4], %2 {strides = array<i32>} : memref<182x64xbf16, #tpu.memory_space<vmem>>, vector<2x64xbf16>,
    %c35 = arith.constant 35 : index
    %c0_5 = arith.constant 0 : index
    %7 = vector.load %arg7[%c35, %c0_5] : memref<182x64xbf16, #tpu.memory_space<vmem>>, vector<2x64xbf16>
    tpu.vector_store %arg7[%c35, %c0_5], %2 {strides = array<i32>} : memref<182x64xbf16, #tpu.memory_space<vmem>>, vector<2x64xbf16>,
    %c53 = arith.constant 53 : index
    %c0_6 = arith.constant 0 : index
    %8 = vector.load %arg7[%c53, %c0_6] : memref<182x64xbf16, #tpu.memory_space<vmem>>, vector<2x64xbf16>
    tpu.vector_store %arg7[%c53, %c0_6], %2 {strides = array<i32>} : memref<182x64xbf16, #tpu.memory_space<vmem>>, vector<2x64xbf16>,
    %c71 = arith.constant 71 : index
    %c0_7 = arith.constant 0 : index
    %9 = vector.load %arg7[%c71, %c0_7] : memref<182x64xbf16, #tpu.memory_space<vmem>>, vector<2x64xbf16>
    tpu.vector_store %arg7[%c71, %c0_7], %2 {strides = array<i32>} : memref<182x64xbf16, #tpu.memory_space<vmem>>, vector<2x64xbf16>,
    %c89 = arith.constant 89 : index
    %c0_8 = arith.constant 0 : index
    %10 = vector.load %arg7[%c89, %c0_8] : memref<182x64xbf16, #tpu.memory_space<vmem>>, vector<2x64xbf16>
    tpu.vector_store %arg7[%c89, %c0_8], %2 {strides = array<i32>} : memref<182x64xbf16, #tpu.memory_space<vmem>>, vector<2x64xbf16>,
    %c107 = arith.constant 107 : index
    %c0_9 = arith.constant 0 : index
    %11 = vector.load %arg7[%c107, %c0_9] : memref<182x64xbf16, #tpu.memory_space<vmem>>, vector<2x64xbf16>
    tpu.vector_store %arg7[%c107, %c0_9], %2 {strides = array<i32>} : memref<182x64xbf16, #tpu.memory_space<vmem>>, vector<2x64xbf16>,
    %c125 = arith.constant 125 : index
    %c0_10 = arith.constant 0 : index
    %12 = vector.load %arg7[%c125, %c0_10] : memref<182x64xbf16, #tpu.memory_space<vmem>>, vector<2x64xbf16>
    tpu.vector_store %arg7[%c125, %c0_10], %2 {strides = array<i32>} : memref<182x64xbf16, #tpu.memory_space<vmem>>, vector<2x64xbf16>,
    %c143 = arith.constant 143 : index
    %c0_11 = arith.constant 0 : index
    %13 = vector.load %arg7[%c143, %c0_11] : memref<182x64xbf16, #tpu.memory_space<vmem>>, vector<2x64xbf16>
    tpu.vector_store %arg7[%c143, %c0_11], %2 {strides = array<i32>} : memref<182x64xbf16, #tpu.memory_space<vmem>>, vector<2x64xbf16>,
    %c161 = arith.constant 161 : index
    %c0_12 = arith.constant 0 : index
    %14 = vector.load %arg7[%c161, %c0_12] : memref<182x64xbf16, #tpu.memory_space<vmem>>, vector<2x64xbf16>
    tpu.vector_store %arg7[%c161, %c0_12], %2 {strides = array<i32>} : memref<182x64xbf16, #tpu.memory_space<vmem>>, vector<2x64xbf16>,
    %c179 = arith.constant 179 : index
    %c0_13 = arith.constant 0 : index
    %15 = vector.load %arg7[%c179, %c0_13] : memref<182x64xbf16, #tpu.memory_space<vmem>>, vector<3x64xbf16>
    tpu.vector_store %arg7[%c179, %c0_13], %3 {strides = array<i32>} : memref<182x64xbf16, #tpu.memory_space<vmem>>, vector<3x64xbf16>,
    %c1_i32 = arith.constant 1 : i32
    %16 = arith.addi %0, %c1_i32 : i32
    %c1_i32_14 = arith.constant 1 : i32
    %17 = arith.subi %16, %c1_i32_14 : i32
    %c0_15 = arith.constant 0 : index
    %18 = arith.index_cast %17 : i32 to index
    %c0_16 = arith.constant 0 : index
    %c0_17 = arith.constant 0 : index
    %19 = vector.load %arg2[%c0_15, %18, %c0_16, %c0_17] : memref<1x16x16x64xbf16, #tpu.memory_space<vmem>>, vector<1x1x16x64xbf16>
    %20 = vector.shape_cast %19 : vector<1x1x16x64xbf16> to vector<16x64xbf16>
    %c19 = arith.constant 19 : index
    %c0_18 = arith.constant 0 : index
    %21 = vector.load %arg7[%c19, %c0_18] : memref<182x64xbf16, #tpu.memory_space<vmem>>, vector<16x64xbf16>
    tpu.vector_store %arg7[%c19, %c0_18], %20 {strides = array<i32>} : memref<182x64xbf16, #tpu.memory_space<vmem>>, vector<16x64xbf16>,
    %c2_i32 = arith.constant 2 : i32
    %22 = arith.addi %0, %c2_i32 : i32
    %c1_i32_19 = arith.constant 1 : i32
    %23 = arith.subi %22, %c1_i32_19 : i32
    %c0_20 = arith.constant 0 : index
    %24 = arith.index_cast %23 : i32 to index
    %c0_21 = arith.constant 0 : index
    %c0_22 = arith.constant 0 : index
    %25 = vector.load %arg2[%c0_20, %24, %c0_21, %c0_22] : memref<1x16x16x64xbf16, #tpu.memory_space<vmem>>, vector<1x1x16x64xbf16>
    %26 = vector.shape_cast %25 : vector<1x1x16x64xbf16> to vector<16x64xbf16>
    %c37 = arith.constant 37 : index
    %c0_23 = arith.constant 0 : index
    %27 = vector.load %arg7[%c37, %c0_23] : memref<182x64xbf16, #tpu.memory_space<vmem>>, vector<16x64xbf16>
    tpu.vector_store %arg7[%c37, %c0_23], %26 {strides = array<i32>} : memref<182x64xbf16, #tpu.memory_space<vmem>>, vector<16x64xbf16>,
    %c3_i32 = arith.constant 3 : i32
    %28 = arith.addi %0, %c3_i32 : i32
    %c1_i32_24 = arith.constant 1 : i32
    %29 = arith.subi %28, %c1_i32_24 : i32
    %c0_25 = arith.constant 0 : index
    %30 = arith.index_cast %29 : i32 to index
    %c0_26 = arith.constant 0 : index
    %c0_27 = arith.constant 0 : index
    %31 = vector.load %arg2[%c0_25, %30, %c0_26, %c0_27] : memref<1x16x16x64xbf16, #tpu.memory_space<vmem>>, vector<1x1x16x64xbf16>
    %32 = vector.shape_cast %31 : vector<1x1x16x64xbf16> to vector<16x64xbf16>
    %c55 = arith.constant 55 : index
    %c0_28 = arith.constant 0 : index
    %33 = vector.load %arg7[%c55, %c0_28] : memref<182x64xbf16, #tpu.memory_space<vmem>>, vector<16x64xbf16>
    tpu.vector_store %arg7[%c55, %c0_28], %32 {strides = array<i32>} : memref<182x64xbf16, #tpu.memory_space<vmem>>, vector<16x64xbf16>,
    %c4_i32 = arith.constant 4 : i32
    %34 = arith.addi %0, %c4_i32 : i32
    %c1_i32_29 = arith.constant 1 : i32
    %35 = arith.subi %34, %c1_i32_29 : i32
    %c0_30 = arith.constant 0 : index
    %36 = arith.index_cast %35 : i32 to index
    %c0_31 = arith.constant 0 : index
    %c0_32 = arith.constant 0 : index
    %37 = vector.load %arg2[%c0_30, %36, %c0_31, %c0_32] : memref<1x16x16x64xbf16, #tpu.memory_space<vmem>>, vector<1x1x16x64xbf16>
    %38 = vector.shape_cast %37 : vector<1x1x16x64xbf16> to vector<16x64xbf16>
    %c73 = arith.constant 73 : index
    %c0_33 = arith.constant 0 : index
    %39 = vector.load %arg7[%c73, %c0_33] : memref<182x64xbf16, #tpu.memory_space<vmem>>, vector<16x64xbf16>
    tpu.vector_store %arg7[%c73, %c0_33], %38 {strides = array<i32>} : memref<182x64xbf16, #tpu.memory_space<vmem>>, vector<16x64xbf16>,
    %c5_i32 = arith.constant 5 : i32
    %40 = arith.addi %0, %c5_i32 : i32
    %c1_i32_34 = arith.constant 1 : i32
    %41 = arith.subi %40, %c1_i32_34 : i32
    %c0_35 = arith.constant 0 : index
    %42 = arith.index_cast %41 : i32 to index
    %c0_36 = arith.constant 0 : index
    %c0_37 = arith.constant 0 : index
    %43 = vector.load %arg2[%c0_35, %42, %c0_36, %c0_37] : memref<1x16x16x64xbf16, #tpu.memory_space<vmem>>, vector<1x1x16x64xbf16>
    %44 = vector.shape_cast %43 : vector<1x1x16x64xbf16> to vector<16x64xbf16>
    %c91 = arith.constant 91 : index
    %c0_38 = arith.constant 0 : index
    %45 = vector.load %arg7[%c91, %c0_38] : memref<182x64xbf16, #tpu.memory_space<vmem>>, vector<16x64xbf16>
    tpu.vector_store %arg7[%c91, %c0_38], %44 {strides = array<i32>} : memref<182x64xbf16, #tpu.memory_space<vmem>>, vector<16x64xbf16>,
    %c6_i32 = arith.constant 6 : i32
    %46 = arith.addi %0, %c6_i32 : i32
    %c1_i32_39 = arith.constant 1 : i32
    %47 = arith.subi %46, %c1_i32_39 : i32
    %c0_40 = arith.constant 0 : index
    %48 = arith.index_cast %47 : i32 to index
    %c0_41 = arith.constant 0 : index
    %c0_42 = arith.constant 0 : index
    %49 = vector.load %arg2[%c0_40, %48, %c0_41, %c0_42] : memref<1x16x16x64xbf16, #tpu.memory_space<vmem>>, vector<1x1x16x64xbf16>
    %50 = vector.shape_cast %49 : vector<1x1x16x64xbf16> to vector<16x64xbf16>
    %c109 = arith.constant 109 : index
    %c0_43 = arith.constant 0 : index
    %51 = vector.load %arg7[%c109, %c0_43] : memref<182x64xbf16, #tpu.memory_space<vmem>>, vector<16x64xbf16>
    tpu.vector_store %arg7[%c109, %c0_43], %50 {strides = array<i32>} : memref<182x64xbf16, #tpu.memory_space<vmem>>, vector<16x64xbf16>,
    %c7_i32 = arith.constant 7 : i32
    %52 = arith.addi %0, %c7_i32 : i32
    %c1_i32_44 = arith.constant 1 : i32
    %53 = arith.subi %52, %c1_i32_44 : i32
    %c0_45 = arith.constant 0 : index
    %54 = arith.index_cast %53 : i32 to index
    %c0_46 = arith.constant 0 : index
    %c0_47 = arith.constant 0 : index
    %55 = vector.load %arg2[%c0_45, %54, %c0_46, %c0_47] : memref<1x16x16x64xbf16, #tpu.memory_space<vmem>>, vector<1x1x16x64xbf16>
    %56 = vector.shape_cast %55 : vector<1x1x16x64xbf16> to vector<16x64xbf16>
    %c127 = arith.constant 127 : index
    %c0_48 = arith.constant 0 : index
    %57 = vector.load %arg7[%c127, %c0_48] : memref<182x64xbf16, #tpu.memory_space<vmem>>, vector<16x64xbf16>
    tpu.vector_store %arg7[%c127, %c0_48], %56 {strides = array<i32>} : memref<182x64xbf16, #tpu.memory_space<vmem>>, vector<16x64xbf16>,
    %c8_i32_49 = arith.constant 8 : i32
    %58 = arith.addi %0, %c8_i32_49 : i32
    %c1_i32_50 = arith.constant 1 : i32
    %59 = arith.subi %58, %c1_i32_50 : i32
    %c0_51 = arith.constant 0 : index
    %60 = arith.index_cast %59 : i32 to index
    %c0_52 = arith.constant 0 : index
    %c0_53 = arith.constant 0 : index
    %61 = vector.load %arg2[%c0_51, %60, %c0_52, %c0_53] : memref<1x16x16x64xbf16, #tpu.memory_space<vmem>>, vector<1x1x16x64xbf16>
    %62 = vector.shape_cast %61 : vector<1x1x16x64xbf16> to vector<16x64xbf16>
    %c145 = arith.constant 145 : index
    %c0_54 = arith.constant 0 : index
    %63 = vector.load %arg7[%c145, %c0_54] : memref<182x64xbf16, #tpu.memory_space<vmem>>, vector<16x64xbf16>
    tpu.vector_store %arg7[%c145, %c0_54], %62 {strides = array<i32>} : memref<182x64xbf16, #tpu.memory_space<vmem>>, vector<16x64xbf16>,
    %c0_i32 = arith.constant 0 : i32
    %64 = arith.cmpi sgt, %arg1, %c0_i32 : i32
    %65 = arith.extui %64 : i1 to i32
    %c0_i32_55 = arith.constant 0 : i32
    %66 = arith.cmpi ne, %65, %c0_i32_55 : i32
    scf.if %66 {
      %c1_i32_168 = arith.constant 1 : i32
      %218 = arith.subi %0, %c1_i32_168 : i32
      %c0_169 = arith.constant 0 : index
      %219 = arith.index_cast %218 : i32 to index
      %c0_170 = arith.constant 0 : index
      %c0_171 = arith.constant 0 : index
      %220 = vector.load %arg2[%c0_169, %219, %c0_170, %c0_171] : memref<1x16x16x64xbf16, #tpu.memory_space<vmem>>, vector<1x1x16x64xbf16>
      %221 = vector.shape_cast %220 : vector<1x1x16x64xbf16> to vector<16x64xbf16>
      %c1_172 = arith.constant 1 : index
      %c0_173 = arith.constant 0 : index
      %222 = vector.load %arg7[%c1_172, %c0_173] : memref<182x64xbf16, #tpu.memory_space<vmem>>, vector<16x64xbf16>
      tpu.vector_store %arg7[%c1_172, %c0_173], %221 {strides = array<i32>} : memref<182x64xbf16, #tpu.memory_space<vmem>>, vector<16x64xbf16>,
    } else {
    }
    %c0_i32_56 = arith.constant 0 : i32
    %67 = arith.cmpi eq, %arg1, %c0_i32_56 : i32
    %68 = arith.extui %67 : i1 to i32
    %c0_i32_57 = arith.constant 0 : i32
    %69 = arith.cmpi ne, %68, %c0_i32_57 : i32
    scf.if %69 {
      %c1_168 = arith.constant 1 : index
      %c0_169 = arith.constant 0 : index
      %218 = vector.load %arg7[%c1_168, %c0_169] : memref<182x64xbf16, #tpu.memory_space<vmem>>, vector<16x64xbf16>
      tpu.vector_store %arg7[%c1_168, %c0_169], %4 {strides = array<i32>} : memref<182x64xbf16, #tpu.memory_space<vmem>>, vector<16x64xbf16>,
    } else {
    }
    %c1_i32_58 = arith.constant 1 : i32
    %70 = arith.cmpi slt, %arg1, %c1_i32_58 : i32
    %71 = arith.extui %70 : i1 to i32
    %c0_i32_59 = arith.constant 0 : i32
    %72 = arith.cmpi ne, %71, %c0_i32_59 : i32
    scf.if %72 {
      %c8_i32_168 = arith.constant 8 : i32
      %218 = arith.addi %0, %c8_i32_168 : i32
      %c0_169 = arith.constant 0 : index
      %219 = arith.index_cast %218 : i32 to index
      %c0_170 = arith.constant 0 : index
      %c0_171 = arith.constant 0 : index
      %220 = vector.load %arg2[%c0_169, %219, %c0_170, %c0_171] : memref<1x16x16x64xbf16, #tpu.memory_space<vmem>>, vector<1x1x16x64xbf16>
      %221 = vector.shape_cast %220 : vector<1x1x16x64xbf16> to vector<16x64xbf16>
      %c163 = arith.constant 163 : index
      %c0_172 = arith.constant 0 : index
      %222 = vector.load %arg7[%c163, %c0_172] : memref<182x64xbf16, #tpu.memory_space<vmem>>, vector<16x64xbf16>
      tpu.vector_store %arg7[%c163, %c0_172], %221 {strides = array<i32>} : memref<182x64xbf16, #tpu.memory_space<vmem>>, vector<16x64xbf16>,
    } else {
    }
    %c1_i32_60 = arith.constant 1 : i32
    %73 = arith.cmpi eq, %arg1, %c1_i32_60 : i32
    %74 = arith.extui %73 : i1 to i32
    %c0_i32_61 = arith.constant 0 : i32
    %75 = arith.cmpi ne, %74, %c0_i32_61 : i32
    scf.if %75 {
      %c163 = arith.constant 163 : index
      %c0_168 = arith.constant 0 : index
      %218 = vector.load %arg7[%c163, %c0_168] : memref<182x64xbf16, #tpu.memory_space<vmem>>, vector<16x64xbf16>
      tpu.vector_store %arg7[%c163, %c0_168], %4 {strides = array<i32>} : memref<182x64xbf16, #tpu.memory_space<vmem>>, vector<16x64xbf16>,
    } else {
    }
    %c0_62 = arith.constant 0 : index
    %c0_63 = arith.constant 0 : index
    %76 = vector.load %arg7[%c0_62, %c0_63] : memref<182x64xbf16, #tpu.memory_space<vmem>>, vector<144x64xbf16>
    %c0_64 = arith.constant 0 : index
    %c0_65 = arith.constant 0 : index
    %77 = vector.load %arg3[%c0_64, %c0_65] : memref<576x128xbf16, #tpu.memory_space<vmem>>, vector<64x128xbf16>
    %cst_66 = arith.constant dense<0.000000e+00> : vector<144x128xf32>
    %78 = tpu.matmul %76, %77, %cst_66 {dimension_numbers = #tpu.dot_dimension_numbers<[1], [0], [0], [1], [0, 0, 1, 1], [], []>} : vector<144x64xbf16>, vector<64x128xbf16>, vector<144x128xf32> -> vector<144x128xf32>
    %c0_67 = arith.constant 0 : index
    %c0_68 = arith.constant 0 : index
    %79 = vector.load %arg8[%c0_67, %c0_68] : memref<144x128xf32, #tpu.memory_space<vmem>>, vector<144x128xf32>
    tpu.vector_store %arg8[%c0_67, %c0_68], %78 {strides = array<i32>} : memref<144x128xf32, #tpu.memory_space<vmem>>, vector<144x128xf32>,
    %c1 = arith.constant 1 : index
    %c0_69 = arith.constant 0 : index
    %80 = vector.load %arg7[%c1, %c0_69] : memref<182x64xbf16, #tpu.memory_space<vmem>>, vector<144x64xbf16>
    %c64 = arith.constant 64 : index
    %c0_70 = arith.constant 0 : index
    %81 = vector.load %arg3[%c64, %c0_70] : memref<576x128xbf16, #tpu.memory_space<vmem>>, vector<64x128xbf16>
    %cst_71 = arith.constant dense<0.000000e+00> : vector<144x128xf32>
    %82 = tpu.matmul %80, %81, %cst_71 {dimension_numbers = #tpu.dot_dimension_numbers<[1], [0], [0], [1], [0, 0, 1, 1], [], []>} : vector<144x64xbf16>, vector<64x128xbf16>, vector<144x128xf32> -> vector<144x128xf32>
    %c0_72 = arith.constant 0 : index
    %c0_73 = arith.constant 0 : index
    %83 = vector.load %arg8[%c0_72, %c0_73] : memref<144x128xf32, #tpu.memory_space<vmem>>, vector<144x128xf32>
    %84 = arith.addf %83, %82 : vector<144x128xf32>
    %c0_74 = arith.constant 0 : index
    %c0_75 = arith.constant 0 : index
    %85 = vector.load %arg8[%c0_74, %c0_75] : memref<144x128xf32, #tpu.memory_space<vmem>>, vector<144x128xf32>
    tpu.vector_store %arg8[%c0_74, %c0_75], %84 {strides = array<i32>} : memref<144x128xf32, #tpu.memory_space<vmem>>, vector<144x128xf32>,
    %c2 = arith.constant 2 : index
    %c0_76 = arith.constant 0 : index
    %86 = vector.load %arg7[%c2, %c0_76] : memref<182x64xbf16, #tpu.memory_space<vmem>>, vector<144x64xbf16>
    %c128 = arith.constant 128 : index
    %c0_77 = arith.constant 0 : index
    %87 = vector.load %arg3[%c128, %c0_77] : memref<576x128xbf16, #tpu.memory_space<vmem>>, vector<64x128xbf16>
    %cst_78 = arith.constant dense<0.000000e+00> : vector<144x128xf32>
    %88 = tpu.matmul %86, %87, %cst_78 {dimension_numbers = #tpu.dot_dimension_numbers<[1], [0], [0], [1], [0, 0, 1, 1], [], []>} : vector<144x64xbf16>, vector<64x128xbf16>, vector<144x128xf32> -> vector<144x128xf32>
    %c0_79 = arith.constant 0 : index
    %c0_80 = arith.constant 0 : index
    %89 = vector.load %arg8[%c0_79, %c0_80] : memref<144x128xf32, #tpu.memory_space<vmem>>, vector<144x128xf32>
    %90 = arith.addf %89, %88 : vector<144x128xf32>
    %c0_81 = arith.constant 0 : index
    %c0_82 = arith.constant 0 : index
    %91 = vector.load %arg8[%c0_81, %c0_82] : memref<144x128xf32, #tpu.memory_space<vmem>>, vector<144x128xf32>
    tpu.vector_store %arg8[%c0_81, %c0_82], %90 {strides = array<i32>} : memref<144x128xf32, #tpu.memory_space<vmem>>, vector<144x128xf32>,
    %c18 = arith.constant 18 : index
    %c0_83 = arith.constant 0 : index
    %92 = vector.load %arg7[%c18, %c0_83] : memref<182x64xbf16, #tpu.memory_space<vmem>>, vector<144x64xbf16>
    %c192 = arith.constant 192 : index
    %c0_84 = arith.constant 0 : index
    %93 = vector.load %arg3[%c192, %c0_84] : memref<576x128xbf16, #tpu.memory_space<vmem>>, vector<64x128xbf16>
    %cst_85 = arith.constant dense<0.000000e+00> : vector<144x128xf32>
    %94 = tpu.matmul %92, %93, %cst_85 {dimension_numbers = #tpu.dot_dimension_numbers<[1], [0], [0], [1], [0, 0, 1, 1], [], []>} : vector<144x64xbf16>, vector<64x128xbf16>, vector<144x128xf32> -> vector<144x128xf32>
    %c0_86 = arith.constant 0 : index
    %c0_87 = arith.constant 0 : index
    %95 = vector.load %arg8[%c0_86, %c0_87] : memref<144x128xf32, #tpu.memory_space<vmem>>, vector<144x128xf32>
    %96 = arith.addf %95, %94 : vector<144x128xf32>
    %c0_88 = arith.constant 0 : index
    %c0_89 = arith.constant 0 : index
    %97 = vector.load %arg8[%c0_88, %c0_89] : memref<144x128xf32, #tpu.memory_space<vmem>>, vector<144x128xf32>
    tpu.vector_store %arg8[%c0_88, %c0_89], %96 {strides = array<i32>} : memref<144x128xf32, #tpu.memory_space<vmem>>, vector<144x128xf32>,
    %c19_90 = arith.constant 19 : index
    %c0_91 = arith.constant 0 : index
    %98 = vector.load %arg7[%c19_90, %c0_91] : memref<182x64xbf16, #tpu.memory_space<vmem>>, vector<144x64xbf16>
    %c256 = arith.constant 256 : index
    %c0_92 = arith.constant 0 : index
    %99 = vector.load %arg3[%c256, %c0_92] : memref<576x128xbf16, #tpu.memory_space<vmem>>, vector<64x128xbf16>
    %cst_93 = arith.constant dense<0.000000e+00> : vector<144x128xf32>
    %100 = tpu.matmul %98, %99, %cst_93 {dimension_numbers = #tpu.dot_dimension_numbers<[1], [0], [0], [1], [0, 0, 1, 1], [], []>} : vector<144x64xbf16>, vector<64x128xbf16>, vector<144x128xf32> -> vector<144x128xf32>
    %c0_94 = arith.constant 0 : index
    %c0_95 = arith.constant 0 : index
    %101 = vector.load %arg8[%c0_94, %c0_95] : memref<144x128xf32, #tpu.memory_space<vmem>>, vector<144x128xf32>
    %102 = arith.addf %101, %100 : vector<144x128xf32>
    %c0_96 = arith.constant 0 : index
    %c0_97 = arith.constant 0 : index
    %103 = vector.load %arg8[%c0_96, %c0_97] : memref<144x128xf32, #tpu.memory_space<vmem>>, vector<144x128xf32>
    tpu.vector_store %arg8[%c0_96, %c0_97], %102 {strides = array<i32>} : memref<144x128xf32, #tpu.memory_space<vmem>>, vector<144x128xf32>,
    %c20 = arith.constant 20 : index
    %c0_98 = arith.constant 0 : index
    %104 = vector.load %arg7[%c20, %c0_98] : memref<182x64xbf16, #tpu.memory_space<vmem>>, vector<144x64xbf16>
    %c320 = arith.constant 320 : index
    %c0_99 = arith.constant 0 : index
    %105 = vector.load %arg3[%c320, %c0_99] : memref<576x128xbf16, #tpu.memory_space<vmem>>, vector<64x128xbf16>
    %cst_100 = arith.constant dense<0.000000e+00> : vector<144x128xf32>
    %106 = tpu.matmul %104, %105, %cst_100 {dimension_numbers = #tpu.dot_dimension_numbers<[1], [0], [0], [1], [0, 0, 1, 1], [], []>} : vector<144x64xbf16>, vector<64x128xbf16>, vector<144x128xf32> -> vector<144x128xf32>
    %c0_101 = arith.constant 0 : index
    %c0_102 = arith.constant 0 : index
    %107 = vector.load %arg8[%c0_101, %c0_102] : memref<144x128xf32, #tpu.memory_space<vmem>>, vector<144x128xf32>
    %108 = arith.addf %107, %106 : vector<144x128xf32>
    %c0_103 = arith.constant 0 : index
    %c0_104 = arith.constant 0 : index
    %109 = vector.load %arg8[%c0_103, %c0_104] : memref<144x128xf32, #tpu.memory_space<vmem>>, vector<144x128xf32>
    tpu.vector_store %arg8[%c0_103, %c0_104], %108 {strides = array<i32>} : memref<144x128xf32, #tpu.memory_space<vmem>>, vector<144x128xf32>,
    %c36 = arith.constant 36 : index
    %c0_105 = arith.constant 0 : index
    %110 = vector.load %arg7[%c36, %c0_105] : memref<182x64xbf16, #tpu.memory_space<vmem>>, vector<144x64xbf16>
    %c384 = arith.constant 384 : index
    %c0_106 = arith.constant 0 : index
    %111 = vector.load %arg3[%c384, %c0_106] : memref<576x128xbf16, #tpu.memory_space<vmem>>, vector<64x128xbf16>
    %cst_107 = arith.constant dense<0.000000e+00> : vector<144x128xf32>
    %112 = tpu.matmul %110, %111, %cst_107 {dimension_numbers = #tpu.dot_dimension_numbers<[1], [0], [0], [1], [0, 0, 1, 1], [], []>} : vector<144x64xbf16>, vector<64x128xbf16>, vector<144x128xf32> -> vector<144x128xf32>
    %c0_108 = arith.constant 0 : index
    %c0_109 = arith.constant 0 : index
    %113 = vector.load %arg8[%c0_108, %c0_109] : memref<144x128xf32, #tpu.memory_space<vmem>>, vector<144x128xf32>
    %114 = arith.addf %113, %112 : vector<144x128xf32>
    %c0_110 = arith.constant 0 : index
    %c0_111 = arith.constant 0 : index
    %115 = vector.load %arg8[%c0_110, %c0_111] : memref<144x128xf32, #tpu.memory_space<vmem>>, vector<144x128xf32>
    tpu.vector_store %arg8[%c0_110, %c0_111], %114 {strides = array<i32>} : memref<144x128xf32, #tpu.memory_space<vmem>>, vector<144x128xf32>,
    %c37_112 = arith.constant 37 : index
    %c0_113 = arith.constant 0 : index
    %116 = vector.load %arg7[%c37_112, %c0_113] : memref<182x64xbf16, #tpu.memory_space<vmem>>, vector<144x64xbf16>
    %c448 = arith.constant 448 : index
    %c0_114 = arith.constant 0 : index
    %117 = vector.load %arg3[%c448, %c0_114] : memref<576x128xbf16, #tpu.memory_space<vmem>>, vector<64x128xbf16>
    %cst_115 = arith.constant dense<0.000000e+00> : vector<144x128xf32>
    %118 = tpu.matmul %116, %117, %cst_115 {dimension_numbers = #tpu.dot_dimension_numbers<[1], [0], [0], [1], [0, 0, 1, 1], [], []>} : vector<144x64xbf16>, vector<64x128xbf16>, vector<144x128xf32> -> vector<144x128xf32>
    %c0_116 = arith.constant 0 : index
    %c0_117 = arith.constant 0 : index
    %119 = vector.load %arg8[%c0_116, %c0_117] : memref<144x128xf32, #tpu.memory_space<vmem>>, vector<144x128xf32>
    %120 = arith.addf %119, %118 : vector<144x128xf32>
    %c0_118 = arith.constant 0 : index
    %c0_119 = arith.constant 0 : index
    %121 = vector.load %arg8[%c0_118, %c0_119] : memref<144x128xf32, #tpu.memory_space<vmem>>, vector<144x128xf32>
    tpu.vector_store %arg8[%c0_118, %c0_119], %120 {strides = array<i32>} : memref<144x128xf32, #tpu.memory_space<vmem>>, vector<144x128xf32>,
    %c38 = arith.constant 38 : index
    %c0_120 = arith.constant 0 : index
    %122 = vector.load %arg7[%c38, %c0_120] : memref<182x64xbf16, #tpu.memory_space<vmem>>, vector<144x64xbf16>
    %c512 = arith.constant 512 : index
    %c0_121 = arith.constant 0 : index
    %123 = vector.load %arg3[%c512, %c0_121] : memref<576x128xbf16, #tpu.memory_space<vmem>>, vector<64x128xbf16>
    %cst_122 = arith.constant dense<0.000000e+00> : vector<144x128xf32>
    %124 = tpu.matmul %122, %123, %cst_122 {dimension_numbers = #tpu.dot_dimension_numbers<[1], [0], [0], [1], [0, 0, 1, 1], [], []>} : vector<144x64xbf16>, vector<64x128xbf16>, vector<144x128xf32> -> vector<144x128xf32>
    %c0_123 = arith.constant 0 : index
    %c0_124 = arith.constant 0 : index
    %125 = vector.load %arg8[%c0_123, %c0_124] : memref<144x128xf32, #tpu.memory_space<vmem>>, vector<144x128xf32>
    %126 = arith.addf %125, %124 : vector<144x128xf32>
    %c0_125 = arith.constant 0 : index
    %c0_126 = arith.constant 0 : index
    %127 = vector.load %arg8[%c0_125, %c0_126] : memref<144x128xf32, #tpu.memory_space<vmem>>, vector<144x128xf32>
    tpu.vector_store %arg8[%c0_125, %c0_126], %126 {strides = array<i32>} : memref<144x128xf32, #tpu.memory_space<vmem>>, vector<144x128xf32>,
    %c0_127 = arith.constant 0 : index
    %c0_128 = arith.constant 0 : index
    %128 = vector.load %arg4[%c0_127, %c0_128] : memref<1x128xf32, #tpu.memory_space<vmem>>, vector<1x128xf32>
    %c0_129 = arith.constant 0 : index
    %c0_130 = arith.constant 0 : index
    %129 = vector.load %arg5[%c0_129, %c0_130] : memref<1x128xf32, #tpu.memory_space<vmem>>, vector<1x128xf32>
    %c0_131 = arith.constant 0 : index
    %c0_132 = arith.constant 0 : index
    %130 = vector.load %arg8[%c0_131, %c0_132] : memref<144x128xf32, #tpu.memory_space<vmem>>, vector<16x128xf32>
    %131 = vector.broadcast %128 : vector<1x128xf32> to vector<16x128xf32>
    %132 = arith.mulf %130, %131 : vector<16x128xf32>
    %133 = vector.broadcast %129 : vector<1x128xf32> to vector<16x128xf32>
    %134 = arith.addf %132, %133 : vector<16x128xf32>
    %cst_133 = arith.constant 0.000000e+00 : f32
    %135 = vector.broadcast %cst_133 : f32 to vector<16x128xf32>
    %136 = arith.maximumf %134, %135 : vector<16x128xf32>
    %137 = arith.truncf %136 : vector<16x128xf32> to vector<16x128xbf16>
    %c0_134 = arith.constant 0 : index
    %c0_135 = arith.constant 0 : index
    %c0_136 = arith.constant 0 : index
    %138 = vector.load %arg6[%c0_134, %c0_135, %c0_136] : memref<1x128x128xbf16, #tpu.memory_space<vmem>>, vector<1x16x128xbf16>
    %139 = vector.shape_cast %138 : vector<1x16x128xbf16> to vector<16x128xbf16>
    %140 = vector.shape_cast %137 : vector<16x128xbf16> to vector<1x16x128xbf16>
    tpu.vector_store %arg6[%c0_134, %c0_135, %c0_136], %140 {strides = array<i32>} : memref<1x128x128xbf16, #tpu.memory_space<vmem>>, vector<1x16x128xbf16>,
    %c18_137 = arith.constant 18 : index
    %c0_138 = arith.constant 0 : index
    %141 = vector.load %arg8[%c18_137, %c0_138] : memref<144x128xf32, #tpu.memory_space<vmem>>, vector<16x128xf32>
    %142 = vector.broadcast %128 : vector<1x128xf32> to vector<16x128xf32>
    %143 = arith.mulf %141, %142 : vector<16x128xf32>
    %144 = vector.broadcast %129 : vector<1x128xf32> to vector<16x128xf32>
    %145 = arith.addf %143, %144 : vector<16x128xf32>
    %cst_139 = arith.constant 0.000000e+00 : f32
    %146 = vector.broadcast %cst_139 : f32 to vector<16x128xf32>
    %147 = arith.maximumf %145, %146 : vector<16x128xf32>
    %148 = arith.truncf %147 : vector<16x128xf32> to vector<16x128xbf16>
    %c0_140 = arith.constant 0 : index
    %c16 = arith.constant 16 : index
    %c0_141 = arith.constant 0 : index
    %149 = vector.load %arg6[%c0_140, %c16, %c0_141] : memref<1x128x128xbf16, #tpu.memory_space<vmem>>, vector<1x16x128xbf16>
    %150 = vector.shape_cast %149 : vector<1x16x128xbf16> to vector<16x128xbf16>
    %151 = vector.shape_cast %148 : vector<16x128xbf16> to vector<1x16x128xbf16>
    tpu.vector_store %arg6[%c0_140, %c16, %c0_141], %151 {strides = array<i32>} : memref<1x128x128xbf16, #tpu.memory_space<vmem>>, vector<1x16x128xbf16>,
    %c36_142 = arith.constant 36 : index
    %c0_143 = arith.constant 0 : index
    %152 = vector.load %arg8[%c36_142, %c0_143] : memref<144x128xf32, #tpu.memory_space<vmem>>, vector<16x128xf32>
    %153 = vector.broadcast %128 : vector<1x128xf32> to vector<16x128xf32>
    %154 = arith.mulf %152, %153 : vector<16x128xf32>
    %155 = vector.broadcast %129 : vector<1x128xf32> to vector<16x128xf32>
    %156 = arith.addf %154, %155 : vector<16x128xf32>
    %cst_144 = arith.constant 0.000000e+00 : f32
    %157 = vector.broadcast %cst_144 : f32 to vector<16x128xf32>
    %158 = arith.maximumf %156, %157 : vector<16x128xf32>
    %159 = arith.truncf %158 : vector<16x128xf32> to vector<16x128xbf16>
    %c0_145 = arith.constant 0 : index
    %c32 = arith.constant 32 : index
    %c0_146 = arith.constant 0 : index
    %160 = vector.load %arg6[%c0_145, %c32, %c0_146] : memref<1x128x128xbf16, #tpu.memory_space<vmem>>, vector<1x16x128xbf16>
    %161 = vector.shape_cast %160 : vector<1x16x128xbf16> to vector<16x128xbf16>
    %162 = vector.shape_cast %159 : vector<16x128xbf16> to vector<1x16x128xbf16>
    tpu.vector_store %arg6[%c0_145, %c32, %c0_146], %162 {strides = array<i32>} : memref<1x128x128xbf16, #tpu.memory_space<vmem>>, vector<1x16x128xbf16>,
    %c54 = arith.constant 54 : index
    %c0_147 = arith.constant 0 : index
    %163 = vector.load %arg8[%c54, %c0_147] : memref<144x128xf32, #tpu.memory_space<vmem>>, vector<16x128xf32>
    %164 = vector.broadcast %128 : vector<1x128xf32> to vector<16x128xf32>
    %165 = arith.mulf %163, %164 : vector<16x128xf32>
    %166 = vector.broadcast %129 : vector<1x128xf32> to vector<16x128xf32>
    %167 = arith.addf %165, %166 : vector<16x128xf32>
    %cst_148 = arith.constant 0.000000e+00 : f32
    %168 = vector.broadcast %cst_148 : f32 to vector<16x128xf32>
    %169 = arith.maximumf %167, %168 : vector<16x128xf32>
    %170 = arith.truncf %169 : vector<16x128xf32> to vector<16x128xbf16>
    %c0_149 = arith.constant 0 : index
    %c48 = arith.constant 48 : index
    %c0_150 = arith.constant 0 : index
    %171 = vector.load %arg6[%c0_149, %c48, %c0_150] : memref<1x128x128xbf16, #tpu.memory_space<vmem>>, vector<1x16x128xbf16>
    %172 = vector.shape_cast %171 : vector<1x16x128xbf16> to vector<16x128xbf16>
    %173 = vector.shape_cast %170 : vector<16x128xbf16> to vector<1x16x128xbf16>
    tpu.vector_store %arg6[%c0_149, %c48, %c0_150], %173 {strides = array<i32>} : memref<1x128x128xbf16, #tpu.memory_space<vmem>>, vector<1x16x128xbf16>,
    %c72 = arith.constant 72 : index
    %c0_151 = arith.constant 0 : index
    %174 = vector.load %arg8[%c72, %c0_151] : memref<144x128xf32, #tpu.memory_space<vmem>>, vector<16x128xf32>
    %175 = vector.broadcast %128 : vector<1x128xf32> to vector<16x128xf32>
    %176 = arith.mulf %174, %175 : vector<16x128xf32>
    %177 = vector.broadcast %129 : vector<1x128xf32> to vector<16x128xf32>
    %178 = arith.addf %176, %177 : vector<16x128xf32>
    %cst_152 = arith.constant 0.000000e+00 : f32
    %179 = vector.broadcast %cst_152 : f32 to vector<16x128xf32>
    %180 = arith.maximumf %178, %179 : vector<16x128xf32>
    %181 = arith.truncf %180 : vector<16x128xf32> to vector<16x128xbf16>
    %c0_153 = arith.constant 0 : index
    %c64_154 = arith.constant 64 : index
    %c0_155 = arith.constant 0 : index
    %182 = vector.load %arg6[%c0_153, %c64_154, %c0_155] : memref<1x128x128xbf16, #tpu.memory_space<vmem>>, vector<1x16x128xbf16>
    %183 = vector.shape_cast %182 : vector<1x16x128xbf16> to vector<16x128xbf16>
    %184 = vector.shape_cast %181 : vector<16x128xbf16> to vector<1x16x128xbf16>
    tpu.vector_store %arg6[%c0_153, %c64_154, %c0_155], %184 {strides = array<i32>} : memref<1x128x128xbf16, #tpu.memory_space<vmem>>, vector<1x16x128xbf16>,
    %c90 = arith.constant 90 : index
    %c0_156 = arith.constant 0 : index
    %185 = vector.load %arg8[%c90, %c0_156] : memref<144x128xf32, #tpu.memory_space<vmem>>, vector<16x128xf32>
    %186 = vector.broadcast %128 : vector<1x128xf32> to vector<16x128xf32>
    %187 = arith.mulf %185, %186 : vector<16x128xf32>
    %188 = vector.broadcast %129 : vector<1x128xf32> to vector<16x128xf32>
    %189 = arith.addf %187, %188 : vector<16x128xf32>
    %cst_157 = arith.constant 0.000000e+00 : f32
    %190 = vector.broadcast %cst_157 : f32 to vector<16x128xf32>
    %191 = arith.maximumf %189, %190 : vector<16x128xf32>
    %192 = arith.truncf %191 : vector<16x128xf32> to vector<16x128xbf16>
    %c0_158 = arith.constant 0 : index
    %c80 = arith.constant 80 : index
    %c0_159 = arith.constant 0 : index
    %193 = vector.load %arg6[%c0_158, %c80, %c0_159] : memref<1x128x128xbf16, #tpu.memory_space<vmem>>, vector<1x16x128xbf16>
    %194 = vector.shape_cast %193 : vector<1x16x128xbf16> to vector<16x128xbf16>
    %195 = vector.shape_cast %192 : vector<16x128xbf16> to vector<1x16x128xbf16>
    tpu.vector_store %arg6[%c0_158, %c80, %c0_159], %195 {strides = array<i32>} : memref<1x128x128xbf16, #tpu.memory_space<vmem>>, vector<1x16x128xbf16>,
    %c108 = arith.constant 108 : index
    %c0_160 = arith.constant 0 : index
    %196 = vector.load %arg8[%c108, %c0_160] : memref<144x128xf32, #tpu.memory_space<vmem>>, vector<16x128xf32>
    %197 = vector.broadcast %128 : vector<1x128xf32> to vector<16x128xf32>
    %198 = arith.mulf %196, %197 : vector<16x128xf32>
    %199 = vector.broadcast %129 : vector<1x128xf32> to vector<16x128xf32>
    %200 = arith.addf %198, %199 : vector<16x128xf32>
    %cst_161 = arith.constant 0.000000e+00 : f32
    %201 = vector.broadcast %cst_161 : f32 to vector<16x128xf32>
    %202 = arith.maximumf %200, %201 : vector<16x128xf32>
    %203 = arith.truncf %202 : vector<16x128xf32> to vector<16x128xbf16>
    %c0_162 = arith.constant 0 : index
    %c96 = arith.constant 96 : index
    %c0_163 = arith.constant 0 : index
    %204 = vector.load %arg6[%c0_162, %c96, %c0_163] : memref<1x128x128xbf16, #tpu.memory_space<vmem>>, vector<1x16x128xbf16>
    %205 = vector.shape_cast %204 : vector<1x16x128xbf16> to vector<16x128xbf16>
    %206 = vector.shape_cast %203 : vector<16x128xbf16> to vector<1x16x128xbf16>
    tpu.vector_store %arg6[%c0_162, %c96, %c0_163], %206 {strides = array<i32>} : memref<1x128x128xbf16, #tpu.memory_space<vmem>>, vector<1x16x128xbf16>,
    %c126 = arith.constant 126 : index
    %c0_164 = arith.constant 0 : index
    %207 = vector.load %arg8[%c126, %c0_164] : memref<144x128xf32, #tpu.memory_space<vmem>>, vector<16x128xf32>
    %208 = vector.broadcast %128 : vector<1x128xf32> to vector<16x128xf32>
    %209 = arith.mulf %207, %208 : vector<16x128xf32>
    %210 = vector.broadcast %129 : vector<1x128xf32> to vector<16x128xf32>
    %211 = arith.addf %209, %210 : vector<16x128xf32>
    %cst_165 = arith.constant 0.000000e+00 : f32
    %212 = vector.broadcast %cst_165 : f32 to vector<16x128xf32>
    %213 = arith.maximumf %211, %212 : vector<16x128xf32>
    %214 = arith.truncf %213 : vector<16x128xf32> to vector<16x128xbf16>
    %c0_166 = arith.constant 0 : index
    %c112 = arith.constant 112 : index
    %c0_167 = arith.constant 0 : index
    %215 = vector.load %arg6[%c0_166, %c112, %c0_167] : memref<1x128x128xbf16, #tpu.memory_space<vmem>>, vector<1x16x128xbf16>
    %216 = vector.shape_cast %215 : vector<1x16x128xbf16> to vector<16x128xbf16>
    %217 = vector.shape_cast %214 : vector<16x128xbf16> to vector<1x16x128xbf16>
    tpu.vector_store %arg6[%c0_166, %c112, %c0_167], %217 {strides = array<i32>} : memref<1x128x128xbf16, #tpu.memory_space<vmem>>, vector<1x16x128xbf16>,
    return
  }
  func.func @transform_0(%arg0: i32, %arg1: i32) -> (i32, i32, i32, i32) {
    %c0_i32 = arith.constant 0 : i32
    %c0_i32_0 = arith.constant 0 : i32
    %c0_i32_1 = arith.constant 0 : i32
    %c0_i32_2 = arith.constant 0 : i32
    return %arg0, %c0_i32, %c0_i32_0, %c0_i32_1 : i32, i32, i32, i32
  }
  func.func @transform_1(%arg0: i32, %arg1: i32) -> (i32, i32) {
    %c0_i32 = arith.constant 0 : i32
    %c0_i32_0 = arith.constant 0 : i32
    %c0_i32_1 = arith.constant 0 : i32
    return %c0_i32, %c0_i32_0 : i32, i32
  }
  func.func @transform_2(%arg0: i32, %arg1: i32) -> (i32, i32) {
    %c0_i32 = arith.constant 0 : i32
    %c0_i32_0 = arith.constant 0 : i32
    %c0_i32_1 = arith.constant 0 : i32
    return %c0_i32, %c0_i32_0 : i32, i32
  }
  func.func @transform_3(%arg0: i32, %arg1: i32) -> (i32, i32) {
    %c0_i32 = arith.constant 0 : i32
    %c0_i32_0 = arith.constant 0 : i32
    %c0_i32_1 = arith.constant 0 : i32
    return %c0_i32, %c0_i32_0 : i32, i32
  }
  func.func @transform_4(%arg0: i32, %arg1: i32) -> (i32, i32, i32) {
    %c0_i32 = arith.constant 0 : i32
    %c0_i32_0 = arith.constant 0 : i32
    return %arg0, %arg1, %c0_i32 : i32, i32, i32
  }
}

module attributes {stable_mosaic.version = 11 : i64} {
  func.func @_conv_bn_relu_kernel(%arg0: i32, %arg1: i32, %arg2: memref<1x16x16x128xbf16, #tpu.memory_space<vmem>>, %arg3: memref<1152x128xbf16, #tpu.memory_space<vmem>>, %arg4: memref<1x128xf32, #tpu.memory_space<vmem>>, %arg5: memref<1x128xf32, #tpu.memory_space<vmem>>, %arg6: memref<1x256x128xf32, #tpu.memory_space<vmem>>, %arg7: memref<326x128xbf16, #tpu.memory_space<vmem>>, %arg8: memref<288x128xf32, #tpu.memory_space<vmem>>) attributes {dimension_semantics = [#tpu.dimension_semantics<parallel>, #tpu.dimension_semantics<arbitrary>], iteration_bounds = array<i64: 2, 1>, scalar_prefetch = 0 : i64, scratch_operands = 2 : i64, tpu.core_type = #tpu.core_type<tc>, window_params = [{transform_indices = @transform_0, window_bounds = array<i64: 1, 16, 16, 128>}, {pipeline_mode = #tpu.pipeline_mode<synchronous>, transform_indices = @transform_1, window_bounds = array<i64: 1152, 128>}, {pipeline_mode = #tpu.pipeline_mode<synchronous>, transform_indices = @transform_2, window_bounds = array<i64: 1, 128>}, {pipeline_mode = #tpu.pipeline_mode<synchronous>, transform_indices = @transform_3, window_bounds = array<i64: 1, 128>}, {transform_indices = @transform_4, window_bounds = array<i64: 1, 256, 128>}]} {
    %c16_i32 = arith.constant 16 : i32
    %0 = arith.muli %arg1, %c16_i32 : i32
    %cst = arith.constant 0.000000e+00 : bf16
    %1 = vector.broadcast %cst : bf16 to vector<1x128xbf16>
    %cst_0 = arith.constant 0.000000e+00 : bf16
    %2 = vector.broadcast %cst_0 : bf16 to vector<2x128xbf16>
    %cst_1 = arith.constant 0.000000e+00 : bf16
    %3 = vector.broadcast %cst_1 : bf16 to vector<3x128xbf16>
    %cst_2 = arith.constant 0.000000e+00 : bf16
    %4 = vector.broadcast %cst_2 : bf16 to vector<16x128xbf16>
    %c0 = arith.constant 0 : index
    %c0_3 = arith.constant 0 : index
    %5 = vector.load %arg7[%c0, %c0_3] : memref<326x128xbf16, #tpu.memory_space<vmem>>, vector<1x128xbf16>
    tpu.vector_store %arg7[%c0, %c0_3], %1 {strides = array<i32>} : memref<326x128xbf16, #tpu.memory_space<vmem>>, vector<1x128xbf16>,
    %c17 = arith.constant 17 : index
    %c0_4 = arith.constant 0 : index
    %6 = vector.load %arg7[%c17, %c0_4] : memref<326x128xbf16, #tpu.memory_space<vmem>>, vector<2x128xbf16>
    tpu.vector_store %arg7[%c17, %c0_4], %2 {strides = array<i32>} : memref<326x128xbf16, #tpu.memory_space<vmem>>, vector<2x128xbf16>,
    %c35 = arith.constant 35 : index
    %c0_5 = arith.constant 0 : index
    %7 = vector.load %arg7[%c35, %c0_5] : memref<326x128xbf16, #tpu.memory_space<vmem>>, vector<2x128xbf16>
    tpu.vector_store %arg7[%c35, %c0_5], %2 {strides = array<i32>} : memref<326x128xbf16, #tpu.memory_space<vmem>>, vector<2x128xbf16>,
    %c53 = arith.constant 53 : index
    %c0_6 = arith.constant 0 : index
    %8 = vector.load %arg7[%c53, %c0_6] : memref<326x128xbf16, #tpu.memory_space<vmem>>, vector<2x128xbf16>
    tpu.vector_store %arg7[%c53, %c0_6], %2 {strides = array<i32>} : memref<326x128xbf16, #tpu.memory_space<vmem>>, vector<2x128xbf16>,
    %c71 = arith.constant 71 : index
    %c0_7 = arith.constant 0 : index
    %9 = vector.load %arg7[%c71, %c0_7] : memref<326x128xbf16, #tpu.memory_space<vmem>>, vector<2x128xbf16>
    tpu.vector_store %arg7[%c71, %c0_7], %2 {strides = array<i32>} : memref<326x128xbf16, #tpu.memory_space<vmem>>, vector<2x128xbf16>,
    %c89 = arith.constant 89 : index
    %c0_8 = arith.constant 0 : index
    %10 = vector.load %arg7[%c89, %c0_8] : memref<326x128xbf16, #tpu.memory_space<vmem>>, vector<2x128xbf16>
    tpu.vector_store %arg7[%c89, %c0_8], %2 {strides = array<i32>} : memref<326x128xbf16, #tpu.memory_space<vmem>>, vector<2x128xbf16>,
    %c107 = arith.constant 107 : index
    %c0_9 = arith.constant 0 : index
    %11 = vector.load %arg7[%c107, %c0_9] : memref<326x128xbf16, #tpu.memory_space<vmem>>, vector<2x128xbf16>
    tpu.vector_store %arg7[%c107, %c0_9], %2 {strides = array<i32>} : memref<326x128xbf16, #tpu.memory_space<vmem>>, vector<2x128xbf16>,
    %c125 = arith.constant 125 : index
    %c0_10 = arith.constant 0 : index
    %12 = vector.load %arg7[%c125, %c0_10] : memref<326x128xbf16, #tpu.memory_space<vmem>>, vector<2x128xbf16>
    tpu.vector_store %arg7[%c125, %c0_10], %2 {strides = array<i32>} : memref<326x128xbf16, #tpu.memory_space<vmem>>, vector<2x128xbf16>,
    %c143 = arith.constant 143 : index
    %c0_11 = arith.constant 0 : index
    %13 = vector.load %arg7[%c143, %c0_11] : memref<326x128xbf16, #tpu.memory_space<vmem>>, vector<2x128xbf16>
    tpu.vector_store %arg7[%c143, %c0_11], %2 {strides = array<i32>} : memref<326x128xbf16, #tpu.memory_space<vmem>>, vector<2x128xbf16>,
    %c161 = arith.constant 161 : index
    %c0_12 = arith.constant 0 : index
    %14 = vector.load %arg7[%c161, %c0_12] : memref<326x128xbf16, #tpu.memory_space<vmem>>, vector<2x128xbf16>
    tpu.vector_store %arg7[%c161, %c0_12], %2 {strides = array<i32>} : memref<326x128xbf16, #tpu.memory_space<vmem>>, vector<2x128xbf16>,
    %c179 = arith.constant 179 : index
    %c0_13 = arith.constant 0 : index
    %15 = vector.load %arg7[%c179, %c0_13] : memref<326x128xbf16, #tpu.memory_space<vmem>>, vector<2x128xbf16>
    tpu.vector_store %arg7[%c179, %c0_13], %2 {strides = array<i32>} : memref<326x128xbf16, #tpu.memory_space<vmem>>, vector<2x128xbf16>,
    %c197 = arith.constant 197 : index
    %c0_14 = arith.constant 0 : index
    %16 = vector.load %arg7[%c197, %c0_14] : memref<326x128xbf16, #tpu.memory_space<vmem>>, vector<2x128xbf16>
    tpu.vector_store %arg7[%c197, %c0_14], %2 {strides = array<i32>} : memref<326x128xbf16, #tpu.memory_space<vmem>>, vector<2x128xbf16>,
    %c215 = arith.constant 215 : index
    %c0_15 = arith.constant 0 : index
    %17 = vector.load %arg7[%c215, %c0_15] : memref<326x128xbf16, #tpu.memory_space<vmem>>, vector<2x128xbf16>
    tpu.vector_store %arg7[%c215, %c0_15], %2 {strides = array<i32>} : memref<326x128xbf16, #tpu.memory_space<vmem>>, vector<2x128xbf16>,
    %c233 = arith.constant 233 : index
    %c0_16 = arith.constant 0 : index
    %18 = vector.load %arg7[%c233, %c0_16] : memref<326x128xbf16, #tpu.memory_space<vmem>>, vector<2x128xbf16>
    tpu.vector_store %arg7[%c233, %c0_16], %2 {strides = array<i32>} : memref<326x128xbf16, #tpu.memory_space<vmem>>, vector<2x128xbf16>,
    %c251 = arith.constant 251 : index
    %c0_17 = arith.constant 0 : index
    %19 = vector.load %arg7[%c251, %c0_17] : memref<326x128xbf16, #tpu.memory_space<vmem>>, vector<2x128xbf16>
    tpu.vector_store %arg7[%c251, %c0_17], %2 {strides = array<i32>} : memref<326x128xbf16, #tpu.memory_space<vmem>>, vector<2x128xbf16>,
    %c269 = arith.constant 269 : index
    %c0_18 = arith.constant 0 : index
    %20 = vector.load %arg7[%c269, %c0_18] : memref<326x128xbf16, #tpu.memory_space<vmem>>, vector<2x128xbf16>
    tpu.vector_store %arg7[%c269, %c0_18], %2 {strides = array<i32>} : memref<326x128xbf16, #tpu.memory_space<vmem>>, vector<2x128xbf16>,
    %c287 = arith.constant 287 : index
    %c0_19 = arith.constant 0 : index
    %21 = vector.load %arg7[%c287, %c0_19] : memref<326x128xbf16, #tpu.memory_space<vmem>>, vector<2x128xbf16>
    tpu.vector_store %arg7[%c287, %c0_19], %2 {strides = array<i32>} : memref<326x128xbf16, #tpu.memory_space<vmem>>, vector<2x128xbf16>,
    %c305 = arith.constant 305 : index
    %c0_20 = arith.constant 0 : index
    %22 = vector.load %arg7[%c305, %c0_20] : memref<326x128xbf16, #tpu.memory_space<vmem>>, vector<2x128xbf16>
    tpu.vector_store %arg7[%c305, %c0_20], %2 {strides = array<i32>} : memref<326x128xbf16, #tpu.memory_space<vmem>>, vector<2x128xbf16>,
    %c323 = arith.constant 323 : index
    %c0_21 = arith.constant 0 : index
    %23 = vector.load %arg7[%c323, %c0_21] : memref<326x128xbf16, #tpu.memory_space<vmem>>, vector<3x128xbf16>
    tpu.vector_store %arg7[%c323, %c0_21], %3 {strides = array<i32>} : memref<326x128xbf16, #tpu.memory_space<vmem>>, vector<3x128xbf16>,
    %c1_i32 = arith.constant 1 : i32
    %24 = arith.addi %0, %c1_i32 : i32
    %c1_i32_22 = arith.constant 1 : i32
    %25 = arith.subi %24, %c1_i32_22 : i32
    %c0_23 = arith.constant 0 : index
    %26 = arith.index_cast %25 : i32 to index
    %c0_24 = arith.constant 0 : index
    %c0_25 = arith.constant 0 : index
    %27 = vector.load %arg2[%c0_23, %26, %c0_24, %c0_25] : memref<1x16x16x128xbf16, #tpu.memory_space<vmem>>, vector<1x1x16x128xbf16>
    %28 = vector.shape_cast %27 : vector<1x1x16x128xbf16> to vector<16x128xbf16>
    %c19 = arith.constant 19 : index
    %c0_26 = arith.constant 0 : index
    %29 = vector.load %arg7[%c19, %c0_26] : memref<326x128xbf16, #tpu.memory_space<vmem>>, vector<16x128xbf16>
    tpu.vector_store %arg7[%c19, %c0_26], %28 {strides = array<i32>} : memref<326x128xbf16, #tpu.memory_space<vmem>>, vector<16x128xbf16>,
    %c2_i32 = arith.constant 2 : i32
    %30 = arith.addi %0, %c2_i32 : i32
    %c1_i32_27 = arith.constant 1 : i32
    %31 = arith.subi %30, %c1_i32_27 : i32
    %c0_28 = arith.constant 0 : index
    %32 = arith.index_cast %31 : i32 to index
    %c0_29 = arith.constant 0 : index
    %c0_30 = arith.constant 0 : index
    %33 = vector.load %arg2[%c0_28, %32, %c0_29, %c0_30] : memref<1x16x16x128xbf16, #tpu.memory_space<vmem>>, vector<1x1x16x128xbf16>
    %34 = vector.shape_cast %33 : vector<1x1x16x128xbf16> to vector<16x128xbf16>
    %c37 = arith.constant 37 : index
    %c0_31 = arith.constant 0 : index
    %35 = vector.load %arg7[%c37, %c0_31] : memref<326x128xbf16, #tpu.memory_space<vmem>>, vector<16x128xbf16>
    tpu.vector_store %arg7[%c37, %c0_31], %34 {strides = array<i32>} : memref<326x128xbf16, #tpu.memory_space<vmem>>, vector<16x128xbf16>,
    %c3_i32 = arith.constant 3 : i32
    %36 = arith.addi %0, %c3_i32 : i32
    %c1_i32_32 = arith.constant 1 : i32
    %37 = arith.subi %36, %c1_i32_32 : i32
    %c0_33 = arith.constant 0 : index
    %38 = arith.index_cast %37 : i32 to index
    %c0_34 = arith.constant 0 : index
    %c0_35 = arith.constant 0 : index
    %39 = vector.load %arg2[%c0_33, %38, %c0_34, %c0_35] : memref<1x16x16x128xbf16, #tpu.memory_space<vmem>>, vector<1x1x16x128xbf16>
    %40 = vector.shape_cast %39 : vector<1x1x16x128xbf16> to vector<16x128xbf16>
    %c55 = arith.constant 55 : index
    %c0_36 = arith.constant 0 : index
    %41 = vector.load %arg7[%c55, %c0_36] : memref<326x128xbf16, #tpu.memory_space<vmem>>, vector<16x128xbf16>
    tpu.vector_store %arg7[%c55, %c0_36], %40 {strides = array<i32>} : memref<326x128xbf16, #tpu.memory_space<vmem>>, vector<16x128xbf16>,
    %c4_i32 = arith.constant 4 : i32
    %42 = arith.addi %0, %c4_i32 : i32
    %c1_i32_37 = arith.constant 1 : i32
    %43 = arith.subi %42, %c1_i32_37 : i32
    %c0_38 = arith.constant 0 : index
    %44 = arith.index_cast %43 : i32 to index
    %c0_39 = arith.constant 0 : index
    %c0_40 = arith.constant 0 : index
    %45 = vector.load %arg2[%c0_38, %44, %c0_39, %c0_40] : memref<1x16x16x128xbf16, #tpu.memory_space<vmem>>, vector<1x1x16x128xbf16>
    %46 = vector.shape_cast %45 : vector<1x1x16x128xbf16> to vector<16x128xbf16>
    %c73 = arith.constant 73 : index
    %c0_41 = arith.constant 0 : index
    %47 = vector.load %arg7[%c73, %c0_41] : memref<326x128xbf16, #tpu.memory_space<vmem>>, vector<16x128xbf16>
    tpu.vector_store %arg7[%c73, %c0_41], %46 {strides = array<i32>} : memref<326x128xbf16, #tpu.memory_space<vmem>>, vector<16x128xbf16>,
    %c5_i32 = arith.constant 5 : i32
    %48 = arith.addi %0, %c5_i32 : i32
    %c1_i32_42 = arith.constant 1 : i32
    %49 = arith.subi %48, %c1_i32_42 : i32
    %c0_43 = arith.constant 0 : index
    %50 = arith.index_cast %49 : i32 to index
    %c0_44 = arith.constant 0 : index
    %c0_45 = arith.constant 0 : index
    %51 = vector.load %arg2[%c0_43, %50, %c0_44, %c0_45] : memref<1x16x16x128xbf16, #tpu.memory_space<vmem>>, vector<1x1x16x128xbf16>
    %52 = vector.shape_cast %51 : vector<1x1x16x128xbf16> to vector<16x128xbf16>
    %c91 = arith.constant 91 : index
    %c0_46 = arith.constant 0 : index
    %53 = vector.load %arg7[%c91, %c0_46] : memref<326x128xbf16, #tpu.memory_space<vmem>>, vector<16x128xbf16>
    tpu.vector_store %arg7[%c91, %c0_46], %52 {strides = array<i32>} : memref<326x128xbf16, #tpu.memory_space<vmem>>, vector<16x128xbf16>,
    %c6_i32 = arith.constant 6 : i32
    %54 = arith.addi %0, %c6_i32 : i32
    %c1_i32_47 = arith.constant 1 : i32
    %55 = arith.subi %54, %c1_i32_47 : i32
    %c0_48 = arith.constant 0 : index
    %56 = arith.index_cast %55 : i32 to index
    %c0_49 = arith.constant 0 : index
    %c0_50 = arith.constant 0 : index
    %57 = vector.load %arg2[%c0_48, %56, %c0_49, %c0_50] : memref<1x16x16x128xbf16, #tpu.memory_space<vmem>>, vector<1x1x16x128xbf16>
    %58 = vector.shape_cast %57 : vector<1x1x16x128xbf16> to vector<16x128xbf16>
    %c109 = arith.constant 109 : index
    %c0_51 = arith.constant 0 : index
    %59 = vector.load %arg7[%c109, %c0_51] : memref<326x128xbf16, #tpu.memory_space<vmem>>, vector<16x128xbf16>
    tpu.vector_store %arg7[%c109, %c0_51], %58 {strides = array<i32>} : memref<326x128xbf16, #tpu.memory_space<vmem>>, vector<16x128xbf16>,
    %c7_i32 = arith.constant 7 : i32
    %60 = arith.addi %0, %c7_i32 : i32
    %c1_i32_52 = arith.constant 1 : i32
    %61 = arith.subi %60, %c1_i32_52 : i32
    %c0_53 = arith.constant 0 : index
    %62 = arith.index_cast %61 : i32 to index
    %c0_54 = arith.constant 0 : index
    %c0_55 = arith.constant 0 : index
    %63 = vector.load %arg2[%c0_53, %62, %c0_54, %c0_55] : memref<1x16x16x128xbf16, #tpu.memory_space<vmem>>, vector<1x1x16x128xbf16>
    %64 = vector.shape_cast %63 : vector<1x1x16x128xbf16> to vector<16x128xbf16>
    %c127 = arith.constant 127 : index
    %c0_56 = arith.constant 0 : index
    %65 = vector.load %arg7[%c127, %c0_56] : memref<326x128xbf16, #tpu.memory_space<vmem>>, vector<16x128xbf16>
    tpu.vector_store %arg7[%c127, %c0_56], %64 {strides = array<i32>} : memref<326x128xbf16, #tpu.memory_space<vmem>>, vector<16x128xbf16>,
    %c8_i32 = arith.constant 8 : i32
    %66 = arith.addi %0, %c8_i32 : i32
    %c1_i32_57 = arith.constant 1 : i32
    %67 = arith.subi %66, %c1_i32_57 : i32
    %c0_58 = arith.constant 0 : index
    %68 = arith.index_cast %67 : i32 to index
    %c0_59 = arith.constant 0 : index
    %c0_60 = arith.constant 0 : index
    %69 = vector.load %arg2[%c0_58, %68, %c0_59, %c0_60] : memref<1x16x16x128xbf16, #tpu.memory_space<vmem>>, vector<1x1x16x128xbf16>
    %70 = vector.shape_cast %69 : vector<1x1x16x128xbf16> to vector<16x128xbf16>
    %c145 = arith.constant 145 : index
    %c0_61 = arith.constant 0 : index
    %71 = vector.load %arg7[%c145, %c0_61] : memref<326x128xbf16, #tpu.memory_space<vmem>>, vector<16x128xbf16>
    tpu.vector_store %arg7[%c145, %c0_61], %70 {strides = array<i32>} : memref<326x128xbf16, #tpu.memory_space<vmem>>, vector<16x128xbf16>,
    %c9_i32 = arith.constant 9 : i32
    %72 = arith.addi %0, %c9_i32 : i32
    %c1_i32_62 = arith.constant 1 : i32
    %73 = arith.subi %72, %c1_i32_62 : i32
    %c0_63 = arith.constant 0 : index
    %74 = arith.index_cast %73 : i32 to index
    %c0_64 = arith.constant 0 : index
    %c0_65 = arith.constant 0 : index
    %75 = vector.load %arg2[%c0_63, %74, %c0_64, %c0_65] : memref<1x16x16x128xbf16, #tpu.memory_space<vmem>>, vector<1x1x16x128xbf16>
    %76 = vector.shape_cast %75 : vector<1x1x16x128xbf16> to vector<16x128xbf16>
    %c163 = arith.constant 163 : index
    %c0_66 = arith.constant 0 : index
    %77 = vector.load %arg7[%c163, %c0_66] : memref<326x128xbf16, #tpu.memory_space<vmem>>, vector<16x128xbf16>
    tpu.vector_store %arg7[%c163, %c0_66], %76 {strides = array<i32>} : memref<326x128xbf16, #tpu.memory_space<vmem>>, vector<16x128xbf16>,
    %c10_i32 = arith.constant 10 : i32
    %78 = arith.addi %0, %c10_i32 : i32
    %c1_i32_67 = arith.constant 1 : i32
    %79 = arith.subi %78, %c1_i32_67 : i32
    %c0_68 = arith.constant 0 : index
    %80 = arith.index_cast %79 : i32 to index
    %c0_69 = arith.constant 0 : index
    %c0_70 = arith.constant 0 : index
    %81 = vector.load %arg2[%c0_68, %80, %c0_69, %c0_70] : memref<1x16x16x128xbf16, #tpu.memory_space<vmem>>, vector<1x1x16x128xbf16>
    %82 = vector.shape_cast %81 : vector<1x1x16x128xbf16> to vector<16x128xbf16>
    %c181 = arith.constant 181 : index
    %c0_71 = arith.constant 0 : index
    %83 = vector.load %arg7[%c181, %c0_71] : memref<326x128xbf16, #tpu.memory_space<vmem>>, vector<16x128xbf16>
    tpu.vector_store %arg7[%c181, %c0_71], %82 {strides = array<i32>} : memref<326x128xbf16, #tpu.memory_space<vmem>>, vector<16x128xbf16>,
    %c11_i32 = arith.constant 11 : i32
    %84 = arith.addi %0, %c11_i32 : i32
    %c1_i32_72 = arith.constant 1 : i32
    %85 = arith.subi %84, %c1_i32_72 : i32
    %c0_73 = arith.constant 0 : index
    %86 = arith.index_cast %85 : i32 to index
    %c0_74 = arith.constant 0 : index
    %c0_75 = arith.constant 0 : index
    %87 = vector.load %arg2[%c0_73, %86, %c0_74, %c0_75] : memref<1x16x16x128xbf16, #tpu.memory_space<vmem>>, vector<1x1x16x128xbf16>
    %88 = vector.shape_cast %87 : vector<1x1x16x128xbf16> to vector<16x128xbf16>
    %c199 = arith.constant 199 : index
    %c0_76 = arith.constant 0 : index
    %89 = vector.load %arg7[%c199, %c0_76] : memref<326x128xbf16, #tpu.memory_space<vmem>>, vector<16x128xbf16>
    tpu.vector_store %arg7[%c199, %c0_76], %88 {strides = array<i32>} : memref<326x128xbf16, #tpu.memory_space<vmem>>, vector<16x128xbf16>,
    %c12_i32 = arith.constant 12 : i32
    %90 = arith.addi %0, %c12_i32 : i32
    %c1_i32_77 = arith.constant 1 : i32
    %91 = arith.subi %90, %c1_i32_77 : i32
    %c0_78 = arith.constant 0 : index
    %92 = arith.index_cast %91 : i32 to index
    %c0_79 = arith.constant 0 : index
    %c0_80 = arith.constant 0 : index
    %93 = vector.load %arg2[%c0_78, %92, %c0_79, %c0_80] : memref<1x16x16x128xbf16, #tpu.memory_space<vmem>>, vector<1x1x16x128xbf16>
    %94 = vector.shape_cast %93 : vector<1x1x16x128xbf16> to vector<16x128xbf16>
    %c217 = arith.constant 217 : index
    %c0_81 = arith.constant 0 : index
    %95 = vector.load %arg7[%c217, %c0_81] : memref<326x128xbf16, #tpu.memory_space<vmem>>, vector<16x128xbf16>
    tpu.vector_store %arg7[%c217, %c0_81], %94 {strides = array<i32>} : memref<326x128xbf16, #tpu.memory_space<vmem>>, vector<16x128xbf16>,
    %c13_i32 = arith.constant 13 : i32
    %96 = arith.addi %0, %c13_i32 : i32
    %c1_i32_82 = arith.constant 1 : i32
    %97 = arith.subi %96, %c1_i32_82 : i32
    %c0_83 = arith.constant 0 : index
    %98 = arith.index_cast %97 : i32 to index
    %c0_84 = arith.constant 0 : index
    %c0_85 = arith.constant 0 : index
    %99 = vector.load %arg2[%c0_83, %98, %c0_84, %c0_85] : memref<1x16x16x128xbf16, #tpu.memory_space<vmem>>, vector<1x1x16x128xbf16>
    %100 = vector.shape_cast %99 : vector<1x1x16x128xbf16> to vector<16x128xbf16>
    %c235 = arith.constant 235 : index
    %c0_86 = arith.constant 0 : index
    %101 = vector.load %arg7[%c235, %c0_86] : memref<326x128xbf16, #tpu.memory_space<vmem>>, vector<16x128xbf16>
    tpu.vector_store %arg7[%c235, %c0_86], %100 {strides = array<i32>} : memref<326x128xbf16, #tpu.memory_space<vmem>>, vector<16x128xbf16>,
    %c14_i32 = arith.constant 14 : i32
    %102 = arith.addi %0, %c14_i32 : i32
    %c1_i32_87 = arith.constant 1 : i32
    %103 = arith.subi %102, %c1_i32_87 : i32
    %c0_88 = arith.constant 0 : index
    %104 = arith.index_cast %103 : i32 to index
    %c0_89 = arith.constant 0 : index
    %c0_90 = arith.constant 0 : index
    %105 = vector.load %arg2[%c0_88, %104, %c0_89, %c0_90] : memref<1x16x16x128xbf16, #tpu.memory_space<vmem>>, vector<1x1x16x128xbf16>
    %106 = vector.shape_cast %105 : vector<1x1x16x128xbf16> to vector<16x128xbf16>
    %c253 = arith.constant 253 : index
    %c0_91 = arith.constant 0 : index
    %107 = vector.load %arg7[%c253, %c0_91] : memref<326x128xbf16, #tpu.memory_space<vmem>>, vector<16x128xbf16>
    tpu.vector_store %arg7[%c253, %c0_91], %106 {strides = array<i32>} : memref<326x128xbf16, #tpu.memory_space<vmem>>, vector<16x128xbf16>,
    %c15_i32 = arith.constant 15 : i32
    %108 = arith.addi %0, %c15_i32 : i32
    %c1_i32_92 = arith.constant 1 : i32
    %109 = arith.subi %108, %c1_i32_92 : i32
    %c0_93 = arith.constant 0 : index
    %110 = arith.index_cast %109 : i32 to index
    %c0_94 = arith.constant 0 : index
    %c0_95 = arith.constant 0 : index
    %111 = vector.load %arg2[%c0_93, %110, %c0_94, %c0_95] : memref<1x16x16x128xbf16, #tpu.memory_space<vmem>>, vector<1x1x16x128xbf16>
    %112 = vector.shape_cast %111 : vector<1x1x16x128xbf16> to vector<16x128xbf16>
    %c271 = arith.constant 271 : index
    %c0_96 = arith.constant 0 : index
    %113 = vector.load %arg7[%c271, %c0_96] : memref<326x128xbf16, #tpu.memory_space<vmem>>, vector<16x128xbf16>
    tpu.vector_store %arg7[%c271, %c0_96], %112 {strides = array<i32>} : memref<326x128xbf16, #tpu.memory_space<vmem>>, vector<16x128xbf16>,
    %c16_i32_97 = arith.constant 16 : i32
    %114 = arith.addi %0, %c16_i32_97 : i32
    %c1_i32_98 = arith.constant 1 : i32
    %115 = arith.subi %114, %c1_i32_98 : i32
    %c0_99 = arith.constant 0 : index
    %116 = arith.index_cast %115 : i32 to index
    %c0_100 = arith.constant 0 : index
    %c0_101 = arith.constant 0 : index
    %117 = vector.load %arg2[%c0_99, %116, %c0_100, %c0_101] : memref<1x16x16x128xbf16, #tpu.memory_space<vmem>>, vector<1x1x16x128xbf16>
    %118 = vector.shape_cast %117 : vector<1x1x16x128xbf16> to vector<16x128xbf16>
    %c289 = arith.constant 289 : index
    %c0_102 = arith.constant 0 : index
    %119 = vector.load %arg7[%c289, %c0_102] : memref<326x128xbf16, #tpu.memory_space<vmem>>, vector<16x128xbf16>
    tpu.vector_store %arg7[%c289, %c0_102], %118 {strides = array<i32>} : memref<326x128xbf16, #tpu.memory_space<vmem>>, vector<16x128xbf16>,
    %c0_i32 = arith.constant 0 : i32
    %120 = arith.cmpi sgt, %arg1, %c0_i32 : i32
    %121 = arith.extui %120 : i1 to i32
    %c0_i32_103 = arith.constant 0 : i32
    %122 = arith.cmpi ne, %121, %c0_i32_103 : i32
    scf.if %122 {
      %c1_i32_249 = arith.constant 1 : i32
      %346 = arith.subi %0, %c1_i32_249 : i32
      %c0_250 = arith.constant 0 : index
      %347 = arith.index_cast %346 : i32 to index
      %c0_251 = arith.constant 0 : index
      %c0_252 = arith.constant 0 : index
      %348 = vector.load %arg2[%c0_250, %347, %c0_251, %c0_252] : memref<1x16x16x128xbf16, #tpu.memory_space<vmem>>, vector<1x1x16x128xbf16>
      %349 = vector.shape_cast %348 : vector<1x1x16x128xbf16> to vector<16x128xbf16>
      %c1_253 = arith.constant 1 : index
      %c0_254 = arith.constant 0 : index
      %350 = vector.load %arg7[%c1_253, %c0_254] : memref<326x128xbf16, #tpu.memory_space<vmem>>, vector<16x128xbf16>
      tpu.vector_store %arg7[%c1_253, %c0_254], %349 {strides = array<i32>} : memref<326x128xbf16, #tpu.memory_space<vmem>>, vector<16x128xbf16>,
    } else {
    }
    %c0_i32_104 = arith.constant 0 : i32
    %123 = arith.cmpi eq, %arg1, %c0_i32_104 : i32
    %124 = arith.extui %123 : i1 to i32
    %c0_i32_105 = arith.constant 0 : i32
    %125 = arith.cmpi ne, %124, %c0_i32_105 : i32
    scf.if %125 {
      %c1_249 = arith.constant 1 : index
      %c0_250 = arith.constant 0 : index
      %346 = vector.load %arg7[%c1_249, %c0_250] : memref<326x128xbf16, #tpu.memory_space<vmem>>, vector<16x128xbf16>
      tpu.vector_store %arg7[%c1_249, %c0_250], %4 {strides = array<i32>} : memref<326x128xbf16, #tpu.memory_space<vmem>>, vector<16x128xbf16>,
    } else {
    }
    %c0_i32_106 = arith.constant 0 : i32
    %126 = arith.cmpi slt, %arg1, %c0_i32_106 : i32
    %127 = arith.extui %126 : i1 to i32
    %c0_i32_107 = arith.constant 0 : i32
    %128 = arith.cmpi ne, %127, %c0_i32_107 : i32
    scf.if %128 {
      %c16_i32_249 = arith.constant 16 : i32
      %346 = arith.addi %0, %c16_i32_249 : i32
      %c0_250 = arith.constant 0 : index
      %347 = arith.index_cast %346 : i32 to index
      %c0_251 = arith.constant 0 : index
      %c0_252 = arith.constant 0 : index
      %348 = vector.load %arg2[%c0_250, %347, %c0_251, %c0_252] : memref<1x16x16x128xbf16, #tpu.memory_space<vmem>>, vector<1x1x16x128xbf16>
      %349 = vector.shape_cast %348 : vector<1x1x16x128xbf16> to vector<16x128xbf16>
      %c307 = arith.constant 307 : index
      %c0_253 = arith.constant 0 : index
      %350 = vector.load %arg7[%c307, %c0_253] : memref<326x128xbf16, #tpu.memory_space<vmem>>, vector<16x128xbf16>
      tpu.vector_store %arg7[%c307, %c0_253], %349 {strides = array<i32>} : memref<326x128xbf16, #tpu.memory_space<vmem>>, vector<16x128xbf16>,
    } else {
    }
    %c0_i32_108 = arith.constant 0 : i32
    %129 = arith.cmpi eq, %arg1, %c0_i32_108 : i32
    %130 = arith.extui %129 : i1 to i32
    %c0_i32_109 = arith.constant 0 : i32
    %131 = arith.cmpi ne, %130, %c0_i32_109 : i32
    scf.if %131 {
      %c307 = arith.constant 307 : index
      %c0_249 = arith.constant 0 : index
      %346 = vector.load %arg7[%c307, %c0_249] : memref<326x128xbf16, #tpu.memory_space<vmem>>, vector<16x128xbf16>
      tpu.vector_store %arg7[%c307, %c0_249], %4 {strides = array<i32>} : memref<326x128xbf16, #tpu.memory_space<vmem>>, vector<16x128xbf16>,
    } else {
    }
    %c0_110 = arith.constant 0 : index
    %c0_111 = arith.constant 0 : index
    %132 = vector.load %arg7[%c0_110, %c0_111] : memref<326x128xbf16, #tpu.memory_space<vmem>>, vector<288x128xbf16>
    %c0_112 = arith.constant 0 : index
    %c0_113 = arith.constant 0 : index
    %133 = vector.load %arg3[%c0_112, %c0_113] : memref<1152x128xbf16, #tpu.memory_space<vmem>>, vector<128x128xbf16>
    %cst_114 = arith.constant dense<0.000000e+00> : vector<288x128xf32>
    %134 = tpu.matmul %132, %133, %cst_114 {dimension_numbers = #tpu.dot_dimension_numbers<[1], [0], [0], [1], [0, 0, 1, 1], [], []>} : vector<288x128xbf16>, vector<128x128xbf16>, vector<288x128xf32> -> vector<288x128xf32>
    %c0_115 = arith.constant 0 : index
    %c0_116 = arith.constant 0 : index
    %135 = vector.load %arg8[%c0_115, %c0_116] : memref<288x128xf32, #tpu.memory_space<vmem>>, vector<288x128xf32>
    tpu.vector_store %arg8[%c0_115, %c0_116], %134 {strides = array<i32>} : memref<288x128xf32, #tpu.memory_space<vmem>>, vector<288x128xf32>,
    %c1 = arith.constant 1 : index
    %c0_117 = arith.constant 0 : index
    %136 = vector.load %arg7[%c1, %c0_117] : memref<326x128xbf16, #tpu.memory_space<vmem>>, vector<288x128xbf16>
    %c128 = arith.constant 128 : index
    %c0_118 = arith.constant 0 : index
    %137 = vector.load %arg3[%c128, %c0_118] : memref<1152x128xbf16, #tpu.memory_space<vmem>>, vector<128x128xbf16>
    %cst_119 = arith.constant dense<0.000000e+00> : vector<288x128xf32>
    %138 = tpu.matmul %136, %137, %cst_119 {dimension_numbers = #tpu.dot_dimension_numbers<[1], [0], [0], [1], [0, 0, 1, 1], [], []>} : vector<288x128xbf16>, vector<128x128xbf16>, vector<288x128xf32> -> vector<288x128xf32>
    %c0_120 = arith.constant 0 : index
    %c0_121 = arith.constant 0 : index
    %139 = vector.load %arg8[%c0_120, %c0_121] : memref<288x128xf32, #tpu.memory_space<vmem>>, vector<288x128xf32>
    %140 = arith.addf %139, %138 : vector<288x128xf32>
    %c0_122 = arith.constant 0 : index
    %c0_123 = arith.constant 0 : index
    %141 = vector.load %arg8[%c0_122, %c0_123] : memref<288x128xf32, #tpu.memory_space<vmem>>, vector<288x128xf32>
    tpu.vector_store %arg8[%c0_122, %c0_123], %140 {strides = array<i32>} : memref<288x128xf32, #tpu.memory_space<vmem>>, vector<288x128xf32>,
    %c2 = arith.constant 2 : index
    %c0_124 = arith.constant 0 : index
    %142 = vector.load %arg7[%c2, %c0_124] : memref<326x128xbf16, #tpu.memory_space<vmem>>, vector<288x128xbf16>
    %c256 = arith.constant 256 : index
    %c0_125 = arith.constant 0 : index
    %143 = vector.load %arg3[%c256, %c0_125] : memref<1152x128xbf16, #tpu.memory_space<vmem>>, vector<128x128xbf16>
    %cst_126 = arith.constant dense<0.000000e+00> : vector<288x128xf32>
    %144 = tpu.matmul %142, %143, %cst_126 {dimension_numbers = #tpu.dot_dimension_numbers<[1], [0], [0], [1], [0, 0, 1, 1], [], []>} : vector<288x128xbf16>, vector<128x128xbf16>, vector<288x128xf32> -> vector<288x128xf32>
    %c0_127 = arith.constant 0 : index
    %c0_128 = arith.constant 0 : index
    %145 = vector.load %arg8[%c0_127, %c0_128] : memref<288x128xf32, #tpu.memory_space<vmem>>, vector<288x128xf32>
    %146 = arith.addf %145, %144 : vector<288x128xf32>
    %c0_129 = arith.constant 0 : index
    %c0_130 = arith.constant 0 : index
    %147 = vector.load %arg8[%c0_129, %c0_130] : memref<288x128xf32, #tpu.memory_space<vmem>>, vector<288x128xf32>
    tpu.vector_store %arg8[%c0_129, %c0_130], %146 {strides = array<i32>} : memref<288x128xf32, #tpu.memory_space<vmem>>, vector<288x128xf32>,
    %c18 = arith.constant 18 : index
    %c0_131 = arith.constant 0 : index
    %148 = vector.load %arg7[%c18, %c0_131] : memref<326x128xbf16, #tpu.memory_space<vmem>>, vector<288x128xbf16>
    %c384 = arith.constant 384 : index
    %c0_132 = arith.constant 0 : index
    %149 = vector.load %arg3[%c384, %c0_132] : memref<1152x128xbf16, #tpu.memory_space<vmem>>, vector<128x128xbf16>
    %cst_133 = arith.constant dense<0.000000e+00> : vector<288x128xf32>
    %150 = tpu.matmul %148, %149, %cst_133 {dimension_numbers = #tpu.dot_dimension_numbers<[1], [0], [0], [1], [0, 0, 1, 1], [], []>} : vector<288x128xbf16>, vector<128x128xbf16>, vector<288x128xf32> -> vector<288x128xf32>
    %c0_134 = arith.constant 0 : index
    %c0_135 = arith.constant 0 : index
    %151 = vector.load %arg8[%c0_134, %c0_135] : memref<288x128xf32, #tpu.memory_space<vmem>>, vector<288x128xf32>
    %152 = arith.addf %151, %150 : vector<288x128xf32>
    %c0_136 = arith.constant 0 : index
    %c0_137 = arith.constant 0 : index
    %153 = vector.load %arg8[%c0_136, %c0_137] : memref<288x128xf32, #tpu.memory_space<vmem>>, vector<288x128xf32>
    tpu.vector_store %arg8[%c0_136, %c0_137], %152 {strides = array<i32>} : memref<288x128xf32, #tpu.memory_space<vmem>>, vector<288x128xf32>,
    %c19_138 = arith.constant 19 : index
    %c0_139 = arith.constant 0 : index
    %154 = vector.load %arg7[%c19_138, %c0_139] : memref<326x128xbf16, #tpu.memory_space<vmem>>, vector<288x128xbf16>
    %c512 = arith.constant 512 : index
    %c0_140 = arith.constant 0 : index
    %155 = vector.load %arg3[%c512, %c0_140] : memref<1152x128xbf16, #tpu.memory_space<vmem>>, vector<128x128xbf16>
    %cst_141 = arith.constant dense<0.000000e+00> : vector<288x128xf32>
    %156 = tpu.matmul %154, %155, %cst_141 {dimension_numbers = #tpu.dot_dimension_numbers<[1], [0], [0], [1], [0, 0, 1, 1], [], []>} : vector<288x128xbf16>, vector<128x128xbf16>, vector<288x128xf32> -> vector<288x128xf32>
    %c0_142 = arith.constant 0 : index
    %c0_143 = arith.constant 0 : index
    %157 = vector.load %arg8[%c0_142, %c0_143] : memref<288x128xf32, #tpu.memory_space<vmem>>, vector<288x128xf32>
    %158 = arith.addf %157, %156 : vector<288x128xf32>
    %c0_144 = arith.constant 0 : index
    %c0_145 = arith.constant 0 : index
    %159 = vector.load %arg8[%c0_144, %c0_145] : memref<288x128xf32, #tpu.memory_space<vmem>>, vector<288x128xf32>
    tpu.vector_store %arg8[%c0_144, %c0_145], %158 {strides = array<i32>} : memref<288x128xf32, #tpu.memory_space<vmem>>, vector<288x128xf32>,
    %c20 = arith.constant 20 : index
    %c0_146 = arith.constant 0 : index
    %160 = vector.load %arg7[%c20, %c0_146] : memref<326x128xbf16, #tpu.memory_space<vmem>>, vector<288x128xbf16>
    %c640 = arith.constant 640 : index
    %c0_147 = arith.constant 0 : index
    %161 = vector.load %arg3[%c640, %c0_147] : memref<1152x128xbf16, #tpu.memory_space<vmem>>, vector<128x128xbf16>
    %cst_148 = arith.constant dense<0.000000e+00> : vector<288x128xf32>
    %162 = tpu.matmul %160, %161, %cst_148 {dimension_numbers = #tpu.dot_dimension_numbers<[1], [0], [0], [1], [0, 0, 1, 1], [], []>} : vector<288x128xbf16>, vector<128x128xbf16>, vector<288x128xf32> -> vector<288x128xf32>
    %c0_149 = arith.constant 0 : index
    %c0_150 = arith.constant 0 : index
    %163 = vector.load %arg8[%c0_149, %c0_150] : memref<288x128xf32, #tpu.memory_space<vmem>>, vector<288x128xf32>
    %164 = arith.addf %163, %162 : vector<288x128xf32>
    %c0_151 = arith.constant 0 : index
    %c0_152 = arith.constant 0 : index
    %165 = vector.load %arg8[%c0_151, %c0_152] : memref<288x128xf32, #tpu.memory_space<vmem>>, vector<288x128xf32>
    tpu.vector_store %arg8[%c0_151, %c0_152], %164 {strides = array<i32>} : memref<288x128xf32, #tpu.memory_space<vmem>>, vector<288x128xf32>,
    %c36 = arith.constant 36 : index
    %c0_153 = arith.constant 0 : index
    %166 = vector.load %arg7[%c36, %c0_153] : memref<326x128xbf16, #tpu.memory_space<vmem>>, vector<288x128xbf16>
    %c768 = arith.constant 768 : index
    %c0_154 = arith.constant 0 : index
    %167 = vector.load %arg3[%c768, %c0_154] : memref<1152x128xbf16, #tpu.memory_space<vmem>>, vector<128x128xbf16>
    %cst_155 = arith.constant dense<0.000000e+00> : vector<288x128xf32>
    %168 = tpu.matmul %166, %167, %cst_155 {dimension_numbers = #tpu.dot_dimension_numbers<[1], [0], [0], [1], [0, 0, 1, 1], [], []>} : vector<288x128xbf16>, vector<128x128xbf16>, vector<288x128xf32> -> vector<288x128xf32>
    %c0_156 = arith.constant 0 : index
    %c0_157 = arith.constant 0 : index
    %169 = vector.load %arg8[%c0_156, %c0_157] : memref<288x128xf32, #tpu.memory_space<vmem>>, vector<288x128xf32>
    %170 = arith.addf %169, %168 : vector<288x128xf32>
    %c0_158 = arith.constant 0 : index
    %c0_159 = arith.constant 0 : index
    %171 = vector.load %arg8[%c0_158, %c0_159] : memref<288x128xf32, #tpu.memory_space<vmem>>, vector<288x128xf32>
    tpu.vector_store %arg8[%c0_158, %c0_159], %170 {strides = array<i32>} : memref<288x128xf32, #tpu.memory_space<vmem>>, vector<288x128xf32>,
    %c37_160 = arith.constant 37 : index
    %c0_161 = arith.constant 0 : index
    %172 = vector.load %arg7[%c37_160, %c0_161] : memref<326x128xbf16, #tpu.memory_space<vmem>>, vector<288x128xbf16>
    %c896 = arith.constant 896 : index
    %c0_162 = arith.constant 0 : index
    %173 = vector.load %arg3[%c896, %c0_162] : memref<1152x128xbf16, #tpu.memory_space<vmem>>, vector<128x128xbf16>
    %cst_163 = arith.constant dense<0.000000e+00> : vector<288x128xf32>
    %174 = tpu.matmul %172, %173, %cst_163 {dimension_numbers = #tpu.dot_dimension_numbers<[1], [0], [0], [1], [0, 0, 1, 1], [], []>} : vector<288x128xbf16>, vector<128x128xbf16>, vector<288x128xf32> -> vector<288x128xf32>
    %c0_164 = arith.constant 0 : index
    %c0_165 = arith.constant 0 : index
    %175 = vector.load %arg8[%c0_164, %c0_165] : memref<288x128xf32, #tpu.memory_space<vmem>>, vector<288x128xf32>
    %176 = arith.addf %175, %174 : vector<288x128xf32>
    %c0_166 = arith.constant 0 : index
    %c0_167 = arith.constant 0 : index
    %177 = vector.load %arg8[%c0_166, %c0_167] : memref<288x128xf32, #tpu.memory_space<vmem>>, vector<288x128xf32>
    tpu.vector_store %arg8[%c0_166, %c0_167], %176 {strides = array<i32>} : memref<288x128xf32, #tpu.memory_space<vmem>>, vector<288x128xf32>,
    %c38 = arith.constant 38 : index
    %c0_168 = arith.constant 0 : index
    %178 = vector.load %arg7[%c38, %c0_168] : memref<326x128xbf16, #tpu.memory_space<vmem>>, vector<288x128xbf16>
    %c1024 = arith.constant 1024 : index
    %c0_169 = arith.constant 0 : index
    %179 = vector.load %arg3[%c1024, %c0_169] : memref<1152x128xbf16, #tpu.memory_space<vmem>>, vector<128x128xbf16>
    %cst_170 = arith.constant dense<0.000000e+00> : vector<288x128xf32>
    %180 = tpu.matmul %178, %179, %cst_170 {dimension_numbers = #tpu.dot_dimension_numbers<[1], [0], [0], [1], [0, 0, 1, 1], [], []>} : vector<288x128xbf16>, vector<128x128xbf16>, vector<288x128xf32> -> vector<288x128xf32>
    %c0_171 = arith.constant 0 : index
    %c0_172 = arith.constant 0 : index
    %181 = vector.load %arg8[%c0_171, %c0_172] : memref<288x128xf32, #tpu.memory_space<vmem>>, vector<288x128xf32>
    %182 = arith.addf %181, %180 : vector<288x128xf32>
    %c0_173 = arith.constant 0 : index
    %c0_174 = arith.constant 0 : index
    %183 = vector.load %arg8[%c0_173, %c0_174] : memref<288x128xf32, #tpu.memory_space<vmem>>, vector<288x128xf32>
    tpu.vector_store %arg8[%c0_173, %c0_174], %182 {strides = array<i32>} : memref<288x128xf32, #tpu.memory_space<vmem>>, vector<288x128xf32>,
    %c0_175 = arith.constant 0 : index
    %c0_176 = arith.constant 0 : index
    %184 = vector.load %arg4[%c0_175, %c0_176] : memref<1x128xf32, #tpu.memory_space<vmem>>, vector<1x128xf32>
    %c0_177 = arith.constant 0 : index
    %c0_178 = arith.constant 0 : index
    %185 = vector.load %arg5[%c0_177, %c0_178] : memref<1x128xf32, #tpu.memory_space<vmem>>, vector<1x128xf32>
    %c0_179 = arith.constant 0 : index
    %c0_180 = arith.constant 0 : index
    %186 = vector.load %arg8[%c0_179, %c0_180] : memref<288x128xf32, #tpu.memory_space<vmem>>, vector<16x128xf32>
    %187 = vector.broadcast %184 : vector<1x128xf32> to vector<16x128xf32>
    %188 = arith.mulf %186, %187 : vector<16x128xf32>
    %189 = vector.broadcast %185 : vector<1x128xf32> to vector<16x128xf32>
    %190 = arith.addf %188, %189 : vector<16x128xf32>
    %cst_181 = arith.constant 0.000000e+00 : f32
    %191 = vector.broadcast %cst_181 : f32 to vector<16x128xf32>
    %192 = arith.maximumf %190, %191 : vector<16x128xf32>
    %c0_182 = arith.constant 0 : index
    %c0_183 = arith.constant 0 : index
    %c0_184 = arith.constant 0 : index
    %193 = vector.load %arg6[%c0_182, %c0_183, %c0_184] : memref<1x256x128xf32, #tpu.memory_space<vmem>>, vector<1x16x128xf32>
    %194 = vector.shape_cast %193 : vector<1x16x128xf32> to vector<16x128xf32>
    %195 = vector.shape_cast %192 : vector<16x128xf32> to vector<1x16x128xf32>
    tpu.vector_store %arg6[%c0_182, %c0_183, %c0_184], %195 {strides = array<i32>} : memref<1x256x128xf32, #tpu.memory_space<vmem>>, vector<1x16x128xf32>,
    %c18_185 = arith.constant 18 : index
    %c0_186 = arith.constant 0 : index
    %196 = vector.load %arg8[%c18_185, %c0_186] : memref<288x128xf32, #tpu.memory_space<vmem>>, vector<16x128xf32>
    %197 = vector.broadcast %184 : vector<1x128xf32> to vector<16x128xf32>
    %198 = arith.mulf %196, %197 : vector<16x128xf32>
    %199 = vector.broadcast %185 : vector<1x128xf32> to vector<16x128xf32>
    %200 = arith.addf %198, %199 : vector<16x128xf32>
    %cst_187 = arith.constant 0.000000e+00 : f32
    %201 = vector.broadcast %cst_187 : f32 to vector<16x128xf32>
    %202 = arith.maximumf %200, %201 : vector<16x128xf32>
    %c0_188 = arith.constant 0 : index
    %c16 = arith.constant 16 : index
    %c0_189 = arith.constant 0 : index
    %203 = vector.load %arg6[%c0_188, %c16, %c0_189] : memref<1x256x128xf32, #tpu.memory_space<vmem>>, vector<1x16x128xf32>
    %204 = vector.shape_cast %203 : vector<1x16x128xf32> to vector<16x128xf32>
    %205 = vector.shape_cast %202 : vector<16x128xf32> to vector<1x16x128xf32>
    tpu.vector_store %arg6[%c0_188, %c16, %c0_189], %205 {strides = array<i32>} : memref<1x256x128xf32, #tpu.memory_space<vmem>>, vector<1x16x128xf32>,
    %c36_190 = arith.constant 36 : index
    %c0_191 = arith.constant 0 : index
    %206 = vector.load %arg8[%c36_190, %c0_191] : memref<288x128xf32, #tpu.memory_space<vmem>>, vector<16x128xf32>
    %207 = vector.broadcast %184 : vector<1x128xf32> to vector<16x128xf32>
    %208 = arith.mulf %206, %207 : vector<16x128xf32>
    %209 = vector.broadcast %185 : vector<1x128xf32> to vector<16x128xf32>
    %210 = arith.addf %208, %209 : vector<16x128xf32>
    %cst_192 = arith.constant 0.000000e+00 : f32
    %211 = vector.broadcast %cst_192 : f32 to vector<16x128xf32>
    %212 = arith.maximumf %210, %211 : vector<16x128xf32>
    %c0_193 = arith.constant 0 : index
    %c32 = arith.constant 32 : index
    %c0_194 = arith.constant 0 : index
    %213 = vector.load %arg6[%c0_193, %c32, %c0_194] : memref<1x256x128xf32, #tpu.memory_space<vmem>>, vector<1x16x128xf32>
    %214 = vector.shape_cast %213 : vector<1x16x128xf32> to vector<16x128xf32>
    %215 = vector.shape_cast %212 : vector<16x128xf32> to vector<1x16x128xf32>
    tpu.vector_store %arg6[%c0_193, %c32, %c0_194], %215 {strides = array<i32>} : memref<1x256x128xf32, #tpu.memory_space<vmem>>, vector<1x16x128xf32>,
    %c54 = arith.constant 54 : index
    %c0_195 = arith.constant 0 : index
    %216 = vector.load %arg8[%c54, %c0_195] : memref<288x128xf32, #tpu.memory_space<vmem>>, vector<16x128xf32>
    %217 = vector.broadcast %184 : vector<1x128xf32> to vector<16x128xf32>
    %218 = arith.mulf %216, %217 : vector<16x128xf32>
    %219 = vector.broadcast %185 : vector<1x128xf32> to vector<16x128xf32>
    %220 = arith.addf %218, %219 : vector<16x128xf32>
    %cst_196 = arith.constant 0.000000e+00 : f32
    %221 = vector.broadcast %cst_196 : f32 to vector<16x128xf32>
    %222 = arith.maximumf %220, %221 : vector<16x128xf32>
    %c0_197 = arith.constant 0 : index
    %c48 = arith.constant 48 : index
    %c0_198 = arith.constant 0 : index
    %223 = vector.load %arg6[%c0_197, %c48, %c0_198] : memref<1x256x128xf32, #tpu.memory_space<vmem>>, vector<1x16x128xf32>
    %224 = vector.shape_cast %223 : vector<1x16x128xf32> to vector<16x128xf32>
    %225 = vector.shape_cast %222 : vector<16x128xf32> to vector<1x16x128xf32>
    tpu.vector_store %arg6[%c0_197, %c48, %c0_198], %225 {strides = array<i32>} : memref<1x256x128xf32, #tpu.memory_space<vmem>>, vector<1x16x128xf32>,
    %c72 = arith.constant 72 : index
    %c0_199 = arith.constant 0 : index
    %226 = vector.load %arg8[%c72, %c0_199] : memref<288x128xf32, #tpu.memory_space<vmem>>, vector<16x128xf32>
    %227 = vector.broadcast %184 : vector<1x128xf32> to vector<16x128xf32>
    %228 = arith.mulf %226, %227 : vector<16x128xf32>
    %229 = vector.broadcast %185 : vector<1x128xf32> to vector<16x128xf32>
    %230 = arith.addf %228, %229 : vector<16x128xf32>
    %cst_200 = arith.constant 0.000000e+00 : f32
    %231 = vector.broadcast %cst_200 : f32 to vector<16x128xf32>
    %232 = arith.maximumf %230, %231 : vector<16x128xf32>
    %c0_201 = arith.constant 0 : index
    %c64 = arith.constant 64 : index
    %c0_202 = arith.constant 0 : index
    %233 = vector.load %arg6[%c0_201, %c64, %c0_202] : memref<1x256x128xf32, #tpu.memory_space<vmem>>, vector<1x16x128xf32>
    %234 = vector.shape_cast %233 : vector<1x16x128xf32> to vector<16x128xf32>
    %235 = vector.shape_cast %232 : vector<16x128xf32> to vector<1x16x128xf32>
    tpu.vector_store %arg6[%c0_201, %c64, %c0_202], %235 {strides = array<i32>} : memref<1x256x128xf32, #tpu.memory_space<vmem>>, vector<1x16x128xf32>,
    %c90 = arith.constant 90 : index
    %c0_203 = arith.constant 0 : index
    %236 = vector.load %arg8[%c90, %c0_203] : memref<288x128xf32, #tpu.memory_space<vmem>>, vector<16x128xf32>
    %237 = vector.broadcast %184 : vector<1x128xf32> to vector<16x128xf32>
    %238 = arith.mulf %236, %237 : vector<16x128xf32>
    %239 = vector.broadcast %185 : vector<1x128xf32> to vector<16x128xf32>
    %240 = arith.addf %238, %239 : vector<16x128xf32>
    %cst_204 = arith.constant 0.000000e+00 : f32
    %241 = vector.broadcast %cst_204 : f32 to vector<16x128xf32>
    %242 = arith.maximumf %240, %241 : vector<16x128xf32>
    %c0_205 = arith.constant 0 : index
    %c80 = arith.constant 80 : index
    %c0_206 = arith.constant 0 : index
    %243 = vector.load %arg6[%c0_205, %c80, %c0_206] : memref<1x256x128xf32, #tpu.memory_space<vmem>>, vector<1x16x128xf32>
    %244 = vector.shape_cast %243 : vector<1x16x128xf32> to vector<16x128xf32>
    %245 = vector.shape_cast %242 : vector<16x128xf32> to vector<1x16x128xf32>
    tpu.vector_store %arg6[%c0_205, %c80, %c0_206], %245 {strides = array<i32>} : memref<1x256x128xf32, #tpu.memory_space<vmem>>, vector<1x16x128xf32>,
    %c108 = arith.constant 108 : index
    %c0_207 = arith.constant 0 : index
    %246 = vector.load %arg8[%c108, %c0_207] : memref<288x128xf32, #tpu.memory_space<vmem>>, vector<16x128xf32>
    %247 = vector.broadcast %184 : vector<1x128xf32> to vector<16x128xf32>
    %248 = arith.mulf %246, %247 : vector<16x128xf32>
    %249 = vector.broadcast %185 : vector<1x128xf32> to vector<16x128xf32>
    %250 = arith.addf %248, %249 : vector<16x128xf32>
    %cst_208 = arith.constant 0.000000e+00 : f32
    %251 = vector.broadcast %cst_208 : f32 to vector<16x128xf32>
    %252 = arith.maximumf %250, %251 : vector<16x128xf32>
    %c0_209 = arith.constant 0 : index
    %c96 = arith.constant 96 : index
    %c0_210 = arith.constant 0 : index
    %253 = vector.load %arg6[%c0_209, %c96, %c0_210] : memref<1x256x128xf32, #tpu.memory_space<vmem>>, vector<1x16x128xf32>
    %254 = vector.shape_cast %253 : vector<1x16x128xf32> to vector<16x128xf32>
    %255 = vector.shape_cast %252 : vector<16x128xf32> to vector<1x16x128xf32>
    tpu.vector_store %arg6[%c0_209, %c96, %c0_210], %255 {strides = array<i32>} : memref<1x256x128xf32, #tpu.memory_space<vmem>>, vector<1x16x128xf32>,
    %c126 = arith.constant 126 : index
    %c0_211 = arith.constant 0 : index
    %256 = vector.load %arg8[%c126, %c0_211] : memref<288x128xf32, #tpu.memory_space<vmem>>, vector<16x128xf32>
    %257 = vector.broadcast %184 : vector<1x128xf32> to vector<16x128xf32>
    %258 = arith.mulf %256, %257 : vector<16x128xf32>
    %259 = vector.broadcast %185 : vector<1x128xf32> to vector<16x128xf32>
    %260 = arith.addf %258, %259 : vector<16x128xf32>
    %cst_212 = arith.constant 0.000000e+00 : f32
    %261 = vector.broadcast %cst_212 : f32 to vector<16x128xf32>
    %262 = arith.maximumf %260, %261 : vector<16x128xf32>
    %c0_213 = arith.constant 0 : index
    %c112 = arith.constant 112 : index
    %c0_214 = arith.constant 0 : index
    %263 = vector.load %arg6[%c0_213, %c112, %c0_214] : memref<1x256x128xf32, #tpu.memory_space<vmem>>, vector<1x16x128xf32>
    %264 = vector.shape_cast %263 : vector<1x16x128xf32> to vector<16x128xf32>
    %265 = vector.shape_cast %262 : vector<16x128xf32> to vector<1x16x128xf32>
    tpu.vector_store %arg6[%c0_213, %c112, %c0_214], %265 {strides = array<i32>} : memref<1x256x128xf32, #tpu.memory_space<vmem>>, vector<1x16x128xf32>,
    %c144 = arith.constant 144 : index
    %c0_215 = arith.constant 0 : index
    %266 = vector.load %arg8[%c144, %c0_215] : memref<288x128xf32, #tpu.memory_space<vmem>>, vector<16x128xf32>
    %267 = vector.broadcast %184 : vector<1x128xf32> to vector<16x128xf32>
    %268 = arith.mulf %266, %267 : vector<16x128xf32>
    %269 = vector.broadcast %185 : vector<1x128xf32> to vector<16x128xf32>
    %270 = arith.addf %268, %269 : vector<16x128xf32>
    %cst_216 = arith.constant 0.000000e+00 : f32
    %271 = vector.broadcast %cst_216 : f32 to vector<16x128xf32>
    %272 = arith.maximumf %270, %271 : vector<16x128xf32>
    %c0_217 = arith.constant 0 : index
    %c128_218 = arith.constant 128 : index
    %c0_219 = arith.constant 0 : index
    %273 = vector.load %arg6[%c0_217, %c128_218, %c0_219] : memref<1x256x128xf32, #tpu.memory_space<vmem>>, vector<1x16x128xf32>
    %274 = vector.shape_cast %273 : vector<1x16x128xf32> to vector<16x128xf32>
    %275 = vector.shape_cast %272 : vector<16x128xf32> to vector<1x16x128xf32>
    tpu.vector_store %arg6[%c0_217, %c128_218, %c0_219], %275 {strides = array<i32>} : memref<1x256x128xf32, #tpu.memory_space<vmem>>, vector<1x16x128xf32>,
    %c162 = arith.constant 162 : index
    %c0_220 = arith.constant 0 : index
    %276 = vector.load %arg8[%c162, %c0_220] : memref<288x128xf32, #tpu.memory_space<vmem>>, vector<16x128xf32>
    %277 = vector.broadcast %184 : vector<1x128xf32> to vector<16x128xf32>
    %278 = arith.mulf %276, %277 : vector<16x128xf32>
    %279 = vector.broadcast %185 : vector<1x128xf32> to vector<16x128xf32>
    %280 = arith.addf %278, %279 : vector<16x128xf32>
    %cst_221 = arith.constant 0.000000e+00 : f32
    %281 = vector.broadcast %cst_221 : f32 to vector<16x128xf32>
    %282 = arith.maximumf %280, %281 : vector<16x128xf32>
    %c0_222 = arith.constant 0 : index
    %c144_223 = arith.constant 144 : index
    %c0_224 = arith.constant 0 : index
    %283 = vector.load %arg6[%c0_222, %c144_223, %c0_224] : memref<1x256x128xf32, #tpu.memory_space<vmem>>, vector<1x16x128xf32>
    %284 = vector.shape_cast %283 : vector<1x16x128xf32> to vector<16x128xf32>
    %285 = vector.shape_cast %282 : vector<16x128xf32> to vector<1x16x128xf32>
    tpu.vector_store %arg6[%c0_222, %c144_223, %c0_224], %285 {strides = array<i32>} : memref<1x256x128xf32, #tpu.memory_space<vmem>>, vector<1x16x128xf32>,
    %c180 = arith.constant 180 : index
    %c0_225 = arith.constant 0 : index
    %286 = vector.load %arg8[%c180, %c0_225] : memref<288x128xf32, #tpu.memory_space<vmem>>, vector<16x128xf32>
    %287 = vector.broadcast %184 : vector<1x128xf32> to vector<16x128xf32>
    %288 = arith.mulf %286, %287 : vector<16x128xf32>
    %289 = vector.broadcast %185 : vector<1x128xf32> to vector<16x128xf32>
    %290 = arith.addf %288, %289 : vector<16x128xf32>
    %cst_226 = arith.constant 0.000000e+00 : f32
    %291 = vector.broadcast %cst_226 : f32 to vector<16x128xf32>
    %292 = arith.maximumf %290, %291 : vector<16x128xf32>
    %c0_227 = arith.constant 0 : index
    %c160 = arith.constant 160 : index
    %c0_228 = arith.constant 0 : index
    %293 = vector.load %arg6[%c0_227, %c160, %c0_228] : memref<1x256x128xf32, #tpu.memory_space<vmem>>, vector<1x16x128xf32>
    %294 = vector.shape_cast %293 : vector<1x16x128xf32> to vector<16x128xf32>
    %295 = vector.shape_cast %292 : vector<16x128xf32> to vector<1x16x128xf32>
    tpu.vector_store %arg6[%c0_227, %c160, %c0_228], %295 {strides = array<i32>} : memref<1x256x128xf32, #tpu.memory_space<vmem>>, vector<1x16x128xf32>,
    %c198 = arith.constant 198 : index
    %c0_229 = arith.constant 0 : index
    %296 = vector.load %arg8[%c198, %c0_229] : memref<288x128xf32, #tpu.memory_space<vmem>>, vector<16x128xf32>
    %297 = vector.broadcast %184 : vector<1x128xf32> to vector<16x128xf32>
    %298 = arith.mulf %296, %297 : vector<16x128xf32>
    %299 = vector.broadcast %185 : vector<1x128xf32> to vector<16x128xf32>
    %300 = arith.addf %298, %299 : vector<16x128xf32>
    %cst_230 = arith.constant 0.000000e+00 : f32
    %301 = vector.broadcast %cst_230 : f32 to vector<16x128xf32>
    %302 = arith.maximumf %300, %301 : vector<16x128xf32>
    %c0_231 = arith.constant 0 : index
    %c176 = arith.constant 176 : index
    %c0_232 = arith.constant 0 : index
    %303 = vector.load %arg6[%c0_231, %c176, %c0_232] : memref<1x256x128xf32, #tpu.memory_space<vmem>>, vector<1x16x128xf32>
    %304 = vector.shape_cast %303 : vector<1x16x128xf32> to vector<16x128xf32>
    %305 = vector.shape_cast %302 : vector<16x128xf32> to vector<1x16x128xf32>
    tpu.vector_store %arg6[%c0_231, %c176, %c0_232], %305 {strides = array<i32>} : memref<1x256x128xf32, #tpu.memory_space<vmem>>, vector<1x16x128xf32>,
    %c216 = arith.constant 216 : index
    %c0_233 = arith.constant 0 : index
    %306 = vector.load %arg8[%c216, %c0_233] : memref<288x128xf32, #tpu.memory_space<vmem>>, vector<16x128xf32>
    %307 = vector.broadcast %184 : vector<1x128xf32> to vector<16x128xf32>
    %308 = arith.mulf %306, %307 : vector<16x128xf32>
    %309 = vector.broadcast %185 : vector<1x128xf32> to vector<16x128xf32>
    %310 = arith.addf %308, %309 : vector<16x128xf32>
    %cst_234 = arith.constant 0.000000e+00 : f32
    %311 = vector.broadcast %cst_234 : f32 to vector<16x128xf32>
    %312 = arith.maximumf %310, %311 : vector<16x128xf32>
    %c0_235 = arith.constant 0 : index
    %c192 = arith.constant 192 : index
    %c0_236 = arith.constant 0 : index
    %313 = vector.load %arg6[%c0_235, %c192, %c0_236] : memref<1x256x128xf32, #tpu.memory_space<vmem>>, vector<1x16x128xf32>
    %314 = vector.shape_cast %313 : vector<1x16x128xf32> to vector<16x128xf32>
    %315 = vector.shape_cast %312 : vector<16x128xf32> to vector<1x16x128xf32>
    tpu.vector_store %arg6[%c0_235, %c192, %c0_236], %315 {strides = array<i32>} : memref<1x256x128xf32, #tpu.memory_space<vmem>>, vector<1x16x128xf32>,
    %c234 = arith.constant 234 : index
    %c0_237 = arith.constant 0 : index
    %316 = vector.load %arg8[%c234, %c0_237] : memref<288x128xf32, #tpu.memory_space<vmem>>, vector<16x128xf32>
    %317 = vector.broadcast %184 : vector<1x128xf32> to vector<16x128xf32>
    %318 = arith.mulf %316, %317 : vector<16x128xf32>
    %319 = vector.broadcast %185 : vector<1x128xf32> to vector<16x128xf32>
    %320 = arith.addf %318, %319 : vector<16x128xf32>
    %cst_238 = arith.constant 0.000000e+00 : f32
    %321 = vector.broadcast %cst_238 : f32 to vector<16x128xf32>
    %322 = arith.maximumf %320, %321 : vector<16x128xf32>
    %c0_239 = arith.constant 0 : index
    %c208 = arith.constant 208 : index
    %c0_240 = arith.constant 0 : index
    %323 = vector.load %arg6[%c0_239, %c208, %c0_240] : memref<1x256x128xf32, #tpu.memory_space<vmem>>, vector<1x16x128xf32>
    %324 = vector.shape_cast %323 : vector<1x16x128xf32> to vector<16x128xf32>
    %325 = vector.shape_cast %322 : vector<16x128xf32> to vector<1x16x128xf32>
    tpu.vector_store %arg6[%c0_239, %c208, %c0_240], %325 {strides = array<i32>} : memref<1x256x128xf32, #tpu.memory_space<vmem>>, vector<1x16x128xf32>,
    %c252 = arith.constant 252 : index
    %c0_241 = arith.constant 0 : index
    %326 = vector.load %arg8[%c252, %c0_241] : memref<288x128xf32, #tpu.memory_space<vmem>>, vector<16x128xf32>
    %327 = vector.broadcast %184 : vector<1x128xf32> to vector<16x128xf32>
    %328 = arith.mulf %326, %327 : vector<16x128xf32>
    %329 = vector.broadcast %185 : vector<1x128xf32> to vector<16x128xf32>
    %330 = arith.addf %328, %329 : vector<16x128xf32>
    %cst_242 = arith.constant 0.000000e+00 : f32
    %331 = vector.broadcast %cst_242 : f32 to vector<16x128xf32>
    %332 = arith.maximumf %330, %331 : vector<16x128xf32>
    %c0_243 = arith.constant 0 : index
    %c224 = arith.constant 224 : index
    %c0_244 = arith.constant 0 : index
    %333 = vector.load %arg6[%c0_243, %c224, %c0_244] : memref<1x256x128xf32, #tpu.memory_space<vmem>>, vector<1x16x128xf32>
    %334 = vector.shape_cast %333 : vector<1x16x128xf32> to vector<16x128xf32>
    %335 = vector.shape_cast %332 : vector<16x128xf32> to vector<1x16x128xf32>
    tpu.vector_store %arg6[%c0_243, %c224, %c0_244], %335 {strides = array<i32>} : memref<1x256x128xf32, #tpu.memory_space<vmem>>, vector<1x16x128xf32>,
    %c270 = arith.constant 270 : index
    %c0_245 = arith.constant 0 : index
    %336 = vector.load %arg8[%c270, %c0_245] : memref<288x128xf32, #tpu.memory_space<vmem>>, vector<16x128xf32>
    %337 = vector.broadcast %184 : vector<1x128xf32> to vector<16x128xf32>
    %338 = arith.mulf %336, %337 : vector<16x128xf32>
    %339 = vector.broadcast %185 : vector<1x128xf32> to vector<16x128xf32>
    %340 = arith.addf %338, %339 : vector<16x128xf32>
    %cst_246 = arith.constant 0.000000e+00 : f32
    %341 = vector.broadcast %cst_246 : f32 to vector<16x128xf32>
    %342 = arith.maximumf %340, %341 : vector<16x128xf32>
    %c0_247 = arith.constant 0 : index
    %c240 = arith.constant 240 : index
    %c0_248 = arith.constant 0 : index
    %343 = vector.load %arg6[%c0_247, %c240, %c0_248] : memref<1x256x128xf32, #tpu.memory_space<vmem>>, vector<1x16x128xf32>
    %344 = vector.shape_cast %343 : vector<1x16x128xf32> to vector<16x128xf32>
    %345 = vector.shape_cast %342 : vector<16x128xf32> to vector<1x16x128xf32>
    tpu.vector_store %arg6[%c0_247, %c240, %c0_248], %345 {strides = array<i32>} : memref<1x256x128xf32, #tpu.memory_space<vmem>>, vector<1x16x128xf32>,
    return
  }
  func.func @transform_0(%arg0: i32, %arg1: i32) -> (i32, i32, i32, i32) {
    %c0_i32 = arith.constant 0 : i32
    %c0_i32_0 = arith.constant 0 : i32
    %c0_i32_1 = arith.constant 0 : i32
    %c0_i32_2 = arith.constant 0 : i32
    return %arg0, %c0_i32, %c0_i32_0, %c0_i32_1 : i32, i32, i32, i32
  }
  func.func @transform_1(%arg0: i32, %arg1: i32) -> (i32, i32) {
    %c0_i32 = arith.constant 0 : i32
    %c0_i32_0 = arith.constant 0 : i32
    %c0_i32_1 = arith.constant 0 : i32
    return %c0_i32, %c0_i32_0 : i32, i32
  }
  func.func @transform_2(%arg0: i32, %arg1: i32) -> (i32, i32) {
    %c0_i32 = arith.constant 0 : i32
    %c0_i32_0 = arith.constant 0 : i32
    %c0_i32_1 = arith.constant 0 : i32
    return %c0_i32, %c0_i32_0 : i32, i32
  }
  func.func @transform_3(%arg0: i32, %arg1: i32) -> (i32, i32) {
    %c0_i32 = arith.constant 0 : i32
    %c0_i32_0 = arith.constant 0 : i32
    %c0_i32_1 = arith.constant 0 : i32
    return %c0_i32, %c0_i32_0 : i32, i32
  }
  func.func @transform_4(%arg0: i32, %arg1: i32) -> (i32, i32, i32) {
    %c0_i32 = arith.constant 0 : i32
    %c0_i32_0 = arith.constant 0 : i32
    return %arg0, %arg1, %c0_i32 : i32, i32, i32
  }
}

</mosaic_0001>

<bundles_post_ra>
// kernel: _lambda_.2
= control target key start
LH: loop header
LB: loop body
LE: loop exit
PB: predicated region body
PF: predicated region fallthrough
CT: control target
= control target key end

     0   :  { %s5256_s15 = smov 0   ;;  %s5258_s16 = smov 0   ;;  %s6078_s0 = inlined_call_operand.vmem [shape: bf16[2,16,16,64], index: 0, kind: input, shape index: {}]   ;;  %s6079_s1 = inlined_call_operand.vmem [shape: bf16[576,128], index: 1, kind: input, shape index: {}]   ;;  %s6080_s2 = inlined_call_operand.vmem [shape: f32[1,128], index: 2, kind: input, shape index: {}]   ;;  %s6081_s3 = inlined_call_operand.vmem [shape: f32[1,128], index: 3, kind: input, shape index: {}]   ;;  %s6082_s4 = inlined_call_operand.vmem [shape: bf16[2,256,128], index: 4, kind: output, shape index: {}]  }
   0x1   :  { %s5260_s17 = smov 0   ;;  %s5262_s18 = smov 0  }
   0x2   :  { %s5264_s19 = smov 0  }
   0x3 LB: > { %s23_s20 = sadd.s32 1, %s5217_s17  ;;  %s26_s21 = sadd.s32 1, %s5221_s18  ;;  %s5225_s19 = sphi %s5264_s19, %s14_s19   ;;  %s5221_s18 = sphi %s5262_s18, %s6122_s18   ;;  %s5217_s17 = sphi %s5260_s17, %s6121_s17   ;;  %s5213_s16 = sphi %s5258_s16, %s6120_s16   ;;  %s5209_s15 = sphi %s5256_s15, %s6119_s15  }
   0x4   : > { %p24_p0 = scmp.ge.s32.totalorder %s23_s20, 2  ;;  %p3838_p1 = scmp.ge.s32.totalorder %s5225_s19, 1 }
   0x5   : > { %p176_p2 = scmp.lt.s32.totalorder %s5225_s19, 5 }
   0x6   : > { %s6124_s20 = smov (%p24_p0, %s23_s20), 0  ;;  %s6126_s21 = smov (!%p24_p0, %s26_s21), %s5221_s18 }
   0x7   : > { %p177_p3 = pnand %p3838_p1, %p176_p2  ;;  %p28_p4 = scmp.ge.s32.totalorder %s6126_s21, 2 }
   0x8   : > { %vm229_vm0 = vcmask (!%p177_p3), 517120   ;;  %vm230_vm1 = vsmask.f32 (!%p177_p3), 1282  ;;  %v232_v0 = vld [vmem:[#allocation2 + $0x8] sm:$0x3] (!%p177_p3)  ;;  %vm235_vm2 = vcmask (!%p177_p3), 518145  }
   0x9   : > { %s6128_s21 = smov (%p28_p4, %s6126_s21), 0  ;;  %180 = sbr.rel (%p177_p3) target bundleno = 672 (0x2a0), region = 36 }
   0xa   : > { %vm5291_vm3 = vmand (!%p177_p3), %vm229_vm0, %vm230_vm1  ;;  %vm236_vm4 = vsmask.f32 (!%p177_p3), 2310  ;;  %v238_v2 = vld [vmem:[#allocation2 + $0x10] sm:$0x6] (!%p177_p3)  ;;  %vm241_vm5 = vcmask (!%p177_p3), 519170   ;;  %vm247_vm8 = vcmask (!%p177_p3), 519171  }
   0xb   : > { %v233_v3 = vsel (!%p177_p3), %vm5291_vm3, 0, %v232_v0  ;;  %vm5298_vm6 = vmand (!%p177_p3), %vm235_vm2, %vm236_vm4  ;;  %vm242_vm7 = vsmask.f32 (!%p177_p3), 3338  ;;  %v244_v5 = vld [vmem:[#allocation2 + $0x18] sm:$0xc] (!%p177_p3)  ;;  %vm223_vm11 = vcmask (!%p177_p3), 516096  }
   0xc   : > { %234 = vst [vmem:[#allocation2 + $0x8] sm:$0x3] (!%p177_p3), %v233_v3  ;;  %v239_v6 = vsel (!%p177_p3), %vm5298_vm6, 0, %v238_v2  ;;  %vm5305_vm9 = vmand (!%p177_p3), %vm241_vm5, %vm242_vm7  ;;  %vm248_vm10 = vsmask.f32 (!%p177_p3), 7950  ;;  %s3844_s22 = sshll.u32 (!%p177_p3), %s5209_s15, 3 }
   0xd   : > { %240 = vst [vmem:[#allocation2 + $0x10] sm:$0x6] (!%p177_p3), %v239_v6  ;;  %v245_v8 = vsel (!%p177_p3), %vm5305_vm9, 0, %v244_v5  ;;  %v250_v9 = vld [vmem:[#allocation2 + $0x20] sm:$0x8] (!%p177_p3)  ;;  %vm5312_vm13 = vmand (!%p177_p3), %vm247_vm8, %vm248_vm10  ;;  %p206_p5 = scmp.lt.s32.totalorder (!%p177_p3), %s5213_s16, 1 }
   0xe   : > { %vm6083_vm12 = vsmask.f32 (!%p177_p3), 256  ;;  %246 = vst [vmem:[#allocation2 + $0x18] sm:$0xc] (!%p177_p3), %v245_v8  ;;  %v253_v11 = vld [vmem:[#allocation2 + $0x24] sm:$0x1] (!%p177_p3) }
   0xf   : > { %v256_v12 = vld [vmem:[#allocation2 + $0x2c] sm:$0x3] (!%p177_p3)  ;;  %vm274_vm14 = vsmask.f32 (!%p177_p3), 7942  ;;  %v251_v13 = vsel (!%p177_p3), %vm5312_vm13, 0, %v250_v9  ;;  %vm5319_vm15 = vmand (!%p177_p3), %vm223_vm11, %vm6083_vm12  ;;  %s3841_s23 = sshll.u32 (!%p177_p3), %s5209_s15, 4 }
  0x10   : > { %v257_v15 = vsel %vm5291_vm3, 0, %v256_v12  ;;  %v259_v16 = vld [vmem:[#allocation2 + $0x34] sm:$0x6]  ;;  %v262_v17 = vld [vmem:[#allocation2 + $0x3c] sm:$0xc]  ;;  %v254_v18 = vsel %vm5319_vm15, 0, %v253_v11  ;;  %vm5333_vm1 = vmand %vm235_vm2, %vm274_vm14 }
  0x11   : > { %252 = vst [vmem:[#allocation2 + $0x20] sm:$0x8] %v251_v13  ;;  %258 = vst [vmem:[#allocation2 + $0x2c] sm:$0x3] %v257_v15  ;;  %v260_v19 = vsel %vm5298_vm6, 0, %v259_v16  ;;  %v263_v20 = vsel %vm5305_vm9, 0, %v262_v17 }
  0x12   : > { %v265_v21 = vld [vmem:[#allocation2 + $0x44] sm:$0x8]  ;;  %255 = vst [vmem:[#allocation2 + $0x24] sm:$0x1] %v254_v18  ;;  %261 = vst [vmem:[#allocation2 + $0x34] sm:$0x6] %v260_v19 }
  0x13   : > { %264 = vst [vmem:[#allocation2 + $0x3c] sm:$0xc] %v263_v20  ;;  %v266_v23 = vsel %vm5312_vm13, 0, %v265_v21  ;;  %v268_v24 = vld [vmem:[#allocation2 + $0x48] sm:$0x1]  ;;  %s6130_s16 = smov (!%p206_p5, %s5213_s16), 1 }
  0x14   : > { %v271_v25 = vld [vmem:[#allocation2 + $0x50] sm:$0x3]  ;;  %267 = vst [vmem:[#allocation2 + $0x44] sm:$0x8] %v266_v23  ;;  %v269_v26 = vsel %vm5319_vm15, 0, %v268_v24  ;;  %p214_p6 = scmp.lt.s32.totalorder %s3841_s23, 31 }
  0x15   : > { %v272_v27 = vsel %vm5291_vm3, 0, %v271_v25  ;;  %v226_v28 = vld [vmem:[#allocation2] sm:$0x1]  ;;  %v276_v29 = vld [vmem:[#allocation2 + $0x58] sm:$0x6]  ;;  %s4112_s24 = sshll.u32 %s6130_s16, 7 }
  0x16   : > { %270 = vst [vmem:[#allocation2 + $0x48] sm:$0x1] %v269_v26  ;;  %273 = vst [vmem:[#allocation2 + $0x50] sm:$0x3] %v272_v27  ;;  %v227_v30 = vsel %vm5319_vm15, 0, %v226_v28  ;;  %v277_v31 = vsel %vm5333_vm1, 0, %v276_v29  ;;  %s5356_s28 = scalar_lea.vmem %s6078_s0, %s4112_s24 }
  0x17   : > { %228 = vst [vmem:[#allocation2] sm:$0x1] %v227_v30  ;;  %278 = vst [vmem:[#allocation2 + $0x58] sm:$0x6] %v277_v31  ;;  %s4114_s25 = sshll.u32 %s5209_s15, 6  ;;  %s3842_s29 = sshll.u32 %s6130_s16, 5 }
  0x18   : > { %vm351_vm2 = vsmask.f32 7946  ;;  %s6132_s23 = smov (!%p214_p6, %s3841_s23), 31  ;;  %vm284_vm3 = vsmask.f32 1280  ;;  %vm309_vm6 = vcmask 519169   ;;  %s5359_s30 = scalar_lea.vmem %s5356_s28, %s4114_s25 }
  0x19   : > { %vm285_vm4 = vsmask.f32 5392  ;;  %vm326_vm7 = vsmask.f32 2304  ;;  %vm327_vm8 = vsmask.f32 6416  ;;  %s217_s5 = sadd.s32 %s3842_s29, %s6132_s23  ;;  %vm5373_vm12 = vmand %vm241_vm5, %vm351_vm2 }
  0x1a   : > { %vm357_vm9 = vcmask 518144   ;;  %v282_v32 = vld [vmem:[%s5359_s30] sm:$0xf]  ;;  %v283_v33 = vld [vmem:[%s5359_s30 + $0x4] sm:$0xf]  ;;  %s3843_s6 = sshll.u32 %s217_s5, 2  ;;  %vm5380_vm10 = vmand %vm309_vm6, %vm274_vm14 }
  0x1b   : > { %v3849_v34 = vld [vmem:[%s5359_s30 + $0x8] sm:$0xf]  ;;  %vm369_vm11 = vsmask.f32 7440  ;;  %v288_v35 = vshrl.u32 %v282_v32, 16  ;;  %v291_v36 = vshll.u32 %v282_v32, 16  ;;  %s5367_s9 = scalar_lea.vmem %s6082_s4, %s3843_s6  ;;  %vm5386_vm5 = vmor %vm284_vm3, %vm285_vm4 }
  0x1c   : > { %v297_v37 = vshrl.u32 %v283_v33, 16  ;;  %v300_v38 = vshll.u32 %v283_v33, 16  ;;  %vm314_vm1 = vcmask 519168   ;;  %v330_v39 = vshrl.u32 %v3849_v34, 16  ;;  %v3850_v41 = vld [vmem:[%s5359_s30 + $0xc] sm:$0xf]  ;;  %vm5392_vm14 = vmand %vm229_vm0, %vm284_vm3 }
  0x1d   : > { %v333_v40 = vshll.u32 %v3849_v34, 16  ;;  %v3853_v42 = vld [vmem:[%s5359_s30 + $0x10] sm:$0xf]  ;;  %v290_v44 = vrot.slane %v288_v35, 6  ;;  %v293_v45 = vrot.slane %v291_v36, 7  ;;  %v339_v53 = vshrl.u32 %v3850_v41, 16  ;;  %vm5400_vm2 = vmor %vm326_vm7, %vm327_vm8 }
  0x1e   : > { %v299_v46 = vrot.slane %v297_v37, 6  ;;  %v302_v47 = vrot.slane %v300_v38, 7  ;;  %v3854_v48 = vld [vmem:[%s5359_s30 + $0x14] sm:$0xf]  ;;  %v311_v50 = vld [vmem:[#allocation2 + $0x8] sm:$0xe]  ;;  %vm5413_vm0 = vmand %vm357_vm9, %vm326_vm7 }
  0x1f   : > { %v332_v51 = vrot.slane %v330_v39, 5  ;;  %v335_v52 = vrot.slane %v333_v40, 6  ;;  %v342_v54 = vshll.u32 %v3850_v41, 16  ;;  %v294_v55 = vor.u32 %v293_v45, %v290_v44  ;;  %v317_v58 = vld [vmem:[#allocation2 + $0x10] sm:$0x3]  ;;  %p3875_p7 = scmp.le.s32.totalorder %s5209_s15, 0 }
  0x20   : > { %v303_v57 = vor.u32 %v302_v47, %v299_v46  ;;  %v353_v59 = vld [vmem:[#allocation2 + $0x10] sm:$0xc]  ;;  %v372_v60 = vshll.u32 %v3853_v42, 16  ;;  %v375_v61 = vshrl.u32 %v3853_v42, 16  ;;  %v341_v0 = vrot.slane %v339_v53, 5  ;;  %s3876_s10 = sadd.s32 (!%p3875_p7), 4294967295, %s3844_s22 }
  0x21   : > { %v336_v63 = vor.u32 %v335_v52, %v332_v51  ;;  %v344_v1 = vrot.slane %v342_v54, 6  ;;  %v393_v2 = vld [vmem:[#allocation2 + $0x18] sm:$0x8]  ;;  %v381_v3 = vshll.u32 %v3854_v48, 16  ;;  %v312_v4 = vsel %vm5380_vm10, %v294_v55, %v311_v50  ;;  %v359_v19 = vld [vmem:[#allocation2 + $0x18] sm:$0x7] }
  0x22   : > { %v295_v5 = vrot.slane %v294_v55, 4  ;;  %v305_v6 = vrot.slane %v303_v57, 4  ;;  %v374_v8 = vrot.slane %v372_v60, 5  ;;  %313 = vst [vmem:[#allocation2 + $0x8] sm:$0xe] %v312_v4  ;;  %v377_v13 = vrot.slane %v375_v61, 4 }
  0x23   : > { %v354_v9 = vsel %vm5373_vm12, %v336_v63, %v353_v59  ;;  %v337_v11 = vrot.slane %v336_v63, 4  ;;  %v345_v12 = vor.u32 %v344_v1, %v341_v0  ;;  %v3857_v15 = vld [vmem:[%s5359_s30 + $0x18] sm:$0xf]  ;;  %v383_v21 = vrot.slane %v381_v3, 5  ;;  %v3858_v22 = vld [vmem:[%s5359_s30 + $0x1c] sm:$0xf] }
  0x24   : > { %v304_v16 = vsel %vm5386_vm5, %v295_v5, %v303_v57  ;;  %v318_v17 = vsel %vm5392_vm14, %v305_v6, %v317_v58  ;;  %355 = vst [vmem:[#allocation2 + $0x10] sm:$0xc] %v354_v9  ;;  %v394_v20 = vsel %vm5312_vm13, %v374_v8, %v393_v2  ;;  %v378_v25 = vor.u32 %v377_v13, %v374_v8  ;;  %v3861_v27 = vld [vmem:[%s5359_s30 + $0x20] sm:$0xf]  ;;  %v3862_v28 = vld [vmem:[%s5359_s30 + $0x24] sm:$0xf] }
  0x25   : > { %315 = vst.msk [vmem:[#allocation2 + $0xc] sm:$0xf] %vm314_vm1, %v304_v16  ;;  %319 = vst [vmem:[#allocation2 + $0x10] sm:$0x3] %v318_v17  ;;  %v346_v23 = vsel %vm5400_vm2, %v337_v11, %v345_v12  ;;  %v347_v24 = vrot.slane %v345_v12, 4  ;;  %v385_v26 = vshrl.u32 %v3854_v48, 16 }
  0x26   : > { %395 = vst [vmem:[#allocation2 + $0x18] sm:$0x8] %v394_v20  ;;  %356 = vst.msk [vmem:[#allocation2 + $0x14] sm:$0xf] %vm314_vm1, %v346_v23  ;;  %vm6108_vm3 = vsmask.f32 3328 }
  0x27   : > { %vm5428_vm4 = vmor %vm6108_vm3, %vm369_vm11  ;;  %v411_v30 = vshrl.u32 %v3857_v15, 16  ;;  %v414_v31 = vshll.u32 %v3857_v15, 16  ;;  %vm430_vm6 = vsmask.f32 7938  ;;  %vm408_vm7 = vsmask.f32 4368 }
  0x28   : > { %v360_v32 = vsel %vm5413_vm0, %v347_v24, %v359_v19  ;;  %v379_v33 = vrot.slane %v378_v25, 4  ;;  %v387_v34 = vrot.slane %v385_v26, 4  ;;  %v419_v35 = vshrl.u32 %v3858_v22, 16  ;;  %vm6111_vm8 = vmmov %vm6108_vm3  ;;  %v399_v37 = vld [vmem:[#allocation2 + $0x20] sm:$0xf]  ;;  %s4122_s11 = sshll.u32 (!%p3875_p7), %s3876_s10, 3 }
  0x29   : > { %361 = vst [vmem:[#allocation2 + $0x18] sm:$0x7] %v360_v32  ;;  %vm5436_vm9 = vmand %vm314_vm1, %vm6111_vm8  ;;  %v413_v38 = vrot.slane %v411_v30, 7  ;;  %v422_v39 = vshll.u32 %v3858_v22, 16  ;;  %v446_v40 = vshrl.u32 %v3861_v27, 16  ;;  %v449_v41 = vshll.u32 %v3861_v27, 16  ;;  %s584_s12 = scalar_lea.vmem (!%p3875_p7), %s5356_s28, %s4122_s11 }
  0x2a   : > { %v384_v42 = vsel %vm5428_vm4, %v379_v33, %v383_v21  ;;  %v388_v44 = vor.u32 %v387_v34, %v383_v21  ;;  %vm5444_vm11 = vmand %vm314_vm1, %vm430_vm6  ;;  %v432_v46 = vld [vmem:[#allocation2 + $0x24] sm:$0xf]  ;;  %v421_v47 = vrot.slane %v419_v35, 7  ;;  %v455_v48 = vshrl.u32 %v3862_v28, 16  ;;  %v3865_v50 = vld [vmem:[%s5359_s30 + $0x28] sm:$0xf] }
  0x2b   : > { %396 = vst.msk [vmem:[#allocation2 + $0x1c] sm:$0xf] %vm314_vm1, %v384_v42  ;;  %v416_v51 = vor.u32 %v414_v31, %v413_v38  ;;  %vm6116_vm3 = vsmask.f32 256  ;;  %v417_v53 = vrot.slane %v413_v38, 4  ;;  %v448_v55 = vrot.slane %v446_v40, 6 }
  0x2c   : > { %vm5452_vm8 = vmor %vm6116_vm3, %vm408_vm7  ;;  %v436_v54 = vld [vmem:[#allocation2 + $0x2c] sm:$0x1]  ;;  %v451_v57 = vrot.slane %v449_v41, 7  ;;  %v389_v58 = vrot.slane %v388_v44, 4  ;;  %v424_v59 = vor.u32 %v422_v39, %v421_v47  ;;  %v426_v60 = vrot.slane %v421_v47, 4 }
  0x2d   : > { %v467_v61 = vld [vmem:[#allocation2 + $0x2c] sm:$0xe]  ;;  %v457_v63 = vrot.slane %v455_v48, 6  ;;  %v433_v0 = vsel %vm5444_vm11, %v416_v51, %v432_v46  ;;  %v458_v2 = vshll.u32 %v3862_v28, 16  ;;  %v481_v3 = vshrl.u32 %v3865_v50, 16 }
  0x2e   : > { %v452_v1 = vor.u32 %v451_v57, %v448_v55  ;;  %v3866_v4 = vld [vmem:[%s5359_s30 + $0x2c] sm:$0xf]  ;;  %v3869_v5 = vld [vmem:[%s5359_s30 + $0x30] sm:$0xf]  ;;  %v400_v6 = vsel %vm5436_vm9, %v389_v58, %v399_v37  ;;  %434 = vst [vmem:[#allocation2 + $0x24] sm:$0xf] %v433_v0  ;;  %v425_v8 = vsel %vm5452_vm8, %v417_v53, %v424_v59  ;;  %v437_v9 = vsel %vm5319_vm15, %v426_v60, %v436_v54 }
  0x2f   : > { %v484_v11 = vshll.u32 %v3865_v50, 16  ;;  %v3870_v12 = vld [vmem:[%s5359_s30 + $0x34] sm:$0xf]  ;;  %401 = vst [vmem:[#allocation2 + $0x20] sm:$0xf] %v400_v6  ;;  %v460_v16 = vrot.slane %v458_v2, 7 }
  0x30   : > { %435 = vst.msk [vmem:[#allocation2 + $0x28] sm:$0xf] %vm314_vm1, %v425_v8  ;;  %438 = vst [vmem:[#allocation2 + $0x2c] sm:$0x1] %v437_v9  ;;  %v468_v13 = vsel %vm5380_vm10, %v452_v1, %v467_v61  ;;  %v453_v15 = vrot.slane %v452_v1, 4  ;;  %v483_v17 = vrot.slane %v481_v3, 5 }
  0x31   : > { %469 = vst [vmem:[#allocation2 + $0x2c] sm:$0xe] %v468_v13  ;;  %v471_v19 = vld [vmem:[#allocation2 + $0x34] sm:$0x3]  ;;  %v486_v20 = vrot.slane %v484_v11, 6  ;;  %v490_v22 = vshrl.u32 %v3866_v4, 16  ;;  %v461_v25 = vor.u32 %v460_v16, %v457_v63 }
  0x32   : > { %v502_v21 = vld [vmem:[#allocation2 + $0x34] sm:$0xc]  ;;  %v493_v23 = vshll.u32 %v3866_v4, 16  ;;  %v516_v24 = vshll.u32 %v3869_v5, 16  ;;  %v537_v26 = vld [vmem:[#allocation2 + $0x3c] sm:$0x8] }
  0x33   : > { %v519_v27 = vshrl.u32 %v3869_v5, 16  ;;  %v525_v28 = vshll.u32 %v3870_v12, 16  ;;  %v529_v30 = vshrl.u32 %v3870_v12, 16  ;;  %v487_v31 = vor.u32 %v486_v20, %v483_v17  ;;  %v3873_v35 = vld [vmem:[%s5359_s30 + $0x38] sm:$0xf] }
  0x34   : > { %v492_v32 = vrot.slane %v490_v22, 5  ;;  %v495_v33 = vrot.slane %v493_v23, 6  ;;  %v518_v34 = vrot.slane %v516_v24, 5  ;;  %v462_v37 = vsel %vm5386_vm5, %v453_v15, %v461_v25  ;;  %v3874_v41 = vld [vmem:[%s5359_s30 + $0x3c] sm:$0xf] }
  0x35   : > { %v463_v38 = vrot.slane %v461_v25, 4  ;;  %v521_v39 = vrot.slane %v519_v27, 4  ;;  %v527_v40 = vrot.slane %v525_v28, 5  ;;  %470 = vst.msk [vmem:[#allocation2 + $0x30] sm:$0xf] %vm314_vm1, %v462_v37  ;;  %v503_v42 = vsel %vm5373_vm12, %v487_v31, %v502_v21 }
  0x36   : > { %v488_v44 = vrot.slane %v487_v31, 4  ;;  %v496_v46 = vor.u32 %v495_v33, %v492_v32  ;;  %v538_v47 = vsel %vm5312_vm13, %v518_v34, %v537_v26  ;;  %504 = vst [vmem:[#allocation2 + $0x34] sm:$0xc] %v503_v42  ;;  %v506_v50 = vld [vmem:[#allocation2 + $0x3c] sm:$0x7]  ;;  %v531_v53 = vrot.slane %v529_v30, 4 }
  0x37   : > { %v472_v48 = vsel %vm5392_vm14, %v463_v38, %v471_v19  ;;  %539 = vst [vmem:[#allocation2 + $0x3c] sm:$0x8] %v538_v47  ;;  %v522_v51 = vor.u32 %v521_v39, %v518_v34  ;;  %v551_v54 = vshrl.u32 %v3873_v35, 16  ;;  %v554_v57 = vshll.u32 %v3873_v35, 16  ;;  %v541_v0 = vld [vmem:[#allocation2 + $0x44] sm:$0xf] }
  0x38   : > { %473 = vst [vmem:[#allocation2 + $0x34] sm:$0x3] %v472_v48  ;;  %v497_v55 = vsel %vm5400_vm2, %v488_v44, %v496_v46  ;;  %v498_v43 = vrot.slane %v496_v46, 4  ;;  %v559_v58 = vshrl.u32 %v3874_v41, 16  ;;  %v532_v59 = vor.u32 %v531_v53, %v527_v40  ;;  %v570_v1 = vld [vmem:[#allocation2 + $0x48] sm:$0xf] }
  0x39   : > { %505 = vst.msk [vmem:[#allocation2 + $0x38] sm:$0xf] %vm314_vm1, %v497_v55  ;;  %v523_v10 = vrot.slane %v522_v51, 4  ;;  %v553_v60 = vrot.slane %v551_v54, 7  ;;  %v562_v61 = vshll.u32 %v3874_v41, 16  ;;  %580 = sbr.rel (%p3875_p7) target bundleno = 69 (0x45), region = 40 }
  0x3a   : > { %v507_v63 = vsel %vm5413_vm0, %v498_v43, %v506_v50  ;;  %v561_v2 = vrot.slane %v559_v58, 7  ;;  %v533_v3 = vrot.slane %v532_v59, 4  ;;  %v574_v6 = vld [vmem:[#allocation2 + $0x50] sm:$0x1]  ;;  %v585_v36 = vld [vmem:[%s584_s12] sm:$0xf] (!%p3875_p7) }
  0x3b   : > { %508 = vst [vmem:[#allocation2 + $0x3c] sm:$0x7] %v507_v63  ;;  %v528_v7 = vsel %vm5428_vm4, %v523_v10, %v527_v40  ;;  %v556_v4 = vor.u32 %v554_v57, %v553_v60  ;;  %v557_v5 = vrot.slane %v553_v60, 4  ;;  %v586_v13 = vld [vmem:[%s584_s12 + $0x4] sm:$0xf] (!%p3875_p7)  ;;  %v588_v15 = vshrl.u32 (!%p3875_p7), %v585_v36, 16 }
  0x3c   : > { %540 = vst.msk [vmem:[#allocation2 + $0x40] sm:$0xf] %vm314_vm1, %v528_v7  ;;  %v564_v8 = vor.u32 %v562_v61, %v561_v2  ;;  %v566_v9 = vrot.slane %v561_v2, 4  ;;  %v542_v11 = vsel %vm5436_vm9, %v533_v3, %v541_v0  ;;  %v591_v16 = vshll.u32 (!%p3875_p7), %v585_v36, 16  ;;  %v607_v22 = vld [vmem:[#allocation2] sm:$0xf] (!%p3875_p7) }
  0x3d   : > { %v571_v18 = vsel %vm5444_vm11, %v556_v4, %v570_v1  ;;  %543 = vst [vmem:[#allocation2 + $0x44] sm:$0xf] %v542_v11  ;;  %v596_v17 = vshrl.u32 (!%p3875_p7), %v586_v13, 16  ;;  %v599_v19 = vshll.u32 (!%p3875_p7), %v586_v13, 16  ;;  %v590_v20 = vrot.slane (!%p3875_p7), %v588_v15, 7 }
  0x3e   : > { %572 = vst [vmem:[#allocation2 + $0x48] sm:$0xf] %v571_v18  ;;  %v565_v29 = vsel %vm5452_vm8, %v557_v5, %v564_v8  ;;  %v575_v12 = vsel %vm5319_vm15, %v566_v9, %v574_v6  ;;  %v611_v23 = vld [vmem:[#allocation2 + $0x8] sm:$0x1] (!%p3875_p7) }
  0x3f   : > { %573 = vst.msk [vmem:[#allocation2 + $0x4c] sm:$0xf] %vm314_vm1, %v565_v29  ;;  %576 = vst [vmem:[#allocation2 + $0x50] sm:$0x1] %v575_v12  ;;  %v598_v21 = vrot.slane (!%p3875_p7), %v596_v17, 7  ;;  %v593_v24 = vor.u32 (!%p3875_p7), %v591_v16, %v590_v20  ;;  %v594_v25 = vrot.slane (!%p3875_p7), %v590_v20, 4 }
  0x41   : > { %v601_v26 = vor.u32 %v599_v19, %v598_v21  ;;  %v603_v27 = vrot.slane %v598_v21, 4  ;;  %v608_v28 = vsel %vm5444_vm11, %v593_v24, %v607_v22 }
  0x42   : > { %609 = vst [vmem:[#allocation2] sm:$0xf] %v608_v28 }
  0x43   : > { %v602_v30 = vsel %vm5452_vm8, %v594_v25, %v601_v26  ;;  %v612_v31 = vsel %vm5319_vm15, %v603_v27, %v611_v23 }
  0x44   : > { %610 = vst.msk [vmem:[#allocation2 + $0x4] sm:$0xf] %vm314_vm1, %v602_v30  ;;  %613 = vst [vmem:[#allocation2 + $0x8] sm:$0x1] %v612_v31 }
  0x45 PF: > { %p3879_p8 = scmp.ne.s32.totalorder %s5209_s15, 0 }
  0x46   : > { %v5227_v35 = vmov (!%p3879_p8), 0  }
  0x47   : > { %617 = sbr.rel (%p3879_p8) target bundleno = 78 (0x4e), region = 44  ;;  %621 = vst.msk [vmem:[#allocation2 + $0x4] sm:$0xf] (!%p3879_p8), %vm314_vm1, %v5227_v35 }
  0x49   : > { %v618_v32 = vld [vmem:[#allocation2] sm:$0xf] (!%p3879_p8) }
  0x4a   : > { %v619_v34 = vsel (!%p3879_p8), %vm5444_vm11, 0, %v618_v32 }
  0x4b   : > { %v622_v33 = vld [vmem:[#allocation2 + $0x8] sm:$0x1] (!%p3879_p8)  ;;  %620 = vst [vmem:[#allocation2] sm:$0xf] (!%p3879_p8), %v619_v34 }
  0x4c   : > { %v623_v52 = vsel (!%p3879_p8), %vm5319_vm15, 0, %v622_v33 }
  0x4d   : > { %624 = vst [vmem:[#allocation2 + $0x8] sm:$0x1] (!%p3879_p8), %v623_v52 }
  0x4e PF: > { %p3880_p9 = scmp.ge.s32.totalorder %s5209_s15, 1 }
  0x4f   : > { %v3883_v37 = vld [vmem:[%s5359_s30 + $0x40] sm:$0xf] (!%p3880_p9)  ;;  %v3884_v38 = vld [vmem:[%s5359_s30 + $0x44] sm:$0xf] (!%p3880_p9)  ;;  %v657_v14 = vld [vmem:[#allocation2 + $0x50] sm:$0xe] (!%p3880_p9) }
  0x50   : > { %628 = sbr.rel (%p3880_p9) target bundleno = 90 (0x5a), region = 48  ;;  %v636_v39 = vshrl.u32 (!%p3880_p9), %v3883_v37, 16  ;;  %v639_v40 = vshll.u32 (!%p3880_p9), %v3883_v37, 16  ;;  %v645_v45 = vshrl.u32 (!%p3880_p9), %v3884_v38, 16  ;;  %v648_v41 = vshll.u32 (!%p3880_p9), %v3884_v38, 16 }
  0x51   : > { %v661_v51 = vld [vmem:[#allocation2 + $0x58] sm:$0x3] (!%p3880_p9) }
  0x52   : > { %v638_v42 = vrot.slane (!%p3880_p9), %v636_v39, 6  ;;  %v641_v44 = vrot.slane (!%p3880_p9), %v639_v40, 7  ;;  %v647_v46 = vrot.slane (!%p3880_p9), %v645_v45, 6  ;;  %v650_v47 = vrot.slane (!%p3880_p9), %v648_v41, 7 }
  0x54   : > { %v642_v48 = vor.u32 (!%p3880_p9), %v641_v44, %v638_v42  ;;  %v651_v50 = vor.u32 (!%p3880_p9), %v650_v47, %v647_v46 }
  0x56   : > { %v658_v53 = vsel (!%p3880_p9), %vm5380_vm10, %v642_v48, %v657_v14  ;;  %v643_v54 = vrot.slane (!%p3880_p9), %v642_v48, 4  ;;  %v653_v55 = vrot.slane (!%p3880_p9), %v651_v50, 4 }
  0x57   : > { %659 = vst [vmem:[#allocation2 + $0x50] sm:$0xe] %v658_v53 }
  0x58   : > { %v652_v43 = vsel %vm5386_vm5, %v643_v54, %v651_v50  ;;  %v662_v57 = vsel %vm5392_vm14, %v653_v55, %v661_v51 }
  0x59   : > { %660 = vst.msk [vmem:[#allocation2 + $0x54] sm:$0xf] %vm314_vm1, %v652_v43  ;;  %663 = vst [vmem:[#allocation2 + $0x58] sm:$0x3] %v662_v57 }
  0x5a PF: > { %p3885_p10 = scmp.ne.s32.totalorder %s5209_s15, 1 }
  0x5b   : > { %v5228_v60 = vmov (!%p3885_p10), 0  }
  0x5c   : > { %667 = sbr.rel (%p3885_p10) target bundleno = 100 (0x64), region = 52  ;;  %671 = vst.msk [vmem:[#allocation2 + $0x54] sm:$0xf] (!%p3885_p10), %vm314_vm1, %v5228_v60 }
  0x60   : > { %v672_v10 = vld [vmem:[#allocation2 + $0x58] sm:$0x3] (!%p3885_p10) }
  0x61   : > { %v668_v58 = vld [vmem:[#allocation2 + $0x50] sm:$0xe] (!%p3885_p10)  ;;  %v673_v56 = vsel (!%p3885_p10), %vm5392_vm14, 0, %v672_v10 }
  0x62   : > { %v669_v59 = vsel (!%p3885_p10), %vm5380_vm10, 0, %v668_v58  ;;  %674 = vst [vmem:[#allocation2 + $0x58] sm:$0x3] (!%p3885_p10), %v673_v56 }
  0x63   : > { %670 = vst [vmem:[#allocation2 + $0x50] sm:$0xe] %v669_v59 }
  0x64 PF: > { %v5058_v61 = vld [vmem:[%s6079_s1] sm:$0xff]   ;;  %v5229_v63 = vmov 0.0   ;;  %v5060_v62 = vld [vmem:[%s6079_s1 + $0x8] sm:$0xff]   ;;  %vm5230_vm12 = vmmov 0   ;;  %v5062_v1 = vld [vmem:[%s6079_s1 + $0x10] sm:$0xff]   ;;  %vm770_vm13 = vcmask 523264  }
  0x65   : > { %4304 = vmatprep.subr.bf16.mxu1 %v5229_v63  ;;  %4480 = vmatprep.subr.bf16.mxu0 %v5229_v63  ;;  %v5059_v49 = vld [vmem:[%s6079_s1 + $0x80] sm:$0xff]   ;;  %v5061_v0 = vld [vmem:[%s6079_s1 + $0x88] sm:$0xff]   ;;  %v5063_v2 = vld [vmem:[%s6079_s1 + $0x90] sm:$0xff]   ;;  %vm1967_vm15 = vsmask.f32 6400  ;;  %vm2342_vm10 = vcmask 1045504  }
  0x66   : > { %4305 = vmatpush3.bf16.msra.mxu1 %v5058_v61  ;;  %4312 = vmatprep.mubr.msk.bf16.mxu1 %vm5230_vm12, %v5229_v63  ;;  %v5064_v7 = vld [vmem:[%s6079_s1 + $0x18] sm:$0xff]   ;;  %v5067_v4 = vld [vmem:[#allocation2 + $0x8] sm:$0xfe]   ;;  %v5068_v5 = vld [vmem:[#allocation2 + $0x10] sm:$0xff]   ;;  %vm996_vm1 = vsmask.f32 7424 }
  0x67   : > { %4481 = vmatpush3.bf16.msra.mxu0 %v5059_v49  ;;  %4306 = vmatprep.subr.bf16.mxu1 %v5229_v63  ;;  %v5065_v3 = vld [vmem:[%s6079_s1 + $0x98] sm:$0xff]   ;;  %v5066_v6 = vld [vmem:[#allocation2] sm:$0xff]   ;;  %v1969_v8 = vshrl.u32 %v5067_v4, 16  ;;  %v1972_v9 = vshll.u32 %v5067_v4, 16  ;;  %v1977_v11 = vshrl.u32 %v5068_v5, 16  ;;  %v1980_v18 = vshll.u32 %v5068_v5, 16 }
  0x68   : > { %4482 = vmatprep.subr.bf16.mxu0 %v5229_v63  ;;  %4488 = vmatprep.mubr.msk.bf16.mxu0 %vm5230_vm12, %v5229_v63  ;;  %v5069_v29 = vld [vmem:[%s6079_s1 + $0x20] sm:$0xff]   ;;  %v5072_v20 = vld [vmem:[#allocation2 + $0x18] sm:$0xff]   ;;  %v5071_v25 = vld [vmem:[#allocation2 + $0x8] sm:$0xff]   ;;  %vm1358_vm5 = vcmask 1046528   ;;  %vm2951_vm14 = vsmask.f32 5376 }
  0x69   : > { %v1971_v12 = vrot.slane %v1969_v8, 1  ;;  %v1974_v36 = vrot.slane %v1972_v9, 2  ;;  %v1979_v13 = vrot.slane %v1977_v11, 1  ;;  %v1982_v15 = vrot.slane %v1980_v18, 2  ;;  %v5070_v16 = vld [vmem:[%s6079_s1 + $0xa0] sm:$0xff]   ;;  %v5073_v28 = vld [vmem:[%s6079_s1 + $0xa8] sm:$0xff]  }
  0x6a   : > { %4307 = vmatpush3.bf16.msra.mxu1 %v5060_v62  ;;  %v1986_v22 = vshrl.u32 %v5072_v20, 16  ;;  %v1989_v23 = vshll.u32 %v5072_v20, 16  ;;  %v5075_v24 = vld [vmem:[#allocation2 + $0x20] sm:$0xff]   ;;  %v5076_v32 = vld [vmem:[%s6079_s1 + $0x28] sm:$0xff]   ;;  %v5077_v37 = vld [vmem:[%s6079_s1 + $0xb0] sm:$0xff]   ;;  %vm3326_vm2 = vcmask 1044480  }
  0x6b   : > { %4483 = vmatpush3.bf16.msra.mxu0 %v5061_v0  ;;  %4308 = vmatprep.subr.bf16.mxu1 %v5229_v63  ;;  %v1975_v17 = vor.u32 %v1974_v36, %v1971_v12  ;;  %v1983_v19 = vor.u32 %v1982_v15, %v1979_v13  ;;  %v1995_v30 = vshrl.u32 %v5075_v24, 16  ;;  %v1998_v31 = vshll.u32 %v5075_v24, 16  ;;  %v5079_v38 = vld [vmem:[#allocation2 + $0x28] sm:$0xff]   ;;  %v5083_v39 = vld [vmem:[%s6079_s1 + $0x30] sm:$0xff]   ;;  %v5080_v44 = vld [vmem:[%s6079_s1 + $0xb8] sm:$0xff]  }
  0x6c   : > { %4484 = vmatprep.subr.bf16.mxu0 %v5229_v63  ;;  %v1988_v26 = vrot.slane %v1986_v22, 1  ;;  %v1991_v27 = vrot.slane %v1989_v23, 2  ;;  %v5074_v40 = vld [vmem:[#allocation2 + $0x10] sm:$0xff]   ;;  %v2004_v41 = vshrl.u32 %v5079_v38, 16  ;;  %v2007_v42 = vshll.u32 %v5079_v38, 16  ;;  %v5090_v50 = vld [vmem:[%s6079_s1 + $0x38] sm:$0xff]  }
  0x6d   : > { %v1984_v21 = vsel %vm1967_vm15, %v1975_v17, %v1983_v19  ;;  %v1997_v35 = vrot.slane %v1995_v30, 1  ;;  %v2000_v52 = vrot.slane %v1998_v31, 2  ;;  %v5082_v46 = vld [vmem:[#allocation2 + $0x30] sm:$0xff]   ;;  %v5078_v55 = vld [vmem:[#allocation2 + $0x18] sm:$0xff]   ;;  %v5081_v59 = vld [vmem:[#allocation2 + $0x20] sm:$0xff]  }
  0x6e   : > { %4309 = vmatpush3.bf16.msra.mxu1 %v5062_v1  ;;  %v1992_v33 = vor.u32 %v1991_v27, %v1988_v26  ;;  %v2006_v14 = vrot.slane %v2004_v41, 1  ;;  %v2009_v48 = vrot.slane %v2007_v42, 2  ;;  %v2013_v51 = vshrl.u32 %v5082_v46, 16  ;;  %v5086_v60 = vld [vmem:[#allocation2 + $0x10] sm:$0xff]   ;;  %v5085_v61 = vld [vmem:[#allocation2 + $0x8] sm:$0xfc]  }
  0x6f   : > { %4485 = vmatpush3.bf16.msra.mxu0 %v5063_v2  ;;  %4310 = vmatprep.subr.bf16.mxu1 %v5229_v63  ;;  %v2001_v45 = vor.u32 %v2000_v52, %v1997_v35  ;;  %v2016_v53 = vshll.u32 %v5082_v46, 16  ;;  %v2343_v49 = vrot.slane %v5085_v61, 2  ;;  %v2344_v62 = vrot.slane %v5086_v60, 2  ;;  %v5084_v0 = vld [vmem:[#allocation2 + $0x28] sm:$0xff]   ;;  %v5087_v2 = vld [vmem:[%s6079_s1 + $0xc0] sm:$0xff]   ;;  %v5088_v5 = vld [vmem:[#allocation2 + $0x30] sm:$0xff]  }
  0x70   : > { %4486 = vmatprep.subr.bf16.mxu0 %v5229_v63  ;;  %v1993_v34 = vsel %vm1967_vm15, %v1983_v19, %v1992_v33  ;;  %v2010_v54 = vor.u32 %v2009_v48, %v2006_v14  ;;  %v2015_v43 = vrot.slane %v2013_v51, 1  ;;  %v5093_v4 = vld [vmem:[%s6079_s1 + $0xc8] sm:$0xff]   ;;  %v5100_v9 = vld [vmem:[%s6079_s1 + $0xd0] sm:$0xff]   ;;  %v5106_v18 = vld [vmem:[%s6079_s1 + $0xd8] sm:$0xff]  }
  0x71   : > { %v2002_v47 = vsel %vm1967_vm15, %v1992_v33, %v2001_v45  ;;  %v2018_v57 = vrot.slane %v2016_v53, 2  ;;  %v2345_v1 = vsel %vm2342_vm10, %v2343_v49, %v2344_v62  ;;  %v5096_v12 = vld [vmem:[#allocation2] sm:$0xff]   ;;  %v5095_v13 = vld [vmem:[#allocation2 + $0x28] sm:$0xff]   ;;  %v5098_v24 = vld [vmem:[#allocation2 + $0x30] sm:$0xff]  }
  0x72   : > { %4311 = vmatpush3.bf16.msra.mxu1 %v5064_v7  ;;  %v2011_v58 = vsel %vm1967_vm15, %v2001_v45, %v2010_v54  ;;  %v5089_v7 = vld [vmem:[#allocation2 + $0x18] sm:$0xff]   ;;  %v5097_v15 = vld [vmem:[#allocation2 + $0x8] sm:$0xff]   ;;  %v2350_v17 = vrot.slane %v5095_v13, 2  ;;  %v5094_v19 = vld [vmem:[#allocation2 + $0x40] sm:$0xff]   ;;  %v998_v20 = vshrl.u32 %v5096_v12, 16 }
  0x73   : > { %4487 = vmatpush3.bf16.msra.mxu0 %v5065_v3  ;;  %4348 = vmatprep.subr.bf16.mxu1 %v5229_v63  ;;  %v5629_v10 = vor.u32 %v2018_v57, %v2015_v43  ;;  %v2346_v3 = vrot.slane %v5089_v7, 2  ;;  %v1005_v22 = vshll.u32 %v5097_v15, 16  ;;  %v5101_v27 = vld [vmem:[#allocation2 + $0x10] sm:$0xff]   ;;  %v5099_v30 = vld [vmem:[%s6079_s1 + $0x40] sm:$0xff]   ;;  %v5103_v52 = vld [vmem:[#allocation2 + $0x18] sm:$0xff]  }
  0x74   : > { %4524 = vmatprep.subr.bf16.mxu0 %v5229_v63  ;;  %v1013_v33 = vshll.u32 %v5101_v27, 16  ;;  %v1017_v45 = vshrl.u32 %v5101_v27, 16  ;;  %v1021_v42 = vshll.u32 %v5103_v52, 16  ;;  %v5104_v46 = vld [vmem:[#allocation2 + $0x40] sm:$0xff]   ;;  %v5118_v51 = vld [vmem:[%s6079_s1 + $0x58] sm:$0xff]   ;;  %v1025_v43 = vshrl.u32 %v5103_v52, 16 }
  0x75   : > { %4313 = vmatmul.mubr.msk.bf16.vlgmr.msra.gmra.mrb[0].mxu1 %vm770_vm13, %v5066_v6  ;;  %v2020_v56 = vsel %vm1967_vm15, %v2010_v54, %v5629_v10  ;;  %v5092_v6 = vld [vmem:[#allocation2 + $0x20] sm:$0xff]   ;;  %v2347_v8 = vsel %vm2342_vm10, %v2344_v62, %v2346_v3  ;;  %v1007_v26 = vrot.slane %v1005_v22, 1  ;;  %v2356_v53 = vrot.slane %v5104_v46, 2  ;;  %v5109_v60 = vld [vmem:[#allocation2 + $0x28] sm:$0xff]   ;;  %v5116_v13 = vld [vmem:[#allocation2 + $0x38] sm:$0xff]  }
  0x76   : > { %4349 = vmatpush3.bf16.msra.mxu1 %v5069_v29  ;;  %4316 = vmatprep.mubr.msk.bf16.mxu1 %vm5230_vm12, %v5229_v63  ;;  %v2348_v11 = vrot.slane %v5092_v6, 2  ;;  %v5091_v29 = vld [vmem:[#allocation2 + $0x38] sm:$0xff]   ;;  %v1015_v38 = vrot.slane %v1013_v33, 1  ;;  %v5107_v14 = vld [vmem:[#allocation2 + $0x20] sm:$0xff]   ;;  %v5123_v46 = vld [vmem:[#allocation2 + $0x30] sm:$0xff]  }
  0x77   : > { %4489 = vmatmul.mubr.msk.bf16.vlgmr.msra.gmra.mrb[0].mxu0 %vm770_vm13, %v1984_v21  ;;  %4350 = vmatprep.subr.bf16.mxu1 %v5229_v63  ;;  %v1029_v54 = vshll.u32 %v5107_v14, 16  ;;  %v1033_v62 = vshrl.u32 %v5107_v14, 16  ;;  %v5115_v22 = vld [vmem:[%s6079_s1 + $0xe0] sm:$0xff]  }
  0x78   : > { %4525 = vmatpush3.bf16.msra.mxu0 %v5070_v16  ;;  %4492 = vmatprep.mubr.msk.bf16.mxu0 %vm5230_vm12, %v5229_v63  ;;  %v2349_v36 = vsel %vm2342_vm10, %v2346_v3, %v2348_v11  ;;  %v1000_v16 = vshll.u32 %v5096_v12, 16  ;;  %v2351_v23 = vsel %vm2342_vm10, %v2348_v11, %v2350_v17  ;;  %v1019_v48 = vor.u32 %v1017_v45, %v1015_v38  ;;  %v5113_v11 = vld [vmem:[#allocation2 + $0x10] sm:$0xfc]  }
  0x79   : > { %4526 = vmatprep.subr.bf16.mxu0 %v5229_v63 }
  0x7a   : > { %4351 = vmatpush3.bf16.msra.mxu1 %v5076_v32  ;;  %v1002_v21 = vrot.slane %v1000_v16, 1  ;;  %v1009_v32 = vshrl.u32 %v5097_v15, 16  ;;  %v2647_v15 = vrot.slane %v5113_v11, 2 }
  0x7b   : > { %4352 = vmatprep.subr.bf16.mxu1 %v5229_v63 }
  0x7c   : > { %4527 = vmatpush3.bf16.msra.mxu0 %v5073_v28  ;;  %v2352_v28 = vrot.slane %v5098_v24, 2 }
  0x7d   : > { %4317 = vmatmul.mubr.msk.bf16.gmra.mrb[4].mxu1 %vm770_vm13, %v5071_v25  ;;  %4528 = vmatprep.subr.bf16.mxu0 %v5229_v63  ;;  %v1003_v25 = vor.u32 %v1002_v21, %v998_v20  ;;  %v1053_v20 = vshll.u32 %v5116_v13, 16 }
  0x7e   : > { %4320 = vmatprep.mubr.msk.bf16.mxu1 %vm5230_vm12, %v5229_v63  ;;  %4353 = vmatpush3.bf16.msra.mxu1 %v5083_v39  ;;  %v2353_v35 = vsel %vm2342_vm10, %v2350_v17, %v2352_v28  ;;  %v5105_v39 = vld [vmem:[%s6079_s1 + $0x48] sm:$0xff]  }
  0x7f   : > { %4493 = vmatmul.mubr.msk.bf16.gmra.mrb[4].mxu0 %vm770_vm13, %v1993_v34  ;;  %4354 = vmatprep.subr.bf16.mxu1 %v5229_v63  ;;  %v1008_v31 = vsel %vm996_vm1, %v1003_v25, %v1007_v26  ;;  %v5102_v34 = vld [vmem:[#allocation2 + $0x38] sm:$0xff]   ;;  %v1055_v25 = vrot.slane %v1053_v20, 1  ;;  %v5141_v20 = vld [vmem:[#allocation2 + $0x10] sm:$0xfc]  }
  0x80   : > { %4496 = vmatprep.mubr.msk.bf16.mxu0 %vm5230_vm12, %v5229_v63  ;;  %4529 = vmatpush3.bf16.msra.mxu0 %v5077_v37  ;;  %v1011_v37 = vor.u32 %v1009_v32, %v1007_v26  ;;  %v5119_v26 = vld [vmem:[#allocation2 + $0x40] sm:$0xff]  }
  0x81   : > { %4530 = vmatprep.subr.bf16.mxu0 %v5229_v63  ;;  %v1061_v32 = vshll.u32 %v5119_v26, 16 }
  0x82   : > { %4355 = vmatpush3.bf16.msra.mxu1 %v5090_v50  ;;  %v1016_v41 = vsel %vm996_vm1, %v1011_v37, %v1015_v38  ;;  %v1023_v50 = vrot.slane %v1021_v42, 1  ;;  %v5122_v38 = vld [vmem:[#allocation2 + $0x48] ss:$0 sps:$4 sm:$0x11]  }
  0x83   : > { %4392 = vmatprep.subr.bf16.mxu1 %v5229_v63  ;;  %v1063_v37 = vrot.slane %v1061_v32, 1  ;;  %v1069_v42 = vshll.u32 %v5122_v38, 16 }
  0x84   : > { %4531 = vmatpush3.bf16.msra.mxu0 %v5080_v44  ;;  %v5111_v44 = vld [vmem:[%s6079_s1 + $0x50] sm:$0xff]  }
  0x85   : > { %4321 = vmatmul.mubr.msk.bf16.gmra.mrb[8].mxu1 %vm770_vm13, %v5074_v40  ;;  %4568 = vmatprep.subr.bf16.mxu0 %v5229_v63  ;;  %v2354_v40 = vrot.slane %v5102_v34, 2  ;;  %v5120_v34 = vld [vmem:[#allocation2 + $0x28] sm:$0xff]   ;;  %v1071_v14 = vrot.slane %v1069_v42, 1  ;;  %v5144_v42 = vld [vmem:[#allocation2 + $0x38] sm:$0xff]  }
  0x86   : > { %4324 = vmatprep.mubr.msk.bf16.mxu1 %vm5230_vm12, %v5229_v63 }
  0x87   : > { %4497 = vmatmul.mubr.msk.bf16.gmra.mrb[8].mxu0 %vm770_vm13, %v2002_v47  ;;  %v2355_v47 = vsel %vm2342_vm10, %v2352_v28, %v2354_v40  ;;  %v2357_v57 = vsel %vm2342_vm10, %v2354_v40, %v2356_v53  ;;  %v5121_v28 = vld [vmem:[%s6079_s1 + $0xe8] sm:$0xff]   ;;  %v5134_v40 = vld [vmem:[%s6079_s1 + $0xf8] sm:$0xff]  }
  0x88   : > { %4500 = vmatprep.mubr.msk.bf16.mxu0 %vm5230_vm12, %v5229_v63 }
  0x8d   : > { %4325 = vmatmul.mubr.msk.bf16.gmra.mrb[12].mxu1 %vm770_vm13, %v5078_v55  ;;  %v1024_v55 = vsel %vm996_vm1, %v1019_v48, %v1023_v50  ;;  %v2654_v48 = vrot.slane %v5123_v46, 2  ;;  %v5143_v46 = vld [vmem:[%s6079_s1 + $0x100] sm:$0xff]  }
  0x8e   : > { %4328 = vmatprep.mubr.msk.bf16.mxu1 %vm5230_vm12, %v5229_v63 }
  0x8f   : > { %4501 = vmatmul.mubr.msk.bf16.gmra.mrb[12].mxu0 %vm770_vm13, %v2011_v58  ;;  %v5108_v58 = vld [vmem:[#allocation2 + $0x48] sm:$0xff]  }
  0x90   : > { %4504 = vmatprep.mubr.msk.bf16.mxu0 %vm5230_vm12, %v5229_v63  ;;  %v2358_v61 = vrot.slane %v5108_v58, 2 }
  0x95   : > { %4329 = vmatmul.mubr.msk.bf16.gmra.mrb[16].mxu1 %vm770_vm13, %v5081_v59  ;;  %v1031_v59 = vrot.slane %v1029_v54, 1 }
  0x96   : > { %4332 = vmatprep.mubr.msk.bf16.mxu1 %vm5230_vm12, %v5229_v63 }
  0x97   : > { %4505 = vmatmul.mubr.msk.bf16.gmra.mrb[16].mxu0 %vm770_vm13, %v2020_v56  ;;  %v1027_v56 = vor.u32 %v1025_v43, %v1023_v50  ;;  %v1035_v7 = vor.u32 %v1033_v62, %v1031_v59 }
  0x98   : > { %4532 = vmatprep.mubr.msk.bf16.mxu0 %vm5230_vm12, %v5229_v63 }
  0x99   : > { %v1032_v49 = vsel %vm996_vm1, %v1027_v56, %v1031_v59  ;;  %v5129_v56 = vld [vmem:[#allocation2 + $0x10] sm:$0xff]  }
  0x9a   : > { %v1362_v62 = vrot.slane %v5129_v56, 1  ;;  %v5151_v56 = vld [vmem:[#allocation2 + $0x30] sm:$0xff]  }
  0x9d   : > { %4333 = vmatmul.mubr.msk.bf16.gmra.mrb[20].mxu1 %vm770_vm13, %v5084_v0  ;;  %v1037_v0 = vshll.u32 %v5109_v60, 16 }
  0x9e   : > { %4336 = vmatprep.mubr.msk.bf16.mxu1 %vm5230_vm12, %v5229_v63 }
  0x9f   : > { %4533 = vmatmul.mubr.msk.bf16.vlgmr.msra.gmra.mrb[0].mxu0 %vm770_vm13, %v2345_v1  ;;  %v5110_v1 = vld [vmem:[#allocation2 + $0x50] ss:$0 sps:$4 sm:$0x33]   ;;  %v1039_v3 = vrot.slane %v1037_v0, 1  ;;  %v5133_v0 = vld [vmem:[%s6079_s1 + $0x68] sm:$0xff]  }
  0xa0   : > { %4569 = vmatpush3.bf16.msra.mxu0 %v5087_v2  ;;  %4536 = vmatprep.mubr.msk.bf16.mxu0 %vm5230_vm12, %v5229_v63  ;;  %v2359_v2 = vsel %vm2342_vm10, %v2356_v53, %v2358_v61  ;;  %v5125_v53 = vld [vmem:[#allocation2 + $0x8] sm:$0xff]  }
  0xa1   : > { %4570 = vmatprep.subr.bf16.mxu0 %v5229_v63  ;;  %v1040_v6 = vsel %vm996_vm1, %v1035_v7, %v1039_v3  ;;  %v5131_v7 = vld [vmem:[#allocation2 + $0x18] sm:$0xff]  }
  0xa4   : > { %4571 = vmatpush3.bf16.msra.mxu0 %v5093_v4  ;;  %v5112_v4 = vld [vmem:[#allocation2 + $0x30] sm:$0xff]  }
  0xa5   : > { %4337 = vmatmul.mubr.msk.bf16.gmra.mrb[24].mxu1 %vm770_vm13, %v5088_v5  ;;  %4572 = vmatprep.subr.bf16.mxu0 %v5229_v63  ;;  %v2360_v5 = vrot.slane %v5110_v1, 2 }
  0xa6   : > { %4340 = vmatprep.mubr.msk.bf16.mxu1 %vm5230_vm12, %v5229_v63 }
  0xa7   : > { %4537 = vmatmul.mubr.msk.bf16.gmra.mrb[4].mxu0 %vm770_vm13, %v2347_v8  ;;  %v1041_v8 = vshrl.u32 %v5109_v60, 16  ;;  %v5127_v60 = vld [vmem:[%s6079_s1 + $0x60] sm:$0xff]  }
  0xa8   : > { %4540 = vmatprep.mubr.msk.bf16.mxu0 %vm5230_vm12, %v5229_v63  ;;  %4573 = vmatpush3.bf16.msra.mxu0 %v5100_v9  ;;  %v1045_v9 = vshll.u32 %v5112_v4, 16 }
  0xa9   : > { %4574 = vmatprep.subr.bf16.mxu0 %v5229_v63  ;;  %v1043_v12 = vor.u32 %v1041_v8, %v1039_v3  ;;  %v5139_v3 = vld [vmem:[%s6079_s1 + $0x70] sm:$0xff]   ;;  %v5146_v8 = vld [vmem:[%s6079_s1 + $0x78] sm:$0xff]  }
  0xac   : > { %4575 = vmatpush3.bf16.msra.mxu0 %v5106_v18  ;;  %v5114_v18 = vld [vmem:[#allocation2 + $0x18] sm:$0xff]  }
  0xad   : > { %4341 = vmatmul.mubr.msk.bf16.gmra.mrb[28].mxu1 %vm770_vm13, %v5091_v29  ;;  %4612 = vmatprep.subr.bf16.mxu0 %v5229_v63  ;;  %v2361_v29 = vsel %vm2342_vm10, %v2358_v61, %v2360_v5  ;;  %v2648_v16 = vrot.slane %v5114_v18, 2  ;;  %v5132_v5 = vld [vmem:[#allocation2 + $0x48] sm:$0xff]   ;;  %v5135_v18 = vld [vmem:[#allocation2 + $0x20] sm:$0xff]  }
  0xae   : > { %4344 = vmatprep.mubr.msk.bf16.mxu1 %vm5230_vm12, %v5229_v63 }
  0xaf   : > { %4541 = vmatmul.mubr.msk.bf16.gmra.mrb[8].mxu0 %vm770_vm13, %v2349_v36  ;;  %v1047_v36 = vrot.slane %v1045_v9, 1  ;;  %v2649_v21 = vsel %vm2342_vm10, %v2647_v15, %v2648_v16  ;;  %v2660_v9 = vrot.slane %v5132_v5, 2 }
  0xb0   : > { %4544 = vmatprep.mubr.msk.bf16.mxu0 %vm5230_vm12, %v5229_v63 }
  0xb1   : > { %v1048_v17 = vsel %vm996_vm1, %v1043_v12, %v1047_v36  ;;  %v5136_v12 = vld [vmem:[#allocation2 + $0x50] sm:$0xff]  }
  0xb5   : > { %4345 = vmatmul.mubr.msk.bf16.gmra.mrb[32].mxu1 %vm770_vm13, %v5094_v19  ;;  %v1049_v19 = vshrl.u32 %v5112_v4, 16 }
  0xb6   : > { %4356 = vmatprep.mubr.msk.bf16.mxu1 %vm5230_vm12, %v5229_v63 }
  0xb7   : > { %4545 = vmatmul.mubr.msk.bf16.gmra.mrb[12].mxu0 %vm770_vm13, %v2351_v23  ;;  %v5117_v23 = vld [vmem:[#allocation2 + $0x20] sm:$0xff]   ;;  %v1051_v24 = vor.u32 %v1049_v19, %v1047_v36  ;;  %v1366_v36 = vrot.slane %v5135_v18, 1 }
  0xb8   : > { %4548 = vmatprep.mubr.msk.bf16.mxu0 %vm5230_vm12, %v5229_v63  ;;  %v2650_v27 = vrot.slane %v5117_v23, 2 }
  0xba   : > { %v2651_v33 = vsel %vm2342_vm10, %v2648_v16, %v2650_v27  ;;  %v5137_v16 = vld [vmem:[#allocation2 + $0x28] sm:$0xff]  }
  0xbd   : > { %4357 = vmatmul.mubr.msk.bf16.vlgmr.msra.gmra.mrb[0].mxu1 %vm770_vm13, %v1008_v31  ;;  %v1057_v31 = vshrl.u32 %v5116_v13, 16  ;;  %v2662_v13 = vrot.slane %v5136_v12, 2 }
  0xbe   : > { %4393 = vmatpush3.bf16.msra.mxu1 %v5099_v30  ;;  %4360 = vmatprep.mubr.msk.bf16.mxu1 %vm5230_vm12, %v5229_v63  ;;  %v1056_v30 = vsel %vm996_vm1, %v1051_v24, %v1055_v25  ;;  %v2953_v24 = vshrl.u32 %v5141_v20, 16 }
  0xbf   : > { %4549 = vmatmul.mubr.msk.bf16.gmra.mrb[16].mxu0 %vm770_vm13, %v2353_v35  ;;  %4394 = vmatprep.subr.bf16.mxu1 %v5229_v63  ;;  %v5128_v35 = vld [vmem:[%s6079_s1 + $0xf0] sm:$0xff]   ;;  %v1059_v52 = vor.u32 %v1057_v31, %v1055_v25  ;;  %v2663_v19 = vsel %vm2342_vm10, %v2660_v9, %v2662_v13  ;;  %v2956_v25 = vshll.u32 %v5141_v20, 16 }
  0xc0   : > { %4552 = vmatprep.mubr.msk.bf16.mxu0 %vm5230_vm12, %v5229_v63  ;;  %v2955_v32 = vrot.slane %v2953_v24, 2 }
  0xc1   : > { %v1064_v45 = vsel %vm996_vm1, %v1059_v52, %v1063_v37  ;;  %v5145_v52 = vld [vmem:[#allocation2 + $0x20] sm:$0xff]  }
  0xc2   : > { %4395 = vmatpush3.bf16.msra.mxu1 %v5105_v39  ;;  %v2652_v39 = vrot.slane %v5120_v34, 2 }
  0xc3   : > { %4396 = vmatprep.subr.bf16.mxu1 %v5229_v63 }
  0xc4   : > { %v2655_v54 = vsel %vm2342_vm10, %v2652_v39, %v2654_v48 }
  0xc5   : > { %4361 = vmatmul.mubr.msk.bf16.gmra.mrb[4].mxu1 %vm770_vm13, %v1016_v41  ;;  %v1065_v41 = vshrl.u32 %v5119_v26, 16 }
  0xc6   : > { %4364 = vmatprep.mubr.msk.bf16.mxu1 %vm5230_vm12, %v5229_v63  ;;  %4397 = vmatpush3.bf16.msra.mxu1 %v5111_v44  ;;  %v2653_v44 = vsel %vm2342_vm10, %v2650_v27, %v2652_v39 }
  0xc7   : > { %4553 = vmatmul.mubr.msk.bf16.gmra.mrb[20].mxu0 %vm770_vm13, %v2355_v47  ;;  %4398 = vmatprep.subr.bf16.mxu1 %v5229_v63  ;;  %v1067_v47 = vor.u32 %v1065_v41, %v1063_v37 }
  0xc8   : > { %4556 = vmatprep.mubr.msk.bf16.mxu0 %vm5230_vm12, %v5229_v63 }
  0xc9   : > { %v1072_v50 = vsel %vm996_vm1, %v1067_v47, %v1071_v14 }
  0xca   : > { %4399 = vmatpush3.bf16.msra.mxu1 %v5118_v51  ;;  %v5124_v51 = vld [vmem:[#allocation2] sm:$0xfe]  }
  0xcb   : > { %4436 = vmatprep.subr.bf16.mxu1 %v5229_v63  ;;  %v1359_v43 = vrot.slane %v5124_v51, 1 }
  0xcd   : > { %4365 = vmatmul.mubr.msk.bf16.gmra.mrb[8].mxu1 %vm770_vm13, %v1024_v55  ;;  %v5126_v55 = vld [vmem:[#allocation2 + $0x38] sm:$0xff]  }
  0xce   : > { %4368 = vmatprep.mubr.msk.bf16.mxu1 %vm5230_vm12, %v5229_v63  ;;  %v2656_v58 = vrot.slane %v5126_v55, 2  ;;  %v5149_v55 = vld [vmem:[%s6079_s1 + $0x108] sm:$0xff]  }
  0xcf   : > { %4557 = vmatmul.mubr.msk.bf16.gmra.mrb[24].mxu0 %vm770_vm13, %v2357_v57  ;;  %v1360_v57 = vrot.slane %v5125_v53, 1 }
  0xd0   : > { %4560 = vmatprep.mubr.msk.bf16.mxu0 %vm5230_vm12, %v5229_v63  ;;  %v2657_v61 = vsel %vm2342_vm10, %v2654_v48, %v2656_v58  ;;  %v5148_v48 = vld [vmem:[#allocation2 + $0x28] sm:$0xff]  }
  0xd1   : > { %v1361_v59 = vsel %vm1358_vm5, %v1359_v43, %v1360_v57  ;;  %v2979_v53 = vshrl.u32 %v5148_v48, 16 }
  0xd5   : > { %4369 = vmatmul.mubr.msk.bf16.gmra.mrb[12].mxu1 %vm770_vm13, %v1032_v49  ;;  %v5130_v49 = vld [vmem:[#allocation2 + $0x40] sm:$0xff]  }
  0xd6   : > { %4372 = vmatprep.mubr.msk.bf16.mxu1 %vm5230_vm12, %v5229_v63  ;;  %v2658_v1 = vrot.slane %v5130_v49, 2 }
  0xd7   : > { %4561 = vmatmul.mubr.msk.bf16.gmra.mrb[28].mxu0 %vm770_vm13, %v2359_v2  ;;  %v1363_v2 = vsel %vm1358_vm5, %v1360_v57, %v1362_v62  ;;  %v5147_v57 = vld [vmem:[#allocation2 + $0x40] sm:$0xff]  }
  0xd8   : > { %4564 = vmatprep.mubr.msk.bf16.mxu0 %vm5230_vm12, %v5229_v63  ;;  %v2659_v4 = vsel %vm2342_vm10, %v2656_v58, %v2658_v1  ;;  %v1374_v49 = vrot.slane %v5147_v57, 1  ;;  %v5164_v57 = vld [vmem:[#allocation2 + $0x58] ss:$0 sps:$4 sm:$0x77]  }
  0xdd   : > { %4373 = vmatmul.mubr.msk.bf16.gmra.mrb[16].mxu1 %vm770_vm13, %v1040_v6  ;;  %v1364_v6 = vrot.slane %v5131_v7, 1 }
  0xde   : > { %4376 = vmatprep.mubr.msk.bf16.mxu1 %vm5230_vm12, %v5229_v63 }
  0xdf   : > { %4565 = vmatmul.mubr.msk.bf16.gmra.mrb[32].mxu0 %vm770_vm13, %v2361_v29  ;;  %v1365_v11 = vsel %vm1358_vm5, %v1362_v62, %v1364_v6  ;;  %v2661_v29 = vsel %vm2342_vm10, %v2658_v1, %v2660_v9  ;;  %v1367_v15 = vsel %vm1358_vm5, %v1364_v6, %v1366_v36  ;;  %v2991_v1 = vshll.u32 %v5151_v56, 16 }
  0xe0   : > { %4576 = vmatprep.mubr.msk.bf16.mxu0 %vm5230_vm12, %v5229_v63 }
  0xe1   : > { %v2993_v6 = vrot.slane %v2991_v1, 3 }
  0xe5   : > { %4377 = vmatmul.mubr.msk.bf16.gmra.mrb[20].mxu1 %vm770_vm13, %v1048_v17  ;;  %v5138_v17 = vld [vmem:[#allocation2 + $0x58] ss:$0 sps:$4 sm:$0x33]  }
  0xe6   : > { %4380 = vmatprep.mubr.msk.bf16.mxu1 %vm5230_vm12, %v5229_v63  ;;  %v2664_v23 = vrot.slane %v5138_v17, 2 }
  0xe7   : > { %4577 = vmatmul.mubr.msk.bf16.vlgmr.msra.gmra.mrb[0].mxu0 %vm770_vm13, %v2649_v21  ;;  %v5142_v21 = vld [vmem:[#allocation2 + $0x18] sm:$0xff]  }
  0xe8   : > { %4613 = vmatpush3.bf16.msra.mxu0 %v5115_v22  ;;  %4580 = vmatprep.mubr.msk.bf16.mxu0 %vm5230_vm12, %v5229_v63  ;;  %v1368_v22 = vrot.slane %v5137_v16, 1  ;;  %v2961_v26 = vshrl.u32 %v5142_v21, 16  ;;  %v2964_v27 = vshll.u32 %v5142_v21, 16  ;;  %v2665_v31 = vsel %vm2342_vm10, %v2662_v13, %v2664_v23  ;;  %v5153_v13 = vld [vmem:[#allocation2 + $0x10] sm:$0xff]  }
  0xe9   : > { %4614 = vmatprep.subr.bf16.mxu0 %v5229_v63  ;;  %v1664_v21 = vrot.slane %v5153_v13, 1  ;;  %v5169_v13 = vld [vmem:[#allocation2 + $0x20] sm:$0xff]  }
  0xea   : > { %v2963_v34 = vrot.slane %v2961_v26, 2  ;;  %v5156_v26 = vld [vmem:[#allocation2 + $0x18] sm:$0xff]  }
  0xec   : > { %4615 = vmatpush3.bf16.msra.mxu0 %v5121_v28  ;;  %v1369_v28 = vsel %vm1358_vm5, %v1366_v36, %v1368_v22  ;;  %v5152_v36 = vld [vmem:[#allocation2 + $0x8] sm:$0xfe]  }
  0xed   : > { %4381 = vmatmul.mubr.msk.bf16.gmra.mrb[24].mxu1 %vm770_vm13, %v1056_v30  ;;  %4616 = vmatprep.subr.bf16.mxu0 %v5229_v63  ;;  %v5140_v30 = vld [vmem:[#allocation2 + $0x30] sm:$0xff]   ;;  %v1663_v20 = vrot.slane %v5152_v36, 1 }
  0xee   : > { %4384 = vmatprep.mubr.msk.bf16.mxu1 %vm5230_vm12, %v5229_v63  ;;  %v1370_v37 = vrot.slane %v5140_v30, 1 }
  0xef   : > { %4581 = vmatmul.mubr.msk.bf16.gmra.mrb[4].mxu0 %vm770_vm13, %v2651_v33  ;;  %v2958_v33 = vrot.slane %v2956_v25, 3  ;;  %v1665_v25 = vsel %vm1358_vm5, %v1663_v20, %v1664_v21 }
  0xf0   : > { %4584 = vmatprep.mubr.msk.bf16.mxu0 %vm5230_vm12, %v5229_v63  ;;  %4617 = vmatpush3.bf16.msra.mxu0 %v5128_v35  ;;  %v2966_v35 = vrot.slane %v2964_v27, 3  ;;  %v1371_v41 = vsel %vm1358_vm5, %v1368_v22, %v1370_v37 }
  0xf1   : > { %4618 = vmatprep.subr.bf16.mxu0 %v5229_v63  ;;  %v2959_v38 = vor.u32 %v2958_v33, %v2955_v32  ;;  %v5183_v32 = vld [vmem:[%s6079_s1 + $0x80] sm:$0xff]   ;;  %v1666_v33 = vrot.slane %v5156_v26, 1  ;;  %v5174_v26 = vld [vmem:[#allocation2 + $0x38] sm:$0xff]  }
  0xf2   : > { %v2967_v39 = vor.u32 %v2966_v35, %v2963_v34 }
  0xf4   : > { %4619 = vmatpush3.bf16.msra.mxu0 %v5134_v40  ;;  %v2970_v40 = vshrl.u32 %v5145_v52, 16 }
  0xf5   : > { %4385 = vmatmul.mubr.msk.bf16.gmra.mrb[28].mxu1 %vm770_vm13, %v1064_v45  ;;  %4656 = vmatprep.subr.bf16.mxu0 %v5229_v63  ;;  %v2973_v45 = vshll.u32 %v5145_v52, 16 }
  0xf6   : > { %4388 = vmatprep.mubr.msk.bf16.mxu1 %vm5230_vm12, %v5229_v63  ;;  %v2972_v47 = vrot.slane %v2970_v40, 2 }
  0xf7   : > { %4585 = vmatmul.mubr.msk.bf16.gmra.mrb[8].mxu0 %vm770_vm13, %v2653_v44  ;;  %v2968_v44 = vsel %vm2951_vm14, %v2959_v38, %v2967_v39  ;;  %v2975_v14 = vrot.slane %v2973_v45, 3  ;;  %v5158_v38 = vld [vmem:[#allocation2 + $0x20] sm:$0xff]  }
  0xf8   : > { %4588 = vmatprep.mubr.msk.bf16.mxu0 %vm5230_vm12, %v5229_v63 }
  0xf9   : > { %v2976_v51 = vor.u32 %v2975_v14, %v2972_v47 }
  0xfb   : > { %v2977_v58 = vsel %vm2951_vm14, %v2967_v39, %v2976_v51  ;;  %v5184_v39 = vld [vmem:[%s6079_s1 + $0x88] sm:$0xff]  }
  0xfd   : > { %4389 = vmatmul.mubr.msk.bf16.gmra.mrb[32].mxu1 %vm770_vm13, %v1072_v50  ;;  %v1372_v50 = vrot.slane %v5144_v42, 1  ;;  %v5162_v42 = vld [vmem:[#allocation2 + $0x50] sm:$0xff]  }
  0xfe   : > { %4400 = vmatprep.mubr.msk.bf16.mxu1 %vm5230_vm12, %v5229_v63  ;;  %v3024_v14 = vshrl.u32 %v5162_v42, 16 }
  0xff   : > { %4589 = vmatmul.mubr.msk.bf16.gmra.mrb[12].mxu0 %vm770_vm13, %v2655_v54  ;;  %v2982_v54 = vshll.u32 %v5148_v48, 16  ;;  %v1373_v43 = vsel %vm1358_vm5, %v1370_v37, %v1372_v50  ;;  %v1375_v7 = vsel %vm1358_vm5, %v1372_v50, %v1374_v49  ;;  %v1667_v37 = vsel %vm1358_vm5, %v1664_v21, %v1666_v33  ;;  %v5171_v21 = vld [vmem:[#allocation2 + $0x28] sm:$0xff]  }
 0x100   : > { %4592 = vmatprep.mubr.msk.bf16.mxu0 %vm5230_vm12, %v5229_v63  ;;  %v3027_v48 = vshll.u32 %v5162_v42, 16 }
 0x105   : > { %4401 = vmatmul.mubr.msk.bf16.vlgmr.msra.gmra.mrb[0].mxu1 %vm770_vm13, %v1361_v59  ;;  %v2981_v59 = vrot.slane %v2979_v53, 2  ;;  %v5186_v53 = vld [vmem:[%s6079_s1 + $0x98] sm:$0xff]  }
 0x106   : > { %4437 = vmatpush3.bf16.msra.mxu1 %v5127_v60  ;;  %4404 = vmatprep.mubr.msk.bf16.mxu1 %vm5230_vm12, %v5229_v63  ;;  %v2984_v60 = vrot.slane %v2982_v54, 3 }
 0x107   : > { %4593 = vmatmul.mubr.msk.bf16.gmra.mrb[16].mxu0 %vm770_vm13, %v2657_v61  ;;  %4438 = vmatprep.subr.bf16.mxu1 %v5229_v63  ;;  %v5155_v61 = vld [vmem:[%s6079_s1 + $0x110] sm:$0xff]  }
 0x108   : > { %4596 = vmatprep.mubr.msk.bf16.mxu0 %vm5230_vm12, %v5229_v63  ;;  %v2985_v62 = vor.u32 %v2984_v60, %v2981_v59  ;;  %v3033_v60 = vshrl.u32 %v5164_v57, 16 }
 0x10a   : > { %4439 = vmatpush3.bf16.msra.mxu1 %v5133_v0  ;;  %v2988_v0 = vshrl.u32 %v5151_v56, 16  ;;  %v3036_v56 = vshll.u32 %v5164_v57, 16 }
 0x10b   : > { %4440 = vmatprep.subr.bf16.mxu1 %v5229_v63 }
 0x10c   : > { %v2990_v5 = vrot.slane %v2988_v0, 2  ;;  %v3035_v0 = vrot.slane %v3033_v60, 2  ;;  %v3038_v1 = vrot.slane %v3036_v56, 3  ;;  %v5179_v60 = vld [vmem:[#allocation2 + $0x48] sm:$0xff]  }
 0x10d   : > { %4405 = vmatmul.mubr.msk.bf16.gmra.mrb[4].mxu1 %vm770_vm13, %v1363_v2  ;;  %v5160_v2 = vld [vmem:[%s6079_s1 + $0x118] sm:$0xff]  }
 0x10e   : > { %4408 = vmatprep.mubr.msk.bf16.mxu1 %vm5230_vm12, %v5229_v63  ;;  %4441 = vmatpush3.bf16.msra.mxu1 %v5139_v3  ;;  %v5150_v3 = vld [vmem:[#allocation2 + $0x48] ss:$0 sps:$4 sm:$0x11]  }
 0x10f   : > { %4597 = vmatmul.mubr.msk.bf16.gmra.mrb[20].mxu0 %vm770_vm13, %v2659_v4  ;;  %4442 = vmatprep.subr.bf16.mxu1 %v5229_v63  ;;  %v2986_v4 = vsel %vm2951_vm14, %v2976_v51, %v2985_v62  ;;  %v1376_v9 = vrot.slane %v5150_v3, 1  ;;  %v5161_v51 = vld [vmem:[#allocation2 + $0x28] sm:$0xff]  }
 0x110   : > { %4600 = vmatprep.mubr.msk.bf16.mxu0 %vm5230_vm12, %v5229_v63 }
 0x111   : > { %v1377_v12 = vsel %vm1358_vm5, %v1374_v49, %v1376_v9  ;;  %v5163_v49 = vld [vmem:[#allocation2 + $0x30] sm:$0xff]  }
 0x112   : > { %4443 = vmatpush3.bf16.msra.mxu1 %v5146_v8  ;;  %v5154_v8 = vld [vmem:[#allocation2 + $0x38] sm:$0xff]  }
 0x113   : > { %4700 = vmatprep.subr.bf16.mxu1 %v5229_v63  ;;  %v2997_v18 = vshrl.u32 %v5154_v8, 16 }
 0x115   : > { %4409 = vmatmul.mubr.msk.bf16.gmra.mrb[8].mxu1 %vm770_vm13, %v1365_v11  ;;  %v2994_v11 = vor.u32 %v2993_v6, %v2990_v5  ;;  %v2999_v16 = vrot.slane %v2997_v18, 2  ;;  %v5166_v6 = vld [vmem:[#allocation2 + $0x10] sm:$0xf8]  }
 0x116   : > { %4412 = vmatprep.mubr.msk.bf16.mxu1 %vm5230_vm12, %v5229_v63 }
 0x117   : > { %4601 = vmatmul.mubr.msk.bf16.gmra.mrb[24].mxu0 %vm770_vm13, %v2661_v29  ;;  %v3000_v29 = vshll.u32 %v5154_v8, 16  ;;  %v5167_v8 = vld [vmem:[#allocation2 + $0x18] sm:$0xff]  }
 0x118   : > { %4604 = vmatprep.mubr.msk.bf16.mxu0 %vm5230_vm12, %v5229_v63  ;;  %v3328_v18 = vrot.slane %v5167_v8, 3 }
 0x119   : > { %v3002_v17 = vrot.slane %v3000_v29, 3 }
 0x11b   : > { %v3003_v22 = vor.u32 %v3002_v17, %v2999_v16  ;;  %v3330_v16 = vrot.slane %v5169_v13, 3 }
 0x11d   : > { %4413 = vmatmul.mubr.msk.bf16.gmra.mrb[12].mxu1 %vm770_vm13, %v1367_v15  ;;  %v2995_v15 = vsel %vm2951_vm14, %v2985_v62, %v2994_v11  ;;  %v3004_v27 = vsel %vm2951_vm14, %v2994_v11, %v3003_v22  ;;  %v3327_v11 = vrot.slane %v5166_v6, 3  ;;  %v3331_v20 = vsel %vm3326_vm2, %v3328_v18, %v3330_v16 }
 0x11e   : > { %4416 = vmatprep.mubr.msk.bf16.mxu1 %vm5230_vm12, %v5229_v63 }
 0x11f   : > { %4605 = vmatmul.mubr.msk.bf16.gmra.mrb[28].mxu0 %vm770_vm13, %v2663_v19  ;;  %v5157_v19 = vld [vmem:[#allocation2 + $0x40] sm:$0xff]   ;;  %v3329_v36 = vsel %vm3326_vm2, %v3327_v11, %v3328_v18 }
 0x120   : > { %4608 = vmatprep.mubr.msk.bf16.mxu0 %vm5230_vm12, %v5229_v63  ;;  %v3006_v23 = vshrl.u32 %v5157_v19, 16  ;;  %v3009_v24 = vshll.u32 %v5157_v19, 16  ;;  %v5170_v19 = vld [vmem:[#allocation2 + $0x48] sm:$0xff]  }
 0x122   : > { %v3011_v30 = vrot.slane %v3009_v24, 3 }
 0x125   : > { %4417 = vmatmul.mubr.msk.bf16.gmra.mrb[16].mxu1 %vm770_vm13, %v1369_v28  ;;  %v3008_v28 = vrot.slane %v3006_v23, 2  ;;  %v3332_v23 = vrot.slane %v5171_v21, 3 }
 0x126   : > { %4420 = vmatprep.mubr.msk.bf16.mxu1 %vm5230_vm12, %v5229_v63 }
 0x127   : > { %4609 = vmatmul.mubr.msk.bf16.gmra.mrb[32].mxu0 %vm770_vm13, %v2665_v31  ;;  %v5159_v31 = vld [vmem:[#allocation2 + $0x48] sm:$0xff]   ;;  %v3012_v34 = vor.u32 %v3011_v30, %v3008_v28  ;;  %v5173_v28 = vld [vmem:[#allocation2 + $0x30] sm:$0xff]  }
 0x128   : > { %4620 = vmatprep.mubr.msk.bf16.mxu0 %vm5230_vm12, %v5229_v63  ;;  %v3015_v35 = vshrl.u32 %v5159_v31, 16  ;;  %v3018_v52 = vshll.u32 %v5159_v31, 16  ;;  %v2022_v31 = vshrl.u32 %v5174_v26, 16 }
 0x129   : > { %v3013_v40 = vsel %vm2951_vm14, %v3003_v22, %v3012_v34  ;;  %v1678_v22 = vrot.slane %v5170_v19, 1 }
 0x12a   : > { %v3017_v45 = vrot.slane %v3015_v35, 2  ;;  %v2024_v35 = vrot.slane %v2022_v31, 1 }
 0x12d   : > { %4421 = vmatmul.mubr.msk.bf16.gmra.mrb[20].mxu1 %vm770_vm13, %v1371_v41  ;;  %v3020_v41 = vrot.slane %v3018_v52, 3 }
 0x12e   : > { %4424 = vmatprep.mubr.msk.bf16.mxu1 %vm5230_vm12, %v5229_v63 }
 0x12f   : > { %4621 = vmatmul.mubr.msk.bf16.vlgmr.msra.gmra.mrb[0].mxu0 %vm770_vm13, %v2968_v44  ;;  %v1668_v44 = vrot.slane %v5158_v38, 1  ;;  %v3021_v47 = vor.u32 %v3020_v41, %v3017_v45 }
 0x130   : > { %4657 = vmatpush3.bf16.msra.mxu0 %v5143_v46  ;;  %4624 = vmatprep.mubr.msk.bf16.mxu0 %vm5230_vm12, %v5229_v63  ;;  %v5185_v46 = vld [vmem:[%s6079_s1 + $0x90] sm:$0xff]  }
 0x131   : > { %4658 = vmatprep.subr.bf16.mxu0 %v5229_v63  ;;  %v1669_v50 = vsel %vm1358_vm5, %v1666_v33, %v1668_v44  ;;  %v3022_v54 = vsel %vm2951_vm14, %v3012_v34, %v3021_v47  ;;  %v3334_v33 = vrot.slane %v5173_v28, 3 }
 0x133   : > { %v3335_v38 = vsel %vm3326_vm2, %v3332_v23, %v3334_v33 }
 0x134   : > { %4659 = vmatpush3.bf16.msra.mxu0 %v5149_v55  ;;  %v3026_v55 = vrot.slane %v3024_v14, 2  ;;  %v5178_v14 = vld [vmem:[#allocation2 + $0x48] sm:$0xff]  }
 0x135   : > { %4425 = vmatmul.mubr.msk.bf16.gmra.mrb[24].mxu1 %vm770_vm13, %v1373_v43  ;;  %4660 = vmatprep.subr.bf16.mxu0 %v5229_v63  ;;  %v3029_v43 = vrot.slane %v3027_v48, 3 }
 0x136   : > { %4428 = vmatprep.mubr.msk.bf16.mxu1 %vm5230_vm12, %v5229_v63 }
 0x137   : > { %4625 = vmatmul.mubr.msk.bf16.gmra.mrb[4].mxu0 %vm770_vm13, %v2977_v58  ;;  %v1670_v58 = vrot.slane %v5161_v51, 1  ;;  %v3030_v59 = vor.u32 %v3029_v43, %v3026_v55 }
 0x138   : > { %4628 = vmatprep.mubr.msk.bf16.mxu0 %vm5230_vm12, %v5229_v63  ;;  %4661 = vmatpush3.bf16.msra.mxu0 %v5155_v61 }
 0x139   : > { %4662 = vmatprep.subr.bf16.mxu0 %v5229_v63  ;;  %v1671_v61 = vsel %vm1358_vm5, %v1668_v44, %v1670_v58  ;;  %v3031_v62 = vsel %vm2951_vm14, %v3021_v47, %v3030_v59 }
 0x13c   : > { %4663 = vmatpush3.bf16.msra.mxu0 %v5160_v2  ;;  %v1672_v2 = vrot.slane %v5163_v49, 1 }
 0x13d   : > { %4429 = vmatmul.mubr.msk.bf16.gmra.mrb[28].mxu1 %vm770_vm13, %v1375_v7  ;;  %v3039_v7 = vor.u32 %v3038_v1, %v3035_v0 }
 0x13e   : > { %4432 = vmatprep.mubr.msk.bf16.mxu1 %vm5230_vm12, %v5229_v63  ;;  %v1673_v3 = vsel %vm1358_vm5, %v1670_v58, %v1672_v2  ;;  %v5180_v58 = vld [vmem:[#allocation2 + $0x50] ss:$0 sps:$4 sm:$0x33]  }
 0x13f   : > { %4629 = vmatmul.mubr.msk.bf16.gmra.mrb[8].mxu0 %vm770_vm13, %v2986_v4  ;;  %v5165_v4 = vld [vmem:[#allocation2 + $0x38] sm:$0xff]   ;;  %v3040_v5 = vsel %vm2951_vm14, %v3030_v59, %v3039_v7  ;;  %v2052_v49 = vshll.u32 %v5180_v58, 16 }
 0x140   : > { %4632 = vmatprep.mubr.msk.bf16.mxu0 %vm5230_vm12, %v5229_v63  ;;  %v1674_v9 = vrot.slane %v5165_v4, 1 }
 0x142   : > { %v1675_v29 = vsel %vm1358_vm5, %v1672_v2, %v1674_v9  ;;  %v2054_v2 = vrot.slane %v2052_v49, 2 }
 0x145   : > { %4433 = vmatmul.mubr.msk.bf16.gmra.mrb[32].mxu1 %vm770_vm13, %v1377_v12  ;;  %v5168_v12 = vld [vmem:[#allocation2 + $0x40] sm:$0xff]  }
 0x146   : > { %4444 = vmatprep.mubr.msk.bf16.mxu1 %vm5230_vm12, %v5229_v63 }
 0x147   : > { %4633 = vmatmul.mubr.msk.bf16.gmra.mrb[12].mxu0 %vm770_vm13, %v2995_v15  ;;  %v1676_v15 = vrot.slane %v5168_v12, 1 }
 0x148   : > { %4636 = vmatprep.mubr.msk.bf16.mxu0 %vm5230_vm12, %v5229_v63 }
 0x149   : > { %v1677_v17 = vsel %vm1358_vm5, %v1674_v9, %v1676_v15  ;;  %v1679_v24 = vsel %vm1358_vm5, %v1676_v15, %v1678_v22  ;;  %v5182_v9 = vld [vmem:[#allocation2 + $0x58] ss:$0 sps:$4 sm:$0x77]  }
 0x14a   : > { %v3344_v11 = vrot.slane %v5182_v9, 3 }
 0x14d   : > { %4445 = vmatmul.mubr.msk.bf16.vlgmr.msra.gmra.mrb[0].mxu1 %vm770_vm13, %v1665_v25  ;;  %v5172_v25 = vld [vmem:[#allocation2 + $0x50] ss:$0 sps:$4 sm:$0x11]  }
 0x14e   : > { %4704 = vmatpush3.bf16.msra.mxu1 %v5183_v32  ;;  %4448 = vmatprep.mubr.msk.bf16.mxu1 %vm5230_vm12, %v5229_v63  ;;  %v1680_v30 = vrot.slane %v5172_v25, 1  ;;  %v2025_v32 = vshll.u32 %v5174_v26, 16 }
 0x14f   : > { %4637 = vmatmul.mubr.msk.bf16.gmra.mrb[16].mxu0 %vm770_vm13, %v3004_v27  ;;  %4701 = vmatprep.subr.bf16.mxu1 %v5229_v63  ;;  %v3333_v27 = vsel %vm3326_vm2, %v3330_v16, %v3332_v23 }
 0x150   : > { %4640 = vmatprep.mubr.msk.bf16.mxu0 %vm5230_vm12, %v5229_v63  ;;  %v1681_v34 = vsel %vm1358_vm5, %v1678_v22, %v1680_v30  ;;  %v2027_v52 = vrot.slane %v2025_v32, 2 }
 0x152   : > { %4705 = vmatpush3.bf16.msra.mxu1 %v5184_v39  ;;  %v5175_v39 = vld [vmem:[#allocation2 + $0x38] sm:$0xff]  }
 0x153   : > { %4702 = vmatprep.subr.bf16.mxu1 %v5229_v63  ;;  %v3336_v42 = vrot.slane %v5175_v39, 3 }
 0x155   : > { %4449 = vmatmul.mubr.msk.bf16.gmra.mrb[4].mxu1 %vm770_vm13, %v1667_v37  ;;  %v5176_v37 = vld [vmem:[#allocation2 + $0x40] sm:$0xff]   ;;  %v3337_v48 = vsel %vm3326_vm2, %v3334_v33, %v3336_v42 }
 0x156   : > { %4452 = vmatprep.mubr.msk.bf16.mxu1 %vm5230_vm12, %v5229_v63  ;;  %4706 = vmatpush3.bf16.msra.mxu1 %v5185_v46  ;;  %v2031_v45 = vshrl.u32 %v5176_v37, 16  ;;  %v2034_v41 = vshll.u32 %v5176_v37, 16  ;;  %v6015_v33 = vld [vmem:[%s6080_s2] ss:$0 sm:$0xff] }
 0x157   : > { %4641 = vmatmul.mubr.msk.bf16.gmra.mrb[20].mxu0 %vm770_vm13, %v3013_v40  ;;  %4703 = vmatprep.subr.bf16.mxu1 %v5229_v63  ;;  %v2028_v40 = vor.u32 %v2027_v52, %v2024_v35  ;;  %v6020_v52 = vld [vmem:[%s6081_s3] ss:$0 sm:$0xff] }
 0x158   : > { %4644 = vmatprep.mubr.msk.bf16.mxu0 %vm5230_vm12, %v5229_v63  ;;  %v2033_v46 = vrot.slane %v2031_v45, 1  ;;  %v2036_v47 = vrot.slane %v2034_v41, 2 }
 0x159   : > { %v2029_v44 = vsel %vm1967_vm15, %v5629_v10, %v2028_v40 }
 0x15a   : > { %4707 = vmatpush3.bf16.msra.mxu1 %v5186_v53  ;;  %v2037_v51 = vor.u32 %v2036_v47, %v2033_v46  ;;  %v2040_v53 = vshrl.u32 %v5178_v14, 16 }
 0x15c   : > { %v2038_v55 = vsel %vm1967_vm15, %v2028_v40, %v2037_v51  ;;  %v2042_v43 = vrot.slane %v2040_v53, 1 }
 0x15d   : > { %4453 = vmatmul.mubr.msk.bf16.gmra.mrb[8].mxu1 %vm770_vm13, %v1669_v50  ;;  %v5177_v50 = vld [vmem:[#allocation2 + $0x40] sm:$0xff]  }
 0x15e   : > { %4456 = vmatprep.mubr.msk.bf16.mxu1 %vm5230_vm12, %v5229_v63  ;;  %v3338_v10 = vrot.slane %v5177_v50, 3 }
 0x15f   : > { %4645 = vmatmul.mubr.msk.bf16.gmra.mrb[24].mxu0 %vm770_vm13, %v3022_v54  ;;  %v2043_v54 = vshll.u32 %v5178_v14, 16 }
 0x160   : > { %4648 = vmatprep.mubr.msk.bf16.mxu0 %vm5230_vm12, %v5229_v63  ;;  %v3339_v59 = vsel %vm3326_vm2, %v3336_v42, %v3338_v10 }
 0x161   : > { %v2045_v57 = vrot.slane %v2043_v54, 2 }
 0x163   : > { %v2046_v56 = vor.u32 %v2045_v57, %v2042_v43 }
 0x165   : > { %4457 = vmatmul.mubr.msk.bf16.gmra.mrb[12].mxu1 %vm770_vm13, %v1671_v61  ;;  %v2049_v61 = vshrl.u32 %v5180_v58, 16  ;;  %v2047_v0 = vsel %vm1967_vm15, %v2037_v51, %v2046_v56 }
 0x166   : > { %4460 = vmatprep.mubr.msk.bf16.mxu1 %vm5230_vm12, %v5229_v63 }
 0x167   : > { %4649 = vmatmul.mubr.msk.bf16.gmra.mrb[28].mxu0 %vm770_vm13, %v3031_v62  ;;  %v3340_v62 = vrot.slane %v5179_v60, 3  ;;  %v2051_v1 = vrot.slane %v2049_v61, 1 }
 0x168   : > { %4652 = vmatprep.mubr.msk.bf16.mxu0 %vm5230_vm12, %v5229_v63 }
 0x169   : > { %v3341_v7 = vsel %vm3326_vm2, %v3338_v10, %v3340_v62  ;;  %v2055_v4 = vor.u32 %v2054_v2, %v2051_v1 }
 0x16b   : > { %v2056_v6 = vsel %vm1967_vm15, %v2046_v56, %v2055_v4 }
 0x16d   : > { %4461 = vmatmul.mubr.msk.bf16.gmra.mrb[16].mxu1 %vm770_vm13, %v1673_v3  ;;  %v5181_v3 = vld [vmem:[#allocation2 + $0x50] sm:$0xff]  }
 0x16e   : > { %4464 = vmatprep.mubr.msk.bf16.mxu1 %vm5230_vm12, %v5229_v63 }
 0x16f   : > { %4653 = vmatmul.mubr.msk.bf16.gmra.mrb[32].mxu0 %vm770_vm13, %v3040_v5  ;;  %v3342_v5 = vrot.slane %v5181_v3, 3 }
 0x170   : > { %4664 = vmatprep.mubr.msk.bf16.mxu0 %vm5230_vm12, %v5229_v63 }
 0x171   : > { %v3343_v8 = vsel %vm3326_vm2, %v3340_v62, %v3342_v5  ;;  %v3345_v18 = vsel %vm3326_vm2, %v3342_v5, %v3344_v11 }
 0x175   : > { %4465 = vmatmul.mubr.msk.bf16.gmra.mrb[20].mxu1 %vm770_vm13, %v1675_v29 }
 0x176   : > { %4468 = vmatprep.mubr.msk.bf16.mxu1 %vm5230_vm12, %v5229_v63 }
 0x177   : > { %4665 = vmatmul.mubr.msk.bf16.vlgmr.msra.gmra.mrb[0].mxu0 %vm770_vm13, %v3329_v36 }
 0x178   : > { %4668 = vmatprep.mubr.msk.bf16.mxu0 %vm5230_vm12, %v5229_v63 }
 0x17d   : > { %4469 = vmatmul.mubr.msk.bf16.gmra.mrb[24].mxu1 %vm770_vm13, %v1677_v17 }
 0x17e   : > { %4472 = vmatprep.mubr.msk.bf16.mxu1 %vm5230_vm12, %v5229_v63 }
 0x17f   : > { %4669 = vmatmul.mubr.msk.bf16.gmra.mrb[4].mxu0 %vm770_vm13, %v3331_v20 }
 0x180   : > { %4672 = vmatprep.mubr.msk.bf16.mxu0 %vm5230_vm12, %v5229_v63 }
 0x185   : > { %4473 = vmatmul.mubr.msk.bf16.gmra.mrb[28].mxu1 %vm770_vm13, %v1679_v24 }
 0x186   : > { %4476 = vmatprep.mubr.msk.bf16.mxu1 %vm5230_vm12, %v5229_v63 }
 0x187   : > { %4673 = vmatmul.mubr.msk.bf16.gmra.mrb[8].mxu0 %vm770_vm13, %v3333_v27 }
 0x188   : > { %4676 = vmatprep.mubr.msk.bf16.mxu0 %vm5230_vm12, %v5229_v63 }
 0x18d   : > { %4477 = vmatmul.mubr.msk.bf16.gmra.mrb[32].mxu1 %vm770_vm13, %v1681_v34 }
 0x18e   : > { %4508 = vmatprep.mubr.msk.bf16.mxu1 %vm5230_vm12, %v5229_v63 }
 0x18f   : > { %4677 = vmatmul.mubr.msk.bf16.gmra.mrb[12].mxu0 %vm770_vm13, %v3335_v38 }
 0x190   : > { %4680 = vmatprep.mubr.msk.bf16.mxu0 %vm5230_vm12, %v5229_v63 }
 0x195   : > { %4509 = vmatmul.mubr.msk.bf16.vlgmr.msra.gmra.mrb[20].mxu1 %vm770_vm13, %v2029_v44 }
 0x196   : > { %4512 = vmatprep.mubr.msk.bf16.mxu1 %vm5230_vm12, %v5229_v63 }
 0x197   : > { %4681 = vmatmul.mubr.msk.bf16.gmra.mrb[16].mxu0 %vm770_vm13, %v3337_v48 }
 0x198   : > { %4684 = vmatprep.mubr.msk.bf16.mxu0 %vm5230_vm12, %v5229_v63 }
 0x19d   : > { %4513 = vmatmul.mubr.msk.bf16.gmra.mrb[24].mxu1 %vm770_vm13, %v2038_v55 }
 0x19e   : > { %4516 = vmatprep.mubr.msk.bf16.mxu1 %vm5230_vm12, %v5229_v63 }
 0x19f   : > { %4685 = vmatmul.mubr.msk.bf16.gmra.mrb[20].mxu0 %vm770_vm13, %v3339_v59 }
 0x1a0   : > { %4688 = vmatprep.mubr.msk.bf16.mxu0 %vm5230_vm12, %v5229_v63 }
 0x1a5   : > { %4517 = vmatmul.mubr.msk.bf16.gmra.mrb[28].mxu1 %vm770_vm13, %v2047_v0 }
 0x1a6   : > { %4520 = vmatprep.mubr.msk.bf16.mxu1 %vm5230_vm12, %v5229_v63 }
 0x1a7   : > { %4689 = vmatmul.mubr.msk.bf16.gmra.mrb[24].mxu0 %vm770_vm13, %v3341_v7 }
 0x1a8   : > { %4692 = vmatprep.mubr.msk.bf16.mxu0 %vm5230_vm12, %v5229_v63 }
 0x1ad   : > { %4521 = vmatmul.mubr.msk.bf16.gmra.mrb[32].mxu1 %vm770_vm13, %v2056_v6 }
 0x1af   : > { %4693 = vmatmul.mubr.msk.bf16.gmra.mrb[28].mxu0 %vm770_vm13, %v3343_v8 }
 0x1b0   : > { %4696 = vmatprep.mubr.msk.bf16.mxu0 %vm5230_vm12, %v5229_v63 }
 0x1b7   : > { %4697 = vmatmul.mubr.msk.bf16.gmra.mrb[32].mxu0 %vm770_vm13, %v3345_v18 }
 0x220   : > { %v1767_v29 = vpop.f32.mrb[0].mxu1 }
 0x221   : > { %v4446_v12 = vpop.f32.mrb[1].mxu1 }
 0x222   : > { %v1770_v36 = vpop.f32.mrb[2].mxu1 }
 0x223   : > { %v4447_v13 = vpop.f32.mrb[3].mxu1 }
 0x228   : > { %v1775_v15 = vpop.f32.mrb[4].mxu1 }
 0x229   : > { %v4450_v16 = vpop.f32.mrb[5].mxu1 }
 0x22a   : > { %v1778_v17 = vpop.f32.mrb[6].mxu1 }
 0x22b   : > { %v4451_v19 = vpop.f32.mrb[7].mxu1 }
 0x230   : > { %v1783_v20 = vpop.f32.mrb[8].mxu1 }
 0x231   : > { %v4454_v21 = vpop.f32.mrb[9].mxu1 }
 0x232   : > { %v1786_v22 = vpop.f32.mrb[10].mxu1 }
 0x233   : > { %v4455_v23 = vpop.f32.mrb[11].mxu1 }
 0x238   : > { %v1791_v24 = vpop.f32.mrb[12].mxu1 }
 0x239   : > { %v4458_v25 = vpop.f32.mrb[13].mxu1 }
 0x23a   : > { %v1794_v63 = vpop.f32.mrb[14].mxu1 }
 0x23b   : > { %v4459_v26 = vpop.f32.mrb[15].mxu1 }
 0x240   : > { %v1799_v27 = vpop.f32.mrb[16].mxu1 }
 0x241   : > { %v4462_v28 = vpop.f32.mrb[17].mxu1 }
 0x242   : > { %v6010_v30 = vpop.f32.mrb[18].mxu1 }
 0x243   : > { %v4463_v31 = vpop.f32.mrb[19].mxu1 }
 0x24a   : > { %v3431_v32 = vpop.f32.mrb[0].mxu0 }
 0x24b   : > { %v4710_v34 = vadd.f32 %v3431_v32, %v1767_v29  ;;  %v4666_v35 = vpop.f32.mrb[1].mxu0 }
 0x24c   : > { %v3434_v37 = vpop.f32.mrb[2].mxu0 }
 0x24d   : > { %v3566_v38 = vmul.f32 %v4710_v34, %v6015_v33  ;;  %v4713_v39 = vadd.f32 %v3434_v37, %v1770_v36  ;;  %v4667_v40 = vpop.f32.mrb[3].mxu0 }
 0x24f   : > { %v3574_v45 = vadd.f32 %v6020_v52, %v3566_v38  ;;  %v3567_v41 = vmul.f32 %v4713_v39, %v6015_v33 }
 0x251   : > { %v3575_v42 = vadd.f32 %v6020_v52, %v3567_v41  ;;  %v3576_v46 = vmax.f32 %v3574_v45, 0.0 }
 0x252   : > { %v3439_v44 = vpop.f32.mrb[4].mxu0 }
 0x253   : > { %v3577_v47 = vmax.f32 %v3575_v42, 0.0  ;;  %v4716_v14 = vadd.f32 %v3439_v44, %v1775_v15  ;;  %v4670_v48 = vpop.f32.mrb[5].mxu0 }
 0x254   : > { %v3442_v50 = vpop.f32.mrb[6].mxu0 }
 0x255   : > { %v4143_v51 = vpack.c.bf16 %v3577_v47, %v3576_v46  ;;  %3540 = vst [vmem:[#allocation3 + $0x10] sm:$0xff] %v4716_v14  ;;  %v4719_v53 = vadd.f32 %v3442_v50, %v1778_v17  ;;  %v4671_v54 = vpop.f32.mrb[7].mxu0 }
 0x257   : > { %4144 = vst [vmem:[%s5367_s9] sm:$0xff] %v4143_v51   ;;  %3541 = vst [vmem:[#allocation3 + $0x18] sm:$0xff] %v4719_v53 }
 0x25a   : > { %v3447_v10 = vpop.f32.mrb[8].mxu0 }
 0x25b   : > { %v4722_v55 = vadd.f32 %v3447_v10, %v1783_v20  ;;  %v4674_v43 = vpop.f32.mrb[9].mxu0 }
 0x25c   : > { %v3450_v57 = vpop.f32.mrb[10].mxu0 }
 0x25d   : > { %3542 = vst [vmem:[#allocation3 + $0x20] sm:$0xff] %v4722_v55  ;;  %v4725_v58 = vadd.f32 %v3450_v57, %v1786_v22  ;;  %v4675_v59 = vpop.f32.mrb[11].mxu0 }
 0x25e   : > { %v3588_v60 = vld [vmem:[#allocation3 + $0x12] sm:$0xff] }
 0x25f   : > { %3543 = vst [vmem:[#allocation3 + $0x28] sm:$0xff] %v4725_v58  ;;  %v3590_v56 = vmul.f32 %v6015_v33, %v3588_v60 }
 0x261   : > { %v3592_v2 = vadd.f32 %v6020_v52, %v3590_v56 }
 0x262   : > { %v3455_v61 = vpop.f32.mrb[12].mxu0 }
 0x263   : > { %v4728_v49 = vadd.f32 %v3455_v61, %v1791_v24  ;;  %v4678_v62 = vpop.f32.mrb[13].mxu0  ;;  %v3594_v9 = vmax.f32 %v3592_v2, 0.0 }
 0x264   : > { %v3589_v0 = vld [vmem:[#allocation3 + $0x1a] sm:$0xff]  ;;  %v3458_v1 = vpop.f32.mrb[14].mxu0 }
 0x265   : > { %v3591_v7 = vmul.f32 %v6015_v33, %v3589_v0  ;;  %3544 = vst [vmem:[#allocation3 + $0x30] sm:$0xff] %v4728_v49  ;;  %v4731_v3 = vadd.f32 %v3458_v1, %v1794_v63  ;;  %v4679_v4 = vpop.f32.mrb[15].mxu0 }
 0x266   : > { %v3606_v5 = vld [vmem:[#allocation3 + $0x24] sm:$0xff] }
 0x267   : > { %v3593_v6 = vadd.f32 %v6020_v52, %v3591_v7  ;;  %3545 = vst [vmem:[#allocation3 + $0x38] sm:$0xff] %v4731_v3  ;;  %v3608_v18 = vmul.f32 %v6015_v33, %v3606_v5 }
 0x268   : > { %v2182_v8 = vpop.f32.mrb[20].mxu1 }
 0x269   : > { %v3595_v11 = vmax.f32 %v3593_v6, 0.0  ;;  %v4510_v29 = vpop.f32.mrb[21].mxu1  ;;  %v3610_v21 = vadd.f32 %v6020_v52, %v3608_v18 }
 0x26a   : > { %v3463_v12 = vpop.f32.mrb[16].mxu0  ;;  %v2185_v36 = vpop.f32.mrb[22].mxu1 }
 0x26b   : > { %v4148_v13 = vpack.c.bf16 %v3595_v11, %v3594_v9  ;;  %v4734_v15 = vadd.f32 %v3463_v12, %v1799_v27  ;;  %v4682_v16 = vpop.f32.mrb[17].mxu0  ;;  %v4511_v17 = vpop.f32.mrb[23].mxu1  ;;  %v3612_v28 = vmax.f32 %v3610_v21, 0.0 }
 0x26c   : > { %v3607_v19 = vld [vmem:[#allocation3 + $0x2c] sm:$0xff]  ;;  %v3466_v20 = vpop.f32.mrb[18].mxu0 }
 0x26d   : > { %4180 = vst [vmem:[%s5367_s9 + $0x8] sm:$0xff] %v4148_v13   ;;  %v3609_v22 = vmul.f32 %v6015_v33, %v3607_v19  ;;  %3546 = vst [vmem:[#allocation3 + $0x40] sm:$0xff] %v4734_v15  ;;  %v4737_v23 = vadd.f32 %v3466_v20, %v6010_v30  ;;  %v4683_v24 = vpop.f32.mrb[19].mxu0 }
 0x26e   : > { %v3624_v25 = vld [vmem:[#allocation3 + $0x36] sm:$0xff] }
 0x26f   : > { %v3611_v63 = vadd.f32 %v6020_v52, %v3609_v22  ;;  %v3626_v26 = vmul.f32 %v6015_v33, %v3624_v25  ;;  %v3644_v32 = vmul.f32 %v4737_v23, %v6015_v33 }
 0x270   : > { %v2190_v27 = vpop.f32.mrb[24].mxu1 }
 0x271   : > { %v3613_v31 = vmax.f32 %v3611_v63, 0.0  ;;  %v4514_v34 = vpop.f32.mrb[25].mxu1  ;;  %v3628_v30 = vadd.f32 %v6020_v52, %v3626_v26  ;;  %v3646_v46 = vadd.f32 %v6020_v52, %v3644_v32 }
 0x272   : > { %v3471_v35 = vpop.f32.mrb[20].mxu0  ;;  %v2193_v37 = vpop.f32.mrb[26].mxu1 }
 0x273   : > { %v4153_v38 = vpack.c.bf16 %v3613_v31, %v3612_v28  ;;  %v4740_v39 = vadd.f32 %v3471_v35, %v2182_v8  ;;  %v4686_v40 = vpop.f32.mrb[21].mxu0  ;;  %v4515_v45 = vpop.f32.mrb[27].mxu1  ;;  %v3630_v54 = vmax.f32 %v3628_v30, 0.0  ;;  %v3648_v55 = vmax.f32 %v3646_v46, 0.0 }
 0x274   : > { %v3625_v41 = vld [vmem:[#allocation3 + $0x3e] sm:$0xff]  ;;  %v3474_v42 = vpop.f32.mrb[22].mxu0 }
 0x275   : > { %4181 = vst [vmem:[%s5367_s9 + $0x10] sm:$0xff] %v4153_v38   ;;  %v3627_v44 = vmul.f32 %v6015_v33, %v3625_v41  ;;  %v3645_v47 = vmul.f32 %v4740_v39, %v6015_v33  ;;  %v4743_v14 = vadd.f32 %v3474_v42, %v2185_v36  ;;  %v4687_v48 = vpop.f32.mrb[23].mxu0 }
 0x277   : > { %v3629_v50 = vadd.f32 %v6020_v52, %v3627_v44  ;;  %v3647_v51 = vadd.f32 %v6020_v52, %v3645_v47  ;;  %3549 = vst [vmem:[#allocation3 + $0x58] sm:$0xff] %v4743_v14 }
 0x278   : > { %v2198_v53 = vpop.f32.mrb[28].mxu1 }
 0x279   : > { %v3631_v10 = vmax.f32 %v3629_v50, 0.0  ;;  %v3649_v43 = vmax.f32 %v3647_v51, 0.0  ;;  %v4518_v57 = vpop.f32.mrb[29].mxu1 }
 0x27a   : > { %v3479_v58 = vpop.f32.mrb[24].mxu0  ;;  %v2201_v59 = vpop.f32.mrb[30].mxu1 }
 0x27b   : > { %v4158_v60 = vpack.c.bf16 %v3631_v10, %v3630_v54  ;;  %v4163_v56 = vpack.c.bf16 %v3649_v43, %v3648_v55  ;;  %v4746_v61 = vadd.f32 %v3479_v58, %v2190_v27  ;;  %v4690_v49 = vpop.f32.mrb[25].mxu0  ;;  %v4519_v62 = vpop.f32.mrb[31].mxu1 }
 0x27c   : > { %v3482_v0 = vpop.f32.mrb[26].mxu0 }
 0x27d   : > { %4182 = vst [vmem:[%s5367_s9 + $0x18] sm:$0xff] %v4158_v60   ;;  %4183 = vst [vmem:[%s5367_s9 + $0x20] sm:$0xff] %v4163_v56   ;;  %v4749_v1 = vadd.f32 %v3482_v0, %v2193_v37  ;;  %v4691_v2 = vpop.f32.mrb[27].mxu0 }
 0x27e   : > { %3550 = vst [vmem:[#allocation3 + $0x60] sm:$0xff] %v4746_v61 }
 0x27f   : > { %3551 = vst [vmem:[#allocation3 + $0x68] sm:$0xff] %v4749_v1 }
 0x280   : > { %v2206_v7 = vpop.f32.mrb[32].mxu1 }
 0x281   : > { %v4522_v3 = vpop.f32.mrb[33].mxu1 }
 0x282   : > { %v3487_v4 = vpop.f32.mrb[28].mxu0  ;;  %v2209_v5 = vpop.f32.mrb[34].mxu1 }
 0x283   : > { %v4752_v6 = vadd.f32 %v3487_v4, %v2198_v53  ;;  %v4694_v8 = vpop.f32.mrb[29].mxu0  ;;  %v4523_v9 = vpop.f32.mrb[35].mxu1 }
 0x284   : > { %v3490_v18 = vpop.f32.mrb[30].mxu0 }
 0x285   : > { %v3660_v11 = vld [vmem:[#allocation3 + $0x5a] sm:$0xff]  ;;  %3552 = vst [vmem:[#allocation3 + $0x70] sm:$0xff] %v4752_v6  ;;  %v4755_v12 = vadd.f32 %v3490_v18, %v2201_v59  ;;  %v4695_v36 = vpop.f32.mrb[31].mxu0 }
 0x286   : > { %v3662_v29 = vmul.f32 %v6015_v33, %v3660_v11  ;;  %v3661_v13 = vld [vmem:[#allocation3 + $0x62] sm:$0xff] }
 0x287   : > { %v3663_v16 = vmul.f32 %v6015_v33, %v3661_v13  ;;  %3553 = vst [vmem:[#allocation3 + $0x78] sm:$0xff] %v4755_v12 }
 0x288   : > { %v3664_v15 = vadd.f32 %v6020_v52, %v3662_v29 }
 0x289   : > { %v3665_v17 = vadd.f32 %v6020_v52, %v3663_v16 }
 0x28a   : > { %v3495_v19 = vpop.f32.mrb[32].mxu0  ;;  %v3666_v20 = vmax.f32 %v3664_v15, 0.0 }
 0x28b   : > { %v3667_v21 = vmax.f32 %v3665_v17, 0.0  ;;  %v4758_v22 = vadd.f32 %v3495_v19, %v2206_v7  ;;  %v4698_v23 = vpop.f32.mrb[33].mxu0 }
 0x28c   : > { %v3678_v24 = vld [vmem:[#allocation3 + $0x6c] sm:$0xff]  ;;  %v3498_v25 = vpop.f32.mrb[34].mxu0 }
 0x28d   : > { %v4168_v63 = vpack.c.bf16 %v3667_v21, %v3666_v20  ;;  %v3680_v26 = vmul.f32 %v6015_v33, %v3678_v24  ;;  %3554 = vst [vmem:[#allocation3 + $0x80] sm:$0xff] %v4758_v22  ;;  %v4761_v27 = vadd.f32 %v3498_v25, %v2209_v5  ;;  %v4699_v28 = vpop.f32.mrb[35].mxu0 }
 0x28e   : > { %v3679_v31 = vld [vmem:[#allocation3 + $0x74] sm:$0xff] }
 0x28f   : > { %4184 = vst [vmem:[%s5367_s9 + $0x28] sm:$0xff] %v4168_v63   ;;  %v3682_v32 = vadd.f32 %v6020_v52, %v3680_v26  ;;  %v3681_v34 = vmul.f32 %v6015_v33, %v3679_v31  ;;  %3555 = vst [vmem:[#allocation3 + $0x88] sm:$0xff] %v4761_v27 }
 0x291   : > { %v3683_v35 = vadd.f32 %v6020_v52, %v3681_v34  ;;  %v3684_v37 = vmax.f32 %v3682_v32, 0.0 }
 0x293   : > { %v3685_v38 = vmax.f32 %v3683_v35, 0.0 }
 0x294   : > { %v3696_v39 = vld [vmem:[#allocation3 + $0x7e] sm:$0xff] }
 0x295   : > { %v4173_v40 = vpack.c.bf16 %v3685_v38, %v3684_v37  ;;  %v3698_v45 = vmul.f32 %v6015_v33, %v3696_v39 }
 0x296   : > { %v3697_v30 = vld [vmem:[#allocation3 + $0x86] sm:$0xff] }
 0x297   : > { %4185 = vst [vmem:[%s5367_s9 + $0x30] sm:$0xff] %v4173_v40   ;;  %v3700_v41 = vadd.f32 %v6020_v52, %v3698_v45  ;;  %v3699_v42 = vmul.f32 %v6015_v33, %v3697_v30 }
 0x299   : > { %v3701_v44 = vadd.f32 %v6020_v52, %v3699_v42  ;;  %v3702_v46 = vmax.f32 %v3700_v41, 0.0 }
 0x29b   : > { %v3703_v47 = vmax.f32 %v3701_v44, 0.0 }
 0x29d   : > { %v4178_v14 = vpack.c.bf16 %v3703_v47, %v3702_v46 }
 0x29f   : > { %4186 = vst [vmem:[%s5367_s9 + $0x38] sm:$0xff] %v4178_v14  }
 0x2a0 PF: > { %s14_s19 = sadd.s32 1, %s5225_s19   ;;  %s6119_s15 = smov %s5217_s17 }
 0x2a1   : > { %p11_p11 = scmp.ge.s32.totalorder %s14_s19, 6   ;;  %s6120_s16 = smov %s5221_s18 }
 0x2a2   : > { %s6121_s17 = smov %s6124_s20  ;;  %s6122_s18 = smov %s6128_s21 }
 0x2a3   :  { %13 = sbr.rel (!%p11_p11) target bundleno = 3 (0x3), region = 92 }

// kernel: _lambda_.3
= control target key start
LH: loop header
LB: loop body
LE: loop exit
PB: predicated region body
PF: predicated region fallthrough
CT: control target
= control target key end

     0   :  { %s8072_s15 = smov 0   ;;  %s8074_s16 = smov 0   ;;  %s9001_s0 = inlined_call_operand.vmem [shape: bf16[2,16,16,128], index: 0, kind: input, shape index: {}]   ;;  %s9002_s1 = inlined_call_operand.vmem [shape: bf16[1152,128], index: 1, kind: input, shape index: {}]   ;;  %s9003_s2 = inlined_call_operand.vmem [shape: f32[1,128], index: 2, kind: input, shape index: {}]   ;;  %s9004_s3 = inlined_call_operand.vmem [shape: f32[1,128], index: 3, kind: input, shape index: {}]   ;;  %s9005_s4 = inlined_call_operand.vmem [shape: f32[2,256,128], index: 4, kind: output, shape index: {}]  }
   0x1   :  { %s8076_s17 = smov 0  }
   0x2 LB: > { %s26_s18 = sadd.s32 1, %s8040_s16  ;;  %p6382_p0 = scmp.ge.s32.totalorder %s8044_s17, 1  ;;  %s8044_s17 = sphi %s8076_s17, %s14_s17   ;;  %s8040_s16 = sphi %s8074_s16, %s9111_s16   ;;  %s8036_s15 = sphi %s8072_s15, %s9110_s15  }
   0x3   : > { %p28_p1 = scmp.ge.s32.totalorder %s26_s18, 2  ;;  %p176_p2 = scmp.lt.s32.totalorder %s8044_s17, 3 }
   0x5   : > { %s9113_s18 = smov (%p28_p1, %s26_s18), 0  ;;  %p177_p3 = pnand %p6382_p0, %p176_p2 }
   0x6   : > { %v7772_v0 = vld [vmem:[%s9002_s1] sm:$0xff] (!%p177_p3)   ;;  %v7774_v2 = vld [vmem:[%s9002_s1 + $0x8] sm:$0xff] (!%p177_p3)   ;;  %v8046_v4 = vmov (!%p177_p3), 0   ;;  %v7776_v5 = vld [vmem:[%s9002_s1 + $0x10] sm:$0xff] (!%p177_p3)   ;;  %p206_p4 = scmp.lt.s32.totalorder (!%p177_p3), %s8036_s15, 1  ;;  %vm223_vm0 = vcmask (!%p177_p3), 1040384  }
   0x7   : > { %180 = sbr.rel (%p177_p3) target bundleno = 620 (0x26c), region = 36  ;;  %v7773_v1 = vld [vmem:[%s9002_s1 + $0x100] sm:$0xff] (!%p177_p3)   ;;  %6903 = vmatprep.subr.bf16.mxu1 (!%p177_p3), %v7772_v0  ;;  %v7775_v3 = vld [vmem:[%s9002_s1 + $0x108] sm:$0xff] (!%p177_p3)   ;;  %926 = vst [vmem:[#allocation2 + $0x4] sm:$0xf] (!%p177_p3), %v8046_v4  ;;  %v7777_v6 = vld [vmem:[%s9002_s1 + $0x110] sm:$0xff] (!%p177_p3)  }
   0x8   : > { %7111 = vmatprep.subr.bf16.mxu0 (!%p177_p3), %v7773_v1  ;;  %6904 = vmatpush3.bf16.msra.mxu1 (!%p177_p3), %v7772_v0  ;;  %975 = vst [vmem:[#allocation2 + $0x9c] sm:$0xf] (!%p177_p3), %v8046_v4  ;;  %v7778_v7 = vld [vmem:[%s9002_s1 + $0x18] sm:$0xff] (!%p177_p3)   ;;  %v7780_v9 = vld [vmem:[%s9002_s1 + $0x20] sm:$0xff] (!%p177_p3)   ;;  %vm9009_vm1 = vcmask (!%p177_p3), 1043456   ;;  %vm9008_vm2 = vcmask (!%p177_p3), 1041408  }
   0x9   : > { %7112 = vmatpush3.bf16.msra.mxu0 (!%p177_p3), %v7773_v1  ;;  %6905 = vmatprep.subr.bf16.mxu1 (!%p177_p3), %v7774_v2  ;;  %v7779_v8 = vld [vmem:[%s9002_s1 + $0x118] sm:$0xff] (!%p177_p3)   ;;  %v7781_v10 = vld [vmem:[%s9002_s1 + $0x120] sm:$0xff] (!%p177_p3)   ;;  %vm9006_vm3 = vcmask (!%p177_p3), 1042433   ;;  %v7782_v11 = vld [vmem:[%s9002_s1 + $0x28] sm:$0xff] (!%p177_p3)   ;;  %vm9007_vm4 = vsmask.f32 (!%p177_p3), 256 }
   0xa   : > { %7113 = vmatprep.subr.bf16.mxu0 (!%p177_p3), %v7775_v3  ;;  %v226_v12 = vld [vmem:[#allocation2] sm:$0x1] (!%p177_p3)  ;;  %vm241_vm5 = vcmask (!%p177_p3), 1043458   ;;  %v7783_v13 = vld [vmem:[%s9002_s1 + $0x128] sm:$0xff] (!%p177_p3)   ;;  %vm8134_vm6 = vmand (!%p177_p3), %vm223_vm0, %vm9007_vm4  ;;  %vm459_vm7 = vsmask.f32 (!%p177_p3), 7938 }
   0xb   : > { %v7784_v15 = vld [vmem:[%s9002_s1 + $0x30] sm:$0xff] (!%p177_p3)   ;;  %v227_v16 = vsel (!%p177_p3), %vm8134_vm6, 0, %v226_v12  ;;  %vm230_vm9 = vsmask.f32 (!%p177_p3), 1282  ;;  %v232_v17 = vld [vmem:[#allocation2 + $0x8] sm:$0x3] (!%p177_p3) }
   0xc   : > { %6906 = vmatpush3.bf16.msra.mxu1 (!%p177_p3), %v7774_v2  ;;  %v7785_v18 = vld [vmem:[%s9002_s1 + $0x130] sm:$0xff] (!%p177_p3)   ;;  %228 = vst [vmem:[#allocation2] sm:$0x1] (!%p177_p3), %v227_v16  ;;  %vm236_vm10 = vsmask.f32 (!%p177_p3), 2310  ;;  %vm8154_vm13 = vmand (!%p177_p3), %vm9008_vm2, %vm230_vm9  ;;  %v8161_v25 = vld [vmem:[%s9002_s1 + $0x38] sm:$0xff] (!%p177_p3)  }
   0xd   : > { %7114 = vmatpush3.bf16.msra.mxu0 (!%p177_p3), %v7775_v3  ;;  %6907 = vmatprep.subr.bf16.mxu1 (!%p177_p3), %v7776_v5  ;;  %v238_v19 = vld [vmem:[#allocation2 + $0x10] sm:$0x6] (!%p177_p3)  ;;  %vm242_vm11 = vsmask.f32 (!%p177_p3), 3338  ;;  %vm9010_vm12 = vsmask.f32 (!%p177_p3), 7942  ;;  %vm8167_vm0 = vmand (!%p177_p3), %vm9006_vm3, %vm236_vm10 }
   0xe   : > { %7115 = vmatprep.subr.bf16.mxu0 %v7777_v6  ;;  %s9115_s15 = smov (!%p206_p4, %s8036_s15), 1  ;;  %vm314_vm14 = vsmask.f32 1280  ;;  %vm315_vm15 = vsmask.f32 5392  ;;  %v233_v26 = vsel %vm8154_vm13, 0, %v232_v17  ;;  %vm8177_vm9 = vmand %vm9009_vm1, %vm459_vm7 }
   0xf   : > { %s6667_s13 = sshll.u32 %s9115_s15, 7  ;;  %234 = vst [vmem:[#allocation2 + $0x8] sm:$0x3] %v233_v26  ;;  %v239_v31 = vsel %vm8167_vm0, 0, %v238_v19  ;;  %vm355_vm10 = vsmask.f32 2304  ;;  %vm8186_vm8 = vmand %vm241_vm5, %vm242_vm11 }
  0x10   : > { %6908 = vmatpush3.bf16.msra.mxu1 %v7776_v5  ;;  %s8141_s24 = scalar_lea.vmem %s9001_s0, %s6667_s13  ;;  %240 = vst [vmem:[#allocation2 + $0x10] sm:$0x6] %v239_v31  ;;  %vm356_vm3 = vsmask.f32 6416  ;;  %v7787_v39 = vld [vmem:[%s9002_s1 + $0x138] sm:$0xff]   ;;  %vm8192_vm7 = vmor %vm314_vm14, %vm315_vm15  ;;  %vm9033_vm11 = vcmask 1043457  }
  0x11   : > { %7116 = vmatpush3.bf16.msra.mxu0 %v7777_v6  ;;  %6909 = vmatprep.subr.bf16.mxu1 %v7778_v7  ;;  %v312_v20 = vld [vmem:[%s8141_s24] sm:$0xf]  ;;  %v313_v21 = vld [vmem:[%s8141_s24 + $0x4] sm:$0xf]  ;;  %v6387_v30 = vld [vmem:[%s8141_s24 + $0x8] sm:$0xf] }
  0x12   : > { %7117 = vmatprep.subr.bf16.mxu0 %v7779_v8  ;;  %v318_v23 = vshrl.u32 %v312_v20, 16  ;;  %v321_v24 = vshll.u32 %v312_v20, 16  ;;  %v327_v28 = vshrl.u32 %v313_v21, 16  ;;  %v330_v29 = vshll.u32 %v313_v21, 16  ;;  %v6388_v34 = vld [vmem:[%s8141_s24 + $0xc] sm:$0xf]  ;;  %vm8200_vm2 = vmand %vm9033_vm11, %vm9010_vm12 }
  0x13   : > { %v359_v35 = vshrl.u32 %v6387_v30, 16  ;;  %v362_v43 = vshll.u32 %v6387_v30, 16  ;;  %v368_v44 = vshrl.u32 %v6388_v34, 16  ;;  %v923_v45 = vld [vmem:[#allocation2] sm:$0xf]  ;;  %v371_v48 = vshll.u32 %v6388_v34, 16 }
  0x14   : > { %6910 = vmatpush3.bf16.msra.mxu1 %v7778_v7  ;;  %v320_v32 = vrot.slane %v318_v23, 6  ;;  %v323_v33 = vrot.slane %v321_v24, 7  ;;  %v329_v37 = vrot.slane %v327_v28, 6  ;;  %v332_v38 = vrot.slane %v330_v29, 7  ;;  %v8214_v57 = vld [vmem:[%s9002_s1 + $0x40] sm:$0xff]   ;;  %s6668_s9 = sshll.u32 %s9115_s15, 8 }
  0x15   : > { %7118 = vmatpush3.bf16.msra.mxu0 %v7779_v8  ;;  %6911 = vmatprep.subr.bf16.mxu1 %v7780_v9  ;;  %v361_v42 = vrot.slane %v359_v35, 5  ;;  %vm380_vm1 = vsmask.f32 7946  ;;  %v924_v49 = vsel %vm8177_vm9, 0, %v923_v45  ;;  %v364_v52 = vrot.slane %v362_v43, 6  ;;  %v8230_v0 = vld [vmem:[%s9002_s1 + $0x140] sm:$0xff]   ;;  %s8893_s12 = scalar_lea.vmem %s9005_s4, %s6668_s9 }
  0x16   : > { %7119 = vmatprep.subr.bf16.mxu0 %v7781_v10  ;;  %v324_v41 = vor.u32 %v323_v33, %v320_v32  ;;  %v333_v47 = vor.u32 %v332_v38, %v329_v37  ;;  %v370_v53 = vrot.slane %v368_v44, 5  ;;  %925 = vst [vmem:[#allocation2] sm:$0xf] %v924_v49  ;;  %vm9036_vm15 = vcmask 1041408   ;;  %v244_v58 = vld [vmem:[#allocation2 + $0x18] sm:$0xc]  ;;  %vm8220_vm12 = vmand %vm241_vm5, %vm380_vm1 }
  0x17   : > { %vm8207_vm4 = vmand %vm9036_vm15, %vm314_vm14  ;;  %v9037_v55 = vmov 0  ;;  %v373_v56 = vrot.slane %v371_v48, 6  ;;  %vm247_vm11 = vcmask 1043459   ;;  %v365_v60 = vor.u32 %v364_v52, %v361_v42  ;;  %v6389_v63 = vld [vmem:[%s8141_s24 + $0x10] sm:$0xf] }
  0x18   : > { %6912 = vmatpush3.bf16.msra.mxu1 %v7780_v9  ;;  %v325_v50 = vrot.slane %v324_v41, 4  ;;  %v335_v54 = vrot.slane %v333_v47, 4  ;;  %v9038_v55 = vsel %vm8207_vm4, 4294967295, %v9037_v55  ;;  %v9039_v61 = vmov 0  ;;  %v341_v1 = vld [vmem:[#allocation2 + $0x8] sm:$0xe]  ;;  %vm8234_vm15 = vmor %vm355_vm10, %vm356_vm3 }
  0x19   : > { %7120 = vmatpush3.bf16.msra.mxu0 %v7781_v10  ;;  %6913 = vmatprep.subr.bf16.mxu1 %v7782_v11  ;;  %v9040_v61 = vsel %vm8220_vm12, 4294967295, %v9039_v61  ;;  %v245_v62 = vsel %vm8186_vm8, 0, %v244_v58  ;;  %vm248_vm14 = vsmask.f32 7950  ;;  %v9041_v2 = vmov 0 }
  0x1a   : > { %7121 = vmatprep.subr.bf16.mxu0 %v7783_v13  ;;  %v334_v59 = vsel %vm8192_vm7, %v325_v50, %v333_v47  ;;  %v9042_v2 = vsel %vm8234_vm15, 4294967295, %v9041_v2  ;;  %v374_v3 = vor.u32 %v373_v56, %v370_v53  ;;  %v927_v4 = vld [vmem:[#allocation2 + $0x8] sm:$0x1]  ;;  %246 = vst [vmem:[#allocation2 + $0x18] sm:$0xc] %v245_v62  ;;  %v401_v5 = vshll.u32 %v6389_v63, 16  ;;  %vm8250_vm1 = vmand %vm247_vm11, %vm248_vm14 }
  0x1b   : > { %344 = vst [vmem:[#allocation2 + $0xc] sm:$0xf] %v334_v59  ;;  %v404_v6 = vshrl.u32 %v6389_v63, 16  ;;  %v342_v7 = vsel %vm8200_vm2, %v324_v41, %v341_v1  ;;  %v346_v8 = vld [vmem:[#allocation2 + $0x10] sm:$0x3]  ;;  %v366_v9 = vrot.slane %v365_v60, 4 }
  0x1c   : > { %6914 = vmatpush3.bf16.msra.mxu1 %v7782_v11  ;;  %v382_v10 = vld [vmem:[#allocation2 + $0x10] sm:$0xc]  ;;  %v928_v11 = vsel %vm8134_vm6, 0, %v927_v4  ;;  %343 = vst [vmem:[#allocation2 + $0x8] sm:$0xe] %v342_v7  ;;  %v347_v12 = vsel %vm8207_vm4, %v335_v54, %v346_v8  ;;  %vm9045_vm3 = vcmask 1042432  }
  0x1d   : > { %7122 = vmatpush3.bf16.msra.mxu0 %v7783_v13  ;;  %6915 = vmatprep.subr.bf16.mxu1 %v7784_v15  ;;  %v376_v13 = vrot.slane %v374_v3, 4  ;;  %929 = vst [vmem:[#allocation2 + $0x8] sm:$0x1] %v928_v11  ;;  %v6390_v17 = vld [vmem:[%s8141_s24 + $0x14] sm:$0xf]  ;;  %v375_v19 = vsel %vm8234_vm15, %v366_v9, %v374_v3  ;;  %v406_v20 = vrot.slane %v404_v6, 4  ;;  %vm8260_vm5 = vmand %vm9045_vm3, %vm355_vm10 }
  0x1e   : > { %7123 = vmatprep.subr.bf16.mxu0 %v7785_v18  ;;  %348 = vst [vmem:[#allocation2 + $0x10] sm:$0x3] %v347_v12  ;;  %v410_v21 = vshll.u32 %v6390_v17, 16  ;;  %v414_v23 = vshrl.u32 %v6390_v17, 16  ;;  %385 = vst [vmem:[#allocation2 + $0x14] sm:$0xf] %v375_v19 }
  0x1f   : > { %v250_v24 = vld [vmem:[#allocation2 + $0x20] sm:$0x8]  ;;  %vm9048_vm11 = vsmask.f32 7440  ;;  %vm9049_vm14 = vsmask.f32 3328 }
  0x20   : > { %6916 = vmatpush3.bf16.msra.mxu1 %v7784_v15  ;;  %v383_v15 = vsel %vm8220_vm12, %v365_v60, %v382_v10  ;;  %v412_v29 = vrot.slane %v410_v21, 5  ;;  %v416_v30 = vrot.slane %v414_v23, 4  ;;  %v251_v31 = vsel %vm8250_vm1, 0, %v250_v24  ;;  %vm8268_vm15 = vmor %vm9049_vm14, %vm9048_vm11  ;;  %v253_v33 = vld [vmem:[#allocation2 + $0x24] sm:$0x1]  ;;  %v7801_v47 = vld [vmem:[%s9002_s1 + $0x48] sm:$0xff]  }
  0x21   : > { %7124 = vmatpush3.bf16.msra.mxu0 %v7785_v18  ;;  %6917 = vmatprep.subr.bf16.mxu1 %v8161_v25  ;;  %v403_v18 = vrot.slane %v401_v5, 5  ;;  %384 = vst [vmem:[#allocation2 + $0x10] sm:$0xc] %v383_v15  ;;  %252 = vst [vmem:[#allocation2 + $0x20] sm:$0x8] %v251_v31  ;;  %vm9053_vm3 = vcmask 1043456  }
  0x22   : > { %7125 = vmatprep.subr.bf16.mxu0 %v7787_v39  ;;  %v6391_v34 = vld [vmem:[%s8141_s24 + $0x18] sm:$0xf]  ;;  %v417_v37 = vor.u32 %v416_v30, %v412_v29  ;;  %v256_v38 = vld [vmem:[#allocation2 + $0x2c] sm:$0x3]  ;;  %vm9052_vm10 = vmmov %vm9049_vm14  ;;  %vm9017_vm12 = vsmask.f32 6400 }
  0x23   : > { %v407_v28 = vor.u32 %v406_v20, %v403_v18  ;;  %v388_v35 = vld [vmem:[#allocation2 + $0x18] sm:$0x7]  ;;  %vm8275_vm4 = vmand %vm9053_vm3, %vm9052_vm10  ;;  %v422_v43 = vld [vmem:[#allocation2 + $0x18] sm:$0x8]  ;;  %v254_v44 = vsel %vm8134_vm6, 0, %v253_v33  ;;  %v440_v45 = vshrl.u32 %v6391_v34, 16  ;;  %vm9059_vm3 = vnez %v9040_v61 }
  0x24   : > { %6918 = vmatpush3.bf16.msra.mxu1 %v8161_v25  ;;  %v7788_v25 = vld [vmem:[#allocation2] sm:$0xff]   ;;  %v389_v41 = vsel %vm8260_vm5, %v376_v13, %v388_v35  ;;  %v7789_v48 = vld [vmem:[#allocation2 + $0x8] sm:$0xfe]   ;;  %v423_v49 = vsel %vm8250_vm1, %v403_v18, %v422_v43  ;;  %255 = vst [vmem:[#allocation2 + $0x24] sm:$0x1] %v254_v44  ;;  %v418_v53 = vrot.slane %v417_v37, 4 }
  0x25   : > { %7126 = vmatpush3.bf16.msra.mxu0 %v7787_v39  ;;  %6955 = vmatprep.subr.bf16.mxu1 %v8214_v57  ;;  %v408_v42 = vrot.slane %v407_v28, 4  ;;  %390 = vst [vmem:[#allocation2 + $0x18] sm:$0x7] %v389_v41  ;;  %v7791_v50 = vld [vmem:[#allocation2 + $0x8] sm:$0xff]   ;;  %424 = vst [vmem:[#allocation2 + $0x18] sm:$0x8] %v423_v49 }
  0x26   : > { %7163 = vmatprep.subr.bf16.mxu0 %v8230_v0  ;;  %6919 = vmatprep.mubr.bf16.mxu1 %v7788_v25  ;;  %v3263_v56 = vshrl.u32 %v7789_v48, 16  ;;  %v3266_v58 = vshll.u32 %v7789_v48, 16  ;;  %v442_v60 = vrot.slane %v440_v45, 7  ;;  %v443_v62 = vshll.u32 %v6391_v34, 16  ;;  %v6392_v9 = vld [vmem:[%s8141_s24 + $0x1c] sm:$0xf] }
  0x27   : > { %v413_v52 = vsel %vm8268_vm15, %v408_v42, %v412_v29  ;;  %6920 = vmatmul.mubr.bf16.vlgmr.msra.gmra.mrb[0].mxu1 %v7791_v50  ;;  %v257_v63 = vsel %vm8154_vm13, 0, %v256_v38  ;;  %vm437_vm11 = vsmask.f32 4368  ;;  %v7808_v10 = vld [vmem:[%s9002_s1 + $0x50] sm:$0xff]   ;;  %v448_v15 = vshrl.u32 %v6392_v9, 16  ;;  %v7815_v38 = vld [vmem:[%s9002_s1 + $0x58] sm:$0xff]  }
  0x28   : > { %v7790_v54 = vld [vmem:[#allocation2 + $0x10] sm:$0xff]   ;;  %425 = vst [vmem:[#allocation2 + $0x1c] sm:$0xf] %v413_v52  ;;  %v3265_v1 = vrot.slane %v3263_v56, 1  ;;  %v3268_v3 = vrot.slane %v3266_v58, 2  ;;  %6956 = vmatpush3.bf16.msra.mxu1 %v8214_v57  ;;  %v445_v8 = vor.u32 %v443_v62, %v442_v60  ;;  %v451_v18 = vshll.u32 %v6392_v9, 16 }
  0x29   : > { %v7796_v59 = vld [vmem:[#allocation2 + $0x10] sm:$0xff]   ;;  %v3271_v4 = vshrl.u32 %v7790_v54, 16  ;;  %v3274_v5 = vshll.u32 %v7790_v54, 16  ;;  %v428_v6 = vld [vmem:[#allocation2 + $0x20] sm:$0xf]  ;;  %6957 = vmatprep.subr.bf16.mxu1 %v7801_v47  ;;  %v9057_v24 = vmov 0 }
  0x2a   : > { %6923 = vmatprep.mubr.bf16.mxu1 %v7796_v59  ;;  %258 = vst [vmem:[#allocation2 + $0x2c] sm:$0x3] %v257_v63  ;;  %v429_v7 = vsel %vm8275_vm4, %v418_v53, %v428_v6  ;;  %v3269_v11 = vor.u32 %v3268_v3, %v3265_v1  ;;  %v6393_v57 = vld [vmem:[%s8141_s24 + $0x20] sm:$0xf]  ;;  %vm9056_vm14 = vsmask.f32 256 }
  0x2b   : > { %v3273_v12 = vrot.slane %v3271_v4, 1  ;;  %v3276_v13 = vrot.slane %v3274_v5, 2  ;;  %430 = vst [vmem:[#allocation2 + $0x20] sm:$0xf] %v429_v7  ;;  %v461_v17 = vld [vmem:[#allocation2 + $0x24] sm:$0xf]  ;;  %vm8304_vm10 = vmor %vm9056_vm14, %vm437_vm11  ;;  %vm9060_vm11 = vnez %v9038_v55  ;;  %vm9061_vm14 = vnez %v9042_v2 }
  0x2c   : > { %v475_v19 = vshrl.u32 %v6393_v57, 16  ;;  %v478_v20 = vshll.u32 %v6393_v57, 16  ;;  %v462_v23 = vsel %vm8177_vm9, %v445_v8, %v461_v17  ;;  %v9058_v24 = vsel %vm8304_vm10, 4294967295, %v9057_v24  ;;  %6958 = vmatpush3.bf16.msra.mxu1 %v7801_v47  ;;  %v7795_v52 = vld [vmem:[%s9002_s1 + $0x148] sm:$0xff]   ;;  %v259_v54 = vld [vmem:[#allocation2 + $0x34] sm:$0x6] }
  0x2d   : > { %v3277_v21 = vor.u32 %v3276_v13, %v3273_v12  ;;  %v446_v25 = vrot.slane %v442_v60, 4  ;;  %v450_v28 = vrot.slane %v448_v15, 7  ;;  %463 = vst [vmem:[#allocation2 + $0x24] sm:$0xf] %v462_v23  ;;  %6959 = vmatprep.subr.bf16.mxu1 %v7808_v10  ;;  %v260_v58 = vsel %vm8167_vm0, 0, %v259_v54  ;;  %v7846_v16 = vld [vmem:[#allocation2 + $0x8] sm:$0xff]  }
  0x2e   : > { %v477_v30 = vrot.slane %v475_v19, 6  ;;  %v480_v37 = vrot.slane %v478_v20, 7  ;;  %v6394_v59 = vld [vmem:[%s8141_s24 + $0x24] sm:$0xf]  ;;  %v6395_v62 = vld [vmem:[%s8141_s24 + $0x28] sm:$0xf] }
  0x2f   : > { %v7793_v29 = vld [vmem:[#allocation2 + $0x18] sm:$0xff]   ;;  %v3278_v31 = vsel %vm9017_vm12, %v3269_v11, %v3277_v21  ;;  %v453_v34 = vor.u32 %v451_v18, %v450_v28  ;;  %v455_v35 = vrot.slane %v450_v28, 4  ;;  %261 = vst [vmem:[#allocation2 + $0x34] sm:$0x6] %v260_v58  ;;  %v484_v1 = vshrl.u32 %v6394_v59, 16  ;;  %v7800_v11 = vld [vmem:[%s9002_s1 + $0x150] sm:$0xff]  }
  0x30   : > { %v7798_v33 = vld [vmem:[#allocation2 + $0x18] sm:$0xff]   ;;  %7127 = vmatprep.mubr.bf16.mxu0 %v3278_v31  ;;  %v3280_v41 = vshrl.u32 %v7793_v29, 16  ;;  %v3283_v42 = vshll.u32 %v7793_v29, 16  ;;  %v481_v48 = vor.u32 %v480_v37, %v477_v30  ;;  %6960 = vmatpush3.bf16.msra.mxu1 %v7808_v10  ;;  %v487_v5 = vshll.u32 %v6394_v59, 16  ;;  %v6396_v15 = vld [vmem:[%s8141_s24 + $0x2c] sm:$0xf] }
  0x31   : > { %v465_v43 = vld [vmem:[#allocation2 + $0x2c] sm:$0x1]  ;;  %v496_v44 = vld [vmem:[#allocation2 + $0x2c] sm:$0xe]  ;;  %6924 = vmatmul.mubr.bf16.gmra.mrb[4].mxu1 %v7798_v33  ;;  %v454_v45 = vsel %vm8304_vm10, %v446_v25, %v453_v34  ;;  %6961 = vmatprep.subr.bf16.mxu1 %v7815_v38  ;;  %v510_v6 = vshrl.u32 %v6395_v62, 16  ;;  %v513_v7 = vshll.u32 %v6395_v62, 16 }
  0x32   : > { %v466_v47 = vsel %vm8134_vm6, %v455_v35, %v465_v43  ;;  %v3282_v49 = vrot.slane %v3280_v41, 1  ;;  %v3285_v50 = vrot.slane %v3283_v42, 2  ;;  %464 = vst [vmem:[#allocation2 + $0x28] sm:$0xf] %v454_v45  ;;  %v497_v53 = vsel %vm8200_vm2, %v481_v48, %v496_v44  ;;  %v262_v8 = vld [vmem:[#allocation2 + $0x3c] sm:$0xc] }
  0x33   : > { %467 = vst [vmem:[#allocation2 + $0x2c] sm:$0x1] %v466_v47  ;;  %498 = vst [vmem:[#allocation2 + $0x2c] sm:$0xe] %v497_v53  ;;  %v482_v60 = vrot.slane %v481_v48, 4  ;;  %v486_v12 = vrot.slane %v484_v1, 6 }
  0x34   : > { %v3286_v56 = vor.u32 %v3285_v50, %v3282_v49  ;;  %v7797_v63 = vld [vmem:[#allocation2 + $0x20] sm:$0xff]   ;;  %6962 = vmatpush3.bf16.msra.mxu1 %v7815_v38  ;;  %v263_v13 = vsel %vm8186_vm8, 0, %v262_v8  ;;  %v489_v57 = vrot.slane %v487_v5, 7  ;;  %v512_v17 = vrot.slane %v510_v6, 5  ;;  %v6397_v20 = vld [vmem:[%s8141_s24 + $0x30] sm:$0xf] }
  0x35   : > { %v7803_v4 = vld [vmem:[#allocation2 + $0x20] sm:$0xff]   ;;  %v3289_v9 = vshrl.u32 %v7797_v63, 16  ;;  %v3292_v10 = vshll.u32 %v7797_v63, 16  ;;  %v515_v18 = vrot.slane %v513_v7, 6  ;;  %264 = vst [vmem:[#allocation2 + $0x3c] sm:$0xc] %v263_v13 }
  0x36   : > { %v3287_v3 = vsel %vm9017_vm12, %v3277_v21, %v3286_v56  ;;  %6927 = vmatprep.mubr.bf16.mxu1 %v7803_v4  ;;  %v519_v19 = vshrl.u32 %v6396_v15, 16  ;;  %v490_v25 = vor.u32 %v489_v57, %v486_v12  ;;  %v522_v30 = vshll.u32 %v6396_v15, 16  ;;  %v500_v38 = vld [vmem:[#allocation2 + $0x34] sm:$0x3]  ;;  %v531_v41 = vld [vmem:[#allocation2 + $0x34] sm:$0xc] }
  0x37   : > { %7128 = vmatmul.mubr.bf16.vlgmr.msra.gmra.mrb[0].mxu0 %v3287_v3  ;;  %v3291_v21 = vrot.slane %v3289_v9, 1  ;;  %v3294_v23 = vrot.slane %v3292_v10, 2  ;;  %v516_v28 = vor.u32 %v515_v18, %v512_v17  ;;  %v545_v34 = vshll.u32 %v6397_v20, 16  ;;  %v7807_v62 = vld [vmem:[%s9002_s1 + $0x160] sm:$0xff]   ;;  %v6398_v1 = vld [vmem:[%s8141_s24 + $0x34] sm:$0xf] }
  0x38   : > { %7164 = vmatpush3.bf16.msra.mxu0 %v8230_v0  ;;  %v521_v29 = vrot.slane %v519_v19, 5  ;;  %v7802_v0 = vld [vmem:[%s9002_s1 + $0x158] sm:$0xff]   ;;  %v491_v35 = vsel %vm8192_vm7, %v482_v60, %v490_v25  ;;  %v492_v37 = vrot.slane %v490_v25, 4  ;;  %v524_v50 = vrot.slane %v522_v30, 6  ;;  %v265_v63 = vld [vmem:[#allocation2 + $0x44] sm:$0x8] }
  0x39   : > { %7165 = vmatprep.subr.bf16.mxu0 %v7795_v52  ;;  %v3295_v31 = vor.u32 %v3294_v23, %v3291_v21  ;;  %499 = vst [vmem:[#allocation2 + $0x30] sm:$0xf] %v491_v35  ;;  %v532_v47 = vsel %vm9059_vm3, %v516_v28, %v531_v41  ;;  %v517_v49 = vrot.slane %v516_v28, 4  ;;  %v266_v4 = vsel %vm8250_vm1, 0, %v265_v63  ;;  %v268_v7 = vld [vmem:[#allocation2 + $0x48] sm:$0x1] }
  0x3a   : > { %v7799_v33 = vld [vmem:[#allocation2 + $0x28] sm:$0xff]   ;;  %v501_v48 = vsel %vm9060_vm11, %v492_v37, %v500_v38  ;;  %533 = vst [vmem:[#allocation2 + $0x34] sm:$0xc] %v532_v47  ;;  %v525_v59 = vor.u32 %v524_v50, %v521_v29  ;;  %v548_v5 = vshrl.u32 %v6397_v20, 16  ;;  %v554_v6 = vshll.u32 %v6398_v1, 16  ;;  %v7822_v8 = vld [vmem:[%s9002_s1 + $0x60] sm:$0xff]  }
  0x3b   : > { %v7805_v42 = vld [vmem:[#allocation2 + $0x28] sm:$0xff]   ;;  %v3296_v43 = vsel %vm9017_vm12, %v3286_v56, %v3295_v31  ;;  %v3298_v44 = vshrl.u32 %v7799_v33, 16  ;;  %v3301_v45 = vshll.u32 %v7799_v33, 16  ;;  %502 = vst [vmem:[#allocation2 + $0x34] sm:$0x3] %v501_v48  ;;  %v269_v12 = vsel %vm8134_vm6, 0, %v268_v7  ;;  %6963 = vmatprep.subr.bf16.mxu1 %v7822_v8 }
  0x3c   : > { %7166 = vmatpush3.bf16.msra.mxu0 %v7795_v52  ;;  %7131 = vmatprep.mubr.bf16.mxu0 %v3296_v43  ;;  %v547_v52 = vrot.slane %v545_v34, 5  ;;  %v535_v56 = vld [vmem:[#allocation2 + $0x3c] sm:$0x7]  ;;  %v566_v58 = vld [vmem:[#allocation2 + $0x3c] sm:$0x8]  ;;  %v526_v9 = vsel %vm9061_vm14, %v517_v49, %v525_v59  ;;  %v527_v10 = vrot.slane %v525_v59, 4 }
  0x3d   : > { %7167 = vmatprep.subr.bf16.mxu0 %v7800_v11  ;;  %6928 = vmatmul.mubr.bf16.gmra.mrb[8].mxu1 %v7805_v42  ;;  %v3300_v53 = vrot.slane %v3298_v44, 1  ;;  %v3303_v54 = vrot.slane %v3301_v45, 2  ;;  %267 = vst [vmem:[#allocation2 + $0x44] sm:$0x8] %v266_v4  ;;  %v6399_v13 = vld [vmem:[%s8141_s24 + $0x38] sm:$0xf] }
  0x3e   : > { %v567_v60 = vsel %vm8250_vm1, %v547_v52, %v566_v58  ;;  %v8362_v15 = vld [vmem:[#allocation2 + $0x10] sm:$0xff]   ;;  %534 = vst [vmem:[#allocation2 + $0x38] sm:$0xf] %v526_v9  ;;  %v550_v17 = vrot.slane %v548_v5, 4  ;;  %v556_v18 = vrot.slane %v554_v6, 5  ;;  %v580_v20 = vshrl.u32 %v6399_v13, 16  ;;  %6964 = vmatpush3.bf16.msra.mxu1 %v7822_v8 }
  0x3f   : > { %v8350_v3 = vor.u32 %v3303_v54, %v3300_v53  ;;  %568 = vst [vmem:[#allocation2 + $0x3c] sm:$0x8] %v567_v60  ;;  %270 = vst [vmem:[#allocation2 + $0x48] sm:$0x1] %v269_v12  ;;  %v6400_v19 = vld [vmem:[%s8141_s24 + $0x3c] sm:$0xf]  ;;  %v536_v21 = vsel %vm8260_vm5, %v527_v10, %v535_v56 }
  0x40   : > { %7168 = vmatpush3.bf16.msra.mxu0 %v7800_v11  ;;  %v558_v11 = vshrl.u32 %v6398_v1, 16  ;;  %v7809_v23 = vld [vmem:[%s9002_s1 + $0x168] sm:$0xff]   ;;  %v583_v28 = vshll.u32 %v6399_v13, 16  ;;  %537 = vst [vmem:[#allocation2 + $0x3c] sm:$0x7] %v536_v21  ;;  %v551_v29 = vor.u32 %v550_v17, %v547_v52  ;;  %v582_v30 = vrot.slane %v580_v20, 7 }
  0x41   : > { %7169 = vmatprep.subr.bf16.mxu0 %v7802_v0  ;;  %v3305_v57 = vsel %vm9017_vm12, %v3295_v31, %v8350_v3  ;;  %v588_v31 = vshrl.u32 %v6400_v19, 16  ;;  %v591_v33 = vshll.u32 %v6400_v19, 16  ;;  %v7827_v34 = vld [vmem:[%s9002_s1 + $0x68] sm:$0xff]   ;;  %v3931_v38 = vrot.slane %v8362_v15, 2  ;;  %v7814_v49 = vld [vmem:[%s9002_s1 + $0x170] sm:$0xff]   ;;  %v8381_v50 = vld [vmem:[#allocation2 + $0x18] sm:$0xff]  }
  0x42   : > { %7132 = vmatmul.mubr.bf16.gmra.mrb[4].mxu0 %v3305_v57  ;;  %v560_v25 = vrot.slane %v558_v11, 4  ;;  %v7804_v35 = vld [vmem:[#allocation2 + $0x30] sm:$0xff]   ;;  %v552_v42 = vrot.slane %v551_v29, 4  ;;  %v586_v43 = vrot.slane %v582_v30, 4  ;;  %6965 = vmatprep.subr.bf16.mxu1 %v7827_v34  ;;  %v585_v48 = vor.u32 %v583_v28, %v582_v30  ;;  %v8388_v60 = vld [vmem:[#allocation2 + $0x20] sm:$0xff]   ;;  %v7816_v6 = vld [vmem:[%s9002_s1 + $0x178] sm:$0xff]  }
  0x43   : > { %v7810_v41 = vld [vmem:[#allocation2 + $0x30] sm:$0xff]   ;;  %v8376_v44 = vrot.slane %v588_v31, 7  ;;  %v3310_v45 = vshll.u32 %v7804_v35, 16  ;;  %6966 = vmatpush3.bf16.msra.mxu1 %v7827_v34  ;;  %v3933_v7 = vrot.slane %v8381_v50, 2  ;;  %vm9020_vm12 = vcmask 1045504   ;;  %v8399_v10 = vld [vmem:[#allocation2 + $0x28] sm:$0xff]  }
  0x44   : > { %7170 = vmatpush3.bf16.msra.mxu0 %v7802_v0  ;;  %v561_v37 = vor.u32 %v560_v25, %v556_v18  ;;  %v3307_v0 = vshrl.u32 %v7804_v35, 16  ;;  %6931 = vmatprep.mubr.bf16.mxu1 %v7810_v41  ;;  %v557_v52 = vsel %vm8268_vm15, %v552_v42, %v556_v18  ;;  %v570_v53 = vld [vmem:[#allocation2 + $0x44] sm:$0xf]  ;;  %v7818_v57 = vld [vmem:[#allocation2 + $0x8] sm:$0xfc]   ;;  %v3935_v20 = vrot.slane %v8388_v60, 2 }
  0x45   : > { %7171 = vmatprep.subr.bf16.mxu0 %v7807_v62  ;;  %v593_v54 = vor.u32 %v591_v33, %v8376_v44  ;;  %v3312_v58 = vrot.slane %v3310_v45, 2  ;;  %569 = vst [vmem:[#allocation2 + $0x40] sm:$0xf] %v557_v52  ;;  %v595_v9 = vrot.slane %v8376_v44, 4  ;;  %v3930_v19 = vrot.slane %v7818_v57, 2  ;;  %v7848_v32 = vld [vmem:[#allocation2 + $0x10] sm:$0xff]  }
  0x46   : > { %v562_v47 = vrot.slane %v561_v37, 4  ;;  %v3309_v56 = vrot.slane %v3307_v0, 1  ;;  %v599_v63 = vld [vmem:[#allocation2 + $0x48] sm:$0xf]  ;;  %v271_v21 = vld [vmem:[#allocation2 + $0x50] sm:$0x3] }
  0x47   : > { %v7806_v4 = vld [vmem:[#allocation2 + $0x38] sm:$0xff]   ;;  %v600_v5 = vsel %vm8177_vm9, %v585_v48, %v599_v63  ;;  %v3937_v29 = vrot.slane %v8399_v10, 2  ;;  %v6401_v37 = vld [vmem:[%s8141_s24 + $0x40] sm:$0xf]  ;;  %v6402_v41 = vld [vmem:[%s8141_s24 + $0x44] sm:$0xf] }
  0x48   : > { %7172 = vmatpush3.bf16.msra.mxu0 %v7807_v62  ;;  %v571_v59 = vsel %vm8275_vm4, %v562_v47, %v570_v53  ;;  %v594_v62 = vsel %vm8304_vm10, %v586_v43, %v593_v54  ;;  %v3313_v1 = vor.u32 %v3312_v58, %v3309_v56  ;;  %v7812_v8 = vld [vmem:[#allocation2 + $0x38] sm:$0xff]   ;;  %601 = vst [vmem:[#allocation2 + $0x48] sm:$0xf] %v600_v5  ;;  %vm9062_vm10 = vsmask.f32 6400 }
  0x49   : > { %7173 = vmatprep.subr.bf16.mxu0 %v7809_v23  ;;  %572 = vst [vmem:[#allocation2 + $0x44] sm:$0xf] %v571_v59  ;;  %602 = vst [vmem:[#allocation2 + $0x4c] sm:$0xf] %v594_v62  ;;  %v3316_v12 = vshrl.u32 %v7806_v4, 16  ;;  %v3319_v13 = vshll.u32 %v7806_v4, 16  ;;  %6932 = vmatmul.mubr.bf16.gmra.mrb[12].mxu1 %v7812_v8  ;;  %v3932_v56 = vsel %vm9020_vm12, %v3930_v19, %v3931_v38 }
  0x4a   : > { %v3314_v11 = vsel %vm9062_vm10, %v8350_v3, %v3313_v1  ;;  %v272_v3 = vsel %vm8154_vm13, 0, %v271_v21  ;;  %v613_v45 = vshrl.u32 %v6401_v37, 16  ;;  %v616_v47 = vshll.u32 %v6401_v37, 16  ;;  %v274_v58 = vld [vmem:[#allocation2 + $0x58] sm:$0x6]  ;;  %vm9063_vm12 = vmmov %vm9062_vm10 }
  0x4b   : > { %7135 = vmatprep.mubr.bf16.mxu0 %v3314_v11  ;;  %v3318_v17 = vrot.slane %v3316_v12, 1  ;;  %v3321_v18 = vrot.slane %v3319_v13, 2  ;;  %273 = vst [vmem:[#allocation2 + $0x50] sm:$0x3] %v272_v3  ;;  %v622_v48 = vshrl.u32 %v6402_v41, 16  ;;  %v275_v13 = vsel %vm8167_vm0, 0, %v274_v58 }
  0x4c   : > { %7174 = vmatpush3.bf16.msra.mxu0 %v7809_v23  ;;  %v6403_v59 = vld [vmem:[%s8141_s24 + $0x48] sm:$0xf]  ;;  %v615_v62 = vrot.slane %v613_v45, 6  ;;  %v618_v63 = vrot.slane %v616_v47, 7  ;;  %v6404_v5 = vld [vmem:[%s8141_s24 + $0x4c] sm:$0xf] }
  0x4d   : > { %7175 = vmatprep.subr.bf16.mxu0 %v7814_v49  ;;  %v3322_v23 = vor.u32 %v3321_v18, %v3318_v17  ;;  %v648_v57 = vshrl.u32 %v6403_v59, 16  ;;  %276 = vst [vmem:[#allocation2 + $0x58] sm:$0x6] %v275_v13  ;;  %v651_v21 = vshll.u32 %v6403_v59, 16  ;;  %v657_v3 = vshrl.u32 %v6404_v5, 16  ;;  %v8438_v59 = vld [vmem:[#allocation2 + $0x30] sm:$0xff]  }
  0x4e   : > { %v619_v18 = vor.u32 %v618_v63, %v615_v62  ;;  %v6406_v45 = vld [vmem:[%s8141_s24 + $0x54] sm:$0xf]  ;;  %v280_v62 = vld [vmem:[#allocation2 + $0x68] sm:$0x8]  ;;  %v8440_v63 = vld [vmem:[#allocation2 + $0x38] sm:$0xff]   ;;  %v1563_v39 = vshll.u32 %v7848_v32, 16 }
  0x4f   : > { %v3323_v30 = vsel %vm9062_vm10, %v3313_v1, %v3322_v23  ;;  %v624_v1 = vrot.slane %v622_v48, 6 }
  0x50   : > { %7176 = vmatpush3.bf16.msra.mxu0 %v7814_v49  ;;  %v7811_v25 = vld [vmem:[#allocation2 + $0x40] sm:$0xff]   ;;  %v7813_v34 = vld [vmem:[#allocation2 + $0x48] sm:$0xff]   ;;  %v625_v49 = vshll.u32 %v6402_v41, 16 }
  0x51   : > { %7177 = vmatprep.subr.bf16.mxu0 %v7816_v6  ;;  %v7817_v28 = vld [vmem:[#allocation2 + $0x40] sm:$0xff]   ;;  %v3325_v31 = vshrl.u32 %v7811_v25, 16  ;;  %v3328_v33 = vshll.u32 %v7811_v25, 16  ;;  %v7820_v35 = vld [vmem:[#allocation2 + $0x48] sm:$0xff]   ;;  %7136 = vmatmul.mubr.bf16.gmra.mrb[8].mxu0 %v3323_v30  ;;  %v3334_v44 = vshrl.u32 %v7813_v34, 16  ;;  %v3337_v0 = vshll.u32 %v7813_v34, 16 }
  0x52   : > { %6935 = vmatprep.mubr.bf16.mxu1 %v7817_v28  ;;  %v627_v4 = vrot.slane %v625_v49, 7  ;;  %v603_v11 = vld [vmem:[#allocation2 + $0x50] sm:$0x1]  ;;  %v634_v12 = vld [vmem:[#allocation2 + $0x50] sm:$0xe]  ;;  %v660_v28 = vshll.u32 %v6404_v5, 16 }
  0x53   : > { %v3327_v42 = vrot.slane %v3325_v31, 1  ;;  %v3330_v43 = vrot.slane %v3328_v33, 2  ;;  %6936 = vmatmul.mubr.bf16.gmra.mrb[16].mxu1 %v7820_v35  ;;  %v3336_v53 = vrot.slane %v3334_v44, 1  ;;  %v3339_v54 = vrot.slane %v3337_v0, 2  ;;  %v7832_v34 = vld [vmem:[%s9002_s1 + $0x180] sm:$0xff]  }
  0x54   : > { %7178 = vmatpush3.bf16.msra.mxu0 %v7816_v6  ;;  %v604_v17 = vsel %vm8134_vm6, %v595_v9, %v603_v11  ;;  %v628_v19 = vor.u32 %v627_v4, %v624_v1  ;;  %v620_v30 = vrot.slane %v619_v18, 4  ;;  %v635_v33 = vsel %vm8200_vm2, %v619_v18, %v634_v12  ;;  %v277_v41 = vld [vmem:[#allocation2 + $0x60] sm:$0xc]  ;;  %v638_v5 = vld [vmem:[#allocation2 + $0x58] sm:$0x3] }
  0x55   : > { %v3331_v52 = vor.u32 %v3330_v43, %v3327_v42  ;;  %v8416_v8 = vor.u32 %v3339_v54, %v3336_v53  ;;  %605 = vst [vmem:[#allocation2 + $0x50] sm:$0x1] %v604_v17  ;;  %v653_v9 = vrot.slane %v651_v21, 6  ;;  %636 = vst [vmem:[#allocation2 + $0x50] sm:$0xe] %v635_v33  ;;  %v659_v35 = vrot.slane %v657_v3, 5  ;;  %7215 = vmatprep.subr.bf16.mxu0 %v7832_v34 }
  0x56   : > { %v630_v31 = vrot.slane %v628_v19, 4  ;;  %v662_v37 = vrot.slane %v660_v28, 6  ;;  %v6405_v42 = vld [vmem:[%s8141_s24 + $0x50] sm:$0xf]  ;;  %v629_v43 = vsel %vm8192_vm7, %v620_v30, %v628_v19  ;;  %v278_v0 = vsel %vm8186_vm8, 0, %v277_v41 }
  0x57   : > { %v3332_v6 = vsel %vm9062_vm10, %v3322_v23, %v3331_v52  ;;  %v3341_v25 = vsel %vm9063_vm12, %v3331_v52, %v8416_v8  ;;  %v650_v23 = vrot.slane %v648_v57, 5  ;;  %v683_v47 = vshll.u32 %v6405_v42, 16  ;;  %637 = vst [vmem:[#allocation2 + $0x54] sm:$0xf] %v629_v43  ;;  %279 = vst [vmem:[#allocation2 + $0x60] sm:$0xc] %v278_v0 }
  0x58   : > { %7139 = vmatprep.mubr.bf16.mxu0 %v3332_v6  ;;  %v663_v48 = vor.u32 %v662_v37, %v659_v35  ;;  %v686_v49 = vshrl.u32 %v6405_v42, 16  ;;  %v692_v52 = vshll.u32 %v6406_v45, 16  ;;  %v696_v53 = vshrl.u32 %v6406_v45, 16  ;;  %v7833_v54 = vld [vmem:[%s9002_s1 + $0x70] sm:$0xff]   ;;  %v669_v11 = vld [vmem:[#allocation2 + $0x58] sm:$0xc] }
  0x59   : > { %7140 = vmatmul.mubr.bf16.gmra.mrb[12].mxu0 %v3341_v25  ;;  %v654_v44 = vor.u32 %v653_v9, %v650_v23  ;;  %v685_v58 = vrot.slane %v683_v47, 5  ;;  %vm9064_vm12 = vcmask 1045504   ;;  %6967 = vmatprep.subr.bf16.mxu1 %v7833_v54  ;;  %v639_v13 = vsel %vm9060_vm11, %v630_v31, %v638_v5  ;;  %v283_v17 = vld [vmem:[#allocation2 + $0x6c] sm:$0x1]  ;;  %v6407_v18 = vld [vmem:[%s8141_s24 + $0x58] sm:$0xf] }
  0x5a   : > { %7179 = vmatprep.mubr.bf16.mxu0 %v3932_v56  ;;  %v3934_v1 = vsel %vm9064_vm12, %v3931_v38, %v3933_v7  ;;  %vm9065_vm10 = vmmov %vm9064_vm12  ;;  %v665_v6 = vrot.slane %v663_v48, 4  ;;  %v688_v12 = vrot.slane %v686_v49, 4  ;;  %v694_v38 = vrot.slane %v692_v52, 5  ;;  %6968 = vmatpush3.bf16.msra.mxu1 %v7833_v54  ;;  %640 = vst [vmem:[#allocation2 + $0x58] sm:$0x3] %v639_v13  ;;  %v8465_v37 = vld [vmem:[#allocation2 + $0x40] sm:$0xff]  }
  0x5b   : > { %v655_v56 = vrot.slane %v654_v44, 4  ;;  %v3936_v4 = vsel %vm9065_vm10, %v3933_v7, %v3935_v20  ;;  %v670_v15 = vsel %vm9059_vm3, %v654_v44, %v669_v11  ;;  %v698_v7 = vrot.slane %v696_v53, 4  ;;  %v7838_v0 = vld [vmem:[%s9002_s1 + $0x188] sm:$0xff]   ;;  %vm9066_vm12 = vmmov %vm9065_vm10  ;;  %v6408_v49 = vld [vmem:[%s8141_s24 + $0x5c] sm:$0xf] }
  0x5c   : > { %671 = vst [vmem:[#allocation2 + $0x58] sm:$0xc] %v670_v15  ;;  %v689_v50 = vor.u32 %v688_v12, %v685_v58  ;;  %v281_v19 = vsel %vm8250_vm1, 0, %v280_v62  ;;  %v3939_v21 = vrot.slane %v8438_v59, 2  ;;  %v284_v25 = vsel %vm8134_vm6, 0, %v283_v17 }
  0x5d   : > { %v664_v57 = vsel %vm9061_vm14, %v655_v56, %v663_v48  ;;  %282 = vst [vmem:[#allocation2 + $0x68] sm:$0x8] %v281_v19  ;;  %v718_v23 = vshrl.u32 %v6407_v18, 16  ;;  %v721_v3 = vshll.u32 %v6407_v18, 16  ;;  %v699_v30 = vor.u32 %v698_v7, %v694_v38  ;;  %285 = vst [vmem:[#allocation2 + $0x6c] sm:$0x1] %v284_v25 }
  0x5e   : > { %672 = vst [vmem:[#allocation2 + $0x5c] sm:$0xf] %v664_v57  ;;  %v690_v28 = vrot.slane %v689_v50, 4  ;;  %v3941_v31 = vrot.slane %v8440_v63, 2  ;;  %v7823_v33 = vld [vmem:[#allocation2 + $0x50] sm:$0xff]   ;;  %v726_v54 = vshrl.u32 %v6408_v49, 16 }
  0x5f   : > { %v673_v9 = vld [vmem:[#allocation2 + $0x60] sm:$0x7]  ;;  %v720_v35 = vrot.slane %v718_v23, 7  ;;  %v700_v43 = vrot.slane %v699_v30, 4  ;;  %v704_v44 = vld [vmem:[#allocation2 + $0x60] sm:$0x8]  ;;  %6939 = vmatprep.mubr.bf16.mxu1 %v7823_v33 }
  0x60   : > { %v674_v41 = vsel %vm8260_vm5, %v665_v6, %v673_v9  ;;  %v695_v42 = vsel %vm8268_vm15, %v690_v28, %v694_v38  ;;  %v705_v45 = vsel %vm8250_vm1, %v685_v58, %v704_v44  ;;  %v286_v48 = vld [vmem:[#allocation2 + $0x74] sm:$0x3]  ;;  %v729_v56 = vshll.u32 %v6408_v49, 16  ;;  %v6409_v62 = vld [vmem:[%s8141_s24 + $0x60] sm:$0xf]  ;;  %v7840_v23 = vld [vmem:[%s9002_s1 + $0x78] sm:$0xff]  }
  0x61   : > { %7180 = vmatmul.mubr.bf16.vlgmr.msra.gmra.mrb[0].mxu0 %v3934_v1  ;;  %675 = vst [vmem:[#allocation2 + $0x60] sm:$0x7] %v674_v41  ;;  %707 = vst [vmem:[#allocation2 + $0x64] sm:$0xf] %v695_v42  ;;  %v723_v47 = vor.u32 %v721_v3, %v720_v35  ;;  %v287_v52 = vsel %vm8154_vm13, 0, %v286_v48  ;;  %v724_v53 = vrot.slane %v720_v35, 4  ;;  %6969 = vmatprep.subr.bf16.mxu1 %v7840_v23 }
  0x62   : > { %7183 = vmatprep.mubr.bf16.mxu0 %v3936_v4  ;;  %7216 = vmatpush3.bf16.msra.mxu0 %v7832_v34  ;;  %v3938_v34 = vsel %vm9066_vm12, %v3935_v20, %v3937_v29  ;;  %706 = vst [vmem:[#allocation2 + $0x60] sm:$0x8] %v705_v45  ;;  %v3940_v20 = vsel %vm9065_vm10, %v3937_v29, %v3939_v21  ;;  %288 = vst [vmem:[#allocation2 + $0x74] sm:$0x3] %v287_v52  ;;  %v751_v58 = vshrl.u32 %v6409_v62, 16  ;;  %v8490_v1 = vld [vmem:[#allocation2 + $0x48] sm:$0xff]  }
  0x63   : > { %7217 = vmatprep.subr.bf16.mxu0 %v7838_v0  ;;  %v728_v5 = vrot.slane %v726_v54, 7  ;;  %v754_v6 = vshll.u32 %v6409_v62, 16  ;;  %v3943_v10 = vrot.slane %v8465_v37, 2  ;;  %v289_v17 = vld [vmem:[#allocation2 + $0x7c] sm:$0x6]  ;;  %vm9067_vm12 = vnez %v9058_v24  ;;  %6970 = vmatpush3.bf16.msra.mxu1 %v7840_v23  ;;  %v8521_v49 = vld [vmem:[#allocation2 + $0x50] sm:$0xff]  }
  0x64   : > { %v708_v4 = vld [vmem:[#allocation2 + $0x68] sm:$0xf]  ;;  %v737_v12 = vld [vmem:[#allocation2 + $0x6c] sm:$0xf]  ;;  %v753_v13 = vrot.slane %v751_v58, 6  ;;  %v290_v50 = vsel %vm8167_vm0, 0, %v289_v17  ;;  %vm9068_vm0 = vmmov %vm9065_vm10 }
  0x65   : > { %v7825_v60 = vld [vmem:[#allocation2 + $0x58] sm:$0xff]   ;;  %v709_v11 = vsel %vm8275_vm4, %v700_v43, %v708_v4  ;;  %v738_v29 = vsel %vm8177_vm9, %v723_v47, %v737_v12  ;;  %v731_v57 = vor.u32 %v729_v56, %v728_v5  ;;  %v733_v15 = vrot.slane %v728_v5, 4  ;;  %v6410_v18 = vld [vmem:[%s8141_s24 + $0x64] sm:$0xf]  ;;  %v6411_v25 = vld [vmem:[%s8141_s24 + $0x68] sm:$0xf] }
  0x66   : > { %7218 = vmatpush3.bf16.msra.mxu0 %v7838_v0  ;;  %6940 = vmatmul.mubr.bf16.gmra.mrb[20].mxu1 %v7825_v60  ;;  %710 = vst [vmem:[#allocation2 + $0x68] sm:$0xf] %v709_v11  ;;  %v756_v38 = vrot.slane %v754_v6, 7  ;;  %739 = vst [vmem:[#allocation2 + $0x6c] sm:$0xf] %v738_v29  ;;  %v760_v7 = vshrl.u32 %v6410_v18, 16  ;;  %v3942_v42 = vsel %vm9068_vm0, %v3939_v21, %v3941_v31 }
  0x67   : > { %v763_v19 = vshll.u32 %v6410_v18, 16  ;;  %v732_v3 = vsel %vm9067_vm12, %v724_v53, %v731_v57  ;;  %291 = vst [vmem:[#allocation2 + $0x7c] sm:$0x6] %v290_v50  ;;  %v786_v30 = vshrl.u32 %v6411_v25, 16  ;;  %v789_v33 = vshll.u32 %v6411_v25, 16  ;;  %vm9069_vm10 = vmmov %vm9068_vm0 }
  0x68   : > { %v757_v28 = vor.u32 %v756_v38, %v753_v13  ;;  %740 = vst [vmem:[#allocation2 + $0x70] sm:$0xf] %v732_v3  ;;  %v762_v35 = vrot.slane %v760_v7, 6  ;;  %v3945_v27 = vrot.slane %v8490_v1, 2  ;;  %v3944_v0 = vsel %vm9069_vm10, %v3941_v31, %v3943_v10  ;;  %v292_v63 = vld [vmem:[#allocation2 + $0x84] sm:$0xc]  ;;  %vm9077_vm10 = vmmov %vm9068_vm0 }
  0x69   : > { %7184 = vmatmul.mubr.bf16.gmra.mrb[4].mxu0 %v3938_v34  ;;  %v7828_v9 = vld [vmem:[#allocation2 + $0x60] sm:$0xff]   ;;  %v765_v41 = vrot.slane %v763_v19, 7  ;;  %v741_v43 = vld [vmem:[#allocation2 + $0x74] sm:$0x1]  ;;  %v772_v44 = vld [vmem:[#allocation2 + $0x74] sm:$0xe] }
  0x6a   : > { %7187 = vmatprep.mubr.bf16.mxu0 %v3940_v20  ;;  %v758_v34 = vrot.slane %v757_v28, 4  ;;  %v788_v45 = vrot.slane %v786_v30, 5  ;;  %6943 = vmatprep.mubr.bf16.mxu1 %v7828_v9  ;;  %v742_v47 = vsel %vm8134_vm6, %v733_v15, %v741_v43  ;;  %v773_v59 = vsel %vm8200_vm2, %v757_v28, %v772_v44  ;;  %v6412_v52 = vld [vmem:[%s8141_s24 + $0x6c] sm:$0xf]  ;;  %v6413_v62 = vld [vmem:[%s8141_s24 + $0x70] sm:$0xf] }
  0x6b   : > { %v766_v21 = vor.u32 %v765_v41, %v762_v35  ;;  %v791_v48 = vrot.slane %v789_v33, 6  ;;  %743 = vst [vmem:[#allocation2 + $0x74] sm:$0x1] %v742_v47  ;;  %774 = vst [vmem:[#allocation2 + $0x74] sm:$0xe] %v773_v59  ;;  %v293_v56 = vsel %vm8186_vm8, 0, %v292_v63 }
  0x6c   : > { %294 = vst [vmem:[#allocation2 + $0x84] sm:$0xc] %v293_v56  ;;  %v795_v20 = vshrl.u32 %v6412_v52, 16  ;;  %v798_v58 = vshll.u32 %v6412_v52, 16  ;;  %v821_v1 = vshll.u32 %v6413_v62, 16  ;;  %v3947_v46 = vrot.slane %v8521_v49, 2  ;;  %vm9070_vm8 = vmmov %vm9068_vm0 }
  0x6d   : > { %v767_v31 = vsel %vm8192_vm7, %v758_v34, %v766_v21  ;;  %v768_v53 = vrot.slane %v766_v21, 4  ;;  %v792_v54 = vor.u32 %v791_v48, %v788_v45  ;;  %v7830_v60 = vld [vmem:[#allocation2 + $0x68] sm:$0xff]   ;;  %v824_v57 = vshrl.u32 %v6413_v62, 16  ;;  %v7843_v15 = vld [vmem:[#allocation2 + $0x58] sm:$0xff]   ;;  %v6414_v50 = vld [vmem:[%s8141_s24 + $0x74] sm:$0xf] }
  0x6e   : > { %775 = vst [vmem:[#allocation2 + $0x78] sm:$0xf] %v767_v31  ;;  %v776_v4 = vld [vmem:[#allocation2 + $0x7c] sm:$0x3]  ;;  %v807_v5 = vld [vmem:[#allocation2 + $0x7c] sm:$0xc]  ;;  %6944 = vmatmul.mubr.bf16.gmra.mrb[24].mxu1 %v7830_v60  ;;  %v3946_v38 = vsel %vm9070_vm8, %v3943_v10, %v3945_v27  ;;  %vm9071_vm7 = vmmov %vm9068_vm0 }
  0x6f   : > { %v793_v6 = vrot.slane %v792_v54, 4  ;;  %v777_v11 = vsel %vm9060_vm11, %v768_v53, %v776_v4  ;;  %v808_v40 = vsel %vm9059_vm3, %v792_v54, %v807_v5  ;;  %v797_v12 = vrot.slane %v795_v20, 5  ;;  %v295_v18 = vld [vmem:[#allocation2 + $0x8c] sm:$0x8]  ;;  %v7844_v43 = vld [vmem:[%s9002_s1 + $0x190] sm:$0xff]   ;;  %v7845_v44 = vld [vmem:[#allocation2] sm:$0xff]  }
  0x70   : > { %v800_v13 = vrot.slane %v798_v58, 6  ;;  %778 = vst [vmem:[#allocation2 + $0x7c] sm:$0x3] %v777_v11  ;;  %809 = vst [vmem:[#allocation2 + $0x7c] sm:$0xc] %v808_v40  ;;  %v823_v29 = vrot.slane %v821_v1, 5  ;;  %v3948_v19 = vsel %vm9071_vm7, %v3945_v27, %v3947_v46  ;;  %7219 = vmatprep.subr.bf16.mxu0 %v7844_v43 }
  0x71   : > { %7188 = vmatmul.mubr.bf16.gmra.mrb[8].mxu0 %v3942_v42  ;;  %v296_v61 = vsel %vm8250_vm1, 0, %v295_v18  ;;  %v826_v25 = vrot.slane %v824_v57, 4  ;;  %v830_v23 = vshll.u32 %v6414_v50, 16  ;;  %v834_v30 = vshrl.u32 %v6414_v50, 16  ;;  %v7847_v31 = vld [vmem:[#allocation2 + $0x60] sm:$0xff]   ;;  %v7850_v1 = vld [vmem:[#allocation2 + $0x68] sm:$0xff]   ;;  %vm9075_vm3 = vmmov %vm9068_vm0 }
  0x72   : > { %7191 = vmatprep.mubr.bf16.mxu0 %v3944_v0  ;;  %v801_v17 = vor.u32 %v800_v13, %v797_v12  ;;  %v7834_v7 = vld [vmem:[#allocation2 + $0x70] sm:$0xff]   ;;  %297 = vst [vmem:[#allocation2 + $0x8c] sm:$0x8] %v296_v61  ;;  %v3949_v42 = vrot.slane %v7843_v15, 2  ;;  %7220 = vmatpush3.bf16.msra.mxu0 %v7844_v43  ;;  %v1550_v59 = vshll.u32 %v7845_v44, 16  ;;  %v1548_v48 = vshrl.u32 %v7845_v44, 16  ;;  %vm9083_vm8 = vmmov %vm9068_vm0 }
  0x73   : > { %6947 = vmatprep.mubr.bf16.mxu1 %v7834_v7  ;;  %v811_v37 = vld [vmem:[#allocation2 + $0x84] sm:$0x7]  ;;  %v842_v10 = vld [vmem:[#allocation2 + $0x84] sm:$0x8]  ;;  %v827_v33 = vor.u32 %v826_v25, %v823_v29  ;;  %v832_v41 = vrot.slane %v830_v23, 5  ;;  %v836_v27 = vrot.slane %v834_v30, 4  ;;  %vm9084_vm7 = vmmov %vm9068_vm0 }
  0x74   : > { %v802_v3 = vsel %vm9061_vm14, %v793_v6, %v801_v17  ;;  %v803_v28 = vrot.slane %v801_v17, 4  ;;  %v843_v35 = vsel %vm8250_vm1, %v823_v29, %v842_v10  ;;  %vm9072_vm1 = vmmov %vm9068_vm0  ;;  %v1555_v49 = vshll.u32 %v7846_v16, 16  ;;  %v7849_v62 = vld [vmem:[%s9002_s1 + $0x80] sm:$0xff]   ;;  %v7851_v4 = vld [vmem:[%s9002_s1 + $0x198] sm:$0xff]  }
  0x75   : > { %810 = vst [vmem:[#allocation2 + $0x80] sm:$0xf] %v802_v3  ;;  %844 = vst [vmem:[#allocation2 + $0x84] sm:$0x8] %v843_v35  ;;  %v828_v2 = vrot.slane %v827_v33, 4  ;;  %v837_v34 = vor.u32 %v836_v27, %v832_v41  ;;  %v3950_v47 = vsel %vm9072_vm1, %v3947_v46, %v3949_v42  ;;  %v1552_v52 = vrot.slane %v1550_v59, 1  ;;  %7007 = vmatprep.subr.bf16.mxu1 %v7849_v62 }
  0x76   : > { %v812_v9 = vsel %vm8260_vm5, %v803_v28, %v811_v37  ;;  %vm1546_vm5 = vsmask.f32 7424  ;;  %v3951_v54 = vrot.slane %v7847_v31, 2  ;;  %v1559_v56 = vshrl.u32 %v7846_v16, 16  ;;  %v7852_v6 = vld [vmem:[#allocation2 + $0x18] sm:$0xff]   ;;  %7221 = vmatprep.subr.bf16.mxu0 %v7851_v4  ;;  %v7853_v11 = vld [vmem:[#allocation2 + $0x70] sm:$0xff]   ;;  %vm9076_vm14 = vmmov %vm9068_vm0 }
  0x77   : > { %813 = vst [vmem:[#allocation2 + $0x84] sm:$0x7] %v812_v9  ;;  %v7836_v0 = vld [vmem:[#allocation2 + $0x78] sm:$0xff]   ;;  %v833_v26 = vsel %vm8268_vm15, %v828_v2, %v832_v41  ;;  %v838_v45 = vrot.slane %v837_v34, 4  ;;  %v1553_v60 = vor.u32 %v1552_v52, %v1548_v48  ;;  %v1557_v20 = vrot.slane %v1555_v49, 1  ;;  %vm9073_vm15 = vmmov %vm9068_vm0  ;;  %7222 = vmatpush3.bf16.msra.mxu0 %v7851_v4  ;;  %v7854_v15 = vld [vmem:[#allocation2 + $0x20] sm:$0xff]  }
  0x78   : > { %6948 = vmatmul.mubr.bf16.gmra.mrb[28].mxu1 %v7836_v0  ;;  %845 = vst [vmem:[#allocation2 + $0x88] sm:$0xf] %v833_v26  ;;  %v3952_v58 = vsel %vm9073_vm15, %v3949_v42, %v3951_v54  ;;  %v3953_v5 = vrot.slane %v7850_v1, 2  ;;  %v1567_v46 = vshrl.u32 %v7848_v32, 16  ;;  %v1571_v29 = vshll.u32 %v7852_v6, 16  ;;  %v7857_v25 = vld [vmem:[%s9002_s1 + $0x1a0] sm:$0xff]   ;;  %vm9085_vm1 = vmmov %vm9068_vm0 }
  0x79   : > { %7192 = vmatmul.mubr.bf16.gmra.mrb[12].mxu0 %v3946_v38  ;;  %v846_v21 = vld [vmem:[#allocation2 + $0x8c] sm:$0xf]  ;;  %v1558_v12 = vsel %vm1546_vm5, %v1553_v60, %v1557_v20  ;;  %v3955_v57 = vrot.slane %v7853_v11, 2  ;;  %v7855_v38 = vld [vmem:[#allocation2 + $0x78] sm:$0xff]   ;;  %v1565_v17 = vrot.slane %v1563_v39, 1  ;;  %v1561_v18 = vor.u32 %v1559_v56, %v1557_v20  ;;  %7223 = vmatprep.subr.bf16.mxu0 %v7857_v25  ;;  %v7860_v43 = vld [vmem:[#allocation2 + $0x30] sm:$0xff]  }
  0x7a   : > { %7195 = vmatprep.mubr.bf16.mxu0 %v3948_v19  ;;  %v847_v63 = vsel %vm8275_vm4, %v838_v45, %v846_v21  ;;  %vm9074_vm4 = vmmov %vm9068_vm0  ;;  %v3957_v7 = vrot.slane %v7855_v38, 2  ;;  %v1573_v61 = vrot.slane %v1571_v29, 1  ;;  %v1579_v23 = vshll.u32 %v7854_v15, 16  ;;  %v8568_v3 = vld [vmem:[#allocation2 + $0x28] sm:$0xff]   ;;  %v8585_v45 = vld [vmem:[#allocation2 + $0x38] sm:$0xff]  }
  0x7b   : > { %848 = vst [vmem:[#allocation2 + $0x8c] sm:$0xf] %v847_v63  ;;  %v3954_v13 = vsel %vm9074_vm4, %v3951_v54, %v3953_v5  ;;  %v3956_v50 = vsel %vm9075_vm3, %v3953_v5, %v3955_v57  ;;  %v1569_v19 = vor.u32 %v1567_v46, %v1565_v17  ;;  %v1566_v37 = vsel %vm1546_vm5, %v1561_v18, %v1565_v17  ;;  %v7856_v33 = vld [vmem:[%s9002_s1 + $0x88] sm:$0xff]   ;;  %v7862_v21 = vld [vmem:[%s9002_s1 + $0x90] sm:$0xff]   ;;  %v6415_v49 = vld [vmem:[%s8141_s24 + $0x78] sm:$0xf] }
  0x7c   : > { %v3958_v28 = vsel %vm9076_vm14, %v3955_v57, %v3957_v7  ;;  %v1575_v10 = vshrl.u32 %v7852_v6, 16  ;;  %7224 = vmatpush3.bf16.msra.mxu0 %v7857_v25  ;;  %v1583_v9 = vshrl.u32 %v7854_v15, 16  ;;  %v1587_v27 = vshll.u32 %v8568_v3, 16  ;;  %v7863_v0 = vld [vmem:[%s9002_s1 + $0x1a8] sm:$0xff]   ;;  %v298_v48 = vld [vmem:[#allocation2 + $0x90] sm:$0x1]  ;;  %vm9086_vm15 = vmmov %vm9068_vm0 }
  0x7d   : > { %v1574_v41 = vsel %vm1546_vm5, %v1569_v19, %v1573_v61  ;;  %v1581_v42 = vrot.slane %v1579_v23, 1  ;;  %v1591_v16 = vshrl.u32 %v8568_v3, 16  ;;  %v1595_v63 = vshll.u32 %v7860_v43, 16  ;;  %7225 = vmatprep.subr.bf16.mxu0 %v7863_v0  ;;  %v6416_v31 = vld [vmem:[%s8141_s24 + $0x7c] sm:$0xf]  ;;  %v7866_v57 = vld [vmem:[#allocation2 + $0x40] sm:$0xff]   ;;  %vm9087_vm4 = vmmov %vm9068_vm0 }
  0x7e   : > { %v7839_v53 = vld [vmem:[#allocation2 + $0x80] sm:$0xff]   ;;  %v1577_v26 = vor.u32 %v1575_v10, %v1573_v61  ;;  %v1589_v59 = vrot.slane %v1587_v27, 1  ;;  %v299_v52 = vsel %vm8134_vm6, 0, %v298_v48  ;;  %v856_v32 = vshrl.u32 %v6415_v49, 16  ;;  %v7869_v4 = vld [vmem:[%s9002_s1 + $0x98] sm:$0xff]   ;;  %vm9088_vm14 = vmmov %vm9068_vm0 }
  0x7f   : > { %6951 = vmatprep.mubr.bf16.mxu1 %v7839_v53  ;;  %v7859_v30 = vld [vmem:[#allocation2 + $0x80] sm:$0xff]   ;;  %v7868_v53 = vld [vmem:[%s9002_s1 + $0x1b0] sm:$0xff]   ;;  %300 = vst [vmem:[#allocation2 + $0x90] sm:$0x1] %v299_v52  ;;  %v859_v56 = vshll.u32 %v6415_v49, 16  ;;  %v867_v60 = vshll.u32 %v6416_v31, 16 }
  0x80   : > { %v3959_v2 = vrot.slane %v7859_v30, 2  ;;  %7226 = vmatpush3.bf16.msra.mxu0 %v7863_v0  ;;  %v1582_v20 = vsel %vm1546_vm5, %v1577_v26, %v1581_v42  ;;  %v1603_v1 = vshll.u32 %v8585_v45, 16  ;;  %v858_v39 = vrot.slane %v856_v32, 7  ;;  %v301_v46 = vld [vmem:[#allocation2 + $0x98] sm:$0x3]  ;;  %v7881_v49 = vld [vmem:[%s9002_s1 + $0xa8] sm:$0xff]  }
  0x81   : > { %7196 = vmatmul.mubr.bf16.gmra.mrb[16].mxu0 %v3950_v47  ;;  %v1585_v47 = vor.u32 %v1583_v9, %v1581_v42  ;;  %7227 = vmatprep.subr.bf16.mxu0 %v7868_v53  ;;  %v7870_v11 = vld [vmem:[%s9002_s1 + $0x1b8] sm:$0xff]   ;;  %v302_v15 = vsel %vm8154_vm13, 0, %v301_v46  ;;  %v1593_v38 = vor.u32 %v1591_v16, %v1589_v59  ;;  %v1611_v22 = vshll.u32 %v7866_v57, 16  ;;  %v7874_v9 = vld [vmem:[#allocation2 + $0x50] sm:$0xff]   ;;  %vm9080_vm13 = vmmov %vm9068_vm0 }
  0x82   : > { %7199 = vmatprep.mubr.bf16.mxu0 %v3952_v58  ;;  %v7842_v40 = vld [vmem:[#allocation2 + $0x88] sm:$0xff]   ;;  %v3960_v34 = vsel %vm9068_vm0, %v3957_v7, %v3959_v2  ;;  %v1599_v58 = vshrl.u32 %v7860_v43, 16  ;;  %303 = vst [vmem:[#allocation2 + $0x98] sm:$0x3] %v302_v15  ;;  %v1605_v18 = vrot.slane %v1603_v1, 1  ;;  %v1607_v23 = vshrl.u32 %v8585_v45, 16 }
  0x83   : > { %6952 = vmatmul.mubr.bf16.gmra.mrb[32].mxu1 %v7842_v40  ;;  %v8575_v35 = vld [vmem:[#allocation2 + $0x88] sm:$0xff]   ;;  %v1590_v5 = vsel %vm1546_vm5, %v1585_v47, %v1589_v59  ;;  %v862_v40 = vrot.slane %v858_v39, 4  ;;  %v1613_v36 = vrot.slane %v1611_v22, 1  ;;  %v7873_v0 = vld [vmem:[#allocation2 + $0x18] sm:$0xff]   ;;  %v7872_v26 = vld [vmem:[#allocation2 + $0x10] sm:$0xfc]  }
  0x84   : > { %6971 = vmatprep.mubr.bf16.mxu1 %v1558_v12  ;;  %v3961_v44 = vrot.slane %v8575_v35, 2  ;;  %v1597_v12 = vrot.slane %v1595_v63, 1  ;;  %7228 = vmatpush3.bf16.msra.mxu0 %v7868_v53  ;;  %v7871_v7 = vld [vmem:[#allocation2 + $0x48] sm:$0xff]   ;;  %v1627_v45 = vshll.u32 %v7874_v9, 16  ;;  %v4464_v52 = vrot.slane %v7872_v26, 2  ;;  %v7879_v53 = vld [vmem:[#allocation2 + $0x60] sm:$0xff]  }
  0x85   : > { %7229 = vmatprep.subr.bf16.mxu0 %v7870_v11  ;;  %v1619_v30 = vshll.u32 %v7871_v7, 16  ;;  %v1623_v59 = vshrl.u32 %v7871_v7, 16  ;;  %v7875_v1 = vld [vmem:[#allocation2 + $0x20] sm:$0xff]   ;;  %v7883_v22 = vld [vmem:[#allocation2 + $0x38] sm:$0xff]   ;;  %vm2192_vm3 = vcmask 1046528  }
  0x86   : > { %v3962_v54 = vsel %vm9077_vm10, %v3959_v2, %v3961_v44  ;;  %v1601_v17 = vor.u32 %v1599_v58, %v1597_v12  ;;  %v875_v19 = vld [vmem:[#allocation2 + $0x90] sm:$0xf]  ;;  %v1598_v25 = vsel %vm1546_vm5, %v1593_v38, %v1597_v12  ;;  %v1629_v32 = vrot.slane %v1627_v45, 1 }
  0x87   : > { %v1621_v43 = vrot.slane %v1619_v30, 1  ;;  %v7894_v30 = vld [vmem:[%s9002_s1 + $0xb8] sm:$0xff]   ;;  %vm9090_vm10 = vcmask 1042433  }
  0x88   : > { %7230 = vmatpush3.bf16.msra.mxu0 %v7870_v11  ;;  %v1606_v24 = vsel %vm1546_vm5, %v1601_v17, %v1605_v18  ;;  %v1647_v11 = vshrl.u32 %v7879_v53, 16 }
  0x89   : > { %7200 = vmatmul.mubr.bf16.gmra.mrb[20].mxu0 %v3954_v13  ;;  %v861_v13 = vor.u32 %v859_v56, %v858_v39  ;;  %v879_v10 = vld [vmem:[#allocation2 + $0x98] sm:$0x1]  ;;  %v1625_v56 = vor.u32 %v1623_v59, %v1621_v43  ;;  %v7878_v39 = vld [vmem:[#allocation2 + $0x28] sm:$0xff]  }
  0x8a   : > { %7203 = vmatprep.mubr.bf16.mxu0 %v3956_v50  ;;  %v4469_v15 = vrot.slane %v7878_v39, 2  ;;  %v7895_v39 = vld [vmem:[#allocation2 + $0x58] sm:$0xff]  }
  0x8b   : > { %6972 = vmatmul.mubr.bf16.vlgmr.msra.gmra.mrb[0].mxu1 %v1566_v37  ;;  %v876_v61 = vsel %vm8177_vm9, %v861_v13, %v875_v19  ;;  %v7876_v37 = vld [vmem:[%s9002_s1 + $0xa0] sm:$0xff]   ;;  %v7887_v13 = vld [vmem:[%s9002_s1 + $0xb0] sm:$0xff]   ;;  %v7888_v19 = vld [vmem:[#allocation2 + $0x78] sm:$0xff]  }
  0x8c   : > { %7008 = vmatpush3.bf16.msra.mxu1 %v7849_v62  ;;  %6975 = vmatprep.mubr.bf16.mxu1 %v1574_v41  ;;  %v864_v62 = vshrl.u32 %v6416_v31, 16  ;;  %877 = vst [vmem:[#allocation2 + $0x90] sm:$0xf] %v876_v61  ;;  %v1609_v41 = vor.u32 %v1607_v23, %v1605_v18  ;;  %v4465_v31 = vrot.slane %v7873_v0, 2  ;;  %v7880_v18 = vld [vmem:[#allocation2 + $0x30] sm:$0xff]   ;;  %vm9081_vm9 = vmmov %vm9068_vm0  ;;  %v7892_v23 = vld [vmem:[%s9002_s1 + $0x1c8] sm:$0xff]  }
  0x8d   : > { %7009 = vmatprep.subr.bf16.mxu1 %v7856_v33 }
  0x8e   : > { %v866_v6 = vrot.slane %v864_v62, 7  ;;  %v1614_v47 = vsel %vm1546_vm5, %v1609_v41, %v1613_v36 }
  0x90   : > { %7010 = vmatpush3.bf16.msra.mxu1 %v7856_v33  ;;  %v869_v29 = vor.u32 %v867_v60, %v866_v6  ;;  %v871_v3 = vrot.slane %v866_v6, 4  ;;  %v972_v33 = vld [vmem:[#allocation2 + $0x98] sm:$0xe]  ;;  %v1630_v6 = vsel %vm1546_vm5, %v1625_v56, %v1629_v32 }
  0x91   : > { %7204 = vmatmul.mubr.bf16.gmra.mrb[24].mxu0 %v3958_v28  ;;  %7011 = vmatprep.subr.bf16.mxu1 %v7862_v21  ;;  %v1615_v28 = vshrl.u32 %v7866_v57, 16  ;;  %v973_v2 = vsel %vm8200_vm2, 0, %v972_v33  ;;  %vm9078_vm2 = vmmov %vm9068_vm0  ;;  %v7884_v57 = vld [vmem:[#allocation2 + $0x70] sm:$0xff]   ;;  %v4471_v33 = vrot.slane %v7880_v18, 2  ;;  %v7905_v56 = vld [vmem:[%s9002_s1 + $0x1d8] sm:$0xff]  }
  0x92   : > { %7207 = vmatprep.mubr.bf16.mxu0 %v3960_v34  ;;  %v870_v50 = vsel %vm9067_vm12, %v862_v40, %v869_v29  ;;  %v880_v27 = vsel %vm8134_vm6, %v871_v3, %v879_v10  ;;  %974 = vst [vmem:[#allocation2 + $0x98] sm:$0xe] %v973_v2  ;;  %v7877_v34 = vld [vmem:[#allocation2 + $0x58] sm:$0xff]   ;;  %vm9079_vm6 = vmmov %vm9068_vm0  ;;  %v4467_v29 = vrot.slane %v7875_v1, 2  ;;  %v1667_v10 = vshll.u32 %v7888_v19, 16  ;;  %v7901_v18 = vld [vmem:[#allocation2 + $0x68] sm:$0xff]  }
  0x93   : > { %6976 = vmatmul.mubr.bf16.gmra.mrb[4].mxu1 %v1582_v20  ;;  %878 = vst [vmem:[#allocation2 + $0x94] sm:$0xf] %v870_v50  ;;  %881 = vst [vmem:[#allocation2 + $0x98] sm:$0x1] %v880_v27  ;;  %v1617_v42 = vor.u32 %v1615_v28, %v1613_v36  ;;  %v1635_v51 = vshll.u32 %v7877_v34, 16  ;;  %v7882_v20 = vld [vmem:[#allocation2 + $0x68] sm:$0xff]   ;;  %v4466_v35 = vsel %vm9079_vm6, %v4464_v52, %v4465_v31 }
  0x94   : > { %6979 = vmatprep.mubr.bf16.mxu1 %v1590_v5  ;;  %7012 = vmatpush3.bf16.msra.mxu1 %v7862_v21  ;;  %v1631_v21 = vshrl.u32 %v7874_v9, 16  ;;  %v1639_v46 = vshrl.u32 %v7877_v34, 16  ;;  %v1651_v12 = vshll.u32 %v7882_v20, 16  ;;  %v4468_v61 = vsel %vm9081_vm9, %v4465_v31, %v4467_v29  ;;  %vm9082_vm12 = vmmov %vm9068_vm0  ;;  %v7890_v27 = vld [vmem:[#allocation2 + $0x80] sm:$0xff]   ;;  %v7898_v34 = vld [vmem:[%s9002_s1 + $0x1d0] sm:$0xff]  }
  0x95   : > { %7013 = vmatprep.subr.bf16.mxu1 %v7869_v4  ;;  %v1622_v48 = vsel %vm1546_vm5, %v1617_v42, %v1621_v43  ;;  %v1637_v60 = vrot.slane %v1635_v51, 1  ;;  %v4470_v3 = vsel %vm9082_vm12, %v4467_v29, %v4469_v15  ;;  %v1655_v28 = vshrl.u32 %v7882_v20, 16  ;;  %v7893_v42 = vld [vmem:[#allocation2 + $0x88] sm:$0xff]   ;;  %v7896_v52 = vld [vmem:[#allocation2 + $0x90] ss:$0 sps:$4 sm:$0x11]   ;;  %vm9092_vm6 = vmmov %vm9085_vm1 }
  0x96   : > { %v1633_v62 = vor.u32 %v1631_v21, %v1629_v32  ;;  %v1653_v7 = vrot.slane %v1651_v12, 1  ;;  %v1663_v36 = vshrl.u32 %v7884_v57, 16  ;;  %v4473_v9 = vrot.slane %v7883_v22, 2  ;;  %v8663_v31 = vld [vmem:[%s9002_s1 + $0xc0] sm:$0xff]   ;;  %vm9094_vm9 = vmmov %vm9085_vm1 }
  0x97   : > { %v1641_v17 = vor.u32 %v1639_v46, %v1637_v60  ;;  %v1669_v0 = vrot.slane %v1667_v10, 1  ;;  %v4472_v26 = vsel %vm9083_vm8, %v4469_v15, %v4471_v33  ;;  %v1675_v59 = vshll.u32 %v7890_v27, 16  ;;  %v7899_v46 = vld [vmem:[#allocation2] sm:$0xfe]   ;;  %v7907_v10 = vld [vmem:[#allocation2 + $0x78] sm:$0xff]   ;;  %vm9096_vm12 = vmmov %vm9085_vm1 }
  0x98   : > { %7014 = vmatpush3.bf16.msra.mxu1 %v7869_v4  ;;  %v7886_v4 = vld [vmem:[%s9002_s1 + $0x1c0] sm:$0xff]   ;;  %v1638_v40 = vsel %vm1546_vm5, %v1633_v62, %v1637_v60  ;;  %v1657_v2 = vor.u32 %v1655_v28, %v1653_v7  ;;  %v4474_v45 = vsel %vm9084_vm7, %v4471_v33, %v4473_v9  ;;  %v1679_v51 = vshrl.u32 %v7890_v27, 16  ;;  %v7904_v28 = vld [vmem:[#allocation2 + $0x70] sm:$0xff]   ;;  %vm9097_vm8 = vmmov %vm9085_vm1 }
  0x99   : > { %7208 = vmatmul.mubr.bf16.gmra.mrb[28].mxu0 %v3962_v54  ;;  %7015 = vmatprep.subr.bf16.mxu1 %v7876_v37  ;;  %v4481_v12 = vrot.slane %v7895_v39, 2  ;;  %v2193_v15 = vrot.slane %v7899_v46, 1  ;;  %vm9089_vm0 = vsmask.f32 7942  ;;  %v7926_v39 = vld [vmem:[#allocation2 + $0x10] sm:$0xfc]   ;;  %vm9098_vm7 = vmmov %vm9085_vm1 }
  0x9a   : > { %v7865_v16 = vld [vmem:[#allocation2 + $0x90] sm:$0xff]   ;;  %v7867_v54 = vld [vmem:[#allocation2 + $0x98] ss:$0 sps:$4 sm:$0x33]   ;;  %7267 = vmatprep.subr.bf16.mxu0 %v7886_v4 }
  0x9b   : > { %6980 = vmatmul.mubr.bf16.gmra.mrb[8].mxu1 %v1598_v25  ;;  %v3963_v14 = vrot.slane %v7865_v16, 2  ;;  %v3965_v58 = vrot.slane %v7867_v54, 2  ;;  %v1659_v25 = vshll.u32 %v7884_v57, 16  ;;  %v7885_v16 = vld [vmem:[#allocation2 + $0x40] sm:$0xff]  }
  0x9c   : > { %6983 = vmatprep.mubr.bf16.mxu1 %v1606_v24  ;;  %7016 = vmatpush3.bf16.msra.mxu1 %v7876_v37  ;;  %v7897_v57 = vld [vmem:[#allocation2 + $0x60] sm:$0xff]  }
  0x9d   : > { %v3964_v63 = vsel %vm9078_vm2, %v3961_v44, %v3963_v14  ;;  %7017 = vmatprep.subr.bf16.mxu1 %v7881_v49  ;;  %v1643_v44 = vshll.u32 %v7879_v53, 16  ;;  %v3966_v5 = vsel %vm9080_vm13, %v3963_v14, %v3965_v58  ;;  %v1661_v41 = vrot.slane %v1659_v25, 1  ;;  %v7891_v58 = vld [vmem:[#allocation2 + $0x50] sm:$0xff]   ;;  %v7906_v25 = vld [vmem:[#allocation2 + $0x18] sm:$0xff]   ;;  %vm305_vm2 = vmand %vm9090_vm10, %vm9089_vm0 }
  0x9e   : > { %7211 = vmatprep.mubr.bf16.mxu0 %v3964_v63  ;;  %v1671_v14 = vshrl.u32 %v7888_v19, 16  ;;  %v4475_v63 = vrot.slane %v7885_v16, 2  ;;  %v1677_v53 = vrot.slane %v1675_v59, 1  ;;  %v4489_v16 = vrot.slane %v7907_v10, 2  ;;  %v7916_v59 = vld [vmem:[%s9002_s1 + $0xd0] sm:$0xff]   ;;  %vm9093_vm13 = vmmov %vm9085_vm1 }
  0x9f   : > { %v1645_v38 = vrot.slane %v1643_v44, 1  ;;  %v1665_v43 = vor.u32 %v1663_v36, %v1661_v41  ;;  %v1662_v21 = vsel %vm1546_vm5, %v1657_v2, %v1661_v41  ;;  %v2198_v36 = vrot.slane %v7906_v25, 1  ;;  %v7908_v41 = vld [vmem:[#allocation2 + $0x20] sm:$0xff]   ;;  %v7910_v2 = vld [vmem:[%s9002_s1 + $0xc8] sm:$0xff]  }
  0xa0   : > { %7018 = vmatpush3.bf16.msra.mxu1 %v7881_v49  ;;  %v1683_v49 = vshll.u32 %v7893_v42, 16  ;;  %v1673_v54 = vor.u32 %v1671_v14, %v1669_v0  ;;  %v1681_v62 = vor.u32 %v1679_v51, %v1677_v53  ;;  %v4476_v20 = vsel %vm9085_vm1, %v4473_v9, %v4475_v63 }
  0xa1   : > { %7212 = vmatmul.mubr.bf16.gmra.mrb[32].mxu0 %v3966_v5  ;;  %7019 = vmatprep.subr.bf16.mxu1 %v7887_v13  ;;  %v1649_v50 = vor.u32 %v1647_v11, %v1645_v38  ;;  %v1646_v24 = vsel %vm1546_vm5, %v1641_v17, %v1645_v38  ;;  %v7900_v5 = vld [vmem:[#allocation2 + $0x8] sm:$0xff]   ;;  %v4479_v11 = vrot.slane %v7891_v58, 2 }
  0xa2   : > { %7231 = vmatprep.mubr.bf16.mxu0 %v4466_v35  ;;  %v1685_v60 = vrot.slane %v1683_v49, 1  ;;  %v1687_v35 = vshrl.u32 %v7893_v42, 16  ;;  %v1678_v44 = vsel %vm1546_vm5, %v1673_v54, %v1677_v53  ;;  %v2194_v38 = vrot.slane %v7900_v5, 1  ;;  %v7924_v42 = vld [vmem:[%s9002_s1 + $0x1f8] sm:$0xff]  }
  0xa3   : > { %6984 = vmatmul.mubr.bf16.gmra.mrb[12].mxu1 %v1614_v47  ;;  %v1654_v37 = vsel %vm1546_vm5, %v1649_v50, %v1653_v7  ;;  %v7889_v47 = vld [vmem:[#allocation2 + $0x48] sm:$0xff]   ;;  %v4482_v50 = vsel %vm9088_vm14, %v4479_v11, %v4481_v12  ;;  %v7902_v7 = vld [vmem:[#allocation2 + $0x10] sm:$0xff]   ;;  %v7923_v54 = vld [vmem:[%s9002_s1 + $0xd8] sm:$0xff]   ;;  %vm9100_vm14 = vsmask.f32 6400 }
  0xa4   : > { %6987 = vmatprep.mubr.bf16.mxu1 %v1622_v48  ;;  %7020 = vmatpush3.bf16.msra.mxu1 %v7887_v13  ;;  %v1670_v48 = vsel %vm1546_vm5, %v1665_v43, %v1669_v0  ;;  %v4477_v32 = vrot.slane %v7889_v47, 2  ;;  %v1689_v13 = vor.u32 %v1687_v35, %v1685_v60  ;;  %v2195_v22 = vsel %vm2192_vm3, %v2193_v15, %v2194_v38  ;;  %v7912_v0 = vld [vmem:[#allocation2 + $0x28] sm:$0xff]   ;;  %v7927_v5 = vld [vmem:[#allocation2 + $0x18] sm:$0xff]  }
  0xa5   : > { %7021 = vmatprep.subr.bf16.mxu1 %v7894_v30  ;;  %v2202_v47 = vrot.slane %v7912_v0, 1  ;;  %v7935_v15 = vld [vmem:[%s9002_s1 + $0xe8] sm:$0xff]  }
  0xa6   : > { %v4478_v1 = vsel %vm9086_vm15, %v4475_v63, %v4477_v32  ;;  %v4480_v17 = vsel %vm9087_vm4, %v4477_v32, %v4479_v11  ;;  %v7913_v63 = vld [vmem:[#allocation2 + $0x88] sm:$0xff]   ;;  %v7918_v32 = vld [vmem:[#allocation2 + $0x38] sm:$0xff]   ;;  %vm9099_vm15 = vmmov %vm9087_vm4  ;;  %vm5666_vm4 = vcmask 1044480  }
  0xa7   : > { %v2206_v35 = vrot.slane %v7918_v32, 1 }
  0xa8   : > { %7022 = vmatpush3.bf16.msra.mxu1 %v7894_v30  ;;  %v306_v30 = vld [vmem:[#allocation2 + $0xa0] sm:$0x6] }
  0xa9   : > { %7232 = vmatmul.mubr.bf16.vlgmr.msra.gmra.mrb[0].mxu0 %v4468_v61  ;;  %7059 = vmatprep.subr.bf16.mxu1 %v8663_v31  ;;  %v7917_v61 = vld [vmem:[%s9002_s1 + $0x1e8] sm:$0xff]   ;;  %v307_v33 = vsel %vm305_vm2, 0, %v306_v30 }
  0xaa   : > { %7235 = vmatprep.mubr.bf16.mxu0 %v4470_v3  ;;  %7268 = vmatpush3.bf16.msra.mxu0 %v7886_v4  ;;  %v1691_v4 = vshll.u32 %v7896_v52, 16  ;;  %v4485_v3 = vrot.slane %v7901_v18, 2  ;;  %308 = vst [vmem:[#allocation2 + $0xa0] sm:$0x6] %v307_v33  ;;  %v7914_v52 = vld [vmem:[#allocation2 + $0x30] sm:$0xff]   ;;  %v5011_v18 = vshll.u32 %v7927_v5, 16 }
  0xab   : > { %6988 = vmatmul.mubr.bf16.gmra.mrb[16].mxu1 %v1630_v6  ;;  %7269 = vmatprep.subr.bf16.mxu0 %v7892_v23  ;;  %v1686_v6 = vsel %vm1546_vm5, %v1681_v62, %v1685_v60  ;;  %v8711_v62 = vld [vmem:[#allocation2 + $0x98] sm:$0xff]   ;;  %v4493_v60 = vrot.slane %v7913_v63, 2  ;;  %v2204_v58 = vrot.slane %v7914_v52, 1  ;;  %v7932_v30 = vld [vmem:[#allocation2 + $0x28] sm:$0xff]   ;;  %v7933_v63 = vld [vmem:[#allocation2 + $0x60] sm:$0xff]  }
  0xac   : > { %6991 = vmatprep.mubr.bf16.mxu1 %v1638_v40  ;;  %v7911_v40 = vld [vmem:[%s9002_s1 + $0x1e0] sm:$0xff]   ;;  %v1693_v29 = vrot.slane %v1691_v4, 1  ;;  %v5029_v0 = vshll.u32 %v7932_v30, 16 }
  0xad   : > { %v2205_v46 = vsel %vm2192_vm3, %v2202_v47, %v2204_v58 }
  0xae   : > { %7270 = vmatpush3.bf16.msra.mxu0 %v7892_v23  ;;  %v1694_v19 = vsel %vm1546_vm5, %v1689_v13, %v1693_v29  ;;  %v4483_v23 = vrot.slane %v7897_v57, 2  ;;  %vm9091_vm5 = vmmov %vm9085_vm1  ;;  %v5000_v57 = vshrl.u32 %v7926_v39, 16 }
  0xaf   : > { %7271 = vmatprep.subr.bf16.mxu0 %v7898_v34 }
  0xb0   : > { %v4484_v9 = vsel %vm9091_vm5, %v4481_v12, %v4483_v23  ;;  %v4486_v27 = vsel %vm9092_vm6, %v4483_v23, %v4485_v3  ;;  %v2207_v12 = vsel %vm2192_vm3, %v2204_v58, %v2206_v35  ;;  %v2216_v58 = vrot.slane %v7933_v63, 1  ;;  %v7955_v63 = vld [vmem:[#allocation2 + $0x68] sm:$0xff]  }
  0xb1   : > { %7236 = vmatmul.mubr.bf16.gmra.mrb[4].mxu0 %v4472_v26  ;;  %v4487_v26 = vrot.slane %v7904_v28, 2  ;;  %v5013_v28 = vrot.slane %v5011_v18, 3 }
  0xb2   : > { %7239 = vmatprep.mubr.bf16.mxu0 %v4474_v45  ;;  %7272 = vmatpush3.bf16.msra.mxu0 %v7898_v34  ;;  %v2200_v45 = vrot.slane %v7908_v41, 1 }
  0xb3   : > { %6992 = vmatmul.mubr.bf16.gmra.mrb[20].mxu1 %v1646_v24  ;;  %7273 = vmatprep.subr.bf16.mxu0 %v7905_v56  ;;  %v2196_v24 = vrot.slane %v7902_v7, 1  ;;  %v4488_v14 = vsel %vm9093_vm13, %v4485_v3, %v4487_v26  ;;  %v4490_v49 = vsel %vm9094_vm9, %v4487_v26, %v4489_v16 }
  0xb4   : > { %6995 = vmatprep.mubr.bf16.mxu1 %v1654_v37  ;;  %v7922_v37 = vld [vmem:[%s9002_s1 + $0x1f0] sm:$0xff]   ;;  %v2203_v53 = vsel %vm2192_vm3, %v2200_v45, %v2202_v47  ;;  %v7948_v47 = vld [vmem:[%s9002_s1 + $0xf8] sm:$0xff]  }
  0xb5   : > { %v2197_v43 = vsel %vm2192_vm3, %v2194_v38, %v2196_v24  ;;  %v2199_v34 = vsel %vm2192_vm3, %v2196_v24, %v2198_v36  ;;  %v5003_v38 = vshll.u32 %v7926_v39, 16  ;;  %v7939_v39 = vld [vmem:[#allocation2 + $0x40] sm:$0xff]  }
  0xb6   : > { %7274 = vmatpush3.bf16.msra.mxu0 %v7905_v56  ;;  %v7915_v56 = vld [vmem:[#allocation2 + $0x90] sm:$0xff]  }
  0xb7   : > { %7275 = vmatprep.subr.bf16.mxu0 %v7911_v40  ;;  %v4495_v11 = vrot.slane %v7915_v56, 2  ;;  %v5005_v23 = vrot.slane %v5003_v38, 3  ;;  %v7942_v38 = vld [vmem:[#allocation2 + $0x78] sm:$0xff]  }
  0xb9   : > { %7240 = vmatmul.mubr.bf16.gmra.mrb[8].mxu0 %v4476_v20  ;;  %v7920_v20 = vld [vmem:[#allocation2 + $0x40] sm:$0xff]   ;;  %v4496_v25 = vsel %vm9097_vm8, %v4493_v60, %v4495_v11 }
  0xba   : > { %7243 = vmatprep.mubr.bf16.mxu0 %v4478_v1  ;;  %7276 = vmatpush3.bf16.msra.mxu0 %v7911_v40  ;;  %v8713_v1 = vld [vmem:[#allocation2 + $0x48] sm:$0xff]   ;;  %v4497_v40 = vrot.slane %v8711_v62, 2  ;;  %v2208_v13 = vrot.slane %v7920_v20, 1 }
  0xbb   : > { %6996 = vmatmul.mubr.bf16.gmra.mrb[24].mxu1 %v1662_v21  ;;  %7277 = vmatprep.subr.bf16.mxu0 %v7917_v61  ;;  %v976_v21 = vld [vmem:[#allocation2 + $0xa0] sm:$0x3]  ;;  %v2210_v29 = vrot.slane %v8713_v1, 1 }
  0xbc   : > { %6999 = vmatprep.mubr.bf16.mxu1 %v1670_v48  ;;  %v7909_v48 = vld [vmem:[#allocation2 + $0x80] sm:$0xff]   ;;  %v977_v51 = vsel %vm9060_vm11, 0, %v976_v21  ;;  %vm9095_vm11 = vmmov %vm9085_vm1  ;;  %v4498_v24 = vsel %vm9098_vm7, %v4495_v11, %v4497_v40  ;;  %vm4998_vm1 = vsmask.f32 5376 }
  0xbd   : > { %978 = vst [vmem:[#allocation2 + $0xa0] sm:$0x3] %v977_v51  ;;  %v4491_v55 = vrot.slane %v7909_v48, 2  ;;  %v2211_v33 = vsel %vm2192_vm3, %v2208_v13, %v2210_v29 }
  0xbe   : > { %7278 = vmatpush3.bf16.msra.mxu0 %v7917_v61  ;;  %v5002_v61 = vrot.slane %v5000_v57, 2 }
  0xbf   : > { %7279 = vmatprep.subr.bf16.mxu0 %v7922_v37  ;;  %v4492_v4 = vsel %vm9095_vm11, %v4489_v16, %v4491_v55  ;;  %v7934_v16 = vld [vmem:[#allocation2 + $0x30] sm:$0xff]  }
  0xc1   : > { %7244 = vmatmul.mubr.bf16.gmra.mrb[12].mxu0 %v4480_v17  ;;  %v5008_v17 = vshrl.u32 %v7927_v5, 16 }
  0xc2   : > { %7247 = vmatprep.mubr.bf16.mxu0 %v4482_v50  ;;  %7280 = vmatpush3.bf16.msra.mxu0 %v7922_v37  ;;  %v7929_v50 = vld [vmem:[#allocation2 + $0x20] sm:$0xff]   ;;  %v2209_v37 = vsel %vm2192_vm3, %v2206_v35, %v2208_v13  ;;  %v7938_v13 = vld [vmem:[#allocation2 + $0x70] sm:$0xff]  }
  0xc3   : > { %7000 = vmatmul.mubr.bf16.gmra.mrb[28].mxu1 %v1678_v44  ;;  %7281 = vmatprep.subr.bf16.mxu0 %v7924_v42  ;;  %v7930_v44 = vld [vmem:[%s9002_s1 + $0xe0] sm:$0xff]   ;;  %v5010_v3 = vrot.slane %v5008_v17, 2  ;;  %v5017_v10 = vshrl.u32 %v7929_v50, 16 }
  0xc4   : > { %7003 = vmatprep.mubr.bf16.mxu1 %v1686_v6  ;;  %v4494_v6 = vsel %vm9096_vm12, %v4491_v55, %v4493_v60  ;;  %v7921_v7 = vld [vmem:[#allocation2 + $0xa0] ss:$0 sps:$4 sm:$0x33]  }
  0xc5   : > { %v4499_v41 = vrot.slane %v7921_v7, 2  ;;  %v5019_v26 = vrot.slane %v5017_v10, 2  ;;  %v8750_v55 = vld [vmem:[%s9002_s1 + $0x100] sm:$0xff]  }
  0xc6   : > { %7282 = vmatpush3.bf16.msra.mxu0 %v7924_v42  ;;  %v5014_v42 = vor.u32 %v5013_v28, %v5010_v3  ;;  %v7949_v28 = vld [vmem:[#allocation2 + $0x58] sm:$0xff]   ;;  %v7944_v10 = vld [vmem:[#allocation2 + $0x80] sm:$0xff]  }
  0xc9   : > { %7248 = vmatmul.mubr.bf16.gmra.mrb[16].mxu0 %v4484_v9  ;;  %v7931_v9 = vld [vmem:[#allocation2 + $0x58] sm:$0xff]  }
  0xca   : > { %7251 = vmatprep.mubr.bf16.mxu0 %v4486_v27  ;;  %v5020_v27 = vshll.u32 %v7929_v50, 16 }
  0xcb   : > { %7004 = vmatmul.mubr.bf16.gmra.mrb[32].mxu1 %v1694_v19  ;;  %v8730_v19 = vld [vmem:[%s9002_s1 + $0x200] sm:$0xff]  }
  0xcc   : > { %7023 = vmatprep.mubr.bf16.mxu1 %v2195_v22  ;;  %v7941_v22 = vld [vmem:[%s9002_s1 + $0xf0] sm:$0xff]   ;;  %7319 = vmatprep.subr.bf16.mxu0 %v8730_v19  ;;  %v5022_v21 = vrot.slane %v5020_v27, 3  ;;  %v7947_v27 = vld [vmem:[#allocation2 + $0x88] sm:$0xff]  }
  0xce   : > { %v5023_v56 = vor.u32 %v5022_v21, %v5019_v26  ;;  %v7963_v26 = vld [vmem:[%s9002_s1 + $0x220] sm:$0xff]  }
  0xd1   : > { %7252 = vmatmul.mubr.bf16.gmra.mrb[20].mxu0 %v4488_v14  ;;  %v7937_v14 = vld [vmem:[#allocation2 + $0x38] sm:$0xff]  }
  0xd2   : > { %7255 = vmatprep.mubr.bf16.mxu0 %v4490_v49  ;;  %v5031_v49 = vrot.slane %v5029_v0, 3  ;;  %v5044_v62 = vshrl.u32 %v7937_v14, 16  ;;  %v5047_v20 = vshll.u32 %v7937_v14, 16  ;;  %v5080_v0 = vshrl.u32 %v7949_v28, 16  ;;  %v7951_v14 = vld [vmem:[#allocation2 + $0x60] sm:$0xff]  }
  0xd3   : > { %7024 = vmatmul.mubr.bf16.vlgmr.msra.gmra.mrb[0].mxu1 %v2197_v43  ;;  %v5026_v43 = vshrl.u32 %v7932_v30, 16 }
  0xd4   : > { %7060 = vmatpush3.bf16.msra.mxu1 %v8663_v31  ;;  %7027 = vmatprep.mubr.bf16.mxu1 %v2199_v34  ;;  %v2201_v31 = vsel %vm2192_vm3, %v2198_v36, %v2200_v45  ;;  %v7928_v36 = vld [vmem:[#allocation2 + $0x50] sm:$0xff]   ;;  %v2214_v45 = vrot.slane %v7931_v9, 1  ;;  %v5046_v5 = vrot.slane %v5044_v62, 2  ;;  %v5049_v11 = vrot.slane %v5047_v20, 3 }
  0xd5   : > { %7061 = vmatprep.subr.bf16.mxu1 %v7910_v2  ;;  %v2212_v34 = vrot.slane %v7928_v36, 1  ;;  %v5028_v51 = vrot.slane %v5026_v43, 2  ;;  %v7954_v62 = vld [vmem:[#allocation2 + $0x10] sm:$0xff]   ;;  %v5089_v20 = vshrl.u32 %v7951_v14, 16 }
  0xd6   : > { %v5050_v50 = vor.u32 %v5049_v11, %v5046_v5 }
  0xd7   : > { %v2213_v52 = vsel %vm2192_vm3, %v2210_v29, %v2212_v34  ;;  %v2215_v32 = vsel %vm2192_vm3, %v2212_v34, %v2214_v45  ;;  %v5032_v60 = vor.u32 %v5031_v49, %v5028_v51  ;;  %v5053_v29 = vshrl.u32 %v7939_v39, 16  ;;  %v7950_v49 = vld [vmem:[#allocation2 + $0x90] ss:$0 sps:$4 sm:$0x11]  }
  0xd8   : > { %7062 = vmatpush3.bf16.msra.mxu1 %v7910_v2  ;;  %v5006_v2 = vor.u32 %v5005_v23, %v5002_v61  ;;  %v7952_v61 = vld [vmem:[%s9002_s1 + $0x210] sm:$0xff]   ;;  %v5083_v34 = vshll.u32 %v7949_v28, 16  ;;  %v5082_v51 = vrot.slane %v5080_v0, 2 }
  0xd9   : > { %7063 = vmatprep.subr.bf16.mxu1 %v7916_v59  ;;  %7256 = vmatmul.mubr.bf16.gmra.mrb[24].mxu0 %v4492_v4  ;;  %v5024_v4 = vsel %vm4998_vm1, %v5014_v42, %v5023_v56  ;;  %v5055_v23 = vrot.slane %v5053_v29, 2 }
  0xda   : > { %7259 = vmatprep.mubr.bf16.mxu0 %v4494_v6  ;;  %v5015_v48 = vsel %vm4998_vm1, %v5006_v2, %v5014_v42  ;;  %v7943_v6 = vld [vmem:[#allocation2 + $0x48] sm:$0xff]  }
  0xdb   : > { %7028 = vmatmul.mubr.bf16.gmra.mrb[4].mxu1 %v2201_v31  ;;  %v7936_v31 = vld [vmem:[#allocation2 + $0x68] sm:$0xff]   ;;  %v5062_v18 = vshrl.u32 %v7943_v6, 16  ;;  %v5065_v7 = vshll.u32 %v7943_v6, 16  ;;  %v2728_v6 = vrot.slane %v7954_v62, 1 }
  0xdc   : > { %7031 = vmatprep.mubr.bf16.mxu1 %v2203_v53  ;;  %7064 = vmatpush3.bf16.msra.mxu1 %v7916_v59  ;;  %v4500_v59 = vsel %vm9099_vm15, %v4497_v40, %v4499_v41  ;;  %v5035_v53 = vshrl.u32 %v7934_v16, 16  ;;  %v2218_v1 = vrot.slane %v7936_v31, 1  ;;  %v7946_v40 = vld [vmem:[%s9002_s1 + $0x208] sm:$0xff]   ;;  %v5085_v31 = vrot.slane %v5083_v34, 3 }
  0xdd   : > { %7065 = vmatprep.subr.bf16.mxu1 %v7923_v54  ;;  %v5067_v36 = vrot.slane %v5065_v7, 3 }
  0xde   : > { %v5037_v35 = vrot.slane %v5035_v53, 2  ;;  %v2219_v57 = vsel %vm2192_vm3, %v2216_v58, %v2218_v1 }
  0xe0   : > { %7066 = vmatpush3.bf16.msra.mxu1 %v7923_v54  ;;  %v5038_v54 = vshll.u32 %v7934_v16, 16 }
  0xe1   : > { %7067 = vmatprep.subr.bf16.mxu1 %v7930_v44  ;;  %7260 = vmatmul.mubr.bf16.gmra.mrb[28].mxu0 %v4496_v25  ;;  %v7945_v25 = vld [vmem:[#allocation2 + $0x50] sm:$0xff]  }
  0xe2   : > { %7263 = vmatprep.mubr.bf16.mxu0 %v4498_v24  ;;  %v2222_v24 = vrot.slane %v7942_v38, 1  ;;  %v5071_v41 = vshrl.u32 %v7945_v25, 16  ;;  %v5074_v42 = vshll.u32 %v7945_v25, 16  ;;  %v7974_v38 = vld [vmem:[%s9002_s1 + $0x238] sm:$0xff]  }
  0xe3   : > { %7032 = vmatmul.mubr.bf16.gmra.mrb[8].mxu1 %v2205_v46  ;;  %v5033_v46 = vsel %vm4998_vm1, %v5023_v56, %v5032_v60 }
  0xe4   : > { %7035 = vmatprep.mubr.bf16.mxu1 %v2207_v12  ;;  %7068 = vmatpush3.bf16.msra.mxu1 %v7930_v44  ;;  %v5040_v44 = vrot.slane %v5038_v54, 3  ;;  %v2217_v12 = vsel %vm2192_vm3, %v2214_v45, %v2216_v58  ;;  %v2224_v45 = vrot.slane %v7944_v10, 1  ;;  %v5076_v21 = vrot.slane %v5074_v42, 3  ;;  %v7953_v54 = vld [vmem:[#allocation2 + $0x8] sm:$0xfe]  }
  0xe5   : > { %7069 = vmatprep.subr.bf16.mxu1 %v7935_v15  ;;  %v5092_v58 = vshll.u32 %v7951_v14, 16  ;;  %v2727_v5 = vrot.slane %v7953_v54, 1  ;;  %v7961_v42 = vld [vmem:[#allocation2 + $0x28] sm:$0xff]   ;;  %v7970_v54 = vld [vmem:[#allocation2 + $0x98] sm:$0xff]  }
  0xe6   : > { %v5041_v17 = vor.u32 %v5040_v44, %v5037_v35  ;;  %v2225_v53 = vsel %vm2192_vm3, %v2222_v24, %v2224_v45  ;;  %v5101_v35 = vshll.u32 %v7955_v63, 16  ;;  %v7973_v44 = vld [vmem:[%s9002_s1 + $0x230] sm:$0xff]  }
  0xe8   : > { %7070 = vmatpush3.bf16.msra.mxu1 %v7935_v15  ;;  %v5056_v15 = vshll.u32 %v7939_v39, 16  ;;  %v5042_v30 = vsel %vm4998_vm1, %v5032_v60, %v5041_v17  ;;  %v5086_v39 = vor.u32 %v5085_v31, %v5082_v51  ;;  %v8015_v51 = vld [vmem:[%s9002_s1 + $0x108] sm:$0xff]   ;;  %v7967_v31 = vld [vmem:[#allocation2 + $0x90] sm:$0xff]  }
  0xe9   : > { %7071 = vmatprep.subr.bf16.mxu1 %v7941_v22  ;;  %7264 = vmatmul.mubr.bf16.gmra.mrb[32].mxu0 %v4500_v59  ;;  %v2226_v59 = vrot.slane %v7947_v27, 1 }
  0xea   : > { %7283 = vmatprep.mubr.bf16.mxu0 %v5015_v48  ;;  %v5058_v3 = vrot.slane %v5056_v15, 3  ;;  %v7960_v15 = vld [vmem:[#allocation2 + $0x78] sm:$0xff]  }
  0xeb   : > { %7036 = vmatmul.mubr.bf16.gmra.mrb[12].mxu1 %v2209_v37  ;;  %v5064_v37 = vrot.slane %v5062_v18, 2  ;;  %v2227_v56 = vsel %vm2192_vm3, %v2224_v45, %v2226_v59  ;;  %v7956_v18 = vld [vmem:[#allocation2 + $0x18] sm:$0xff]  }
  0xec   : > { %7039 = vmatprep.mubr.bf16.mxu1 %v2211_v33  ;;  %7072 = vmatpush3.bf16.msra.mxu1 %v7941_v22  ;;  %v2220_v22 = vrot.slane %v7938_v13, 1  ;;  %v7958_v33 = vld [vmem:[%s9002_s1 + $0x218] sm:$0xff]   ;;  %v5059_v43 = vor.u32 %v5058_v3, %v5055_v23  ;;  %v5116_v3 = vshrl.u32 %v7960_v15, 16  ;;  %v2730_v28 = vrot.slane %v7956_v18, 1 }
  0xed   : > { %7073 = vmatprep.subr.bf16.mxu1 %v7948_v47  ;;  %v5068_v16 = vor.u32 %v5067_v36, %v5064_v37 }
  0xee   : > { %v2221_v9 = vsel %vm2192_vm3, %v2218_v1, %v2220_v22  ;;  %v2223_v2 = vsel %vm2192_vm3, %v2220_v22, %v2222_v24  ;;  %v5060_v48 = vsel %vm4998_vm1, %v5050_v50, %v5059_v43  ;;  %v5098_v1 = vshrl.u32 %v7955_v63, 16 }
  0xef   : > { %v5119_v24 = vshll.u32 %v7960_v15, 16 }
  0xf0   : > { %7074 = vmatpush3.bf16.msra.mxu1 %v7948_v47  ;;  %v5073_v47 = vrot.slane %v5071_v41, 2  ;;  %v5100_v29 = vrot.slane %v5098_v1, 2  ;;  %v5118_v41 = vrot.slane %v5116_v3, 2  ;;  %v5143_v1 = vshrl.u32 %v7967_v31, 16 }
  0xf1   : > { %7371 = vmatprep.subr.bf16.mxu1 %v8750_v55  ;;  %7284 = vmatmul.mubr.bf16.vlgmr.msra.gmra.mrb[0].mxu0 %v5024_v4  ;;  %v2228_v4 = vrot.slane %v7950_v49, 1  ;;  %v5121_v27 = vrot.slane %v5119_v24, 3 }
  0xf2   : > { %7287 = vmatprep.mubr.bf16.mxu0 %v5033_v46  ;;  %7320 = vmatpush3.bf16.msra.mxu0 %v8730_v19  ;;  %v5051_v19 = vsel %vm4998_vm1, %v5041_v17, %v5050_v50  ;;  %v5077_v60 = vor.u32 %v5076_v21, %v5073_v47  ;;  %v7957_v46 = vld [vmem:[#allocation2 + $0x70] sm:$0xff]   ;;  %v2729_v50 = vsel %vm2192_vm3, %v2727_v5, %v2728_v6  ;;  %v2734_v21 = vrot.slane %v7961_v42, 1 }
  0xf3   : > { %7040 = vmatmul.mubr.bf16.gmra.mrb[16].mxu1 %v2213_v52  ;;  %7321 = vmatprep.subr.bf16.mxu0 %v7946_v40  ;;  %v5069_v52 = vsel %vm4998_vm1, %v5059_v43, %v5068_v16  ;;  %v2229_v17 = vsel %vm2192_vm3, %v2226_v59, %v2228_v4  ;;  %v5107_v7 = vshrl.u32 %v7957_v46, 16  ;;  %v5110_v25 = vshll.u32 %v7957_v46, 16  ;;  %v7972_v46 = vld [vmem:[#allocation2 + $0xa0] ss:$0 sps:$4 sm:$0x77]   ;;  %v8020_v42 = vld [vmem:[%s9002_s1 + $0x130] sm:$0xff]  }
  0xf4   : > { %7043 = vmatprep.mubr.bf16.mxu1 %v2215_v32  ;;  %v7968_v32 = vld [vmem:[%s9002_s1 + $0x228] sm:$0xff]   ;;  %v5078_v11 = vsel %vm4998_vm1, %v5068_v16, %v5077_v60  ;;  %v5087_v13 = vsel %vm4998_vm1, %v5077_v60, %v5086_v39  ;;  %v5122_v47 = vor.u32 %v5121_v27, %v5118_v41  ;;  %v8016_v60 = vld [vmem:[%s9002_s1 + $0x110] sm:$0xff]   ;;  %v5155_v4 = vshll.u32 %v7970_v54, 16  ;;  %v7978_v41 = vld [vmem:[#allocation2 + $0x58] sm:$0xff]  }
  0xf5   : > { %v5112_v10 = vrot.slane %v5110_v25, 3  ;;  %v5164_v25 = vshll.u32 %v7972_v46, 16 }
  0xf6   : > { %7322 = vmatpush3.bf16.msra.mxu0 %v7946_v40  ;;  %v5091_v40 = vrot.slane %v5089_v20, 2  ;;  %v7969_v20 = vld [vmem:[#allocation2 + $0x40] sm:$0xff]   ;;  %v5157_v15 = vrot.slane %v5155_v4, 3 }
  0xf7   : > { %7323 = vmatprep.subr.bf16.mxu0 %v7952_v61 }
  0xf9   : > { %7288 = vmatmul.mubr.bf16.gmra.mrb[4].mxu0 %v5042_v30  ;;  %v7962_v30 = vld [vmem:[#allocation2 + $0x80] sm:$0xff]  }
  0xfa   : > { %7291 = vmatprep.mubr.bf16.mxu0 %v5051_v19  ;;  %7324 = vmatpush3.bf16.msra.mxu0 %v7952_v61  ;;  %v7959_v61 = vld [vmem:[#allocation2 + $0x20] sm:$0xff]   ;;  %v5109_v19 = vrot.slane %v5107_v7, 2  ;;  %v5125_v43 = vshrl.u32 %v7962_v30, 16  ;;  %v5128_v34 = vshll.u32 %v7962_v30, 16 }
  0xfb   : > { %7044 = vmatmul.mubr.bf16.gmra.mrb[20].mxu1 %v2217_v12  ;;  %7325 = vmatprep.subr.bf16.mxu0 %v7958_v33  ;;  %v5094_v12 = vrot.slane %v5092_v58, 3  ;;  %v2732_v37 = vrot.slane %v7959_v61, 1  ;;  %v8018_v7 = vld [vmem:[%s9002_s1 + $0x120] sm:$0xff]  }
  0xfc   : > { %7047 = vmatprep.mubr.bf16.mxu1 %v2219_v57  ;;  %v5103_v57 = vrot.slane %v5101_v35, 3  ;;  %v5113_v16 = vor.u32 %v5112_v10, %v5109_v19  ;;  %v5127_v14 = vrot.slane %v5125_v43, 2 }
  0xfd   : > { %v5095_v22 = vor.u32 %v5094_v12, %v5091_v40  ;;  %v2733_v0 = vsel %vm2192_vm3, %v2730_v28, %v2732_v37  ;;  %v5145_v12 = vrot.slane %v5143_v1, 2  ;;  %v7988_v1 = vld [vmem:[#allocation2 + $0x80] sm:$0xff]  }
  0xfe   : > { %7326 = vmatpush3.bf16.msra.mxu0 %v7958_v33  ;;  %v5104_v23 = vor.u32 %v5103_v57, %v5100_v29  ;;  %v7965_v33 = vld [vmem:[#allocation2 + $0x88] sm:$0xff]   ;;  %v2756_v4 = vrot.slane %v7988_v1, 1 }
  0xff   : > { %7327 = vmatprep.subr.bf16.mxu0 %v7963_v26  ;;  %v5096_v36 = vsel %vm4998_vm1, %v5086_v39, %v5095_v22  ;;  %v5134_v45 = vshrl.u32 %v7965_v33, 16  ;;  %v5137_v59 = vshll.u32 %v7965_v33, 16  ;;  %v5146_v39 = vshll.u32 %v7967_v31, 16  ;;  %v7977_v33 = vld [vmem:[#allocation2 + $0x18] sm:$0xff]  }
 0x100   : > { %v5114_v63 = vsel %vm4998_vm1, %v5104_v23, %v5113_v16 }
 0x101   : > { %7292 = vmatmul.mubr.bf16.gmra.mrb[8].mxu0 %v5060_v48  ;;  %v5130_v48 = vrot.slane %v5128_v34, 3  ;;  %v5668_v34 = vrot.slane %v7977_v33, 3 }
 0x102   : > { %7295 = vmatprep.mubr.bf16.mxu0 %v5069_v52  ;;  %7328 = vmatpush3.bf16.msra.mxu0 %v7963_v26  ;;  %v7964_v26 = vld [vmem:[#allocation2 + $0x30] sm:$0xff]   ;;  %v5136_v52 = vrot.slane %v5134_v45, 2  ;;  %v8021_v45 = vld [vmem:[%s9002_s1 + $0x138] sm:$0xff]  }
 0x103   : > { %7048 = vmatmul.mubr.bf16.gmra.mrb[24].mxu1 %v2221_v9  ;;  %7329 = vmatprep.subr.bf16.mxu0 %v7968_v32  ;;  %v5105_v9 = vsel %vm4998_vm1, %v5095_v22, %v5104_v23  ;;  %v2736_v49 = vrot.slane %v7964_v26, 1  ;;  %v5131_v58 = vor.u32 %v5130_v48, %v5127_v14  ;;  %v5161_v22 = vshrl.u32 %v7972_v46, 16  ;;  %v7981_v14 = vld [vmem:[#allocation2 + $0x28] sm:$0xff]  }
 0x104   : > { %7051 = vmatprep.mubr.bf16.mxu1 %v2223_v2  ;;  %v2731_v2 = vsel %vm2192_vm3, %v2728_v6, %v2730_v28  ;;  %v2740_v6 = vrot.slane %v7969_v20, 1  ;;  %v8019_v28 = vld [vmem:[%s9002_s1 + $0x128] sm:$0xff]   ;;  %v2746_v26 = vrot.slane %v7978_v41, 1  ;;  %v5672_v31 = vrot.slane %v7981_v14, 3  ;;  %v7986_v20 = vld [vmem:[#allocation2 + $0x78] sm:$0xff]  }
 0x105   : > { %v2737_v62 = vsel %vm2192_vm3, %v2734_v21, %v2736_v49  ;;  %v5132_v40 = vsel %vm4998_vm1, %v5122_v47, %v5131_v58  ;;  %v5163_v19 = vrot.slane %v5161_v22, 2  ;;  %v7991_v22 = vld [vmem:[#allocation2 + $0x50] sm:$0xff]  }
 0x106   : > { %7330 = vmatpush3.bf16.msra.mxu0 %v7968_v32  ;;  %v5123_v32 = vsel %vm4998_vm1, %v5113_v16, %v5122_v47 }
 0x107   : > { %7331 = vmatprep.subr.bf16.mxu0 %v7973_v44 }
 0x109   : > { %7296 = vmatmul.mubr.bf16.gmra.mrb[12].mxu0 %v5078_v11  ;;  %v8017_v11 = vld [vmem:[%s9002_s1 + $0x118] sm:$0xff]  }
 0x10a   : > { %7299 = vmatprep.mubr.bf16.mxu0 %v5087_v13  ;;  %7332 = vmatpush3.bf16.msra.mxu0 %v7973_v44  ;;  %v5152_v44 = vshrl.u32 %v7970_v54, 16  ;;  %v5148_v13 = vrot.slane %v5146_v39, 3 }
 0x10b   : > { %7052 = vmatmul.mubr.bf16.gmra.mrb[28].mxu1 %v2225_v53  ;;  %7333 = vmatprep.subr.bf16.mxu0 %v7974_v38  ;;  %v5139_v53 = vrot.slane %v5137_v59, 3  ;;  %v7979_v59 = vld [vmem:[#allocation2 + $0x20] sm:$0xff]  }
 0x10c   : > { %7055 = vmatprep.mubr.bf16.mxu1 %v2227_v56  ;;  %v7966_v56 = vld [vmem:[#allocation2 + $0x38] sm:$0xff]   ;;  %v5154_v57 = vrot.slane %v5152_v44, 2  ;;  %v5149_v61 = vor.u32 %v5148_v13, %v5145_v12  ;;  %v2754_v44 = vrot.slane %v7986_v20, 1  ;;  %v7990_v12 = vld [vmem:[#allocation2 + $0x88] sm:$0xff]  }
 0x10d   : > { %v5140_v35 = vor.u32 %v5139_v53, %v5136_v52  ;;  %v2738_v5 = vrot.slane %v7966_v56, 1  ;;  %v5670_v52 = vrot.slane %v7979_v59, 3 }
 0x10e   : > { %7334 = vmatpush3.bf16.msra.mxu0 %v7974_v38  ;;  %v5158_v23 = vor.u32 %v5157_v15, %v5154_v57  ;;  %v2757_v13 = vsel %vm2192_vm3, %v2754_v44, %v2756_v4  ;;  %v7996_v57 = vld [vmem:[#allocation2 + $0x50] sm:$0xff]  }
 0x10f   : > { %v5141_v29 = vsel %vm4998_vm1, %v5131_v58, %v5140_v35  ;;  %v2739_v38 = vsel %vm2192_vm3, %v2736_v49, %v2738_v5  ;;  %v2741_v18 = vsel %vm2192_vm3, %v2738_v5, %v2740_v6  ;;  %v5150_v30 = vsel %vm4998_vm1, %v5140_v35, %v5149_v61 }
 0x110   : > { %v5159_v10 = vsel %vm4998_vm1, %v5149_v61, %v5158_v23  ;;  %v5671_v54 = vsel %vm5666_vm4, %v5668_v34, %v5670_v52  ;;  %v5673_v56 = vsel %vm5666_vm4, %v5670_v52, %v5672_v31 }
 0x111   : > { %7300 = vmatmul.mubr.bf16.gmra.mrb[16].mxu0 %v5096_v36  ;;  %v7976_v36 = vld [vmem:[#allocation2 + $0x10] sm:$0xf8]  }
 0x112   : > { %7303 = vmatprep.mubr.bf16.mxu0 %v5105_v9 }
 0x113   : > { %7056 = vmatmul.mubr.bf16.gmra.mrb[32].mxu1 %v2229_v17  ;;  %v7971_v17 = vld [vmem:[#allocation2 + $0x48] sm:$0xff]  }
 0x114   : > { %7075 = vmatprep.mubr.bf16.mxu1 %v2729_v50  ;;  %v7975_v50 = vld [vmem:[#allocation2 + $0x50] sm:$0xff]   ;;  %v2742_v3 = vrot.slane %v7971_v17, 1  ;;  %v2758_v17 = vrot.slane %v7990_v12, 1 }
 0x115   : > { %v2744_v24 = vrot.slane %v7975_v50, 1  ;;  %v3343_v50 = vshrl.u32 %v7996_v57, 16 }
 0x116   : > { %v2743_v9 = vsel %vm2192_vm3, %v2740_v6, %v2742_v3  ;;  %v7987_v6 = vld [vmem:[#allocation2 + $0x40] sm:$0xff]  }
 0x117   : > { %v2745_v27 = vsel %vm2192_vm3, %v2742_v3, %v2744_v24  ;;  %v2747_v48 = vsel %vm2192_vm3, %v2744_v24, %v2746_v26  ;;  %v5678_v15 = vrot.slane %v7987_v6, 3  ;;  %v2759_v3 = vsel %vm2192_vm3, %v2756_v4, %v2758_v17  ;;  %v7994_v24 = vld [vmem:[#allocation2 + $0x98] ss:$0 sps:$4 sm:$0x11]   ;;  %v8008_v6 = vld [vmem:[#allocation2 + $0x80] sm:$0xff]  }
 0x119   : > { %7304 = vmatmul.mubr.bf16.gmra.mrb[20].mxu0 %v5114_v63  ;;  %v7984_v63 = vld [vmem:[#allocation2 + $0x70] sm:$0xff]  }
 0x11a   : > { %7307 = vmatprep.mubr.bf16.mxu0 %v5123_v32  ;;  %v2752_v53 = vrot.slane %v7984_v63, 1 }
 0x11b   : > { %7076 = vmatmul.mubr.bf16.vlgmr.msra.gmra.mrb[0].mxu1 %v2731_v2  ;;  %v7980_v2 = vld [vmem:[#allocation2 + $0x60] sm:$0xff]  }
 0x11c   : > { %7379 = vmatpush3.bf16.msra.mxu1 %v8750_v55  ;;  %7079 = vmatprep.mubr.bf16.mxu1 %v2733_v0  ;;  %v2735_v55 = vsel %vm2192_vm3, %v2732_v37, %v2734_v21  ;;  %v5166_v37 = vrot.slane %v5164_v25, 3  ;;  %v5667_v0 = vrot.slane %v7976_v36, 3  ;;  %v2748_v16 = vrot.slane %v7980_v2, 1  ;;  %v8000_v36 = vld [vmem:[#allocation2 + $0x60] sm:$0xff]  }
 0x11d   : > { %7372 = vmatprep.subr.bf16.mxu1 %v8015_v51 }
 0x11e   : > { %v5167_v43 = vor.u32 %v5166_v37, %v5163_v19  ;;  %v5669_v21 = vsel %vm5666_vm4, %v5667_v0, %v5668_v34  ;;  %v2749_v49 = vsel %vm2192_vm3, %v2746_v26, %v2748_v16  ;;  %v3345_v19 = vrot.slane %v3343_v50, 1  ;;  %v7995_v34 = vld [vmem:[#allocation2 + $0x60] sm:$0xff]   ;;  %v8005_v50 = vld [vmem:[#allocation2 + $0x88] sm:$0xff]  }
 0x11f   : > { %v5686_v63 = vrot.slane %v7995_v34, 3 }
 0x120   : > { %7380 = vmatpush3.bf16.msra.mxu1 %v8015_v51  ;;  %v5168_v47 = vsel %vm4998_vm1, %v5158_v23, %v5167_v43  ;;  %v7982_v51 = vld [vmem:[#allocation2 + $0x68] sm:$0xff]   ;;  %v7993_v23 = vld [vmem:[#allocation2 + $0x58] sm:$0xff]   ;;  %v3364_v43 = vshll.u32 %v8000_v36, 16 }
 0x121   : > { %7373 = vmatprep.subr.bf16.mxu1 %v8016_v60  ;;  %7308 = vmatmul.mubr.bf16.gmra.mrb[24].mxu0 %v5132_v40  ;;  %v2750_v32 = vrot.slane %v7982_v51, 1  ;;  %v2755_v40 = vsel %vm2192_vm3, %v2752_v53, %v2754_v44  ;;  %v5684_v33 = vrot.slane %v7993_v23, 3 }
 0x122   : > { %7311 = vmatprep.mubr.bf16.mxu0 %v5141_v29  ;;  %v7992_v29 = vld [vmem:[#allocation2 + $0x90] sm:$0xff]   ;;  %v3366_v51 = vrot.slane %v3364_v43, 2  ;;  %v8009_v43 = vld [vmem:[#allocation2 + $0x98] sm:$0xff]  }
 0x123   : > { %7080 = vmatmul.mubr.bf16.gmra.mrb[4].mxu1 %v2735_v55  ;;  %v7983_v55 = vld [vmem:[#allocation2 + $0x30] sm:$0xff]   ;;  %v2753_v58 = vsel %vm2192_vm3, %v2750_v32, %v2752_v53 }
 0x124   : > { %7083 = vmatprep.mubr.bf16.mxu1 %v2737_v62  ;;  %7381 = vmatpush3.bf16.msra.mxu1 %v8016_v60  ;;  %v7985_v62 = vld [vmem:[#allocation2 + $0x38] sm:$0xff]   ;;  %v2751_v60 = vsel %vm2192_vm3, %v2748_v16, %v2750_v32  ;;  %v5674_v39 = vrot.slane %v7983_v55, 3  ;;  %v7997_v16 = vld [vmem:[#allocation2 + $0x68] sm:$0xff]  }
 0x125   : > { %7374 = vmatprep.subr.bf16.mxu1 %v8017_v11  ;;  %v5676_v35 = vrot.slane %v7985_v62, 3  ;;  %v5688_v52 = vrot.slane %v7997_v16, 3  ;;  %v5687_v62 = vsel %vm5666_vm4, %v5684_v33, %v5686_v63  ;;  %v8013_v16 = vld [vmem:[#allocation2 + $0x98] ss:$0 sps:$4 sm:$0x33]  }
 0x126   : > { %v5675_v5 = vsel %vm5666_vm4, %v5672_v31, %v5674_v39 }
 0x127   : > { %v5677_v46 = vsel %vm5666_vm4, %v5674_v39, %v5676_v35  ;;  %v5679_v61 = vsel %vm5666_vm4, %v5676_v35, %v5678_v15  ;;  %v5689_v20 = vsel %vm5666_vm4, %v5686_v63, %v5688_v52  ;;  %v8006_v35 = vld [vmem:[#allocation2 + $0x78] sm:$0xff]  }
 0x128   : > { %7382 = vmatpush3.bf16.msra.mxu1 %v8017_v11  ;;  %v7989_v11 = vld [vmem:[#allocation2 + $0x48] sm:$0xff]   ;;  %v3388_v12 = vshrl.u32 %v8006_v35, 16 }
 0x129   : > { %7375 = vmatprep.subr.bf16.mxu1 %v8018_v7  ;;  %7312 = vmatmul.mubr.bf16.gmra.mrb[28].mxu0 %v5150_v30 }
 0x12a   : > { %7315 = vmatprep.mubr.bf16.mxu0 %v5159_v10  ;;  %v5682_v10 = vrot.slane %v7991_v22, 3 }
 0x12b   : > { %7084 = vmatmul.mubr.bf16.gmra.mrb[8].mxu1 %v2739_v38  ;;  %v5680_v38 = vrot.slane %v7989_v11, 3 }
 0x12c   : > { %7087 = vmatprep.mubr.bf16.mxu1 %v2741_v18  ;;  %7383 = vmatpush3.bf16.msra.mxu1 %v8018_v7  ;;  %v2760_v18 = vrot.slane %v7992_v29, 1  ;;  %v3346_v7 = vshll.u32 %v7996_v57, 16  ;;  %v5685_v26 = vsel %vm5666_vm4, %v5682_v10, %v5684_v33  ;;  %v3397_v57 = vshrl.u32 %v8008_v6, 16 }
 0x12d   : > { %7376 = vmatprep.subr.bf16.mxu1 %v8019_v28  ;;  %v5681_v25 = vsel %vm5666_vm4, %v5678_v15, %v5680_v38  ;;  %v5683_v0 = vsel %vm5666_vm4, %v5680_v38, %v5682_v10  ;;  %v3400_v15 = vshll.u32 %v8008_v6, 16 }
 0x12e   : > { %v2761_v30 = vsel %vm2192_vm3, %v2758_v17, %v2760_v18  ;;  %v3348_v37 = vrot.slane %v3346_v7, 2  ;;  %v8003_v17 = vld [vmem:[#allocation2 + $0x80] sm:$0xff]  }
 0x130   : > { %7384 = vmatpush3.bf16.msra.mxu1 %v8019_v28  ;;  %v7998_v28 = vld [vmem:[#allocation2 + $0x58] sm:$0xff]   ;;  %v3349_v2 = vor.u32 %v3348_v37, %v3345_v19  ;;  %v5696_v19 = vrot.slane %v8005_v50, 3  ;;  %v8879_v50 = vld [vmem:[%s9003_s2] ss:$0 sm:$0xff] }
 0x131   : > { %7377 = vmatprep.subr.bf16.mxu1 %v8020_v42  ;;  %7316 = vmatmul.mubr.bf16.gmra.mrb[32].mxu0 %v5168_v47  ;;  %v3352_v41 = vshrl.u32 %v7998_v28, 16 }
 0x132   : > { %7335 = vmatprep.mubr.bf16.mxu0 %v5669_v21  ;;  %v8002_v21 = vld [vmem:[#allocation2 + $0x68] sm:$0xff]   ;;  %v3350_v14 = vsel %vm9100_vm14, %v8416_v8, %v3349_v2  ;;  %v8001_v8 = vld [vmem:[#allocation2 + $0x78] sm:$0xff]  }
 0x133   : > { %7088 = vmatmul.mubr.bf16.gmra.mrb[12].mxu1 %v2743_v9  ;;  %v2762_v9 = vrot.slane %v7994_v24, 1  ;;  %v3354_v47 = vrot.slane %v3352_v41, 1  ;;  %v3370_v32 = vshrl.u32 %v8002_v21, 16  ;;  %v3373_v53 = vshll.u32 %v8002_v21, 16 }
 0x134   : > { %7091 = vmatprep.mubr.bf16.mxu1 %v2745_v27  ;;  %7385 = vmatpush3.bf16.msra.mxu1 %v8020_v42  ;;  %v3355_v27 = vshll.u32 %v7998_v28, 16  ;;  %v3361_v42 = vshrl.u32 %v8000_v36, 16  ;;  %v5692_v11 = vrot.slane %v8001_v8, 3  ;;  %v3402_v24 = vrot.slane %v3400_v15, 2  ;;  %v8012_v28 = vld [vmem:[#allocation2 + $0x90] sm:$0xff]  }
 0x135   : > { %7378 = vmatprep.subr.bf16.mxu1 %v8021_v45  ;;  %v3372_v1 = vrot.slane %v3370_v32, 1  ;;  %v3375_v39 = vrot.slane %v3373_v53, 2  ;;  %v3418_v41 = vshll.u32 %v8012_v28, 16 }
 0x136   : > { %v3357_v59 = vrot.slane %v3355_v27, 2 }
 0x138   : > { %7386 = vmatpush3.bf16.msra.mxu1 %v8021_v45  ;;  %v2763_v45 = vsel %vm2192_vm3, %v2760_v18, %v2762_v9  ;;  %v3358_v31 = vor.u32 %v3357_v59, %v3354_v47  ;;  %vm9101_vm3 = vmmov %vm9100_vm14  ;;  %v3415_v9 = vshrl.u32 %v8012_v28, 16  ;;  %v3420_v59 = vrot.slane %v3418_v41, 2 }
 0x139   : > { %7336 = vmatmul.mubr.bf16.vlgmr.msra.gmra.mrb[0].mxu0 %v5671_v54  ;;  %vm9102_vm0 = vmmov %vm9101_vm3 }
 0x13a   : > { %7339 = vmatprep.mubr.bf16.mxu0 %v5673_v56  ;;  %vm9103_vm10 = vmmov %vm9102_vm0  ;;  %v3417_v47 = vrot.slane %v3415_v9, 1 }
 0x13b   : > { %7092 = vmatmul.mubr.bf16.gmra.mrb[16].mxu1 %v2747_v48  ;;  %v3363_v48 = vrot.slane %v3361_v42, 1  ;;  %vm9104_vm2 = vmmov %vm9102_vm0 }
 0x13c   : > { %7095 = vmatprep.mubr.bf16.mxu1 %v2749_v49  ;;  %v8004_v49 = vld [vmem:[#allocation2 + $0x70] sm:$0xff]   ;;  %vm9105_vm5 = vmmov %vm9102_vm0  ;;  %v3421_v63 = vor.u32 %v3420_v59, %v3417_v47 }
 0x13d   : > { %v3367_v54 = vor.u32 %v3366_v51, %v3363_v48  ;;  %v3379_v55 = vshrl.u32 %v8004_v49, 16  ;;  %v3382_v56 = vshll.u32 %v8004_v49, 16  ;;  %vm9106_vm6 = vmmov %vm9102_vm0  ;;  %v3424_v51 = vshrl.u32 %v8013_v16, 16 }
 0x13e   : > { %v3427_v49 = vshll.u32 %v8013_v16, 16  ;;  %vm9107_vm13 = vmmov %vm9102_vm0 }
 0x13f   : > { %v3368_v44 = vsel %vm9102_vm0, %v3358_v31, %v3367_v54  ;;  %v3381_v4 = vrot.slane %v3379_v55, 1  ;;  %vm9108_vm9 = vmmov %vm9102_vm0 }
 0x140   : > { %v3429_v55 = vrot.slane %v3427_v49, 2  ;;  %vm9109_vm11 = vmmov %vm9102_vm0 }
 0x141   : > { %7340 = vmatmul.mubr.bf16.gmra.mrb[4].mxu0 %v5675_v5  ;;  %v3384_v5 = vrot.slane %v3382_v56, 2 }
 0x142   : > { %7343 = vmatprep.mubr.bf16.mxu0 %v5677_v46 }
 0x143   : > { %7096 = vmatmul.mubr.bf16.gmra.mrb[20].mxu1 %v2751_v60  ;;  %v7999_v60 = vld [vmem:[#allocation2 + $0x70] sm:$0xff]   ;;  %v3385_v29 = vor.u32 %v3384_v5, %v3381_v4 }
 0x144   : > { %7099 = vmatprep.mubr.bf16.mxu1 %v2753_v58  ;;  %v3359_v58 = vsel %vm9101_vm3, %v3349_v2, %v3358_v31  ;;  %v5690_v46 = vrot.slane %v7999_v60, 3  ;;  %v8007_v2 = vld [vmem:[#allocation2 + $0x90] sm:$0xff]   ;;  %v8011_v31 = vld [vmem:[#allocation2 + $0xa0] ss:$0 sps:$4 sm:$0x77]  }
 0x145   : > { %v5698_v21 = vrot.slane %v8007_v2, 3 }
 0x146   : > { %v5691_v38 = vsel %vm5666_vm4, %v5688_v52, %v5690_v46  ;;  %v5693_v18 = vsel %vm5666_vm4, %v5690_v46, %v5692_v11 }
 0x147   : > { %v5699_v52 = vsel %vm5666_vm4, %v5696_v19, %v5698_v21 }
 0x149   : > { %7344 = vmatmul.mubr.bf16.gmra.mrb[8].mxu0 %v5679_v61  ;;  %v3390_v61 = vrot.slane %v3388_v12, 1 }
 0x14a   : > { %7347 = vmatprep.mubr.bf16.mxu0 %v5681_v25  ;;  %v8010_v25 = vld [vmem:[#allocation2 + $0x88] sm:$0xff]  }
 0x14b   : > { %7100 = vmatmul.mubr.bf16.gmra.mrb[24].mxu1 %v2755_v40  ;;  %v3376_v40 = vor.u32 %v3375_v39, %v3372_v1  ;;  %v3406_v36 = vshrl.u32 %v8010_v25, 16  ;;  %v3409_v10 = vshll.u32 %v8010_v25, 16 }
 0x14c   : > { %7103 = vmatprep.mubr.bf16.mxu1 %v2757_v13  ;;  %v3391_v13 = vshll.u32 %v8006_v35, 16 }
 0x14d   : > { %v3377_v7 = vsel %vm9103_vm10, %v3367_v54, %v3376_v40  ;;  %v3386_v23 = vsel %vm9104_vm2, %v3376_v40, %v3385_v29  ;;  %v3408_v34 = vrot.slane %v3406_v36, 1  ;;  %v3426_v54 = vrot.slane %v3424_v51, 1 }
 0x14e   : > { %v3393_v22 = vrot.slane %v3391_v13, 2 }
 0x14f   : > { %v3430_v60 = vor.u32 %v3429_v55, %v3426_v54 }
 0x150   : > { %v3394_v37 = vor.u32 %v3393_v22, %v3390_v61  ;;  %v8884_v22 = vld [vmem:[%s9004_s3] ss:$0 sm:$0xff] }
 0x151   : > { %7348 = vmatmul.mubr.bf16.gmra.mrb[12].mxu0 %v5683_v0  ;;  %v3431_v8 = vsel %vm9109_vm11, %v3421_v63, %v3430_v60 }
 0x152   : > { %7351 = vmatprep.mubr.bf16.mxu0 %v5685_v26  ;;  %v3395_v0 = vsel %vm9105_vm5, %v3385_v29, %v3394_v37  ;;  %v3411_v26 = vrot.slane %v3409_v10, 2 }
 0x153   : > { %7104 = vmatmul.mubr.bf16.gmra.mrb[28].mxu1 %v2759_v3  ;;  %v3399_v3 = vrot.slane %v3397_v57, 1 }
 0x154   : > { %7107 = vmatprep.mubr.bf16.mxu1 %v2761_v30  ;;  %v5694_v30 = vrot.slane %v8003_v17, 3  ;;  %v3412_v48 = vor.u32 %v3411_v26, %v3408_v34 }
 0x155   : > { %v3403_v33 = vor.u32 %v3402_v24, %v3399_v3 }
 0x156   : > { %v5695_v27 = vsel %vm5666_vm4, %v5692_v11, %v5694_v30  ;;  %v5697_v42 = vsel %vm5666_vm4, %v5694_v30, %v5696_v19  ;;  %v3422_v56 = vsel %vm9108_vm9, %v3412_v48, %v3421_v63 }
 0x157   : > { %v3413_v53 = vsel %vm9107_vm13, %v3403_v33, %v3412_v48 }
 0x159   : > { %7352 = vmatmul.mubr.bf16.gmra.mrb[16].mxu0 %v5687_v62  ;;  %v5702_v62 = vrot.slane %v8011_v31, 3 }
 0x15a   : > { %7355 = vmatprep.mubr.bf16.mxu0 %v5689_v20 }
 0x15b   : > { %7108 = vmatmul.mubr.bf16.gmra.mrb[32].mxu1 %v2763_v45  ;;  %v3404_v45 = vsel %vm9106_vm6, %v3394_v37, %v3403_v33 }
 0x15c   : > { %7143 = vmatprep.mubr.bf16.mxu1 %v3350_v14  ;;  %v5700_v14 = vrot.slane %v8009_v43, 3 }
 0x15e   : > { %v5701_v32 = vsel %vm5666_vm4, %v5698_v21, %v5700_v14  ;;  %v5703_v20 = vsel %vm5666_vm4, %v5700_v14, %v5702_v62 }
 0x161   : > { %7356 = vmatmul.mubr.bf16.gmra.mrb[20].mxu0 %v5691_v38 }
 0x162   : > { %7359 = vmatprep.mubr.bf16.mxu0 %v5693_v18 }
 0x163   : > { %7144 = vmatmul.mubr.bf16.vlgmr.msra.gmra.mrb[16].mxu1 %v3359_v58 }
 0x164   : > { %7147 = vmatprep.mubr.bf16.mxu1 %v3368_v44 }
 0x169   : > { %7360 = vmatmul.mubr.bf16.gmra.mrb[24].mxu0 %v5695_v27 }
 0x16a   : > { %7363 = vmatprep.mubr.bf16.mxu0 %v5697_v42 }
 0x16b   : > { %7148 = vmatmul.mubr.bf16.gmra.mrb[20].mxu1 %v3377_v7 }
 0x16c   : > { %7151 = vmatprep.mubr.bf16.mxu1 %v3386_v23 }
 0x171   : > { %7364 = vmatmul.mubr.bf16.gmra.mrb[28].mxu0 %v5699_v52 }
 0x172   : > { %7367 = vmatprep.mubr.bf16.mxu0 %v5701_v32 }
 0x173   : > { %7152 = vmatmul.mubr.bf16.gmra.mrb[24].mxu1 %v3395_v0 }
 0x174   : > { %7155 = vmatprep.mubr.bf16.mxu1 %v3404_v45 }
 0x179   : > { %7368 = vmatmul.mubr.bf16.gmra.mrb[32].mxu0 %v5703_v20 }
 0x17b   : > { %7156 = vmatmul.mubr.bf16.gmra.mrb[28].mxu1 %v3413_v53 }
 0x17c   : > { %7159 = vmatprep.mubr.bf16.mxu1 %v3422_v56 }
 0x183   : > { %7160 = vmatmul.mubr.bf16.gmra.mrb[32].mxu1 %v3431_v8 }
 0x1ee   : > { %v7077_v58 = vpop.f32.mrb[0].mxu1 }
 0x1ef   : > { %v2864_v1 = vpop.f32.mrb[1].mxu1 }
 0x1f0   : > { %v7078_v39 = vpop.f32.mrb[2].mxu1 }
 0x1f1   : > { %v2867_v35 = vpop.f32.mrb[3].mxu1 }
 0x1f6   : > { %v7081_v44 = vpop.f32.mrb[4].mxu1 }
 0x1f7   : > { %v2880_v4 = vpop.f32.mrb[5].mxu1 }
 0x1f8   : > { %v7082_v5 = vpop.f32.mrb[6].mxu1 }
 0x1f9   : > { %v2883_v6 = vpop.f32.mrb[7].mxu1 }
 0x1fe   : > { %v7085_v46 = vpop.f32.mrb[8].mxu1 }
 0x1ff   : > { %v2896_v11 = vpop.f32.mrb[9].mxu1 }
 0x200   : > { %v7086_v40 = vpop.f32.mrb[10].mxu1 }
 0x201   : > { %v2899_v12 = vpop.f32.mrb[11].mxu1 }
 0x206   : > { %v8868_v13 = vpop.f32.mrb[12].mxu1 }
 0x207   : > { %v8870_v29 = vpop.f32.mrb[13].mxu1 }
 0x208   : > { %v8872_v57 = vpop.f32.mrb[14].mxu1 }
 0x209   : > { %v8874_v15 = vpop.f32.mrb[15].mxu1 }
 0x20c   : > { %v7337_v38 = vpop.f32.mrb[0].mxu0 }
 0x20d   : > { %v7389_v17 = vadd.f32 %v7337_v38, %v7077_v58  ;;  %v5804_v18 = vpop.f32.mrb[1].mxu0 }
 0x20e   : > { %v7392_v7 = vadd.f32 %v5804_v18, %v2864_v1  ;;  %v7338_v61 = vpop.f32.mrb[2].mxu0 }
 0x20f   : > { %6021 = vst [vmem:[#allocation3 + $0x10] sm:$0xff] %v7389_v17  ;;  %v7395_v25 = vadd.f32 %v7338_v61, %v7078_v39  ;;  %v5807_v23 = vpop.f32.mrb[3].mxu0 }
 0x210   : > { %v6065_v3 = vmul.f32 %v7392_v7, %v8879_v50  ;;  %v7398_v24 = vadd.f32 %v5807_v23, %v2867_v35 }
 0x211   : > { %6022 = vst [vmem:[#allocation3 + $0x18] sm:$0xff] %v7395_v25 }
 0x212   : > { %v6073_v28 = vadd.f32 %v8884_v22, %v6065_v3  ;;  %v6066_v30 = vmul.f32 %v7398_v24, %v8879_v50 }
 0x214   : > { %v6075_v19 = vmax.f32 %v6073_v28, 0.0  ;;  %v6074_v37 = vadd.f32 %v8884_v22, %v6066_v30  ;;  %v7341_v36 = vpop.f32.mrb[4].mxu0 }
 0x215   : > { %v7401_v10 = vadd.f32 %v7341_v36, %v7081_v44  ;;  %v5820_v33 = vpop.f32.mrb[5].mxu0 }
 0x216   : > { %6077 = vst [vmem:[%s8893_s12] sm:$0xff] %v6075_v19  ;;  %v6076_v9 = vmax.f32 %v6074_v37, 0.0  ;;  %v7404_v41 = vadd.f32 %v5820_v33, %v2880_v4  ;;  %v7342_v27 = vpop.f32.mrb[6].mxu0 }
 0x217   : > { %6025 = vst [vmem:[#allocation3 + $0x30] sm:$0xff] %v7401_v10  ;;  %v7407_v2 = vadd.f32 %v7342_v27, %v7082_v5  ;;  %v5823_v42 = vpop.f32.mrb[7].mxu0 }
 0x218   : > { %v6079_v43 = vld [vmem:[#allocation3 + $0x12] sm:$0xff]  ;;  %6078 = vst [vmem:[%s8893_s12 + $0x8] sm:$0xff] %v6076_v9  ;;  %6023 = vst [vmem:[#allocation3 + $0x20] sm:$0xff] %v7404_v41  ;;  %v7410_v0 = vadd.f32 %v5823_v42, %v2883_v6 }
 0x219   : > { %v6081_v34 = vmul.f32 %v8879_v50, %v6079_v43  ;;  %6026 = vst [vmem:[#allocation3 + $0x38] sm:$0xff] %v7407_v2 }
 0x21a   : > { %6024 = vst [vmem:[#allocation3 + $0x28] sm:$0xff] %v7410_v0 }
 0x21b   : > { %v6083_v26 = vadd.f32 %v8884_v22, %v6081_v34 }
 0x21c   : > { %v7345_v16 = vpop.f32.mrb[8].mxu0 }
 0x21d   : > { %v6085_v45 = vmax.f32 %v6083_v26, 0.0  ;;  %v7413_v47 = vadd.f32 %v7345_v16, %v7085_v46  ;;  %v5836_v59 = vpop.f32.mrb[9].mxu0 }
 0x21e   : > { %v7416_v21 = vadd.f32 %v5836_v59, %v2896_v11  ;;  %v7346_v14 = vpop.f32.mrb[10].mxu0 }
 0x21f   : > { %6087 = vst [vmem:[%s8893_s12 + $0x10] sm:$0xff] %v6085_v45  ;;  %v6080_v48 = vld [vmem:[#allocation3 + $0x1a] sm:$0xff]  ;;  %v6112_v51 = vmul.f32 %v7413_v47, %v8879_v50  ;;  %v7419_v49 = vadd.f32 %v7346_v14, %v7086_v40  ;;  %v5839_v63 = vpop.f32.mrb[11].mxu0 }
 0x220   : > { %v6082_v52 = vmul.f32 %v8879_v50, %v6080_v48  ;;  %v6099_v31 = vld [vmem:[#allocation3 + $0x36] sm:$0xff]  ;;  %6027 = vst [vmem:[#allocation3 + $0x40] sm:$0xff] %v7416_v21  ;;  %v7422_v32 = vadd.f32 %v5839_v63, %v2899_v12 }
 0x221   : > { %v6101_v53 = vmul.f32 %v8879_v50, %v6099_v31  ;;  %v6089_v54 = vld [vmem:[#allocation3 + $0x24] sm:$0xff]  ;;  %v6090_v55 = vld [vmem:[#allocation3 + $0x2c] sm:$0xff]  ;;  %v6114_v56 = vadd.f32 %v8884_v22, %v6112_v51  ;;  %6030 = vst [vmem:[#allocation3 + $0x58] sm:$0xff] %v7419_v49 }
 0x222   : > { %v6084_v62 = vadd.f32 %v8884_v22, %v6082_v52  ;;  %v6091_v60 = vmul.f32 %v8879_v50, %v6089_v54  ;;  %v6092_v20 = vmul.f32 %v8879_v50, %v6090_v55  ;;  %v6111_v8 = vmul.f32 %v7422_v32, %v8879_v50 }
 0x223   : > { %v6103_v58 = vadd.f32 %v8884_v22, %v6101_v53  ;;  %v6116_v1 = vmax.f32 %v6114_v56, 0.0 }
 0x224   : > { %v6086_v39 = vmax.f32 %v6084_v62, 0.0  ;;  %v6093_v35 = vadd.f32 %v8884_v22, %v6091_v60  ;;  %v6094_v44 = vadd.f32 %v8884_v22, %v6092_v20  ;;  %v6113_v4 = vadd.f32 %v8884_v22, %v6111_v8  ;;  %v7349_v5 = vpop.f32.mrb[12].mxu0 }
 0x225   : > { %v6105_v6 = vmax.f32 %v6103_v58, 0.0  ;;  %6118 = vst [vmem:[%s8893_s12 + $0x48] sm:$0xff] %v6116_v1  ;;  %v7425_v46 = vadd.f32 %v7349_v5, %v8868_v13  ;;  %v5852_v11 = vpop.f32.mrb[13].mxu0 }
 0x226   : > { %6088 = vst [vmem:[%s8893_s12 + $0x18] sm:$0xff] %v6086_v39  ;;  %v6095_v40 = vmax.f32 %v6093_v35, 0.0  ;;  %v6096_v12 = vmax.f32 %v6094_v44, 0.0  ;;  %v6115_v38 = vmax.f32 %v6113_v4, 0.0  ;;  %v7428_v17 = vadd.f32 %v5852_v11, %v8870_v29  ;;  %v7350_v18 = vpop.f32.mrb[14].mxu0 }
 0x227   : > { %6107 = vst [vmem:[%s8893_s12 + $0x30] sm:$0xff] %v6105_v6  ;;  %v6100_v7 = vld [vmem:[#allocation3 + $0x3e] sm:$0xff]  ;;  %6033 = vst [vmem:[#allocation3 + $0x70] sm:$0xff] %v7425_v46  ;;  %v7431_v61 = vadd.f32 %v7350_v18, %v8872_v57  ;;  %v5855_v25 = vpop.f32.mrb[15].mxu0 }
 0x228   : > { %6097 = vst [vmem:[%s8893_s12 + $0x20] sm:$0xff] %v6095_v40  ;;  %6098 = vst [vmem:[%s8893_s12 + $0x28] sm:$0xff] %v6096_v12  ;;  %v6102_v13 = vmul.f32 %v8879_v50, %v6100_v7  ;;  %v7434_v23 = vadd.f32 %v5855_v25, %v8874_v15 }
 0x229   : > { %6117 = vst [vmem:[%s8893_s12 + $0x40] sm:$0xff] %v6115_v38  ;;  %6031 = vst [vmem:[#allocation3 + $0x60] sm:$0xff] %v7428_v17 }
 0x22a   : > { %6034 = vst [vmem:[#allocation3 + $0x78] sm:$0xff] %v7431_v61  ;;  %v6104_v3 = vadd.f32 %v8884_v22, %v6102_v13  ;;  %6032 = vst [vmem:[#allocation3 + $0x68] sm:$0xff] %v7434_v23 }
 0x22c   : > { %v6106_v29 = vmax.f32 %v6104_v3, 0.0  ;;  %v7353_v24 = vpop.f32.mrb[16].mxu0 }
 0x22d   : > { %v5868_v28 = vpop.f32.mrb[17].mxu0 }
 0x22e   : > { %6108 = vst [vmem:[%s8893_s12 + $0x38] sm:$0xff] %v6106_v29  ;;  %v7354_v30 = vpop.f32.mrb[18].mxu0 }
 0x22f   : > { %v5871_v37 = vpop.f32.mrb[19].mxu0 }
 0x230   : > { %v6119_v57 = vld [vmem:[#allocation3 + $0x5a] sm:$0xff] }
 0x231   : > { %v6121_v33 = vmul.f32 %v8879_v50, %v6119_v57  ;;  %v6130_v9 = vld [vmem:[#allocation3 + $0x74] sm:$0xff]  ;;  %v6120_v2 = vld [vmem:[#allocation3 + $0x62] sm:$0xff]  ;;  %v6129_v42 = vld [vmem:[#allocation3 + $0x6c] sm:$0xff] }
 0x232   : > { %v6132_v15 = vmul.f32 %v8879_v50, %v6130_v9  ;;  %v6122_v16 = vmul.f32 %v8879_v50, %v6120_v2  ;;  %v6131_v45 = vmul.f32 %v8879_v50, %v6129_v42 }
 0x233   : > { %v6123_v26 = vadd.f32 %v8884_v22, %v6121_v33 }
 0x234   : > { %v6134_v59 = vadd.f32 %v8884_v22, %v6132_v15  ;;  %v6124_v51 = vadd.f32 %v8884_v22, %v6122_v16  ;;  %v6133_v49 = vadd.f32 %v8884_v22, %v6131_v45  ;;  %v7357_v63 = vpop.f32.mrb[20].mxu0 }
 0x235   : > { %v6125_v48 = vmax.f32 %v6123_v26, 0.0  ;;  %v5884_v32 = vpop.f32.mrb[21].mxu0 }
 0x236   : > { %v7145_v19 = vpop.f32.mrb[16].mxu1  ;;  %v6136_v52 = vmax.f32 %v6134_v59, 0.0  ;;  %v6126_v54 = vmax.f32 %v6124_v51, 0.0  ;;  %v6135_v55 = vmax.f32 %v6133_v49, 0.0  ;;  %v7358_v56 = vpop.f32.mrb[22].mxu0 }
 0x237   : > { %v7437_v36 = vadd.f32 %v7353_v24, %v7145_v19  ;;  %v3596_v10 = vpop.f32.mrb[17].mxu1  ;;  %6127 = vst [vmem:[%s8893_s12 + $0x50] sm:$0xff] %v6125_v48  ;;  %v5887_v20 = vpop.f32.mrb[23].mxu0 }
 0x238   : > { %v7440_v41 = vadd.f32 %v5868_v28, %v3596_v10  ;;  %v7146_v27 = vpop.f32.mrb[18].mxu1  ;;  %6138 = vst [vmem:[%s8893_s12 + $0x68] sm:$0xff] %v6136_v52  ;;  %6128 = vst [vmem:[%s8893_s12 + $0x58] sm:$0xff] %v6126_v54 }
 0x239   : > { %v6151_v43 = vmul.f32 %v7437_v36, %v8879_v50  ;;  %v7443_v0 = vadd.f32 %v7354_v30, %v7146_v27  ;;  %v3599_v34 = vpop.f32.mrb[19].mxu1  ;;  %6137 = vst [vmem:[%s8893_s12 + $0x60] sm:$0xff] %v6135_v55 }
 0x23a   : > { %6035 = vst [vmem:[#allocation3 + $0x80] sm:$0xff] %v7440_v41  ;;  %v7446_v47 = vadd.f32 %v5871_v37, %v3599_v34 }
 0x23b   : > { %v6153_v21 = vadd.f32 %v8884_v22, %v6151_v43  ;;  %v6152_v14 = vmul.f32 %v7443_v0, %v8879_v50 }
 0x23c   : > { %6036 = vst [vmem:[#allocation3 + $0x88] sm:$0xff] %v7446_v47  ;;  %v7361_v12 = vpop.f32.mrb[24].mxu0 }
 0x23d   : > { %v6155_v31 = vmax.f32 %v6153_v21, 0.0  ;;  %v6154_v53 = vadd.f32 %v8884_v22, %v6152_v14  ;;  %v5900_v38 = vpop.f32.mrb[25].mxu0 }
 0x23e   : > { %v7149_v62 = vpop.f32.mrb[20].mxu1  ;;  %v7362_v7 = vpop.f32.mrb[26].mxu0 }
 0x23f   : > { %6157 = vst [vmem:[%s8893_s12 + $0x80] sm:$0xff] %v6155_v31  ;;  %v6156_v60 = vmax.f32 %v6154_v53, 0.0  ;;  %v7449_v8 = vadd.f32 %v7357_v63, %v7149_v62  ;;  %v3612_v58 = vpop.f32.mrb[21].mxu1  ;;  %v5903_v25 = vpop.f32.mrb[27].mxu0 }
 0x240   : > { %v7452_v1 = vadd.f32 %v5884_v32, %v3612_v58  ;;  %v7150_v39 = vpop.f32.mrb[22].mxu1 }
 0x241   : > { %v6139_v35 = vld [vmem:[#allocation3 + $0x7e] sm:$0xff]  ;;  %6158 = vst [vmem:[%s8893_s12 + $0x88] sm:$0xff] %v6156_v60  ;;  %6041 = vst [vmem:[#allocation3 + $0xb0] sm:$0xff] %v7449_v8  ;;  %v7455_v44 = vadd.f32 %v7358_v56, %v7150_v39  ;;  %v3615_v4 = vpop.f32.mrb[23].mxu1 }
 0x242   : > { %v6141_v5 = vmul.f32 %v8879_v50, %v6139_v35  ;;  %6039 = vst [vmem:[#allocation3 + $0xa0] sm:$0xff] %v7452_v1  ;;  %v7458_v6 = vadd.f32 %v5887_v20, %v3615_v4 }
 0x243   : > { %v6140_v46 = vld [vmem:[#allocation3 + $0x86] sm:$0xff]  ;;  %6042 = vst [vmem:[#allocation3 + $0xb8] sm:$0xff] %v7455_v44 }
 0x244   : > { %v6143_v11 = vadd.f32 %v8884_v22, %v6141_v5  ;;  %v6142_v40 = vmul.f32 %v8879_v50, %v6140_v46  ;;  %6040 = vst [vmem:[#allocation3 + $0xa8] sm:$0xff] %v7458_v6  ;;  %v7365_v27 = vpop.f32.mrb[28].mxu0 }
 0x245   : > { %v5916_v2 = vpop.f32.mrb[29].mxu0 }
 0x246   : > { %v6145_v17 = vmax.f32 %v6143_v11, 0.0  ;;  %v6144_v18 = vadd.f32 %v8884_v22, %v6142_v40  ;;  %v7153_v61 = vpop.f32.mrb[24].mxu1  ;;  %v7366_v34 = vpop.f32.mrb[30].mxu0 }
 0x247   : > { %v7461_v13 = vadd.f32 %v7361_v12, %v7153_v61  ;;  %v3628_v23 = vpop.f32.mrb[25].mxu1  ;;  %v5919_v47 = vpop.f32.mrb[31].mxu0 }
 0x248   : > { %6147 = vst [vmem:[%s8893_s12 + $0x70] sm:$0xff] %v6145_v17  ;;  %v6146_v3 = vmax.f32 %v6144_v18, 0.0  ;;  %v7464_v29 = vadd.f32 %v5900_v38, %v3628_v23  ;;  %v7154_v24 = vpop.f32.mrb[26].mxu1 }
 0x249   : > { %6045 = vst [vmem:[#allocation3 + $0xd0] sm:$0xff] %v7461_v13  ;;  %v7467_v28 = vadd.f32 %v7362_v7, %v7154_v24  ;;  %v3631_v30 = vpop.f32.mrb[27].mxu1 }
 0x24a   : > { %6148 = vst [vmem:[%s8893_s12 + $0x78] sm:$0xff] %v6146_v3  ;;  %v6169_v19 = vld [vmem:[#allocation3 + $0xb4] sm:$0xff]  ;;  %6043 = vst [vmem:[#allocation3 + $0xc0] sm:$0xff] %v7464_v29  ;;  %v7470_v57 = vadd.f32 %v5903_v25, %v3631_v30 }
 0x24b   : > { %v6171_v37 = vmul.f32 %v8879_v50, %v6169_v19  ;;  %v6159_v36 = vld [vmem:[#allocation3 + $0xa2] sm:$0xff]  ;;  %v6160_v10 = vld [vmem:[#allocation3 + $0xaa] sm:$0xff]  ;;  %v6191_v33 = vmul.f32 %v7467_v28, %v8879_v50 }
 0x24c   : > { %v6161_v9 = vmul.f32 %v8879_v50, %v6159_v36  ;;  %v6162_v41 = vmul.f32 %v8879_v50, %v6160_v10  ;;  %6044 = vst [vmem:[#allocation3 + $0xc8] sm:$0xff] %v7470_v57  ;;  %v7369_v8 = vpop.f32.mrb[32].mxu0 }
 0x24d   : > { %v6173_v15 = vadd.f32 %v8884_v22, %v6171_v37  ;;  %v6193_v42 = vadd.f32 %v8884_v22, %v6191_v33  ;;  %v5932_v1 = vpop.f32.mrb[33].mxu0 }
 0x24e   : > { %v6163_v43 = vadd.f32 %v8884_v22, %v6161_v9  ;;  %v6164_v0 = vadd.f32 %v8884_v22, %v6162_v41  ;;  %v7157_v26 = vpop.f32.mrb[28].mxu1  ;;  %v7370_v5 = vpop.f32.mrb[34].mxu0 }
 0x24f   : > { %v6175_v16 = vmax.f32 %v6173_v15, 0.0  ;;  %v6195_v45 = vmax.f32 %v6193_v42, 0.0  ;;  %v7473_v59 = vadd.f32 %v7365_v27, %v7157_v26  ;;  %v3644_v21 = vpop.f32.mrb[29].mxu1  ;;  %v5935_v46 = vpop.f32.mrb[35].mxu0 }
 0x250   : > { %v6165_v14 = vmax.f32 %v6163_v43, 0.0  ;;  %v6166_v48 = vmax.f32 %v6164_v0, 0.0  ;;  %v7476_v51 = vadd.f32 %v5916_v2, %v3644_v21  ;;  %v7158_v49 = vpop.f32.mrb[30].mxu1 }
 0x251   : > { %6177 = vst [vmem:[%s8893_s12 + $0xa0] sm:$0xff] %v6175_v16  ;;  %v6170_v63 = vld [vmem:[#allocation3 + $0xbc] sm:$0xff]  ;;  %6197 = vst [vmem:[%s8893_s12 + $0xc0] sm:$0xff] %v6195_v45  ;;  %v7479_v52 = vadd.f32 %v7366_v34, %v7158_v49  ;;  %v3647_v31 = vpop.f32.mrb[31].mxu1 }
 0x252   : > { %6049 = vst [vmem:[#allocation3 + $0xf0] sm:$0xff] %v7473_v59  ;;  %6167 = vst [vmem:[%s8893_s12 + $0x90] sm:$0xff] %v6165_v14  ;;  %v6172_v32 = vmul.f32 %v8879_v50, %v6170_v63  ;;  %v6192_v53 = vmul.f32 %v7476_v51, %v8879_v50  ;;  %v7482_v54 = vadd.f32 %v5919_v47, %v3647_v31 }
 0x253   : > { %6168 = vst [vmem:[%s8893_s12 + $0x98] sm:$0xff] %v6166_v48  ;;  %v6179_v55 = vld [vmem:[#allocation3 + $0xc6] sm:$0xff]  ;;  %v6180_v56 = vld [vmem:[#allocation3 + $0xce] sm:$0xff]  ;;  %6050 = vst [vmem:[#allocation3 + $0xf8] sm:$0xff] %v7479_v52 }
 0x254   : > { %v6174_v62 = vadd.f32 %v8884_v22, %v6172_v32  ;;  %v6181_v60 = vmul.f32 %v8879_v50, %v6179_v55  ;;  %v6182_v20 = vmul.f32 %v8879_v50, %v6180_v56  ;;  %v6194_v58 = vadd.f32 %v8884_v22, %v6192_v53  ;;  %6048 = vst [vmem:[#allocation3 + $0xe8] sm:$0xff] %v7482_v54 }
 0x256   : > { %v6176_v39 = vmax.f32 %v6174_v62, 0.0  ;;  %v6183_v35 = vadd.f32 %v8884_v22, %v6181_v60  ;;  %v6184_v44 = vadd.f32 %v8884_v22, %v6182_v20  ;;  %v6196_v4 = vmax.f32 %v6194_v58, 0.0  ;;  %v7161_v6 = vpop.f32.mrb[32].mxu1 }
 0x257   : > { %v7485_v11 = vadd.f32 %v7369_v8, %v7161_v6  ;;  %v3660_v40 = vpop.f32.mrb[33].mxu1 }
 0x258   : > { %6178 = vst [vmem:[%s8893_s12 + $0xa8] sm:$0xff] %v6176_v39  ;;  %v6185_v12 = vmax.f32 %v6183_v35, 0.0  ;;  %v6186_v38 = vmax.f32 %v6184_v44, 0.0  ;;  %6198 = vst [vmem:[%s8893_s12 + $0xc8] sm:$0xff] %v6196_v4  ;;  %v7488_v17 = vadd.f32 %v5932_v1, %v3660_v40  ;;  %v7162_v18 = vpop.f32.mrb[34].mxu1 }
 0x259   : > { %6053 = vst [vmem:[#allocation3 + $0x110] sm:$0xff] %v7485_v11  ;;  %v7491_v7 = vadd.f32 %v7370_v5, %v7162_v18  ;;  %v3663_v61 = vpop.f32.mrb[35].mxu1 }
 0x25a   : > { %6187 = vst [vmem:[%s8893_s12 + $0xb0] sm:$0xff] %v6185_v12  ;;  %6188 = vst [vmem:[%s8893_s12 + $0xb8] sm:$0xff] %v6186_v38  ;;  %v6200_v25 = vld [vmem:[#allocation3 + $0xf2] sm:$0xff]  ;;  %v7494_v13 = vadd.f32 %v5935_v46, %v3663_v61 }
 0x25b   : > { %6051 = vst [vmem:[#allocation3 + $0x100] sm:$0xff] %v7488_v17  ;;  %v6202_v23 = vmul.f32 %v8879_v50, %v6200_v25  ;;  %v6199_v3 = vld [vmem:[#allocation3 + $0xea] sm:$0xff]  ;;  %6054 = vst [vmem:[#allocation3 + $0x118] sm:$0xff] %v7491_v7 }
 0x25c   : > { %v6201_v29 = vmul.f32 %v8879_v50, %v6199_v3  ;;  %6052 = vst [vmem:[#allocation3 + $0x108] sm:$0xff] %v7494_v13 }
 0x25d   : > { %v6204_v24 = vadd.f32 %v8884_v22, %v6202_v23 }
 0x25e   : > { %v6203_v28 = vadd.f32 %v8884_v22, %v6201_v29 }
 0x25f   : > { %v6206_v30 = vmax.f32 %v6204_v24, 0.0 }
 0x260   : > { %v6205_v19 = vmax.f32 %v6203_v28, 0.0 }
 0x261   : > { %6208 = vst [vmem:[%s8893_s12 + $0xd8] sm:$0xff] %v6206_v30 }
 0x262   : > { %v6209_v57 = vld [vmem:[#allocation3 + $0xfc] sm:$0xff]  ;;  %6207 = vst [vmem:[%s8893_s12 + $0xd0] sm:$0xff] %v6205_v19 }
 0x263   : > { %v6211_v37 = vmul.f32 %v8879_v50, %v6209_v57  ;;  %v6220_v36 = vld [vmem:[#allocation3 + $0x116] sm:$0xff]  ;;  %v6210_v33 = vld [vmem:[#allocation3 + $0x104] sm:$0xff]  ;;  %v6219_v9 = vld [vmem:[#allocation3 + $0x10e] sm:$0xff] }
 0x264   : > { %v6222_v10 = vmul.f32 %v8879_v50, %v6220_v36  ;;  %v6212_v27 = vmul.f32 %v8879_v50, %v6210_v33  ;;  %v6221_v15 = vmul.f32 %v8879_v50, %v6219_v9 }
 0x265   : > { %v6213_v41 = vadd.f32 %v8884_v22, %v6211_v37 }
 0x266   : > { %v6224_v2 = vadd.f32 %v8884_v22, %v6222_v10  ;;  %v6214_v43 = vadd.f32 %v8884_v22, %v6212_v27  ;;  %v6223_v0 = vadd.f32 %v8884_v22, %v6221_v15 }
 0x267   : > { %v6215_v42 = vmax.f32 %v6213_v41, 0.0 }
 0x268   : > { %v6226_v34 = vmax.f32 %v6224_v2, 0.0  ;;  %v6216_v26 = vmax.f32 %v6214_v43, 0.0  ;;  %v6225_v16 = vmax.f32 %v6223_v0, 0.0 }
 0x269   : > { %6217 = vst [vmem:[%s8893_s12 + $0xe0] sm:$0xff] %v6215_v42 }
 0x26a   : > { %6228 = vst [vmem:[%s8893_s12 + $0xf8] sm:$0xff] %v6226_v34  ;;  %6218 = vst [vmem:[%s8893_s12 + $0xe8] sm:$0xff] %v6216_v26 }
 0x26b   : > { %6227 = vst [vmem:[%s8893_s12 + $0xf0] sm:$0xff] %v6225_v16 }
 0x26c PF: > { %s14_s17 = sadd.s32 1, %s8044_s17   ;;  %s9110_s15 = smov %s8040_s16 }
 0x26d   : > { %p11_p5 = scmp.ge.s32.totalorder %s14_s17, 4   ;;  %s9111_s16 = smov %s9113_s18 }
 0x26f   :  { %13 = sbr.rel (!%p11_p5) target bundleno = 2 (0x2), region = 100 }

</bundles_post_ra>
